<compile_context>
chip_gen: v7x
topology: tpu7x:2x2x1
jax: 0.10.0
libtpu: 0.0.40
codegen_flags: <defaults>
</compile_context>

<pallas_src>
import functools

import jax
import jax.numpy as jnp
from jax import lax
from jax.experimental import pallas as pl
from jax.experimental.pallas import tpu as pltpu

LANE = 128
_VMEM_LIMIT = 48 * 1024 * 1024   # below v7x's 64 MiB physical VMEM, above the scoped defaults


# ----------------------------- helpers -----------------------------
def _round_up(x, m):
    return (x + m - 1) // m * m


def _pick_tn(coutp):
    """Cout tile: MXU-native 128 on v5e, 256 on newer chips when it divides Coutp."""
    try:
        kind = jax.devices()[0].device_kind.lower()
    except Exception:
        kind = ""
    if "v5 lite" in kind or "v5e" in kind or "v5lite" in kind:
        return 128
    return 256 if coutp % 256 == 0 else 128


# ----------------------------- Pallas kernels -----------------------------
def _conv3x3_s1_kernel(x_ref, w_ref, b_ref, y_ref, st_ref, *, ho, wo, cp):
    # x_ref : (1, ho+2, Wp, cp)  bf16   spatially pre-padded image (Wp = round_up(wo+2, 8))
    # w_ref : (9*cp, tn)         bf16   tap-major (di, dj, cin) rows
    # b_ref : (1, tn)            f32
    # y_ref : (1, ho, wo, tn)    bf16   conv + bias output (pre-BN)
    # st_ref: (1, 2, tn)         f32    per-image [sum, sum-of-squares] of the bf16 output
    tn = w_ref.shape[1]
    acc = jnp.zeros((ho * wo, tn), jnp.float32)
    for di in range(3):
        for dj in range(3):
            t = 3 * di + dj
            a = x_ref[0, di:di + ho, dj:dj + wo, :].reshape(ho * wo, cp)   # bf16 tap (in VMEM)
            acc = acc + jnp.dot(a, w_ref[t * cp:(t + 1) * cp, :],
                                preferred_element_type=jnp.float32)        # MXU, f32 accumulate
    yb = (acc + b_ref[...]).astype(y_ref.dtype)                            # bf16 writeback
    y_ref[0] = yb.reshape(ho, wo, tn)
    y32 = yb.astype(jnp.float32)
    # TODO(synk): E[x^2]-E[x]^2 is cancellation-prone at very large N*H*W; switch to a two-pass
    # or Welford-style reduction before scaling the batch.
    st_ref[0] = jnp.concatenate([jnp.sum(y32, axis=0, keepdims=True),
                                 jnp.sum(y32 * y32, axis=0, keepdims=True)], axis=0)


def _bn_relu_pad_kernel(y_ref, st_ref, g_ref, b_ref, *rest, inv_m, eps):
    # y_ref : (1, H, W, tn) bf16 conv output; st_ref: (2, tn) f32 global [sum, sumsq]
    # g_ref / b_ref: (1, tn) f32 gamma/beta; rest = (o_ref,) or (residual_pad_ref, o_ref)
    # o_ref : (1, H+2, Wp, tn) bf16 -- BN+ReLU(+residual) written in the pre-padded layout the
    #         next conv consumes (halo zeroed here -> zero-padding semantics of Conv2d).
    o_ref = rest[-1]
    y = y_ref[0].astype(jnp.float32)                        # (H, W, tn)
    ho, wo = y.shape[0], y.shape[1]
    st = st_ref[...]
    mean = st[0:1, :] * inv_m
    var = st[1:2, :] * inv_m - mean * mean                  # biased variance (training-mode BN)
    scale = lax.rsqrt(var + eps) * g_ref[...]               # gamma/beta zero-padded => padded
    out = jnp.maximum((y - mean) * scale + b_ref[...], 0.0)  # channel lanes stay exactly 0
    if len(rest) == 2:                                       # fused residual add (post-ReLU)
        out = out + rest[0][0, 1:1 + ho, 1:1 + wo, :].astype(jnp.float32)
    o_ref[...] = jnp.zeros(o_ref.shape, o_ref.dtype)         # zero halo
    o_ref[0, 1:1 + ho, 1:1 + wo, :] = out.astype(o_ref.dtype)


def _conv3x3_s2_kernel(x_ref, w_ref, b_ref, y_ref, *, ho2, wo2, cp):
    # x_ref : (1, (H+2)//2, 2, Wp//2, 2*cp) bf16 -- free row-major view of the padded image with
    #         row pairs split and column pairs merged into the lane dim, so every stride-2 tap
    #         is a contiguous slice (no strided vector access needed).
    # y_ref : (1, ho2, wo2, tn) f32 (final layer: bias only, no BN / act)
    tn = w_ref.shape[1]
    acc = jnp.zeros((ho2 * wo2, tn), jnp.float32)
    for di, (g0, par) in enumerate(((0, 0), (0, 1), (1, 0))):   # padded row = 2*out_row + di
        blk = x_ref[0, g0:g0 + ho2, par:par + 1, :, :]          # (ho2, 1, Wp//2, 2*cp)
        blk = blk.reshape(ho2, blk.shape[2], 2 * cp)
        # taps (di,0) and (di,1) share merged column oc -> one GEMM over 2*cp
        a01 = blk[:, 0:wo2, :].reshape(ho2 * wo2, 2 * cp)
        acc = acc + jnp.dot(a01, w_ref[(3 * di) * cp:(3 * di + 2) * cp, :],
                            preferred_element_type=jnp.float32)
        # tap (di,2): merged column oc+1, even-parity (first cp) channels
        a2 = blk[:, 1:1 + wo2, 0:cp].reshape(ho2 * wo2, cp)
        acc = acc + jnp.dot(a2, w_ref[(3 * di + 2) * cp:(3 * di + 3) * cp, :],
                            preferred_element_type=jnp.float32)
    y_ref[0] = (acc + b_ref[...]).reshape(ho2, wo2, tn)


# ----------------------------- pallas_call wrappers -----------------------------
def conv3x3_s1(x_pad, w_k, b_row, H, W):
    """3x3 / stride-1 / pad-1 conv (+bias), bf16 output, fused per-image BN-stat epilogue."""
    N, Hp2, Wp, Cp = x_pad.shape
    Kp, Coutp = w_k.shape
    assert Kp == 9 * Cp and Coutp % LANE == 0
    tn = _pick_tn(Coutp)
    J = Coutp // tn
    # TODO(synk): for large H*W*Cp one image per grid step exceeds VMEM (esp. v7x's 64 MiB);
    # add a row-tile-with-halo path, and Nb>1 image blocking for small spatial sizes on v6e.
    cost = pl.CostEstimate(
        flops=2 * N * H * W * Kp * Coutp, transcendentals=0,
        bytes_accessed=(N * J * Hp2 * Wp * Cp * 2 + Kp * Coutp * 2
                        + N * H * W * Coutp * 2 + N * 2 * Coutp * 4))
    y, st = pl.pallas_call(
        functools.partial(_conv3x3_s1_kernel, ho=H, wo=W, cp=Cp),
        out_shape=(jax.ShapeDtypeStruct((N, H, W, Coutp), jnp.bfloat16),
                   jax.ShapeDtypeStruct((N, 2, Coutp), jnp.float32)),
        grid_spec=pltpu.PrefetchScalarGridSpec(
            num_scalar_prefetch=0,
            grid=(J, N),                       # Cout outer: weight tile VMEM-resident over n
            in_specs=[
                pl.BlockSpec((1, Hp2, Wp, Cp), lambda j, n: (n, 0, 0, 0)),
                pl.BlockSpec((Kp, tn), lambda j, n: (0, j)),
                pl.BlockSpec((1, tn), lambda j, n: (0, j)),
            ],
            out_specs=(
                pl.BlockSpec((1, H, W, tn), lambda j, n: (n, 0, 0, j)),
                pl.BlockSpec((1, 2, tn), lambda j, n: (n, 0, j)),
            ),
        ),
        compiler_params=pltpu.CompilerParams(
            dimension_semantics=("parallel", "parallel"),
            vmem_limit_bytes=_VMEM_LIMIT),
        cost_estimate=cost,
    )(x_pad, w_k, b_row)
    return y, st


def bn_relu_to_padded(y, stats_tot, gamma_row, beta_row, count, pad_hw,
                      residual_pad=None, eps=1e-5):
    """BN (global batch stats) + ReLU (+ fused residual add), written straight into the
    spatially pre-padded bf16 buffer consumed by the next conv."""
    N, H, W, Coutp = y.shape
    Hp2, Wp = pad_hw
    tn = _pick_tn(Coutp)
    J = Coutp // tn
    in_specs = [
        pl.BlockSpec((1, H, W, tn), lambda n, j: (n, 0, 0, j)),
        pl.BlockSpec((2, tn), lambda n, j: (0, j)),
        pl.BlockSpec((1, tn), lambda n, j: (0, j)),
        pl.BlockSpec((1, tn), lambda n, j: (0, j)),
    ]
    args = [y, stats_tot, gamma_row, beta_row]
    if residual_pad is not None:
        in_specs.append(pl.BlockSpec((1, Hp2, Wp, tn), lambda n, j: (n, 0, 0, j)))
        args.append(residual_pad)
    out = pl.pallas_call(
        functools.partial(_bn_relu_pad_kernel, inv_m=1.0 / count, eps=eps),
        out_shape=jax.ShapeDtypeStruct((N, Hp2, Wp, Coutp), jnp.bfloat16),
        grid_spec=pltpu.PrefetchScalarGridSpec(
            num_scalar_prefetch=0,
            grid=(N, J),
            in_specs=in_specs,
            out_specs=pl.BlockSpec((1, Hp2, Wp, tn), lambda n, j: (n, 0, 0, j)),
        ),
        compiler_params=pltpu.CompilerParams(
            dimension_semantics=("parallel", "parallel"),
            vmem_limit_bytes=_VMEM_LIMIT),
    )(*args)
    return out


def conv3x3_s2(x_pad, w_k, b_row, H, W):
    """3x3 / stride-2 / pad-1 conv (+bias), computed natively at stride 2."""
    N, Hp2, Wp, Cp = x_pad.shape
    Kp, Coutp = w_k.shape
    assert Kp == 9 * Cp and Hp2 % 2 == 0 and Wp % 2 == 0
    ho2, wo2 = H // 2, W // 2
    # Free (row-major, no data movement) HBM reshape: split row pairs, merge column pairs.
    xm = x_pad.reshape(N, Hp2 // 2, 2, Wp // 2, 2 * Cp)
    tn = _pick_tn(Coutp)
    J = Coutp // tn
    cost = pl.CostEstimate(
        flops=2 * N * ho2 * wo2 * Kp * Coutp, transcendentals=0,
        bytes_accessed=(N * J * Hp2 * Wp * Cp * 2 + Kp * Coutp * 2
                        + N * ho2 * wo2 * Coutp * 4))
    y = pl.pallas_call(
        functools.partial(_conv3x3_s2_kernel, ho2=ho2, wo2=wo2, cp=Cp),
        out_shape=jax.ShapeDtypeStruct((N, ho2, wo2, Coutp), jnp.float32),
        grid_spec=pltpu.PrefetchScalarGridSpec(
            num_scalar_prefetch=0,
            grid=(J, N),
            in_specs=[
                pl.BlockSpec((1, Hp2 // 2, 2, Wp // 2, 2 * Cp),
                             lambda j, n: (n, 0, 0, 0, 0)),
                pl.BlockSpec((Kp, tn), lambda j, n: (0, j)),
                pl.BlockSpec((1, tn), lambda j, n: (0, j)),
            ],
            out_specs=pl.BlockSpec((1, ho2, wo2, tn), lambda j, n: (n, 0, 0, j)),
        ),
        compiler_params=pltpu.CompilerParams(
            dimension_semantics=("parallel", "parallel"),
            vmem_limit_bytes=_VMEM_LIMIT),
        cost_estimate=cost,
    )(xm, w_k, b_row)
    return y


# ----------------------------- parameters -----------------------------
def _pack_w(w, cinp, coutp):
    # (3,3,cin,cout) f32 -> (9*cinp, coutp) bf16, tap-major / channel-minor, zero-padded lanes.
    kh, kw, cin, cout = w.shape
    wp = jnp.zeros((kh, kw, cinp, coutp), jnp.float32)
    wp = wp.at[:, :, :cin, :cout].set(w)
    return wp.reshape(kh * kw * cinp, coutp).astype(jnp.bfloat16)


def _pack_vec(v, coutp):
    return jnp.zeros((1, coutp), jnp.float32).at[0, :v.shape[0]].set(v)


def init_residual_conv_params(key, cin, cout):
    cinp, coutp = _round_up(cin, LANE), _round_up(cout, LANE)
    ks = jax.random.split(key, 4)

    def conv_p(k, ci, cip):
        k1, k2 = jax.random.split(k)
        w = jax.random.normal(k1, (3, 3, ci, cout), jnp.float32) / jnp.sqrt(9.0 * ci)
        b = 0.02 * jax.random.normal(k2, (cout,), jnp.float32)
        return {"w": _pack_w(w, cip, coutp), "b": _pack_vec(b, coutp)}

    def bn_p(k):
        k1, k2 = jax.random.split(k)
        g = 1.0 + 0.1 * jax.random.normal(k1, (cout,), jnp.float32)
        be = 0.1 * jax.random.normal(k2, (cout,), jnp.float32)
        # NOTE: zero padding of gamma/beta is load-bearing — it keeps the padded output
        # channel lanes exactly 0 through BN (var = 0 lanes get scale = 0 * rsqrt(eps)).
        return {"gamma": _pack_vec(g, coutp), "beta": _pack_vec(be, coutp)}

    def conv_block_p(k, ci, cip):
        k1, k2 = jax.random.split(k)
        d = conv_p(k1, ci, cip)
        d.update(bn_p(k2))
        return d

    return {"r1": conv_block_p(ks[0], cin, cinp),
            "r2a": conv_block_p(ks[1], cout, coutp),
            "r2b": conv_block_p(ks[2], cout, coutp),
            "r3": conv_p(ks[3], cout, coutp)}


# ----------------------------- forward -----------------------------
def _conv_bn_relu_layer(x_pad, pk, count, hw, residual_pad=None, eps=1e-5):
    H, W = hw
    y, st = conv3x3_s1(x_pad, pk["w"], pk["b"], H, W)
    stats_tot = jnp.sum(st, axis=0)                     # (2, Coutp) global batch stats (f32)
    return bn_relu_to_padded(y, stats_tot, pk["gamma"], pk["beta"], count,
                             pad_hw=(x_pad.shape[1], x_pad.shape[2]),
                             residual_pad=residual_pad, eps=eps)


def residual_conv_forward(params, x_nchw, *, cout, eps=1e-5):
    x = jnp.transpose(x_nchw, (0, 2, 3, 1)).astype(jnp.float32)   # NHWC
    N, H, W, cin = x.shape
    assert H % 2 == 0 and W % 2 == 0   # TODO(synk): odd spatial sizes (stride-2 tail handling)
    cinp = params["r1"]["w"].shape[0] // 9
    Wp = _round_up(W + 2, 8)
    # Single XLA pad+cast for the network input only; all later layers stay in the
    # pre-padded bf16 layout produced by the BN kernels.
    x_pad = jnp.pad(x, ((0, 0), (1, 1), (1, Wp - W - 1), (0, cinp - cin))).astype(jnp.bfloat16)
    count = N * H * W

    r_pad = _conv_bn_relu_layer(x_pad, params["r1"], count, (H, W), eps=eps)       # residual1
    o_pad = _conv_bn_relu_layer(r_pad, params["r2a"], count, (H, W), eps=eps)      # residual2[0]
    o_pad = _conv_bn_relu_layer(o_pad, params["r2b"], count, (H, W),               # residual2[1]
                                residual_pad=r_pad, eps=eps)                       #  + residual1
    y = conv3x3_s2(o_pad, params["r3"]["w"], params["r3"]["b"], H, W)              # residual3
    y = y[..., :cout]
    return jnp.transpose(y, (0, 3, 1, 2))                                          # NCHW


# ----------------------------- pure-JAX reference -----------------------------
def _ref_forward(params, x_nchw, *, cout, eps=1e-5):
    # Same math as the kernels (incl. bf16 quantization of inter-layer activations) in plain JAX.
    x = jnp.transpose(x_nchw, (0, 2, 3, 1)).astype(jnp.float32)
    N, H, W, cin = x.shape
    cinp = params["r1"]["w"].shape[0] // 9
    x = jnp.pad(x, ((0, 0), (0, 0), (0, 0), (0, cinp - cin)))

    def conv(h_bf, wk, b):
        hp = jnp.pad(h_bf.astype(jnp.float32), ((0, 0), (1, 1), (1, 1), (0, 0)))
        taps = [hp[:, di:di + H, dj:dj + W, :] for di in range(3) for dj in range(3)]
        a = jnp.concatenate(taps, axis=-1)
        y = jnp.einsum("nhwk,kc->nhwc", a, wk.astype(jnp.float32),
                       precision=lax.Precision.HIGHEST)
        return y + b[0]

    def bn_relu(y, g, be):
        yb = y.astype(jnp.bfloat16).astype(jnp.float32)    # kernel stores conv output as bf16
        mean = jnp.mean(yb, axis=(0, 1, 2), keepdims=True)
        var = jnp.mean(yb * yb, axis=(0, 1, 2), keepdims=True) - mean * mean
        return jnp.maximum((yb - mean) * lax.rsqrt(var + eps) * g[0] + be[0], 0.0)

    p = params
    x_bf = x.astype(jnp.bfloat16)
    r = bn_relu(conv(x_bf, p["r1"]["w"], p["r1"]["b"]), p["r1"]["gamma"], p["r1"]["beta"])
    r_bf = r.astype(jnp.bfloat16)
    o = bn_relu(conv(r_bf, p["r2a"]["w"], p["r2a"]["b"]), p["r2a"]["gamma"], p["r2a"]["beta"])
    o_bf = o.astype(jnp.bfloat16)
    o = bn_relu(conv(o_bf, p["r2b"]["w"], p["r2b"]["b"]), p["r2b"]["gamma"], p["r2b"]["beta"])
    o = o + r_bf.astype(jnp.float32)
    o_bf = o.astype(jnp.bfloat16)
    y = conv(o_bf, p["r3"]["w"], p["r3"]["b"])[:, ::2, ::2, :cout]
    return jnp.transpose(y, (0, 3, 1, 2))


# ----------------------------- main -----------------------------
if __name__ == "__main__":
    key = jax.random.PRNGKey(0)
    pkey, xkey = jax.random.split(key)
    N, CIN, COUT, H, W = 2, 4, 16, 16, 16
    params = init_residual_conv_params(pkey, CIN, COUT)
    x = jax.random.normal(xkey, (N, CIN, H, W), jnp.float32)     # NCHW like PyTorch

    fwd = jax.jit(functools.partial(residual_conv_forward, cout=COUT))
    y = jax.block_until_ready(fwd(params, x))
    assert y.shape == (N, COUT, H // 2, W // 2), y.shape
    assert bool(jnp.all(jnp.isfinite(y)))

    y_ref = jax.jit(functools.partial(_ref_forward, cout=COUT))(params, x)
    err = float(jnp.max(jnp.abs(y - y_ref)))
    assert err < 5e-2, f"mismatch vs reference: {err}"

    print("KERNEL_OK")
</pallas_src>

<mosaic_0001>
module attributes {stable_mosaic.version = 11 : i64} {
  func.func @_conv3x3_s1_kernel(%arg0: i32, %arg1: i32, %arg2: memref<1x18x24x128xbf16, #tpu.memory_space<vmem>>, %arg3: memref<1152x128xbf16, #tpu.memory_space<vmem>>, %arg4: memref<1x128xf32, #tpu.memory_space<vmem>>, %arg5: memref<1x16x16x128xbf16, #tpu.memory_space<vmem>>, %arg6: memref<1x2x128xf32, #tpu.memory_space<vmem>>) attributes {dimension_semantics = [#tpu.dimension_semantics<parallel>, #tpu.dimension_semantics<parallel>], iteration_bounds = array<i64: 1, 2>, scalar_prefetch = 0 : i64, scratch_operands = 0 : i64, tpu.core_type = #tpu.core_type<tc>, window_params = [{transform_indices = @transform_0, window_bounds = array<i64: 1, 18, 24, 128>}, {transform_indices = @transform_1, window_bounds = array<i64: 1152, 128>}, {transform_indices = @transform_2, window_bounds = array<i64: 1, 128>}, {transform_indices = @transform_3, window_bounds = array<i64: 1, 16, 16, 128>}, {transform_indices = @transform_4, window_bounds = array<i64: 1, 2, 128>}]} {
    %cst = arith.constant 0.000000e+00 : f32
    %0 = vector.broadcast %cst : f32 to vector<256x128xf32>
    %c0 = arith.constant 0 : index
    %c0_0 = arith.constant 0 : index
    %c0_1 = arith.constant 0 : index
    %c0_2 = arith.constant 0 : index
    %1 = vector.load %arg2[%c0, %c0_0, %c0_1, %c0_2] : memref<1x18x24x128xbf16, #tpu.memory_space<vmem>>, vector<1x16x16x128xbf16>
    %2 = vector.shape_cast %1 : vector<1x16x16x128xbf16> to vector<16x16x128xbf16>
    %3 = vector.shape_cast %2 : vector<16x16x128xbf16> to vector<256x128xbf16>
    %c0_3 = arith.constant 0 : index
    %c0_4 = arith.constant 0 : index
    %4 = vector.load %arg3[%c0_3, %c0_4] : memref<1152x128xbf16, #tpu.memory_space<vmem>>, vector<128x128xbf16>
    %cst_5 = arith.constant dense<0.000000e+00> : vector<256x128xf32>
    %5 = tpu.matmul %3, %4, %cst_5 {dimension_numbers = #tpu.dot_dimension_numbers<[1], [0], [0], [1], [0, 0, 1, 1], [], []>} : vector<256x128xbf16>, vector<128x128xbf16>, vector<256x128xf32> -> vector<256x128xf32>
    %6 = arith.addf %0, %5 : vector<256x128xf32>
    %c0_6 = arith.constant 0 : index
    %c0_7 = arith.constant 0 : index
    %c1 = arith.constant 1 : index
    %c0_8 = arith.constant 0 : index
    %7 = vector.load %arg2[%c0_6, %c0_7, %c1, %c0_8] : memref<1x18x24x128xbf16, #tpu.memory_space<vmem>>, vector<1x16x16x128xbf16>
    %8 = vector.shape_cast %7 : vector<1x16x16x128xbf16> to vector<16x16x128xbf16>
    %9 = vector.shape_cast %8 : vector<16x16x128xbf16> to vector<256x128xbf16>
    %c128 = arith.constant 128 : index
    %c0_9 = arith.constant 0 : index
    %10 = vector.load %arg3[%c128, %c0_9] : memref<1152x128xbf16, #tpu.memory_space<vmem>>, vector<128x128xbf16>
    %cst_10 = arith.constant dense<0.000000e+00> : vector<256x128xf32>
    %11 = tpu.matmul %9, %10, %cst_10 {dimension_numbers = #tpu.dot_dimension_numbers<[1], [0], [0], [1], [0, 0, 1, 1], [], []>} : vector<256x128xbf16>, vector<128x128xbf16>, vector<256x128xf32> -> vector<256x128xf32>
    %12 = arith.addf %6, %11 : vector<256x128xf32>
    %c0_11 = arith.constant 0 : index
    %c0_12 = arith.constant 0 : index
    %c2 = arith.constant 2 : index
    %c0_13 = arith.constant 0 : index
    %13 = vector.load %arg2[%c0_11, %c0_12, %c2, %c0_13] : memref<1x18x24x128xbf16, #tpu.memory_space<vmem>>, vector<1x16x16x128xbf16>
    %14 = vector.shape_cast %13 : vector<1x16x16x128xbf16> to vector<16x16x128xbf16>
    %15 = vector.shape_cast %14 : vector<16x16x128xbf16> to vector<256x128xbf16>
    %c256 = arith.constant 256 : index
    %c0_14 = arith.constant 0 : index
    %16 = vector.load %arg3[%c256, %c0_14] : memref<1152x128xbf16, #tpu.memory_space<vmem>>, vector<128x128xbf16>
    %cst_15 = arith.constant dense<0.000000e+00> : vector<256x128xf32>
    %17 = tpu.matmul %15, %16, %cst_15 {dimension_numbers = #tpu.dot_dimension_numbers<[1], [0], [0], [1], [0, 0, 1, 1], [], []>} : vector<256x128xbf16>, vector<128x128xbf16>, vector<256x128xf32> -> vector<256x128xf32>
    %18 = arith.addf %12, %17 : vector<256x128xf32>
    %c0_16 = arith.constant 0 : index
    %c1_17 = arith.constant 1 : index
    %c0_18 = arith.constant 0 : index
    %c0_19 = arith.constant 0 : index
    %19 = vector.load %arg2[%c0_16, %c1_17, %c0_18, %c0_19] : memref<1x18x24x128xbf16, #tpu.memory_space<vmem>>, vector<1x16x16x128xbf16>
    %20 = vector.shape_cast %19 : vector<1x16x16x128xbf16> to vector<16x16x128xbf16>
    %21 = vector.shape_cast %20 : vector<16x16x128xbf16> to vector<256x128xbf16>
    %c384 = arith.constant 384 : index
    %c0_20 = arith.constant 0 : index
    %22 = vector.load %arg3[%c384, %c0_20] : memref<1152x128xbf16, #tpu.memory_space<vmem>>, vector<128x128xbf16>
    %cst_21 = arith.constant dense<0.000000e+00> : vector<256x128xf32>
    %23 = tpu.matmul %21, %22, %cst_21 {dimension_numbers = #tpu.dot_dimension_numbers<[1], [0], [0], [1], [0, 0, 1, 1], [], []>} : vector<256x128xbf16>, vector<128x128xbf16>, vector<256x128xf32> -> vector<256x128xf32>
    %24 = arith.addf %18, %23 : vector<256x128xf32>
    %c0_22 = arith.constant 0 : index
    %c1_23 = arith.constant 1 : index
    %c1_24 = arith.constant 1 : index
    %c0_25 = arith.constant 0 : index
    %25 = vector.load %arg2[%c0_22, %c1_23, %c1_24, %c0_25] : memref<1x18x24x128xbf16, #tpu.memory_space<vmem>>, vector<1x16x16x128xbf16>
    %26 = vector.shape_cast %25 : vector<1x16x16x128xbf16> to vector<16x16x128xbf16>
    %27 = vector.shape_cast %26 : vector<16x16x128xbf16> to vector<256x128xbf16>
    %c512 = arith.constant 512 : index
    %c0_26 = arith.constant 0 : index
    %28 = vector.load %arg3[%c512, %c0_26] : memref<1152x128xbf16, #tpu.memory_space<vmem>>, vector<128x128xbf16>
    %cst_27 = arith.constant dense<0.000000e+00> : vector<256x128xf32>
    %29 = tpu.matmul %27, %28, %cst_27 {dimension_numbers = #tpu.dot_dimension_numbers<[1], [0], [0], [1], [0, 0, 1, 1], [], []>} : vector<256x128xbf16>, vector<128x128xbf16>, vector<256x128xf32> -> vector<256x128xf32>
    %30 = arith.addf %24, %29 : vector<256x128xf32>
    %c0_28 = arith.constant 0 : index
    %c1_29 = arith.constant 1 : index
    %c2_30 = arith.constant 2 : index
    %c0_31 = arith.constant 0 : index
    %31 = vector.load %arg2[%c0_28, %c1_29, %c2_30, %c0_31] : memref<1x18x24x128xbf16, #tpu.memory_space<vmem>>, vector<1x16x16x128xbf16>
    %32 = vector.shape_cast %31 : vector<1x16x16x128xbf16> to vector<16x16x128xbf16>
    %33 = vector.shape_cast %32 : vector<16x16x128xbf16> to vector<256x128xbf16>
    %c640 = arith.constant 640 : index
    %c0_32 = arith.constant 0 : index
    %34 = vector.load %arg3[%c640, %c0_32] : memref<1152x128xbf16, #tpu.memory_space<vmem>>, vector<128x128xbf16>
    %cst_33 = arith.constant dense<0.000000e+00> : vector<256x128xf32>
    %35 = tpu.matmul %33, %34, %cst_33 {dimension_numbers = #tpu.dot_dimension_numbers<[1], [0], [0], [1], [0, 0, 1, 1], [], []>} : vector<256x128xbf16>, vector<128x128xbf16>, vector<256x128xf32> -> vector<256x128xf32>
    %36 = arith.addf %30, %35 : vector<256x128xf32>
    %c0_34 = arith.constant 0 : index
    %c2_35 = arith.constant 2 : index
    %c0_36 = arith.constant 0 : index
    %c0_37 = arith.constant 0 : index
    %37 = vector.load %arg2[%c0_34, %c2_35, %c0_36, %c0_37] : memref<1x18x24x128xbf16, #tpu.memory_space<vmem>>, vector<1x16x16x128xbf16>
    %38 = vector.shape_cast %37 : vector<1x16x16x128xbf16> to vector<16x16x128xbf16>
    %39 = vector.shape_cast %38 : vector<16x16x128xbf16> to vector<256x128xbf16>
    %c768 = arith.constant 768 : index
    %c0_38 = arith.constant 0 : index
    %40 = vector.load %arg3[%c768, %c0_38] : memref<1152x128xbf16, #tpu.memory_space<vmem>>, vector<128x128xbf16>
    %cst_39 = arith.constant dense<0.000000e+00> : vector<256x128xf32>
    %41 = tpu.matmul %39, %40, %cst_39 {dimension_numbers = #tpu.dot_dimension_numbers<[1], [0], [0], [1], [0, 0, 1, 1], [], []>} : vector<256x128xbf16>, vector<128x128xbf16>, vector<256x128xf32> -> vector<256x128xf32>
    %42 = arith.addf %36, %41 : vector<256x128xf32>
    %c0_40 = arith.constant 0 : index
    %c2_41 = arith.constant 2 : index
    %c1_42 = arith.constant 1 : index
    %c0_43 = arith.constant 0 : index
    %43 = vector.load %arg2[%c0_40, %c2_41, %c1_42, %c0_43] : memref<1x18x24x128xbf16, #tpu.memory_space<vmem>>, vector<1x16x16x128xbf16>
    %44 = vector.shape_cast %43 : vector<1x16x16x128xbf16> to vector<16x16x128xbf16>
    %45 = vector.shape_cast %44 : vector<16x16x128xbf16> to vector<256x128xbf16>
    %c896 = arith.constant 896 : index
    %c0_44 = arith.constant 0 : index
    %46 = vector.load %arg3[%c896, %c0_44] : memref<1152x128xbf16, #tpu.memory_space<vmem>>, vector<128x128xbf16>
    %cst_45 = arith.constant dense<0.000000e+00> : vector<256x128xf32>
    %47 = tpu.matmul %45, %46, %cst_45 {dimension_numbers = #tpu.dot_dimension_numbers<[1], [0], [0], [1], [0, 0, 1, 1], [], []>} : vector<256x128xbf16>, vector<128x128xbf16>, vector<256x128xf32> -> vector<256x128xf32>
    %48 = arith.addf %42, %47 : vector<256x128xf32>
    %c0_46 = arith.constant 0 : index
    %c2_47 = arith.constant 2 : index
    %c2_48 = arith.constant 2 : index
    %c0_49 = arith.constant 0 : index
    %49 = vector.load %arg2[%c0_46, %c2_47, %c2_48, %c0_49] : memref<1x18x24x128xbf16, #tpu.memory_space<vmem>>, vector<1x16x16x128xbf16>
    %50 = vector.shape_cast %49 : vector<1x16x16x128xbf16> to vector<16x16x128xbf16>
    %51 = vector.shape_cast %50 : vector<16x16x128xbf16> to vector<256x128xbf16>
    %c1024 = arith.constant 1024 : index
    %c0_50 = arith.constant 0 : index
    %52 = vector.load %arg3[%c1024, %c0_50] : memref<1152x128xbf16, #tpu.memory_space<vmem>>, vector<128x128xbf16>
    %cst_51 = arith.constant dense<0.000000e+00> : vector<256x128xf32>
    %53 = tpu.matmul %51, %52, %cst_51 {dimension_numbers = #tpu.dot_dimension_numbers<[1], [0], [0], [1], [0, 0, 1, 1], [], []>} : vector<256x128xbf16>, vector<128x128xbf16>, vector<256x128xf32> -> vector<256x128xf32>
    %54 = arith.addf %48, %53 : vector<256x128xf32>
    %c0_52 = arith.constant 0 : index
    %c0_53 = arith.constant 0 : index
    %55 = vector.load %arg4[%c0_52, %c0_53] : memref<1x128xf32, #tpu.memory_space<vmem>>, vector<1x128xf32>
    %56 = vector.broadcast %55 : vector<1x128xf32> to vector<256x128xf32>
    %57 = arith.addf %54, %56 : vector<256x128xf32>
    %58 = arith.truncf %57 : vector<256x128xf32> to vector<256x128xbf16>
    %59 = vector.shape_cast %58 : vector<256x128xbf16> to vector<16x16x128xbf16>
    %c0_54 = arith.constant 0 : index
    %c0_55 = arith.constant 0 : index
    %c0_56 = arith.constant 0 : index
    %c0_57 = arith.constant 0 : index
    %60 = vector.load %arg5[%c0_54, %c0_55, %c0_56, %c0_57] : memref<1x16x16x128xbf16, #tpu.memory_space<vmem>>, vector<1x16x16x128xbf16>
    %61 = vector.shape_cast %60 : vector<1x16x16x128xbf16> to vector<16x16x128xbf16>
    %62 = vector.shape_cast %59 : vector<16x16x128xbf16> to vector<1x16x16x128xbf16>
    tpu.vector_store %arg5[%c0_54, %c0_55, %c0_56, %c0_57], %62 {strides = array<i32>} : memref<1x16x16x128xbf16, #tpu.memory_space<vmem>>, vector<1x16x16x128xbf16>,
    %63 = arith.extf %58 : vector<256x128xbf16> to vector<256x128xf32>
    %cst_58 = arith.constant dense<0.000000e+00> : vector<128xf32>
    %64 = vector.multi_reduction <add>, %63, %cst_58 [0] : vector<256x128xf32> to vector<128xf32>
    %65 = vector.shape_cast %64 : vector<128xf32> to vector<1x128xf32>
    %66 = arith.mulf %63, %63 : vector<256x128xf32>
    %cst_59 = arith.constant dense<0.000000e+00> : vector<128xf32>
    %67 = vector.multi_reduction <add>, %66, %cst_59 [0] : vector<256x128xf32> to vector<128xf32>
    %68 = vector.shape_cast %67 : vector<128xf32> to vector<1x128xf32>
    %69 = tpu.concatenate %65, %68 in 0 : vector<1x128xf32>, vector<1x128xf32> -> vector<2x128xf32>
    %c0_60 = arith.constant 0 : index
    %c0_61 = arith.constant 0 : index
    %c0_62 = arith.constant 0 : index
    %70 = vector.load %arg6[%c0_60, %c0_61, %c0_62] : memref<1x2x128xf32, #tpu.memory_space<vmem>>, vector<1x2x128xf32>
    %71 = vector.shape_cast %70 : vector<1x2x128xf32> to vector<2x128xf32>
    %72 = vector.shape_cast %69 : vector<2x128xf32> to vector<1x2x128xf32>
    tpu.vector_store %arg6[%c0_60, %c0_61, %c0_62], %72 {strides = array<i32>} : memref<1x2x128xf32, #tpu.memory_space<vmem>>, vector<1x2x128xf32>,
    return
  }
  func.func @transform_0(%arg0: i32, %arg1: i32) -> (i32, i32, i32, i32) {
    %c0_i32 = arith.constant 0 : i32
    %c0_i32_0 = arith.constant 0 : i32
    %c0_i32_1 = arith.constant 0 : i32
    %c0_i32_2 = arith.constant 0 : i32
    return %arg1, %c0_i32, %c0_i32_0, %c0_i32_1 : i32, i32, i32, i32
  }
  func.func @transform_1(%arg0: i32, %arg1: i32) -> (i32, i32) {
    %c0_i32 = arith.constant 0 : i32
    %c0_i32_0 = arith.constant 0 : i32
    return %c0_i32, %arg0 : i32, i32
  }
  func.func @transform_2(%arg0: i32, %arg1: i32) -> (i32, i32) {
    %c0_i32 = arith.constant 0 : i32
    %c0_i32_0 = arith.constant 0 : i32
    return %c0_i32, %arg0 : i32, i32
  }
  func.func @transform_3(%arg0: i32, %arg1: i32) -> (i32, i32, i32, i32) {
    %c0_i32 = arith.constant 0 : i32
    %c0_i32_0 = arith.constant 0 : i32
    %c0_i32_1 = arith.constant 0 : i32
    return %arg1, %c0_i32, %c0_i32_0, %arg0 : i32, i32, i32, i32
  }
  func.func @transform_4(%arg0: i32, %arg1: i32) -> (i32, i32, i32) {
    %c0_i32 = arith.constant 0 : i32
    %c0_i32_0 = arith.constant 0 : i32
    return %arg1, %c0_i32, %arg0 : i32, i32, i32
  }
}

module attributes {stable_mosaic.version = 11 : i64} {
  func.func @_bn_relu_pad_kernel(%arg0: i32, %arg1: i32, %arg2: memref<1x16x16x128xbf16, #tpu.memory_space<vmem>>, %arg3: memref<2x128xf32, #tpu.memory_space<vmem>>, %arg4: memref<1x128xf32, #tpu.memory_space<vmem>>, %arg5: memref<1x128xf32, #tpu.memory_space<vmem>>, %arg6: memref<1x18x24x128xbf16, #tpu.memory_space<vmem>>) attributes {dimension_semantics = [#tpu.dimension_semantics<parallel>, #tpu.dimension_semantics<parallel>], iteration_bounds = array<i64: 2, 1>, scalar_prefetch = 0 : i64, scratch_operands = 0 : i64, tpu.core_type = #tpu.core_type<tc>, window_params = [{transform_indices = @transform_0, window_bounds = array<i64: 1, 16, 16, 128>}, {transform_indices = @transform_1, window_bounds = array<i64: 2, 128>}, {transform_indices = @transform_2, window_bounds = array<i64: 1, 128>}, {transform_indices = @transform_3, window_bounds = array<i64: 1, 128>}, {transform_indices = @transform_4, window_bounds = array<i64: 1, 18, 24, 128>}]} {
    %c0 = arith.constant 0 : index
    %c0_0 = arith.constant 0 : index
    %c0_1 = arith.constant 0 : index
    %c0_2 = arith.constant 0 : index
    %0 = vector.load %arg2[%c0, %c0_0, %c0_1, %c0_2] : memref<1x16x16x128xbf16, #tpu.memory_space<vmem>>, vector<1x16x16x128xbf16>
    %1 = vector.shape_cast %0 : vector<1x16x16x128xbf16> to vector<16x16x128xbf16>
    %2 = arith.extf %1 : vector<16x16x128xbf16> to vector<16x16x128xf32>
    %c0_3 = arith.constant 0 : index
    %c0_4 = arith.constant 0 : index
    %3 = vector.load %arg3[%c0_3, %c0_4] : memref<2x128xf32, #tpu.memory_space<vmem>>, vector<2x128xf32>
    %4 = vector.extract_strided_slice %3 {offsets = [0, 0], sizes = [1, 128], strides = [1, 1]} : vector<2x128xf32> to vector<1x128xf32>
    %cst = arith.constant 0.001953125 : f32
    %5 = vector.broadcast %cst : f32 to vector<1x128xf32>
    %6 = arith.mulf %4, %5 : vector<1x128xf32>
    %7 = vector.extract_strided_slice %3 {offsets = [1, 0], sizes = [1, 128], strides = [1, 1]} : vector<2x128xf32> to vector<1x128xf32>
    %cst_5 = arith.constant 0.001953125 : f32
    %8 = vector.broadcast %cst_5 : f32 to vector<1x128xf32>
    %9 = arith.mulf %7, %8 : vector<1x128xf32>
    %10 = arith.mulf %6, %6 : vector<1x128xf32>
    %11 = arith.subf %9, %10 : vector<1x128xf32>
    %cst_6 = arith.constant 9.99999974E-6 : f32
    %12 = vector.broadcast %cst_6 : f32 to vector<1x128xf32>
    %13 = arith.addf %11, %12 : vector<1x128xf32>
    %14 = math.rsqrt %13 : vector<1x128xf32>
    %c0_7 = arith.constant 0 : index
    %c0_8 = arith.constant 0 : index
    %15 = vector.load %arg4[%c0_7, %c0_8] : memref<1x128xf32, #tpu.memory_space<vmem>>, vector<1x128xf32>
    %16 = arith.mulf %14, %15 : vector<1x128xf32>
    %17 = vector.shape_cast %6 : vector<1x128xf32> to vector<1x1x128xf32>
    %18 = vector.broadcast %17 : vector<1x1x128xf32> to vector<16x16x128xf32>
    %19 = arith.subf %2, %18 : vector<16x16x128xf32>
    %20 = vector.shape_cast %16 : vector<1x128xf32> to vector<1x1x128xf32>
    %21 = vector.broadcast %20 : vector<1x1x128xf32> to vector<16x16x128xf32>
    %22 = arith.mulf %19, %21 : vector<16x16x128xf32>
    %c0_9 = arith.constant 0 : index
    %c0_10 = arith.constant 0 : index
    %23 = vector.load %arg5[%c0_9, %c0_10] : memref<1x128xf32, #tpu.memory_space<vmem>>, vector<1x128xf32>
    %24 = vector.shape_cast %23 : vector<1x128xf32> to vector<1x1x128xf32>
    %25 = vector.broadcast %24 : vector<1x1x128xf32> to vector<16x16x128xf32>
    %26 = arith.addf %22, %25 : vector<16x16x128xf32>
    %cst_11 = arith.constant 0.000000e+00 : f32
    %27 = vector.broadcast %cst_11 : f32 to vector<16x16x128xf32>
    %28 = arith.maximumf %26, %27 : vector<16x16x128xf32>
    %cst_12 = arith.constant 0.000000e+00 : bf16
    %29 = vector.broadcast %cst_12 : bf16 to vector<1x18x24x128xbf16>
    %c0_13 = arith.constant 0 : index
    %c0_14 = arith.constant 0 : index
    %c0_15 = arith.constant 0 : index
    %c0_16 = arith.constant 0 : index
    %30 = vector.load %arg6[%c0_13, %c0_14, %c0_15, %c0_16] : memref<1x18x24x128xbf16, #tpu.memory_space<vmem>>, vector<1x18x24x128xbf16>
    tpu.vector_store %arg6[%c0_13, %c0_14, %c0_15, %c0_16], %29 {strides = array<i32>} : memref<1x18x24x128xbf16, #tpu.memory_space<vmem>>, vector<1x18x24x128xbf16>,
    %31 = arith.truncf %28 : vector<16x16x128xf32> to vector<16x16x128xbf16>
    %c0_17 = arith.constant 0 : index
    %c1 = arith.constant 1 : index
    %c1_18 = arith.constant 1 : index
    %c0_19 = arith.constant 0 : index
    %32 = vector.load %arg6[%c0_17, %c1, %c1_18, %c0_19] : memref<1x18x24x128xbf16, #tpu.memory_space<vmem>>, vector<1x16x16x128xbf16>
    %33 = vector.shape_cast %32 : vector<1x16x16x128xbf16> to vector<16x16x128xbf16>
    %34 = vector.shape_cast %31 : vector<16x16x128xbf16> to vector<1x16x16x128xbf16>
    tpu.vector_store %arg6[%c0_17, %c1, %c1_18, %c0_19], %34 {strides = array<i32>} : memref<1x18x24x128xbf16, #tpu.memory_space<vmem>>, vector<1x16x16x128xbf16>,
    return
  }
  func.func @transform_0(%arg0: i32, %arg1: i32) -> (i32, i32, i32, i32) {
    %c0_i32 = arith.constant 0 : i32
    %c0_i32_0 = arith.constant 0 : i32
    %c0_i32_1 = arith.constant 0 : i32
    return %arg0, %c0_i32, %c0_i32_0, %arg1 : i32, i32, i32, i32
  }
  func.func @transform_1(%arg0: i32, %arg1: i32) -> (i32, i32) {
    %c0_i32 = arith.constant 0 : i32
    %c0_i32_0 = arith.constant 0 : i32
    return %c0_i32, %arg1 : i32, i32
  }
  func.func @transform_2(%arg0: i32, %arg1: i32) -> (i32, i32) {
    %c0_i32 = arith.constant 0 : i32
    %c0_i32_0 = arith.constant 0 : i32
    return %c0_i32, %arg1 : i32, i32
  }
  func.func @transform_3(%arg0: i32, %arg1: i32) -> (i32, i32) {
    %c0_i32 = arith.constant 0 : i32
    %c0_i32_0 = arith.constant 0 : i32
    return %c0_i32, %arg1 : i32, i32
  }
  func.func @transform_4(%arg0: i32, %arg1: i32) -> (i32, i32, i32, i32) {
    %c0_i32 = arith.constant 0 : i32
    %c0_i32_0 = arith.constant 0 : i32
    %c0_i32_1 = arith.constant 0 : i32
    return %arg0, %c0_i32, %c0_i32_0, %arg1 : i32, i32, i32, i32
  }
}

module attributes {stable_mosaic.version = 11 : i64} {
  func.func @_bn_relu_pad_kernel(%arg0: i32, %arg1: i32, %arg2: memref<1x16x16x128xbf16, #tpu.memory_space<vmem>>, %arg3: memref<2x128xf32, #tpu.memory_space<vmem>>, %arg4: memref<1x128xf32, #tpu.memory_space<vmem>>, %arg5: memref<1x128xf32, #tpu.memory_space<vmem>>, %arg6: memref<1x18x24x128xbf16, #tpu.memory_space<vmem>>, %arg7: memref<1x18x24x128xbf16, #tpu.memory_space<vmem>>) attributes {dimension_semantics = [#tpu.dimension_semantics<parallel>, #tpu.dimension_semantics<parallel>], iteration_bounds = array<i64: 2, 1>, scalar_prefetch = 0 : i64, scratch_operands = 0 : i64, tpu.core_type = #tpu.core_type<tc>, window_params = [{transform_indices = @transform_0, window_bounds = array<i64: 1, 16, 16, 128>}, {transform_indices = @transform_1, window_bounds = array<i64: 2, 128>}, {transform_indices = @transform_2, window_bounds = array<i64: 1, 128>}, {transform_indices = @transform_3, window_bounds = array<i64: 1, 128>}, {transform_indices = @transform_4, window_bounds = array<i64: 1, 18, 24, 128>}, {transform_indices = @transform_5, window_bounds = array<i64: 1, 18, 24, 128>}]} {
    %c0 = arith.constant 0 : index
    %c0_0 = arith.constant 0 : index
    %c0_1 = arith.constant 0 : index
    %c0_2 = arith.constant 0 : index
    %0 = vector.load %arg2[%c0, %c0_0, %c0_1, %c0_2] : memref<1x16x16x128xbf16, #tpu.memory_space<vmem>>, vector<1x16x16x128xbf16>
    %1 = vector.shape_cast %0 : vector<1x16x16x128xbf16> to vector<16x16x128xbf16>
    %2 = arith.extf %1 : vector<16x16x128xbf16> to vector<16x16x128xf32>
    %c0_3 = arith.constant 0 : index
    %c0_4 = arith.constant 0 : index
    %3 = vector.load %arg3[%c0_3, %c0_4] : memref<2x128xf32, #tpu.memory_space<vmem>>, vector<2x128xf32>
    %4 = vector.extract_strided_slice %3 {offsets = [0, 0], sizes = [1, 128], strides = [1, 1]} : vector<2x128xf32> to vector<1x128xf32>
    %cst = arith.constant 0.001953125 : f32
    %5 = vector.broadcast %cst : f32 to vector<1x128xf32>
    %6 = arith.mulf %4, %5 : vector<1x128xf32>
    %7 = vector.extract_strided_slice %3 {offsets = [1, 0], sizes = [1, 128], strides = [1, 1]} : vector<2x128xf32> to vector<1x128xf32>
    %cst_5 = arith.constant 0.001953125 : f32
    %8 = vector.broadcast %cst_5 : f32 to vector<1x128xf32>
    %9 = arith.mulf %7, %8 : vector<1x128xf32>
    %10 = arith.mulf %6, %6 : vector<1x128xf32>
    %11 = arith.subf %9, %10 : vector<1x128xf32>
    %cst_6 = arith.constant 9.99999974E-6 : f32
    %12 = vector.broadcast %cst_6 : f32 to vector<1x128xf32>
    %13 = arith.addf %11, %12 : vector<1x128xf32>
    %14 = math.rsqrt %13 : vector<1x128xf32>
    %c0_7 = arith.constant 0 : index
    %c0_8 = arith.constant 0 : index
    %15 = vector.load %arg4[%c0_7, %c0_8] : memref<1x128xf32, #tpu.memory_space<vmem>>, vector<1x128xf32>
    %16 = arith.mulf %14, %15 : vector<1x128xf32>
    %17 = vector.shape_cast %6 : vector<1x128xf32> to vector<1x1x128xf32>
    %18 = vector.broadcast %17 : vector<1x1x128xf32> to vector<16x16x128xf32>
    %19 = arith.subf %2, %18 : vector<16x16x128xf32>
    %20 = vector.shape_cast %16 : vector<1x128xf32> to vector<1x1x128xf32>
    %21 = vector.broadcast %20 : vector<1x1x128xf32> to vector<16x16x128xf32>
    %22 = arith.mulf %19, %21 : vector<16x16x128xf32>
    %c0_9 = arith.constant 0 : index
    %c0_10 = arith.constant 0 : index
    %23 = vector.load %arg5[%c0_9, %c0_10] : memref<1x128xf32, #tpu.memory_space<vmem>>, vector<1x128xf32>
    %24 = vector.shape_cast %23 : vector<1x128xf32> to vector<1x1x128xf32>
    %25 = vector.broadcast %24 : vector<1x1x128xf32> to vector<16x16x128xf32>
    %26 = arith.addf %22, %25 : vector<16x16x128xf32>
    %cst_11 = arith.constant 0.000000e+00 : f32
    %27 = vector.broadcast %cst_11 : f32 to vector<16x16x128xf32>
    %28 = arith.maximumf %26, %27 : vector<16x16x128xf32>
    %c0_12 = arith.constant 0 : index
    %c1 = arith.constant 1 : index
    %c1_13 = arith.constant 1 : index
    %c0_14 = arith.constant 0 : index
    %29 = vector.load %arg6[%c0_12, %c1, %c1_13, %c0_14] : memref<1x18x24x128xbf16, #tpu.memory_space<vmem>>, vector<1x16x16x128xbf16>
    %30 = vector.shape_cast %29 : vector<1x16x16x128xbf16> to vector<16x16x128xbf16>
    %31 = arith.extf %30 : vector<16x16x128xbf16> to vector<16x16x128xf32>
    %32 = arith.addf %28, %31 : vector<16x16x128xf32>
    %cst_15 = arith.constant 0.000000e+00 : bf16
    %33 = vector.broadcast %cst_15 : bf16 to vector<1x18x24x128xbf16>
    %c0_16 = arith.constant 0 : index
    %c0_17 = arith.constant 0 : index
    %c0_18 = arith.constant 0 : index
    %c0_19 = arith.constant 0 : index
    %34 = vector.load %arg7[%c0_16, %c0_17, %c0_18, %c0_19] : memref<1x18x24x128xbf16, #tpu.memory_space<vmem>>, vector<1x18x24x128xbf16>
    tpu.vector_store %arg7[%c0_16, %c0_17, %c0_18, %c0_19], %33 {strides = array<i32>} : memref<1x18x24x128xbf16, #tpu.memory_space<vmem>>, vector<1x18x24x128xbf16>,
    %35 = arith.truncf %32 : vector<16x16x128xf32> to vector<16x16x128xbf16>
    %c0_20 = arith.constant 0 : index
    %c1_21 = arith.constant 1 : index
    %c1_22 = arith.constant 1 : index
    %c0_23 = arith.constant 0 : index
    %36 = vector.load %arg7[%c0_20, %c1_21, %c1_22, %c0_23] : memref<1x18x24x128xbf16, #tpu.memory_space<vmem>>, vector<1x16x16x128xbf16>
    %37 = vector.shape_cast %36 : vector<1x16x16x128xbf16> to vector<16x16x128xbf16>
    %38 = vector.shape_cast %35 : vector<16x16x128xbf16> to vector<1x16x16x128xbf16>
    tpu.vector_store %arg7[%c0_20, %c1_21, %c1_22, %c0_23], %38 {strides = array<i32>} : memref<1x18x24x128xbf16, #tpu.memory_space<vmem>>, vector<1x16x16x128xbf16>,
    return
  }
  func.func @transform_0(%arg0: i32, %arg1: i32) -> (i32, i32, i32, i32) {
    %c0_i32 = arith.constant 0 : i32
    %c0_i32_0 = arith.constant 0 : i32
    %c0_i32_1 = arith.constant 0 : i32
    return %arg0, %c0_i32, %c0_i32_0, %arg1 : i32, i32, i32, i32
  }
  func.func @transform_1(%arg0: i32, %arg1: i32) -> (i32, i32) {
    %c0_i32 = arith.constant 0 : i32
    %c0_i32_0 = arith.constant 0 : i32
    return %c0_i32, %arg1 : i32, i32
  }
  func.func @transform_2(%arg0: i32, %arg1: i32) -> (i32, i32) {
    %c0_i32 = arith.constant 0 : i32
    %c0_i32_0 = arith.constant 0 : i32
    return %c0_i32, %arg1 : i32, i32
  }
  func.func @transform_3(%arg0: i32, %arg1: i32) -> (i32, i32) {
    %c0_i32 = arith.constant 0 : i32
    %c0_i32_0 = arith.constant 0 : i32
    return %c0_i32, %arg1 : i32, i32
  }
  func.func @transform_4(%arg0: i32, %arg1: i32) -> (i32, i32, i32, i32) {
    %c0_i32 = arith.constant 0 : i32
    %c0_i32_0 = arith.constant 0 : i32
    %c0_i32_1 = arith.constant 0 : i32
    return %arg0, %c0_i32, %c0_i32_0, %arg1 : i32, i32, i32, i32
  }
  func.func @transform_5(%arg0: i32, %arg1: i32) -> (i32, i32, i32, i32) {
    %c0_i32 = arith.constant 0 : i32
    %c0_i32_0 = arith.constant 0 : i32
    %c0_i32_1 = arith.constant 0 : i32
    return %arg0, %c0_i32, %c0_i32_0, %arg1 : i32, i32, i32, i32
  }
}

module attributes {stable_mosaic.version = 11 : i64} {
  func.func @_conv3x3_s2_kernel(%arg0: i32, %arg1: i32, %arg2: memref<1x9x2x12x256xbf16, #tpu.memory_space<vmem>>, %arg3: memref<1152x128xbf16, #tpu.memory_space<vmem>>, %arg4: memref<1x128xf32, #tpu.memory_space<vmem>>, %arg5: memref<1x8x8x128xf32, #tpu.memory_space<vmem>>) attributes {dimension_semantics = [#tpu.dimension_semantics<parallel>, #tpu.dimension_semantics<parallel>], iteration_bounds = array<i64: 1, 2>, scalar_prefetch = 0 : i64, scratch_operands = 0 : i64, tpu.core_type = #tpu.core_type<tc>, window_params = [{transform_indices = @transform_0, window_bounds = array<i64: 1, 9, 2, 12, 256>}, {transform_indices = @transform_1, window_bounds = array<i64: 1152, 128>}, {transform_indices = @transform_2, window_bounds = array<i64: 1, 128>}, {transform_indices = @transform_3, window_bounds = array<i64: 1, 8, 8, 128>}]} {
    %cst = arith.constant 0.000000e+00 : f32
    %0 = vector.broadcast %cst : f32 to vector<64x128xf32>
    %c0 = arith.constant 0 : index
    %c0_0 = arith.constant 0 : index
    %c0_1 = arith.constant 0 : index
    %c0_2 = arith.constant 0 : index
    %c0_3 = arith.constant 0 : index
    %1 = vector.load %arg2[%c0, %c0_0, %c0_1, %c0_2, %c0_3] : memref<1x9x2x12x256xbf16, #tpu.memory_space<vmem>>, vector<1x8x1x12x256xbf16>
    %2 = vector.shape_cast %1 : vector<1x8x1x12x256xbf16> to vector<8x1x12x256xbf16>
    %3 = vector.shape_cast %2 : vector<8x1x12x256xbf16> to vector<8x12x256xbf16>
    %4 = vector.extract_strided_slice %3 {offsets = [0, 0, 0], sizes = [8, 8, 256], strides = [1, 1, 1]} : vector<8x12x256xbf16> to vector<8x8x256xbf16>
    %5 = vector.shape_cast %4 : vector<8x8x256xbf16> to vector<64x256xbf16>
    %c0_4 = arith.constant 0 : index
    %c0_5 = arith.constant 0 : index
    %6 = vector.load %arg3[%c0_4, %c0_5] : memref<1152x128xbf16, #tpu.memory_space<vmem>>, vector<256x128xbf16>
    %cst_6 = arith.constant dense<0.000000e+00> : vector<64x128xf32>
    %7 = tpu.matmul %5, %6, %cst_6 {dimension_numbers = #tpu.dot_dimension_numbers<[1], [0], [0], [1], [0, 0, 1, 1], [], []>} : vector<64x256xbf16>, vector<256x128xbf16>, vector<64x128xf32> -> vector<64x128xf32>
    %8 = arith.addf %0, %7 : vector<64x128xf32>
    %9 = vector.extract_strided_slice %3 {offsets = [0, 1, 0], sizes = [8, 8, 128], strides = [1, 1, 1]} : vector<8x12x256xbf16> to vector<8x8x128xbf16>
    %10 = vector.shape_cast %9 : vector<8x8x128xbf16> to vector<64x128xbf16>
    %c256 = arith.constant 256 : index
    %c0_7 = arith.constant 0 : index
    %11 = vector.load %arg3[%c256, %c0_7] : memref<1152x128xbf16, #tpu.memory_space<vmem>>, vector<128x128xbf16>
    %cst_8 = arith.constant dense<0.000000e+00> : vector<64x128xf32>
    %12 = tpu.matmul %10, %11, %cst_8 {dimension_numbers = #tpu.dot_dimension_numbers<[1], [0], [0], [1], [0, 0, 1, 1], [], []>} : vector<64x128xbf16>, vector<128x128xbf16>, vector<64x128xf32> -> vector<64x128xf32>
    %13 = arith.addf %8, %12 : vector<64x128xf32>
    %c0_9 = arith.constant 0 : index
    %c0_10 = arith.constant 0 : index
    %c1 = arith.constant 1 : index
    %c0_11 = arith.constant 0 : index
    %c0_12 = arith.constant 0 : index
    %14 = vector.load %arg2[%c0_9, %c0_10, %c1, %c0_11, %c0_12] : memref<1x9x2x12x256xbf16, #tpu.memory_space<vmem>>, vector<1x8x1x12x256xbf16>
    %15 = vector.shape_cast %14 : vector<1x8x1x12x256xbf16> to vector<8x1x12x256xbf16>
    %16 = vector.shape_cast %15 : vector<8x1x12x256xbf16> to vector<8x12x256xbf16>
    %17 = vector.extract_strided_slice %16 {offsets = [0, 0, 0], sizes = [8, 8, 256], strides = [1, 1, 1]} : vector<8x12x256xbf16> to vector<8x8x256xbf16>
    %18 = vector.shape_cast %17 : vector<8x8x256xbf16> to vector<64x256xbf16>
    %c384 = arith.constant 384 : index
    %c0_13 = arith.constant 0 : index
    %19 = vector.load %arg3[%c384, %c0_13] : memref<1152x128xbf16, #tpu.memory_space<vmem>>, vector<256x128xbf16>
    %cst_14 = arith.constant dense<0.000000e+00> : vector<64x128xf32>
    %20 = tpu.matmul %18, %19, %cst_14 {dimension_numbers = #tpu.dot_dimension_numbers<[1], [0], [0], [1], [0, 0, 1, 1], [], []>} : vector<64x256xbf16>, vector<256x128xbf16>, vector<64x128xf32> -> vector<64x128xf32>
    %21 = arith.addf %13, %20 : vector<64x128xf32>
    %22 = vector.extract_strided_slice %16 {offsets = [0, 1, 0], sizes = [8, 8, 128], strides = [1, 1, 1]} : vector<8x12x256xbf16> to vector<8x8x128xbf16>
    %23 = vector.shape_cast %22 : vector<8x8x128xbf16> to vector<64x128xbf16>
    %c640 = arith.constant 640 : index
    %c0_15 = arith.constant 0 : index
    %24 = vector.load %arg3[%c640, %c0_15] : memref<1152x128xbf16, #tpu.memory_space<vmem>>, vector<128x128xbf16>
    %cst_16 = arith.constant dense<0.000000e+00> : vector<64x128xf32>
    %25 = tpu.matmul %23, %24, %cst_16 {dimension_numbers = #tpu.dot_dimension_numbers<[1], [0], [0], [1], [0, 0, 1, 1], [], []>} : vector<64x128xbf16>, vector<128x128xbf16>, vector<64x128xf32> -> vector<64x128xf32>
    %26 = arith.addf %21, %25 : vector<64x128xf32>
    %c0_17 = arith.constant 0 : index
    %c1_18 = arith.constant 1 : index
    %c0_19 = arith.constant 0 : index
    %c0_20 = arith.constant 0 : index
    %c0_21 = arith.constant 0 : index
    %27 = vector.load %arg2[%c0_17, %c1_18, %c0_19, %c0_20, %c0_21] : memref<1x9x2x12x256xbf16, #tpu.memory_space<vmem>>, vector<1x8x1x12x256xbf16>
    %28 = vector.shape_cast %27 : vector<1x8x1x12x256xbf16> to vector<8x1x12x256xbf16>
    %29 = vector.shape_cast %28 : vector<8x1x12x256xbf16> to vector<8x12x256xbf16>
    %30 = vector.extract_strided_slice %29 {offsets = [0, 0, 0], sizes = [8, 8, 256], strides = [1, 1, 1]} : vector<8x12x256xbf16> to vector<8x8x256xbf16>
    %31 = vector.shape_cast %30 : vector<8x8x256xbf16> to vector<64x256xbf16>
    %c768 = arith.constant 768 : index
    %c0_22 = arith.constant 0 : index
    %32 = vector.load %arg3[%c768, %c0_22] : memref<1152x128xbf16, #tpu.memory_space<vmem>>, vector<256x128xbf16>
    %cst_23 = arith.constant dense<0.000000e+00> : vector<64x128xf32>
    %33 = tpu.matmul %31, %32, %cst_23 {dimension_numbers = #tpu.dot_dimension_numbers<[1], [0], [0], [1], [0, 0, 1, 1], [], []>} : vector<64x256xbf16>, vector<256x128xbf16>, vector<64x128xf32> -> vector<64x128xf32>
    %34 = arith.addf %26, %33 : vector<64x128xf32>
    %35 = vector.extract_strided_slice %29 {offsets = [0, 1, 0], sizes = [8, 8, 128], strides = [1, 1, 1]} : vector<8x12x256xbf16> to vector<8x8x128xbf16>
    %36 = vector.shape_cast %35 : vector<8x8x128xbf16> to vector<64x128xbf16>
    %c1024 = arith.constant 1024 : index
    %c0_24 = arith.constant 0 : index
    %37 = vector.load %arg3[%c1024, %c0_24] : memref<1152x128xbf16, #tpu.memory_space<vmem>>, vector<128x128xbf16>
    %cst_25 = arith.constant dense<0.000000e+00> : vector<64x128xf32>
    %38 = tpu.matmul %36, %37, %cst_25 {dimension_numbers = #tpu.dot_dimension_numbers<[1], [0], [0], [1], [0, 0, 1, 1], [], []>} : vector<64x128xbf16>, vector<128x128xbf16>, vector<64x128xf32> -> vector<64x128xf32>
    %39 = arith.addf %34, %38 : vector<64x128xf32>
    %c0_26 = arith.constant 0 : index
    %c0_27 = arith.constant 0 : index
    %40 = vector.load %arg4[%c0_26, %c0_27] : memref<1x128xf32, #tpu.memory_space<vmem>>, vector<1x128xf32>
    %41 = vector.broadcast %40 : vector<1x128xf32> to vector<64x128xf32>
    %42 = arith.addf %39, %41 : vector<64x128xf32>
    %43 = vector.shape_cast %42 : vector<64x128xf32> to vector<8x8x128xf32>
    %c0_28 = arith.constant 0 : index
    %c0_29 = arith.constant 0 : index
    %c0_30 = arith.constant 0 : index
    %c0_31 = arith.constant 0 : index
    %44 = vector.load %arg5[%c0_28, %c0_29, %c0_30, %c0_31] : memref<1x8x8x128xf32, #tpu.memory_space<vmem>>, vector<1x8x8x128xf32>
    %45 = vector.shape_cast %44 : vector<1x8x8x128xf32> to vector<8x8x128xf32>
    %46 = vector.shape_cast %43 : vector<8x8x128xf32> to vector<1x8x8x128xf32>
    tpu.vector_store %arg5[%c0_28, %c0_29, %c0_30, %c0_31], %46 {strides = array<i32>} : memref<1x8x8x128xf32, #tpu.memory_space<vmem>>, vector<1x8x8x128xf32>,
    return
  }
  func.func @transform_0(%arg0: i32, %arg1: i32) -> (i32, i32, i32, i32, i32) {
    %c0_i32 = arith.constant 0 : i32
    %c0_i32_0 = arith.constant 0 : i32
    %c0_i32_1 = arith.constant 0 : i32
    %c0_i32_2 = arith.constant 0 : i32
    %c0_i32_3 = arith.constant 0 : i32
    return %arg1, %c0_i32, %c0_i32_0, %c0_i32_1, %c0_i32_2 : i32, i32, i32, i32, i32
  }
  func.func @transform_1(%arg0: i32, %arg1: i32) -> (i32, i32) {
    %c0_i32 = arith.constant 0 : i32
    %c0_i32_0 = arith.constant 0 : i32
    return %c0_i32, %arg0 : i32, i32
  }
  func.func @transform_2(%arg0: i32, %arg1: i32) -> (i32, i32) {
    %c0_i32 = arith.constant 0 : i32
    %c0_i32_0 = arith.constant 0 : i32
    return %c0_i32, %arg0 : i32, i32
  }
  func.func @transform_3(%arg0: i32, %arg1: i32) -> (i32, i32, i32, i32) {
    %c0_i32 = arith.constant 0 : i32
    %c0_i32_0 = arith.constant 0 : i32
    %c0_i32_1 = arith.constant 0 : i32
    return %arg1, %c0_i32, %c0_i32_0, %arg0 : i32, i32, i32, i32
  }
}

</mosaic_0001>

<bundles_post_ra>
// kernel: residual_conv_forward.8
= control target key start
LH: loop header
LB: loop body
LE: loop exit
PB: predicated region body
PF: predicated region fallthrough
CT: control target
= control target key end

     0   :  { %s1530_s15 = smov 0   ;;  %s1532_s16 = smov 0   ;;  %s2071_s0 = inlined_call_operand.vmem [shape: bf16[2,16,16,128], index: 0, kind: input, shape index: {}]   ;;  %s2072_s1 = inlined_call_operand.vmem [shape: f32[2,128], index: 1, kind: input, shape index: {}]   ;;  %s2073_s2 = inlined_call_operand.vmem [shape: f32[1,128], index: 2, kind: input, shape index: {}]   ;;  %s2074_s3 = inlined_call_operand.vmem [shape: f32[1,128], index: 3, kind: input, shape index: {}]   ;;  %s2075_s4 = inlined_call_operand.vmem [shape: bf16[2,18,24,128], index: 4, kind: output, shape index: {}]  }
   0x1   :  { %s1534_s17 = smov 0  }
   0x2 LB: > { %s26_s18 = sadd.s32 1, %s1498_s16  ;;  %p1220_p0 = scmp.ge.s32.totalorder %s1502_s17, 1  ;;  %s1502_s17 = sphi %s1534_s17, %s14_s17   ;;  %s1498_s16 = sphi %s1532_s16, %s2083_s16   ;;  %s1494_s15 = sphi %s1530_s15, %s2082_s15  }
   0x3   : > { %p28_p1 = scmp.ge.s32.totalorder %s26_s18, 2  ;;  %p206_p2 = scmp.lt.s32.totalorder %s1502_s17, 3 }
   0x5   : > { %s2085_s18 = smov (%p28_p1, %s26_s18), 0  ;;  %p207_p3 = pnand %p1220_p0, %p206_p2 }
   0x6   : > { %p248_p4 = scmp.lt.s32.totalorder (!%p207_p3), %s1494_s15, 1  ;;  %v339_v0 = vld [vmem:[%s2072_s1] sm:$0x3] (!%p207_p3)  ;;  %v356_v1 = vlaneseq (!%p207_p3)  ;;  %v1504_v9 = vmov (!%p207_p3), 0   ;;  %vm973_vm0 = vcmask (!%p207_p3), 1043456   ;;  %vm980_vm4 = vcmask (!%p207_p3), 1040384  }
   0x7   : > { %210 = sbr.rel (%p207_p3) target bundleno = 128 (0x80), region = 36  ;;  %v1551_v2 = vmul.f32 (!%p207_p3), 0.001953125, %v339_v0  ;;  %vm974_vm1 = vsmask.f32 (!%p207_p3), 7938  ;;  %vm649_vm2 = vsmask.f32 (!%p207_p3), 256 }
   0x8   : > { %v1553_v3 = vshrl.u32 (!%p207_p3), %v356_v1, 7  ;;  %vm650_vm3 = vsmask.f32 (!%p207_p3), 4368  ;;  %vm1794_vm5 = vmand (!%p207_p3), %vm973_vm0, %vm974_vm1 }
   0x9   : > { %v1557_v4 = vmul.f32 (!%p207_p3), %v1551_v2, %v1551_v2  ;;  %vm1801_vm6 = vmor (!%p207_p3), %vm649_vm2, %vm650_vm3 }
   0xa   : > { %v358_v5 = vsub.s32 (!%p207_p3), 0, %v1553_v3  ;;  %v394_v18 = vsub.s32 (!%p207_p3), 1, %v1553_v3  ;;  %vm1807_vm7 = vmand (!%p207_p3), %vm980_vm4, %vm649_vm2 }
   0xb   : > { %v343_v6 = vrot.slane (!%p207_p3), %v1557_v4, 7 }
   0xc   : > { %v1636_v12 = vrot.slane (!%p207_p3), %v1551_v2, %v358_v5 }
   0xd   : > { %v345_v11 = vsub.f32 (!%p207_p3), %v1551_v2, %v343_v6  ;;  %v1224_v2 = vld [vmem:[%s2073_s2] ss:$0 sm:$0xff] (!%p207_p3) }
   0xe   : > { %s2087_s15 = smov (!%p248_p4, %s1494_s15), 1 }
   0xf   : > { %s1452_s21 = smul.u32 216, %s2087_s15  ;;  %s1340_s22 = sshll.u32 %s2087_s15, 7  ;;  %v346_v17 = vadd.f32 1e-05, %v345_v11 }
  0x10   : > { %s1563_s25 = scalar_lea.vmem %s2071_s0, %s1340_s22 }
  0x11   : > { %s1569_s28 = scalar_lea.vmem %s2075_s4, %s1452_s21  ;;  %v1572_v7 = vld [vmem:[%s1563_s25] sm:$0xff]   ;;  %v1575_v8 = vld [vmem:[%s1563_s25 + $0x8] sm:$0xff]   ;;  %v1438_v14 = vld [vmem:[%s1563_s25 + $0x10] sm:$0xff]   ;;  %1478 = vrsqrt.f32 %v346_v17 }
  0x12   : > { %502 = vst [vmem:[%s1569_s28 + $0xc] sm:$0xf] %v1504_v9  ;;  %499 = vst [vmem:[%s1569_s28] sm:$0xf] %v1504_v9  ;;  %v1375_v10 = vunpack.c.l.bf16 %v1572_v7  ;;  %v1376_v13 = vunpack.c.h.bf16 %v1572_v7  ;;  %v1439_v15 = vld [vmem:[%s1563_s25 + $0x18] sm:$0xff]   ;;  %v1379_v16 = vunpack.c.l.bf16 %v1575_v8  ;;  %v1440_v19 = vld [vmem:[%s1563_s25 + $0x20] sm:$0xff]   ;;  %v1380_v21 = vunpack.c.h.bf16 %v1575_v8 }
  0x13   : > { %500 = vst [vmem:[%s1569_s28 + $0x4] sm:$0xf] %v1504_v9  ;;  %501 = vst [vmem:[%s1569_s28 + $0x8] sm:$0xf] %v1504_v9  ;;  %v1441_v20 = vld [vmem:[%s1563_s25 + $0x28] sm:$0xff]   ;;  %v1383_v22 = vunpack.c.l.bf16 %v1438_v14  ;;  %v1384_v23 = vunpack.c.h.bf16 %v1438_v14  ;;  %v1387_v24 = vunpack.c.l.bf16 %v1439_v15  ;;  %v1442_v25 = vld [vmem:[%s1563_s25 + $0x30] sm:$0xff]   ;;  %v1388_v29 = vunpack.c.h.bf16 %v1439_v15 }
  0x14   : > { %503 = vst [vmem:[%s1569_s28 + $0x10] sm:$0xf] %v1504_v9  ;;  %504 = vst [vmem:[%s1569_s28 + $0x14] sm:$0xf] %v1504_v9  ;;  %v1443_v26 = vld [vmem:[%s1563_s25 + $0x38] sm:$0xff]   ;;  %v1649_v27 = vsub.f32 %v1375_v10, %v1636_v12  ;;  %v1652_v28 = vsub.f32 %v1376_v13, %v1636_v12  ;;  %v1655_v30 = vsub.f32 %v1379_v16, %v1636_v12  ;;  %v1391_v31 = vunpack.c.l.bf16 %v1440_v19  ;;  %v1444_v34 = vld [vmem:[%s1563_s25 + $0x40] sm:$0xff]  }
  0x15   : > { %505 = vst [vmem:[%s1569_s28 + $0x18] sm:$0xf] %v1504_v9  ;;  %506 = vst [vmem:[%s1569_s28 + $0x1c] sm:$0xf] %v1504_v9  ;;  %v1392_v32 = vunpack.c.h.bf16 %v1440_v19  ;;  %v1395_v33 = vunpack.c.l.bf16 %v1441_v20  ;;  %v1396_v35 = vunpack.c.h.bf16 %v1441_v20  ;;  %v1399_v36 = vunpack.c.l.bf16 %v1442_v25  ;;  %v1445_v39 = vld [vmem:[%s1563_s25 + $0x48] sm:$0xff]   ;;  %v1446_v48 = vld [vmem:[%s1563_s25 + $0x50] sm:$0xff]  }
  0x16   : > { %507 = vst [vmem:[%s1569_s28 + $0x20] sm:$0xf] %v1504_v9  ;;  %508 = vst [vmem:[%s1569_s28 + $0x24] sm:$0xf] %v1504_v9  ;;  %v1400_v37 = vunpack.c.h.bf16 %v1442_v25  ;;  %v1403_v38 = vunpack.c.l.bf16 %v1443_v26  ;;  %v1660_v40 = vsub.f32 %v1380_v21, %v1636_v12  ;;  %v1663_v41 = vsub.f32 %v1383_v22, %v1636_v12  ;;  %v1447_v53 = vld [vmem:[%s1563_s25 + $0x58] sm:$0xff]   ;;  %v1449_v58 = vld [vmem:[%s1563_s25 + $0x68] sm:$0xff]  }
  0x17   : > { %509 = vst [vmem:[%s1569_s28 + $0x28] sm:$0xf] %v1504_v9  ;;  %510 = vst [vmem:[%s1569_s28 + $0x2c] sm:$0xf] %v1504_v9  ;;  %v1666_v42 = vsub.f32 %v1384_v23, %v1636_v12  ;;  %v1669_v43 = vsub.f32 %v1387_v24, %v1636_v12  ;;  %v1672_v44 = vsub.f32 %v1388_v29, %v1636_v12  ;;  %v1404_v45 = vunpack.c.h.bf16 %v1443_v26  ;;  %v1450_v59 = vld [vmem:[%s1563_s25 + $0x70] sm:$0xff]   ;;  %v1448_v0 = vld [vmem:[%s1563_s25 + $0x60] sm:$0xff]  }
  0x18   : > { %511 = vst [vmem:[%s1569_s28 + $0x30] sm:$0xf] %v1504_v9  ;;  %512 = vst [vmem:[%s1569_s28 + $0x34] sm:$0xf] %v1504_v9  ;;  %v1407_v46 = vunpack.c.l.bf16 %v1444_v34  ;;  %v1408_v47 = vunpack.c.h.bf16 %v1444_v34  ;;  %v1676_v49 = vsub.f32 %v1391_v31, %v1636_v12  ;;  %v1679_v50 = vsub.f32 %v1392_v32, %v1636_v12  ;;  %v1451_v1 = vld [vmem:[%s1563_s25 + $0x78] sm:$0xff]  }
  0x19   : > { %513 = vst [vmem:[%s1569_s28 + $0x38] sm:$0xf] %v1504_v9  ;;  %514 = vst [vmem:[%s1569_s28 + $0x3c] sm:$0xf] %v1504_v9  ;;  %v1682_v51 = vsub.f32 %v1395_v33, %v1636_v12  ;;  %v1411_v52 = vunpack.c.l.bf16 %v1445_v39  ;;  %v1686_v54 = vsub.f32 %v1396_v35, %v1636_v12  ;;  %v1689_v55 = vsub.f32 %v1399_v36, %v1636_v12  ;;  %v1750_v34 = vld [vmem:[%s2074_s3] ss:$0 sm:$0xff] }
  0x1a   : > { %515 = vst [vmem:[%s1569_s28 + $0x40] sm:$0xf] %v1504_v9  ;;  %516 = vst [vmem:[%s1569_s28 + $0x44] sm:$0xf] %v1504_v9  ;;  %v1692_v56 = vsub.f32 %v1400_v37, %v1636_v12  ;;  %v1695_v57 = vsub.f32 %v1403_v38, %v1636_v12  ;;  %v1700_v60 = vsub.f32 %v1404_v45, %v1636_v12  ;;  %v1412_v61 = vunpack.c.h.bf16 %v1445_v39 }
  0x1b   : > { %517 = vst [vmem:[%s1569_s28 + $0x48] sm:$0xf] %v1504_v9  ;;  %518 = vst [vmem:[%s1569_s28 + $0x4c] sm:$0xf] %v1504_v9  ;;  %v1415_v62 = vunpack.c.l.bf16 %v1446_v48  ;;  %v1416_v63 = vunpack.c.h.bf16 %v1446_v48  ;;  %v1708_v4 = vsub.f32 %v1407_v46, %v1636_v12  ;;  %v1711_v5 = vsub.f32 %v1408_v47, %v1636_v12  ;;  %v1479_v13 = vpop.eup %1478 }
  0x1c   : > { %519 = vst [vmem:[%s1569_s28 + $0x50] sm:$0xf] %v1504_v9  ;;  %520 = vst [vmem:[%s1569_s28 + $0x54] sm:$0xf] %v1504_v9  ;;  %v1714_v6 = vsub.f32 %v1411_v52, %v1636_v12  ;;  %v1419_v7 = vunpack.c.l.bf16 %v1447_v53  ;;  %v1427_v8 = vunpack.c.l.bf16 %v1449_v58  ;;  %v1431_v10 = vunpack.c.l.bf16 %v1450_v59 }
  0x1d   : > { %521 = vst [vmem:[%s1569_s28 + $0x58] sm:$0xf] %v1504_v9  ;;  %522 = vst [vmem:[%s1569_s28 + $0x5c] sm:$0xf] %v1504_v9  ;;  %v1432_v11 = vunpack.c.h.bf16 %v1450_v59  ;;  %v1420_v14 = vunpack.c.h.bf16 %v1447_v53  ;;  %v1423_v15 = vunpack.c.l.bf16 %v1448_v0  ;;  %v1424_v16 = vunpack.c.h.bf16 %v1448_v0 }
  0x1e   : > { %523 = vst [vmem:[%s1569_s28 + $0x60] sm:$0xf] %v1504_v9  ;;  %524 = vst [vmem:[%s1569_s28 + $0x64] sm:$0xf] %v1504_v9  ;;  %v1435_v17 = vunpack.c.l.bf16 %v1451_v1  ;;  %v355_v19 = vmul.f32 %v1479_v13, %v1224_v2  ;;  %v1717_v20 = vsub.f32 %v1427_v8, %v1636_v12  ;;  %v1723_v22 = vsub.f32 %v1431_v10, %v1636_v12 }
  0x1f   : > { %525 = vst [vmem:[%s1569_s28 + $0x68] sm:$0xf] %v1504_v9  ;;  %526 = vst [vmem:[%s1569_s28 + $0x6c] sm:$0xf] %v1504_v9  ;;  %v1726_v23 = vsub.f32 %v1412_v61, %v1636_v12  ;;  %v1729_v24 = vsub.f32 %v1432_v11, %v1636_v12  ;;  %v1436_v26 = vunpack.c.h.bf16 %v1451_v1  ;;  %v1739_v31 = vsub.f32 %v1415_v62, %v1636_v12 }
  0x20   : > { %527 = vst [vmem:[%s1569_s28 + $0x70] sm:$0xf] %v1504_v9  ;;  %528 = vst [vmem:[%s1569_s28 + $0x74] sm:$0xf] %v1504_v9  ;;  %v1732_v25 = vsub.f32 %v1435_v17, %v1636_v12  ;;  %v1736_v29 = vrot.slane %v355_v19, %v394_v18  ;;  %v1742_v32 = vsub.f32 %v1416_v63, %v1636_v12 }
  0x21   : > { %529 = vst [vmem:[%s1569_s28 + $0x78] sm:$0xf] %v1504_v9  ;;  %530 = vst [vmem:[%s1569_s28 + $0x7c] sm:$0xf] %v1504_v9  ;;  %v1745_v33 = vsub.f32 %v1419_v7, %v1636_v12  ;;  %v1753_v3 = vsub.f32 %v1420_v14, %v1636_v12  ;;  %v1756_v18 = vsub.f32 %v1423_v15, %v1636_v12 }
  0x22   : > { %531 = vst [vmem:[%s1569_s28 + $0x80] sm:$0xf] %v1504_v9  ;;  %532 = vst [vmem:[%s1569_s28 + $0x84] sm:$0xf] %v1504_v9  ;;  %v1759_v35 = vsub.f32 %v1424_v16, %v1636_v12  ;;  %v1762_v36 = vsub.f32 %v1436_v26, %v1636_v12  ;;  %v396_v37 = vmul.f32 %v1736_v29, %v1649_v27 }
  0x23   : > { %533 = vst [vmem:[%s1569_s28 + $0x88] sm:$0xf] %v1504_v9  ;;  %534 = vst [vmem:[%s1569_s28 + $0x8c] sm:$0xf] %v1504_v9  ;;  %v397_v38 = vmul.f32 %v1736_v29, %v1652_v28  ;;  %v398_v39 = vmul.f32 %v1736_v29, %v1655_v30  ;;  %v399_v45 = vmul.f32 %v1736_v29, %v1660_v40 }
  0x24   : > { %535 = vst [vmem:[%s1569_s28 + $0x90] sm:$0xf] %v1504_v9  ;;  %536 = vst [vmem:[%s1569_s28 + $0x94] sm:$0xf] %v1504_v9  ;;  %v400_v46 = vmul.f32 %v1736_v29, %v1663_v41  ;;  %v402_v47 = vmul.f32 %v1736_v29, %v1669_v43  ;;  %v403_v27 = vmul.f32 %v1736_v29, %v1672_v44 }
  0x25   : > { %537 = vst [vmem:[%s1569_s28 + $0x98] sm:$0xf] %v1504_v9  ;;  %538 = vst [vmem:[%s1569_s28 + $0x9c] sm:$0xf] %v1504_v9  ;;  %v435_v28 = vadd.f32 %v1750_v34, %v396_v37  ;;  %v436_v48 = vadd.f32 %v1750_v34, %v397_v38  ;;  %v437_v30 = vadd.f32 %v1750_v34, %v398_v39 }
  0x26   : > { %539 = vst [vmem:[%s1569_s28 + $0xa0] sm:$0xf] %v1504_v9  ;;  %540 = vst [vmem:[%s1569_s28 + $0xa4] sm:$0xf] %v1504_v9  ;;  %v438_v40 = vadd.f32 %v1750_v34, %v399_v45  ;;  %v439_v52 = vadd.f32 %v1750_v34, %v400_v46  ;;  %v442_v53 = vadd.f32 %v1750_v34, %v403_v27  ;;  %v1258_v46 = vld [vmem:[%s1569_s28 + $0xc] sm:$0xf] }
  0x27   : > { %541 = vst [vmem:[%s1569_s28 + $0xa8] sm:$0xf] %v1504_v9  ;;  %542 = vst [vmem:[%s1569_s28 + $0xac] sm:$0xf] %v1504_v9  ;;  %v467_v43 = vmax.f32 %v435_v28, 0.0  ;;  %v469_v59 = vmax.f32 %v437_v30, 0.0 }
  0x28   : > { %543 = vst [vmem:[%s1569_s28 + $0xb0] sm:$0xf] %v1504_v9  ;;  %544 = vst [vmem:[%s1569_s28 + $0xb4] sm:$0xf] %v1504_v9  ;;  %v470_v44 = vmax.f32 %v438_v40, 0.0  ;;  %v471_v61 = vmax.f32 %v439_v52, 0.0 }
  0x29   : > { %545 = vst [vmem:[%s1569_s28 + $0xb8] sm:$0xf] %v1504_v9  ;;  %546 = vst [vmem:[%s1569_s28 + $0xbc] sm:$0xf] %v1504_v9  ;;  %v474_v0 = vmax.f32 %v442_v53, 0.0  ;;  %v1341_v1 = vpack.c.bf16 %v467_v43, %v467_v43  ;;  %v1343_v7 = vpack.c.bf16 %v469_v59, %v469_v59 }
  0x2a   : > { %547 = vst [vmem:[%s1569_s28 + $0xc0] sm:$0xf] %v1504_v9  ;;  %548 = vst [vmem:[%s1569_s28 + $0xc4] sm:$0xf] %v1504_v9  ;;  %v1344_v8 = vpack.c.bf16 %v470_v44, %v470_v44  ;;  %v1261_v30 = vld [vmem:[%s1569_s28 + $0x14] sm:$0x1] }
  0x2b   : > { %549 = vst [vmem:[%s1569_s28 + $0xc8] sm:$0xf] %v1504_v9  ;;  %550 = vst [vmem:[%s1569_s28 + $0xcc] sm:$0xf] %v1504_v9  ;;  %v1790_v13 = vpack.c.bf16 %v474_v0, %v474_v0  ;;  %v653_v14 = vshrl.u32 %v1341_v1, 16  ;;  %v656_v15 = vshll.u32 %v1341_v1, 16 }
  0x2c   : > { %551 = vst [vmem:[%s1569_s28 + $0xd0] sm:$0xf] %v1504_v9  ;;  %552 = vst [vmem:[%s1569_s28 + $0xd4] sm:$0xf] %v1504_v9  ;;  %v1428_v9 = vunpack.c.h.bf16 %v1449_v58  ;;  %v468_v58 = vmax.f32 %v436_v48, 0.0  ;;  %v670_v26 = vshrl.u32 %v1343_v7, 16 }
  0x2d   : > { %v673_v37 = vshll.u32 %v1343_v7, 16  ;;  %v678_v38 = vshrl.u32 %v1344_v8, 16  ;;  %v681_v39 = vshll.u32 %v1344_v8, 16  ;;  %v655_v45 = vrot.slane %v653_v14, 7  ;;  %v1263_v44 = vld [vmem:[%s1569_s28 + $0x18] sm:$0xf] }
  0x2e   : > { %v1720_v21 = vsub.f32 %v1428_v9, %v1636_v12  ;;  %v401_v12 = vmul.f32 %v1736_v29, %v1666_v42  ;;  %v441_v42 = vadd.f32 %v1750_v34, %v402_v47  ;;  %v1342_v2 = vpack.c.bf16 %v468_v58, %v468_v58 }
  0x2f   : > { %v1345_v9 = vpack.c.bf16 %v471_v61, %v471_v61  ;;  %v672_v40 = vrot.slane %v670_v26, 7  ;;  %v680_v52 = vrot.slane %v678_v38, 7  ;;  %v658_v53 = vor.u32 %v656_v15, %v655_v45  ;;  %v1266_v61 = vld [vmem:[%s1569_s28 + $0x20] sm:$0x1]  ;;  %v1271_v38 = vld [vmem:[%s1569_s28 + $0x2c] sm:$0x1] }
  0x30   : > { %v440_v41 = vadd.f32 %v1750_v34, %v401_v12  ;;  %v473_v63 = vmax.f32 %v441_v42, 0.0  ;;  %v661_v16 = vshrl.u32 %v1342_v2, 16  ;;  %v664_v17 = vshll.u32 %v1342_v2, 16 }
  0x31   : > { %v687_v27 = vshrl.u32 %v1345_v9, 16  ;;  %v690_v28 = vshll.u32 %v1345_v9, 16  ;;  %v659_v43 = vrot.slane %v655_v45, 4  ;;  %v683_v0 = vor.u32 %v681_v39, %v680_v52 }
  0x32   : > { %v472_v62 = vmax.f32 %v440_v41, 0.0  ;;  %v1788_v11 = vpack.c.bf16 %v473_v63, %v473_v63  ;;  %v663_v47 = vrot.slane %v661_v16, 7  ;;  %v676_v63 = vrot.slane %v672_v40, 4  ;;  %v1268_v16 = vld [vmem:[%s1569_s28 + $0x24] sm:$0xf] }
  0x33   : > { %v685_v1 = vrot.slane %v680_v52, 4  ;;  %v977_v2 = vsel %vm1794_vm5, %v658_v53, %v1258_v46  ;;  %v689_v9 = vrot.slane %v687_v27, 7  ;;  %v712_v27 = vshrl.u32 %v1790_v13, 16  ;;  %v1273_v53 = vld [vmem:[%s1569_s28 + $0x30] sm:$0xf] }
  0x34   : > { %v1346_v10 = vpack.c.bf16 %v472_v62, %v472_v62  ;;  %v666_v58 = vor.u32 %v664_v17, %v663_v47  ;;  %v668_v59 = vrot.slane %v663_v47, 4  ;;  %v675_v62 = vor.u32 %v673_v37, %v672_v40  ;;  %1259 = vst [vmem:[%s1569_s28 + $0xc] sm:$0xf] %v977_v2 }
  0x35   : > { %v684_v14 = vsel %vm1801_vm6, %v676_v63, %v683_v0  ;;  %v990_v15 = vsel %vm1807_vm7, %v685_v1, %v1266_v61  ;;  %v692_v26 = vor.u32 %v690_v28, %v689_v9  ;;  %v693_v37 = vrot.slane %v689_v9, 4 }
  0x36   : > { %v695_v41 = vshrl.u32 %v1346_v10, 16  ;;  %v698_v42 = vshll.u32 %v1346_v10, 16  ;;  %v667_v7 = vsel %vm1801_vm6, %v659_v43, %v666_v58  ;;  %v983_v8 = vsel %vm1807_vm7, %v668_v59, %v1261_v30  ;;  %1265 = vst [vmem:[%s1569_s28 + $0x1c] sm:$0xf] %v684_v14  ;;  %1267 = vst [vmem:[%s1569_s28 + $0x20] sm:$0x1] %v990_v15 }
  0x37   : > { %1260 = vst [vmem:[%s1569_s28 + $0x10] sm:$0xf] %v667_v7  ;;  %1262 = vst [vmem:[%s1569_s28 + $0x14] sm:$0x1] %v983_v8  ;;  %v986_v10 = vsel %vm1794_vm5, %v675_v62, %v1263_v44  ;;  %v704_v39 = vshrl.u32 %v1788_v11, 16  ;;  %v707_v45 = vshll.u32 %v1788_v11, 16  ;;  %v993_v40 = vsel %vm1794_vm5, %v692_v26, %v1268_v16 }
  0x38   : > { %v697_v17 = vrot.slane %v695_v41, 7  ;;  %1264 = vst [vmem:[%s1569_s28 + $0x18] sm:$0xf] %v986_v10  ;;  %v715_v30 = vshll.u32 %v1790_v13, 16  ;;  %v404_v52 = vmul.f32 %v1736_v29, %v1676_v49  ;;  %v405_v41 = vmul.f32 %v1736_v29, %v1679_v50  ;;  %1269 = vst [vmem:[%s1569_s28 + $0x24] sm:$0xf] %v993_v40 }
  0x39   : > { %v706_v28 = vrot.slane %v704_v39, 7  ;;  %v714_v43 = vrot.slane %v712_v27, 7  ;;  %v406_v13 = vmul.f32 %v1736_v29, %v1682_v51  ;;  %v1276_v59 = vld [vmem:[%s1569_s28 + $0x38] sm:$0x1]  ;;  %v407_v0 = vmul.f32 %v1736_v29, %v1686_v54 }
  0x3a   : > { %v700_v46 = vor.u32 %v698_v42, %v697_v17  ;;  %v702_v47 = vrot.slane %v697_v17, 4  ;;  %v443_v50 = vadd.f32 %v1750_v34, %v404_v52  ;;  %v444_v44 = vadd.f32 %v1750_v34, %v405_v41 }
  0x3b   : > { %v709_v58 = vor.u32 %v707_v45, %v706_v28  ;;  %v710_v49 = vrot.slane %v706_v28, 4  ;;  %v717_v61 = vor.u32 %v715_v30, %v714_v43  ;;  %v719_v62 = vrot.slane %v714_v43, 4 }
  0x3c   : > { %v701_v11 = vsel %vm1801_vm6, %v693_v37, %v700_v46  ;;  %v997_v42 = vsel %vm1807_vm7, %v702_v47, %v1271_v38  ;;  %v445_v63 = vadd.f32 %v1750_v34, %v406_v13  ;;  %v475_v1 = vmax.f32 %v443_v50, 0.0 }
  0x3d   : > { %1270 = vst [vmem:[%s1569_s28 + $0x28] sm:$0xf] %v701_v11  ;;  %1272 = vst [vmem:[%s1569_s28 + $0x2c] sm:$0x1] %v997_v42  ;;  %v1000_v51 = vsel %vm1794_vm5, %v709_v58, %v1273_v53  ;;  %v476_v2 = vmax.f32 %v444_v44, 0.0  ;;  %v408_v7 = vmul.f32 %v1736_v29, %v1689_v55  ;;  %v718_v8 = vsel %vm1801_vm6, %v710_v49, %v717_v61 }
  0x3e   : > { %1274 = vst [vmem:[%s1569_s28 + $0x30] sm:$0xf] %v1000_v51  ;;  %v1004_v9 = vsel %vm1807_vm7, %v719_v62, %v1276_v59  ;;  %v477_v10 = vmax.f32 %v445_v63, 0.0  ;;  %v446_v14 = vadd.f32 %v1750_v34, %v407_v0  ;;  %1275 = vst [vmem:[%s1569_s28 + $0x34] sm:$0xf] %v718_v8  ;;  %v1349_v54 = vpack.c.bf16 %v475_v1, %v475_v1 }
  0x3f   : > { %1277 = vst [vmem:[%s1569_s28 + $0x38] sm:$0x1] %v1004_v9  ;;  %v1350_v15 = vpack.c.bf16 %v476_v2, %v476_v2  ;;  %v447_v16 = vadd.f32 %v1750_v34, %v408_v7  ;;  %v409_v55 = vmul.f32 %v1736_v29, %v1692_v56  ;;  %v410_v37 = vmul.f32 %v1736_v29, %v1695_v57  ;;  %v1278_v56 = vld [vmem:[%s1569_s28 + $0x3c] sm:$0xf]  ;;  %v1281_v57 = vld [vmem:[%s1569_s28 + $0x44] sm:$0x1] }
  0x40   : > { %v1351_v17 = vpack.c.bf16 %v477_v10, %v477_v10  ;;  %v478_v26 = vmax.f32 %v446_v14, 0.0  ;;  %v411_v38 = vmul.f32 %v1736_v29, %v1700_v60  ;;  %v721_v39 = vshrl.u32 %v1349_v54, 16  ;;  %v1283_v44 = vld [vmem:[%s1569_s28 + $0x48] sm:$0xf]  ;;  %v1286_v7 = vld [vmem:[%s1569_s28 + $0x50] sm:$0x1] }
  0x41   : > { %v724_v45 = vshll.u32 %v1349_v54, 16  ;;  %v729_v46 = vshrl.u32 %v1350_v15, 16  ;;  %v732_v47 = vshll.u32 %v1350_v15, 16  ;;  %v479_v28 = vmax.f32 %v447_v16, 0.0  ;;  %v1288_v15 = vld [vmem:[%s1569_s28 + $0x54] sm:$0xf] }
  0x42   : > { %v738_v27 = vshrl.u32 %v1351_v17, 16  ;;  %v741_v30 = vshll.u32 %v1351_v17, 16  ;;  %v1352_v40 = vpack.c.bf16 %v478_v26, %v478_v26  ;;  %v723_v52 = vrot.slane %v721_v39, 7 }
  0x43   : > { %v731_v41 = vrot.slane %v729_v46, 7  ;;  %v448_v11 = vadd.f32 %v1750_v34, %v409_v55  ;;  %v449_v42 = vadd.f32 %v1750_v34, %v410_v37  ;;  %v1353_v13 = vpack.c.bf16 %v479_v28, %v479_v28 }
  0x44   : > { %v740_v53 = vrot.slane %v738_v27, 7  ;;  %v746_v60 = vshrl.u32 %v1352_v40, 16  ;;  %v749_v43 = vshll.u32 %v1352_v40, 16  ;;  %v726_v58 = vor.u32 %v724_v45, %v723_v52 }
  0x45   : > { %v727_v49 = vrot.slane %v723_v52, 4  ;;  %v734_v59 = vor.u32 %v732_v47, %v731_v41  ;;  %v736_v50 = vrot.slane %v731_v41, 4  ;;  %v755_v0 = vshrl.u32 %v1353_v13, 16 }
  0x46   : > { %v743_v61 = vor.u32 %v741_v30, %v740_v53  ;;  %v744_v62 = vrot.slane %v740_v53, 4  ;;  %v748_v63 = vrot.slane %v746_v60, 7  ;;  %v1007_v51 = vsel %vm1794_vm5, %v726_v58, %v1278_v56 }
  0x47   : > { %v735_v1 = vsel %vm1801_vm6, %v727_v49, %v734_v59  ;;  %v1011_v2 = vsel %vm1807_vm7, %v736_v50, %v1281_v57  ;;  %v758_v8 = vshll.u32 %v1353_v13, 16  ;;  %1279 = vst [vmem:[%s1569_s28 + $0x3c] sm:$0xf] %v1007_v51  ;;  %v757_v54 = vrot.slane %v755_v0, 7 }
  0x48   : > { %1280 = vst [vmem:[%s1569_s28 + $0x40] sm:$0xf] %v735_v1  ;;  %1282 = vst [vmem:[%s1569_s28 + $0x44] sm:$0x1] %v1011_v2  ;;  %v1014_v9 = vsel %vm1794_vm5, %v743_v61, %v1283_v44  ;;  %v751_v10 = vor.u32 %v749_v43, %v748_v63  ;;  %v753_v14 = vrot.slane %v748_v63, 4  ;;  %v480_v16 = vmax.f32 %v448_v11, 0.0 }
  0x49   : > { %1284 = vst [vmem:[%s1569_s28 + $0x48] sm:$0xf] %v1014_v9  ;;  %v481_v55 = vmax.f32 %v449_v42, 0.0  ;;  %v450_v17 = vadd.f32 %v1750_v34, %v411_v38  ;;  %v412_v26 = vmul.f32 %v1736_v29, %v1708_v4  ;;  %v760_v45 = vor.u32 %v758_v8, %v757_v54 }
  0x4a   : > { %v752_v37 = vsel %vm1801_vm6, %v744_v62, %v751_v10  ;;  %v1018_v39 = vsel %vm1807_vm7, %v753_v14, %v1286_v7  ;;  %v761_v46 = vrot.slane %v757_v54, 4  ;;  %v1354_v47 = vpack.c.bf16 %v480_v16, %v480_v16  ;;  %v1296_v14 = vld [vmem:[%s1569_s28 + $0x68] sm:$0x1] }
  0x4b   : > { %1285 = vst [vmem:[%s1569_s28 + $0x4c] sm:$0xf] %v752_v37  ;;  %1287 = vst [vmem:[%s1569_s28 + $0x50] sm:$0x1] %v1018_v39  ;;  %v1355_v27 = vpack.c.bf16 %v481_v55, %v481_v55  ;;  %v482_v30 = vmax.f32 %v450_v17, 0.0  ;;  %v451_v38 = vadd.f32 %v1750_v34, %v412_v26  ;;  %v1021_v40 = vsel %vm1794_vm5, %v760_v45, %v1288_v15 }
  0x4c   : > { %v413_v4 = vmul.f32 %v1736_v29, %v1711_v5  ;;  %v414_v28 = vmul.f32 %v1736_v29, %v1714_v6  ;;  %v415_v52 = vmul.f32 %v1736_v29, %v1726_v23  ;;  %1289 = vst [vmem:[%s1569_s28 + $0x54] sm:$0xf] %v1021_v40  ;;  %v763_v56 = vshrl.u32 %v1354_v47, 16  ;;  %v1291_v5 = vld [vmem:[%s1569_s28 + $0x5c] sm:$0x1] }
  0x4d   : > { %v766_v41 = vshll.u32 %v1354_v47, 16  ;;  %v772_v11 = vshrl.u32 %v1355_v27, 16  ;;  %v775_v42 = vshll.u32 %v1355_v27, 16  ;;  %v1356_v57 = vpack.c.bf16 %v482_v30, %v482_v30  ;;  %v1293_v23 = vld [vmem:[%s1569_s28 + $0x60] sm:$0xf] }
  0x4e   : > { %v483_v53 = vmax.f32 %v451_v38, 0.0  ;;  %v452_v60 = vadd.f32 %v1750_v34, %v413_v4  ;;  %v453_v43 = vadd.f32 %v1750_v34, %v414_v28  ;;  %v765_v13 = vrot.slane %v763_v56, 7  ;;  %v1298_v26 = vld [vmem:[%s1569_s28 + $0x6c] sm:$0xf] }
  0x4f   : > { %v774_v58 = vrot.slane %v772_v11, 7  ;;  %v454_v6 = vadd.f32 %v1750_v34, %v415_v52  ;;  %v416_v49 = vmul.f32 %v1736_v29, %v1739_v31  ;;  %v780_v59 = vshrl.u32 %v1356_v57, 16 }
  0x50   : > { %v783_v50 = vshll.u32 %v1356_v57, 16  ;;  %v1357_v44 = vpack.c.bf16 %v483_v53, %v483_v53  ;;  %v484_v61 = vmax.f32 %v452_v60, 0.0  ;;  %v768_v62 = vor.u32 %v766_v41, %v765_v13  ;;  %v1301_v41 = vld [vmem:[%s1569_s28 + $0x74] sm:$0x1] }
  0x51   : > { %v770_v63 = vrot.slane %v765_v13, 4  ;;  %v777_v0 = vor.u32 %v775_v42, %v774_v58  ;;  %v778_v51 = vrot.slane %v774_v58, 4  ;;  %v782_v1 = vrot.slane %v780_v59, 7 }
  0x52   : > { %v789_v2 = vshrl.u32 %v1357_v44, 16  ;;  %v792_v7 = vshll.u32 %v1357_v44, 16  ;;  %v1358_v8 = vpack.c.bf16 %v484_v61, %v484_v61  ;;  %v769_v31 = vsel %vm1801_vm6, %v761_v46, %v768_v62 }
  0x53   : > { %v1025_v9 = vsel %vm1807_vm7, %v770_v63, %v1291_v5  ;;  %v1028_v10 = vsel %vm1794_vm5, %v777_v0, %v1293_v23  ;;  %v485_v54 = vmax.f32 %v453_v43, 0.0  ;;  %1290 = vst [vmem:[%s1569_s28 + $0x58] sm:$0xf] %v769_v31  ;;  %v785_v15 = vor.u32 %v783_v50, %v782_v1  ;;  %v1303_v5 = vld [vmem:[%s1569_s28 + $0x78] sm:$0xf] }
  0x54   : > { %1292 = vst [vmem:[%s1569_s28 + $0x5c] sm:$0x1] %v1025_v9  ;;  %1294 = vst [vmem:[%s1569_s28 + $0x60] sm:$0xf] %v1028_v10  ;;  %v787_v16 = vrot.slane %v782_v1, 4  ;;  %v791_v55 = vrot.slane %v789_v2, 7  ;;  %v455_v46 = vadd.f32 %v1750_v34, %v416_v49  ;;  %v417_v42 = vmul.f32 %v1736_v29, %v1742_v32 }
  0x55   : > { %v797_v17 = vshrl.u32 %v1358_v8, 16  ;;  %v800_v37 = vshll.u32 %v1358_v8, 16  ;;  %v1359_v39 = vpack.c.bf16 %v485_v54, %v485_v54  ;;  %v486_v45 = vmax.f32 %v454_v6, 0.0 }
  0x56   : > { %v786_v47 = vsel %vm1801_vm6, %v778_v51, %v785_v15  ;;  %v1032_v27 = vsel %vm1807_vm7, %v787_v16, %v1296_v14  ;;  %v794_v30 = vor.u32 %v792_v7, %v791_v55  ;;  %v795_v38 = vrot.slane %v791_v55, 4  ;;  %v1306_v51 = vld [vmem:[%s1569_s28 + $0x80] sm:$0x1]  ;;  %v1308_v14 = vld [vmem:[%s1569_s28 + $0x84] sm:$0xf] }
  0x57   : > { %1295 = vst [vmem:[%s1569_s28 + $0x64] sm:$0xf] %v786_v47  ;;  %1297 = vst [vmem:[%s1569_s28 + $0x68] sm:$0x1] %v1032_v27  ;;  %v799_v40 = vrot.slane %v797_v17, 7  ;;  %v806_v4 = vshrl.u32 %v1359_v39, 16  ;;  %v1360_v52 = vpack.c.bf16 %v486_v45, %v486_v45  ;;  %v418_v57 = vmul.f32 %v1736_v29, %v1745_v33 }
  0x58   : > { %v809_v28 = vshll.u32 %v1359_v39, 16  ;;  %v1035_v56 = vsel %vm1794_vm5, %v794_v30, %v1298_v26  ;;  %v487_v11 = vmax.f32 %v455_v46, 0.0  ;;  %v456_v49 = vadd.f32 %v1750_v34, %v417_v42 }
  0x59   : > { %1299 = vst [vmem:[%s1569_s28 + $0x6c] sm:$0xf] %v1035_v56  ;;  %v802_v53 = vor.u32 %v800_v37, %v799_v40  ;;  %v804_v60 = vrot.slane %v799_v40, 4  ;;  %v808_v43 = vrot.slane %v806_v4, 7  ;;  %v814_v13 = vshrl.u32 %v1360_v52, 16 }
  0x5a   : > { %v817_v58 = vshll.u32 %v1360_v52, 16  ;;  %v1361_v6 = vpack.c.bf16 %v487_v11, %v487_v11  ;;  %v457_v23 = vadd.f32 %v1750_v34, %v418_v57  ;;  %v488_v63 = vmax.f32 %v456_v49, 0.0  ;;  %v1311_v52 = vld [vmem:[%s1569_s28 + $0x8c] sm:$0x1]  ;;  %v1313_v56 = vld [vmem:[%s1569_s28 + $0x90] sm:$0xf] }
  0x5b   : > { %v803_v32 = vsel %vm1801_vm6, %v795_v38, %v802_v53  ;;  %v1039_v33 = vsel %vm1807_vm7, %v804_v60, %v1301_v41  ;;  %v811_v59 = vor.u32 %v809_v28, %v808_v43  ;;  %v812_v50 = vrot.slane %v808_v43, 4 }
  0x5c   : > { %1300 = vst [vmem:[%s1569_s28 + $0x70] sm:$0xf] %v803_v32  ;;  %1302 = vst [vmem:[%s1569_s28 + $0x74] sm:$0x1] %v1039_v33  ;;  %v816_v44 = vrot.slane %v814_v13, 7  ;;  %v823_v61 = vshrl.u32 %v1361_v6, 16  ;;  %v419_v2 = vmul.f32 %v1736_v29, %v1753_v3  ;;  %v420_v7 = vmul.f32 %v1736_v29, %v1756_v18 }
  0x5d   : > { %v826_v62 = vshll.u32 %v1361_v6, 16  ;;  %v1042_v0 = vsel %vm1794_vm5, %v811_v59, %v1303_v5  ;;  %v489_v1 = vmax.f32 %v457_v23, 0.0  ;;  %v1362_v10 = vpack.c.bf16 %v488_v63, %v488_v63 }
  0x5e   : > { %1304 = vst [vmem:[%s1569_s28 + $0x78] sm:$0xf] %v1042_v0  ;;  %v819_v8 = vor.u32 %v817_v58, %v816_v44  ;;  %v821_v31 = vrot.slane %v816_v44, 4  ;;  %v825_v9 = vrot.slane %v823_v61, 7  ;;  %v458_v15 = vadd.f32 %v1750_v34, %v419_v2  ;;  %v1316_v44 = vld [vmem:[%s1569_s28 + $0x98] sm:$0x1] }
  0x5f   : > { %v1363_v54 = vpack.c.bf16 %v489_v1, %v489_v1  ;;  %v459_v16 = vadd.f32 %v1750_v34, %v420_v7  ;;  %v421_v3 = vmul.f32 %v1736_v29, %v1759_v35  ;;  %v831_v37 = vshrl.u32 %v1362_v10, 16  ;;  %v1318_v61 = vld [vmem:[%s1569_s28 + $0x9c] sm:$0xf] }
  0x60   : > { %v820_v55 = vsel %vm1801_vm6, %v812_v50, %v819_v8  ;;  %v1046_v18 = vsel %vm1807_vm7, %v821_v31, %v1306_v51  ;;  %v828_v17 = vor.u32 %v826_v62, %v825_v9  ;;  %v829_v26 = vrot.slane %v825_v9, 4 }
  0x61   : > { %1305 = vst [vmem:[%s1569_s28 + $0x7c] sm:$0xf] %v820_v55  ;;  %1307 = vst [vmem:[%s1569_s28 + $0x80] sm:$0x1] %v1046_v18  ;;  %v834_v39 = vshll.u32 %v1362_v10, 16  ;;  %v840_v45 = vshrl.u32 %v1363_v54, 16  ;;  %v460_v30 = vadd.f32 %v1750_v34, %v421_v3  ;;  %v422_v4 = vmul.f32 %v1736_v29, %v1717_v20 }
  0x62   : > { %v843_v46 = vshll.u32 %v1363_v54, 16  ;;  %v1049_v47 = vsel %vm1794_vm5, %v828_v17, %v1308_v14  ;;  %v490_v35 = vmax.f32 %v458_v15, 0.0  ;;  %v491_v27 = vmax.f32 %v459_v16, 0.0  ;;  %v1321_v3 = vld [vmem:[%s1569_s28 + $0xa4] sm:$0x1] }
  0x63   : > { %1309 = vst [vmem:[%s1569_s28 + $0x84] sm:$0xf] %v1049_v47  ;;  %v833_v38 = vrot.slane %v831_v37, 7  ;;  %v842_v40 = vrot.slane %v840_v45, 7  ;;  %v423_v28 = vmul.f32 %v1736_v29, %v1720_v21  ;;  %v492_v42 = vmax.f32 %v460_v30, 0.0 }
  0x64   : > { %v1364_v41 = vpack.c.bf16 %v490_v35, %v490_v35  ;;  %v1365_v11 = vpack.c.bf16 %v491_v27, %v491_v27  ;;  %v424_v57 = vmul.f32 %v1736_v29, %v1723_v22  ;;  %v461_v59 = vadd.f32 %v1750_v34, %v422_v4 }
  0x65   : > { %v836_v53 = vor.u32 %v834_v39, %v833_v38  ;;  %v838_v60 = vrot.slane %v833_v38, 4  ;;  %v845_v43 = vor.u32 %v843_v46, %v842_v40  ;;  %v846_v13 = vrot.slane %v842_v40, 4 }
  0x66   : > { %v848_v20 = vshrl.u32 %v1364_v41, 16  ;;  %v851_v5 = vshll.u32 %v1364_v41, 16  ;;  %v857_v21 = vshrl.u32 %v1365_v11, 16  ;;  %v860_v58 = vshll.u32 %v1365_v11, 16  ;;  %v1326_v11 = vld [vmem:[%s1569_s28 + $0xb0] sm:$0x1] }
  0x67   : > { %v837_v6 = vsel %vm1801_vm6, %v829_v26, %v836_v53  ;;  %v1053_v49 = vsel %vm1807_vm7, %v838_v60, %v1311_v52  ;;  %v1056_v23 = vsel %vm1794_vm5, %v845_v43, %v1313_v56  ;;  %v1366_v22 = vpack.c.bf16 %v492_v42, %v492_v42  ;;  %v1323_v56 = vld [vmem:[%s1569_s28 + $0xa8] sm:$0xf]  ;;  %v1328_v60 = vld [vmem:[%s1569_s28 + $0xb4] sm:$0xf] }
  0x68   : > { %1310 = vst [vmem:[%s1569_s28 + $0x88] sm:$0xf] %v837_v6  ;;  %1312 = vst [vmem:[%s1569_s28 + $0x8c] sm:$0x1] %v1053_v49  ;;  %v850_v32 = vrot.slane %v848_v20, 7  ;;  %v859_v33 = vrot.slane %v857_v21, 7  ;;  %v462_v50 = vadd.f32 %v1750_v34, %v423_v28  ;;  %v463_v0 = vadd.f32 %v1750_v34, %v424_v57 }
  0x69   : > { %1314 = vst [vmem:[%s1569_s28 + $0x90] sm:$0xf] %v1056_v23  ;;  %v865_v62 = vshrl.u32 %v1366_v22, 16  ;;  %v868_v63 = vshll.u32 %v1366_v22, 16  ;;  %v425_v51 = vmul.f32 %v1736_v29, %v1729_v24  ;;  %v493_v9 = vmax.f32 %v461_v59, 0.0 }
  0x6a   : > { %v853_v1 = vor.u32 %v851_v5, %v850_v32  ;;  %v855_v2 = vrot.slane %v850_v32, 4  ;;  %v862_v7 = vor.u32 %v860_v58, %v859_v33  ;;  %v863_v8 = vrot.slane %v859_v33, 4  ;;  %v1331_v59 = vld [vmem:[%s1569_s28 + $0xbc] sm:$0x1] }
  0x6b   : > { %v867_v31 = vrot.slane %v865_v62, 7  ;;  %v494_v10 = vmax.f32 %v462_v50, 0.0  ;;  %v495_v14 = vmax.f32 %v463_v0, 0.0  ;;  %v464_v24 = vadd.f32 %v1750_v34, %v425_v51 }
  0x6c   : > { %v854_v54 = vsel %vm1801_vm6, %v846_v13, %v853_v1  ;;  %v1060_v15 = vsel %vm1807_vm7, %v855_v2, %v1316_v44  ;;  %v1063_v16 = vsel %vm1794_vm5, %v862_v7, %v1318_v61  ;;  %v1367_v17 = vpack.c.bf16 %v493_v9, %v493_v9 }
  0x6d   : > { %1315 = vst [vmem:[%s1569_s28 + $0x94] sm:$0xf] %v854_v54  ;;  %1317 = vst [vmem:[%s1569_s28 + $0x98] sm:$0x1] %v1060_v15  ;;  %v870_v55 = vor.u32 %v868_v63, %v867_v31  ;;  %v872_v18 = vrot.slane %v867_v31, 4  ;;  %v1368_v26 = vpack.c.bf16 %v494_v10, %v494_v10  ;;  %v1369_v37 = vpack.c.bf16 %v495_v14, %v495_v14 }
  0x6e   : > { %1319 = vst [vmem:[%s1569_s28 + $0x9c] sm:$0xf] %v1063_v16  ;;  %v496_v39 = vmax.f32 %v464_v24, 0.0  ;;  %v426_v45 = vmul.f32 %v1736_v29, %v1732_v25  ;;  %v427_v46 = vmul.f32 %v1736_v29, %v1762_v36  ;;  %v874_v27 = vshrl.u32 %v1367_v17, 16  ;;  %v1333_v31 = vld [vmem:[%s1569_s28 + $0xc0] sm:$0xf] }
  0x6f   : > { %v871_v47 = vsel %vm1801_vm6, %v863_v8, %v870_v55  ;;  %v1067_v35 = vsel %vm1807_vm7, %v872_v18, %v1321_v3  ;;  %v877_v30 = vshll.u32 %v1367_v17, 16  ;;  %v882_v38 = vshrl.u32 %v1368_v26, 16  ;;  %v1336_v54 = vld [vmem:[%s1569_s28 + $0xc8] sm:$0x1] }
  0x70   : > { %1320 = vst [vmem:[%s1569_s28 + $0xa0] sm:$0xf] %v871_v47  ;;  %1322 = vst [vmem:[%s1569_s28 + $0xa4] sm:$0x1] %v1067_v35  ;;  %v885_v40 = vshll.u32 %v1368_v26, 16  ;;  %v891_v4 = vshrl.u32 %v1369_v37, 16  ;;  %v1370_v52 = vpack.c.bf16 %v496_v39, %v496_v39  ;;  %v465_v29 = vadd.f32 %v1750_v34, %v426_v45 }
  0x71   : > { %v894_v25 = vshll.u32 %v1369_v37, 16  ;;  %v876_v28 = vrot.slane %v874_v27, 7  ;;  %v466_v36 = vadd.f32 %v1750_v34, %v427_v46  ;;  %v884_v41 = vrot.slane %v882_v38, 7 }
  0x72   : > { %v893_v42 = vrot.slane %v891_v4, 7  ;;  %v899_v43 = vshrl.u32 %v1370_v52, 16  ;;  %v902_v13 = vshll.u32 %v1370_v52, 16  ;;  %v497_v49 = vmax.f32 %v465_v29, 0.0 }
  0x73   : > { %v879_v57 = vor.u32 %v877_v30, %v876_v28  ;;  %v880_v53 = vrot.slane %v876_v28, 4  ;;  %v887_v20 = vor.u32 %v885_v40, %v884_v41  ;;  %v889_v5 = vrot.slane %v884_v41, 4 }
  0x74   : > { %v896_v21 = vor.u32 %v894_v25, %v893_v42  ;;  %v897_v58 = vrot.slane %v893_v42, 4  ;;  %v901_v6 = vrot.slane %v899_v43, 7  ;;  %v498_v23 = vmax.f32 %v466_v36, 0.0 }
  0x75   : > { %v1070_v34 = vsel %vm1794_vm5, %v879_v57, %v1323_v56  ;;  %v888_v22 = vsel %vm1801_vm6, %v880_v53, %v887_v20  ;;  %v1074_v32 = vsel %vm1807_vm7, %v889_v5, %v1326_v11  ;;  %v1371_v61 = vpack.c.bf16 %v497_v49, %v497_v49 }
  0x76   : > { %1324 = vst [vmem:[%s1569_s28 + $0xa8] sm:$0xf] %v1070_v34  ;;  %v1077_v33 = vsel %vm1794_vm5, %v896_v21, %v1328_v60  ;;  %1325 = vst [vmem:[%s1569_s28 + $0xac] sm:$0xf] %v888_v22  ;;  %v904_v50 = vor.u32 %v902_v13, %v901_v6  ;;  %v906_v44 = vrot.slane %v901_v6, 4  ;;  %v1372_v62 = vpack.c.bf16 %v498_v23, %v498_v23 }
  0x77   : > { %1327 = vst [vmem:[%s1569_s28 + $0xb0] sm:$0x1] %v1074_v32  ;;  %1329 = vst [vmem:[%s1569_s28 + $0xb4] sm:$0xf] %v1077_v33  ;;  %v908_v51 = vshrl.u32 %v1371_v61, 16  ;;  %v911_v1 = vshll.u32 %v1371_v61, 16 }
  0x78   : > { %v905_v63 = vsel %vm1801_vm6, %v897_v58, %v904_v50  ;;  %v1081_v0 = vsel %vm1807_vm7, %v906_v44, %v1331_v59  ;;  %v916_v2 = vshrl.u32 %v1372_v62, 16  ;;  %v919_v7 = vshll.u32 %v1372_v62, 16 }
  0x79   : > { %1330 = vst [vmem:[%s1569_s28 + $0xb8] sm:$0xf] %v905_v63  ;;  %1332 = vst [vmem:[%s1569_s28 + $0xbc] sm:$0x1] %v1081_v0  ;;  %v910_v8 = vrot.slane %v908_v51, 7 }
  0x7a   : > { %v918_v9 = vrot.slane %v916_v2, 7 }
  0x7b   : > { %v913_v10 = vor.u32 %v911_v1, %v910_v8  ;;  %v914_v14 = vrot.slane %v910_v8, 4 }
  0x7c   : > { %v921_v15 = vor.u32 %v919_v7, %v918_v9  ;;  %v923_v16 = vrot.slane %v918_v9, 4 }
  0x7d   : > { %v1084_v3 = vsel %vm1794_vm5, %v913_v10, %v1333_v31 }
  0x7e   : > { %1334 = vst [vmem:[%s1569_s28 + $0xc0] sm:$0xf] %v1084_v3  ;;  %v922_v24 = vsel %vm1801_vm6, %v914_v14, %v921_v15  ;;  %v1088_v55 = vsel %vm1807_vm7, %v923_v16, %v1336_v54 }
  0x7f   : > { %1335 = vst [vmem:[%s1569_s28 + $0xc4] sm:$0xf] %v922_v24  ;;  %1337 = vst [vmem:[%s1569_s28 + $0xc8] sm:$0x1] %v1088_v55 }
  0x80 PF: > { %s14_s17 = sadd.s32 1, %s1502_s17   ;;  %s2082_s15 = smov %s1498_s16 }
  0x81   : > { %p11_p5 = scmp.ge.s32.totalorder %s14_s17, 4   ;;  %s2083_s16 = smov %s2085_s18 }
  0x83   :  { %13 = sbr.rel (!%p11_p5) target bundleno = 2 (0x2), region = 76 }

// kernel: residual_conv_forward.12
= control target key start
LH: loop header
LB: loop body
LE: loop exit
PB: predicated region body
PF: predicated region fallthrough
CT: control target
= control target key end

     0   :  { %s1991_s18 = smov 0   ;;  %s1993_s19 = smov 0   ;;  %s2590_s0 = inlined_call_operand.vmem [shape: bf16[2,16,16,128], index: 0, kind: input, shape index: {}]   ;;  %s2591_s1 = inlined_call_operand.vmem [shape: f32[2,128], index: 1, kind: input, shape index: {}]   ;;  %s2592_s2 = inlined_call_operand.vmem [shape: f32[1,128], index: 2, kind: input, shape index: {}]   ;;  %s2593_s3 = inlined_call_operand.vmem [shape: f32[1,128], index: 3, kind: input, shape index: {}]   ;;  %s2594_s4 = inlined_call_operand.vmem [shape: bf16[2,18,24,128], index: 4, kind: input, shape index: {}]   ;;  %s2595_s5 = inlined_call_operand.vmem [shape: bf16[2,18,24,128], index: 5, kind: output, shape index: {}]  }
   0x1   :  { %s1995_s20 = smov 0  }
   0x2 LB: > { %s27_s21 = sadd.s32 1, %s1954_s19  ;;  %p1586_p0 = scmp.ge.s32.totalorder %s1958_s20, 1  ;;  %s1958_s20 = sphi %s1995_s20, %s15_s20   ;;  %s1954_s19 = sphi %s1993_s19, %s2603_s19   ;;  %s1950_s18 = sphi %s1991_s18, %s2602_s18  }
   0x3   : > { %p29_p1 = scmp.ge.s32.totalorder %s27_s21, 2  ;;  %p246_p2 = scmp.lt.s32.totalorder %s1958_s20, 3 }
   0x5   : > { %s2605_s21 = smov (%p29_p1, %s27_s21), 0  ;;  %p247_p3 = pnand %p1586_p0, %p246_p2 }
   0x6   : > { %p298_p4 = scmp.lt.s32.totalorder (!%p247_p3), %s1950_s18, 1  ;;  %v397_v0 = vld [vmem:[%s2591_s1] sm:$0x3] (!%p247_p3)  ;;  %v414_v1 = vlaneseq (!%p247_p3)  ;;  %vm702_vm0 = vcmask (!%p247_p3), 1046528   ;;  %v1960_v11 = vmov (!%p247_p3), 0   ;;  %vm1321_vm1 = vcmask (!%p247_p3), 1043456  }
   0x7   : > { %250 = sbr.rel (%p247_p3) target bundleno = 173 (0xad), region = 40  ;;  %v2012_v2 = vmul.f32 (!%p247_p3), 0.001953125, %v397_v0  ;;  %vm1322_vm2 = vsmask.f32 (!%p247_p3), 7938  ;;  %vm997_vm3 = vsmask.f32 (!%p247_p3), 256 }
   0x8   : > { %v2014_v3 = vshrl.u32 (!%p247_p3), %v414_v1, 7  ;;  %vm998_vm4 = vsmask.f32 (!%p247_p3), 4368  ;;  %vm1328_vm5 = vcmask (!%p247_p3), 1040384   ;;  %vm2243_vm6 = vmand (!%p247_p3), %vm1321_vm1, %vm1322_vm2 }
   0x9   : > { %v2018_v4 = vmul.f32 (!%p247_p3), %v2012_v2, %v2012_v2  ;;  %vm2250_vm7 = vmor (!%p247_p3), %vm997_vm3, %vm998_vm4 }
   0xa   : > { %v416_v5 = vsub.s32 (!%p247_p3), 0, %v2014_v3  ;;  %v452_v9 = vsub.s32 (!%p247_p3), 1, %v2014_v3  ;;  %vm2256_vm8 = vmand (!%p247_p3), %vm1328_vm5, %vm997_vm3 }
   0xb   : > { %v401_v6 = vrot.slane (!%p247_p3), %v2018_v4, 7 }
   0xc   : > { %v2041_v8 = vrot.slane (!%p247_p3), %v2012_v2, %v416_v5 }
   0xd   : > { %v403_v13 = vsub.f32 (!%p247_p3), %v2012_v2, %v401_v6 }
   0xe   : > { %s2607_s18 = smov (!%p298_p4, %s1950_s18), 1 }
   0xf   : > { %s1907_s24 = smul.u32 216, %s2607_s18  ;;  %s1755_s25 = sshll.u32 %s2607_s18, 7  ;;  %v404_v24 = vadd.f32 1e-05, %v403_v13 }
  0x10   : > { %s2024_s28 = scalar_lea.vmem %s2590_s0, %s1755_s25 }
  0x11   : > { %s2030_s6 = scalar_lea.vmem %s2595_s5, %s1907_s24  ;;  %s2035_s9 = scalar_lea.vmem %s2594_s4, %s1907_s24  ;;  %v2038_v7 = vld [vmem:[%s2024_s28] sm:$0xff]   ;;  %v2045_v10 = vld [vmem:[%s2024_s28 + $0x8] sm:$0xff]   ;;  %v1885_v28 = vld [vmem:[%s2024_s28 + $0x10] sm:$0xff]   ;;  %1933 = vrsqrt.f32 %v404_v24 }
  0x12   : > { %850 = vst [vmem:[%s2030_s6 + $0xc] sm:$0xf] %v1960_v11  ;;  %847 = vst [vmem:[%s2030_s6] sm:$0xf] %v1960_v11  ;;  %v1790_v12 = vunpack.c.l.bf16 %v2038_v7  ;;  %v1593_v14 = vld [vmem:[%s2035_s9 + $0xc] sm:$0xff]   ;;  %v1791_v15 = vunpack.c.h.bf16 %v2038_v7  ;;  %v1595_v16 = vld [vmem:[%s2035_s9 + $0x14] sm:$0x1]  ;;  %v1794_v17 = vunpack.c.l.bf16 %v2045_v10  ;;  %v1795_v35 = vunpack.c.h.bf16 %v2045_v10 }
  0x13   : > { %848 = vst [vmem:[%s2030_s6 + $0x4] sm:$0xf] %v1960_v11  ;;  %849 = vst [vmem:[%s2030_s6 + $0x8] sm:$0xf] %v1960_v11  ;;  %v1899_v18 = vld [vmem:[%s2035_s9 + $0x18] sm:$0xff]   ;;  %v606_v19 = vunpack.c.l.bf16 %v1593_v14  ;;  %v607_v20 = vunpack.c.h.bf16 %v1593_v14  ;;  %v608_v21 = vunpack.c.l.bf16 %v1595_v16  ;;  %v1599_v33 = vld [vmem:[%s2035_s9 + $0x24] sm:$0xff]   ;;  %v1798_v41 = vunpack.c.l.bf16 %v1885_v28 }
  0x14   : > { %851 = vst [vmem:[%s2030_s6 + $0x10] sm:$0xf] %v1960_v11  ;;  %852 = vst [vmem:[%s2030_s6 + $0x14] sm:$0xf] %v1960_v11  ;;  %v1854_v22 = vunpack.c.l.bf16 %v1899_v18  ;;  %v1598_v23 = vld [vmem:[%s2035_s9 + $0x20] sm:$0x1]  ;;  %v2112_v25 = vsub.f32 %v1790_v12, %v2041_v8  ;;  %v2115_v26 = vsub.f32 %v1791_v15, %v2041_v8  ;;  %v2118_v27 = vsub.f32 %v1794_v17, %v2041_v8 }
  0x15   : > { %853 = vst [vmem:[%s2030_s6 + $0x18] sm:$0xf] %v1960_v11  ;;  %854 = vst [vmem:[%s2030_s6 + $0x1c] sm:$0xf] %v1960_v11  ;;  %v703_v29 = vrot.slane %v606_v19, 1  ;;  %v704_v30 = vrot.slane %v607_v20, 1  ;;  %v1855_v32 = vunpack.c.h.bf16 %v1899_v18  ;;  %v611_v36 = vunpack.c.l.bf16 %v1598_v23 }
  0x16   : > { %855 = vst [vmem:[%s2030_s6 + $0x20] sm:$0xf] %v1960_v11  ;;  %856 = vst [vmem:[%s2030_s6 + $0x24] sm:$0xf] %v1960_v11  ;;  %v706_v31 = vrot.slane %v608_v21, 1  ;;  %v708_v34 = vrot.slane %v1854_v22, 1  ;;  %v2132_v43 = vsub.f32 %v1795_v35, %v2041_v8  ;;  %v612_v45 = vunpack.c.l.bf16 %v1599_v33 }
  0x17   : > { %857 = vst [vmem:[%s2030_s6 + $0x28] sm:$0xf] %v1960_v11  ;;  %858 = vst [vmem:[%s2030_s6 + $0x2c] sm:$0xf] %v1960_v11  ;;  %v1601_v37 = vld [vmem:[%s2035_s9 + $0x2c] sm:$0x1]  ;;  %v2125_v38 = vsel %vm702_vm0, %v703_v29, %v704_v30  ;;  %v613_v46 = vunpack.c.h.bf16 %v1599_v33  ;;  %v2139_v49 = vsub.f32 %v1798_v41, %v2041_v8  ;;  %v1799_v50 = vunpack.c.h.bf16 %v1885_v28 }
  0x18   : > { %859 = vst [vmem:[%s2030_s6 + $0x30] sm:$0xf] %v1960_v11  ;;  %860 = vst [vmem:[%s2030_s6 + $0x34] sm:$0xf] %v1960_v11  ;;  %v2128_v39 = vsel %vm702_vm0, %v704_v30, %v706_v31  ;;  %v709_v40 = vrot.slane %v1855_v32, 1  ;;  %v1886_v42 = vld [vmem:[%s2024_s28 + $0x18] sm:$0xff]   ;;  %v614_v51 = vunpack.c.l.bf16 %v1601_v37 }
  0x19   : > { %861 = vst [vmem:[%s2030_s6 + $0x38] sm:$0xf] %v1960_v11  ;;  %862 = vst [vmem:[%s2030_s6 + $0x3c] sm:$0xf] %v1960_v11  ;;  %v711_v44 = vrot.slane %v611_v36, 1  ;;  %v1900_v47 = vld [vmem:[%s2035_s9 + $0x30] sm:$0xff]   ;;  %v1802_v56 = vunpack.c.l.bf16 %v1886_v42  ;;  %v423_v58 = vsub.f32 %v1799_v50, %v2041_v8  ;;  %v1803_v1 = vunpack.c.h.bf16 %v1886_v42 }
  0x1a   : > { %863 = vst [vmem:[%s2030_s6 + $0x40] sm:$0xf] %v1960_v11  ;;  %864 = vst [vmem:[%s2030_s6 + $0x44] sm:$0xf] %v1960_v11  ;;  %v2136_v48 = vsel %vm702_vm0, %v708_v34, %v709_v40  ;;  %v1604_v52 = vld [vmem:[%s2035_s9 + $0x38] sm:$0x1]  ;;  %v1858_v60 = vunpack.c.l.bf16 %v1900_v47  ;;  %v1859_v61 = vunpack.c.h.bf16 %v1900_v47 }
  0x1b   : > { %865 = vst [vmem:[%s2030_s6 + $0x48] sm:$0xf] %v1960_v11  ;;  %866 = vst [vmem:[%s2030_s6 + $0x4c] sm:$0xf] %v1960_v11  ;;  %v2143_v53 = vsel %vm702_vm0, %v709_v40, %v711_v44  ;;  %v713_v54 = vrot.slane %v612_v45, 1  ;;  %v714_v55 = vrot.slane %v613_v46, 1  ;;  %v424_v0 = vsub.f32 %v1802_v56, %v2041_v8  ;;  %v1934_v22 = vpop.eup %1933 }
  0x1c   : > { %867 = vst [vmem:[%s2030_s6 + $0x50] sm:$0xf] %v1960_v11  ;;  %868 = vst [vmem:[%s2030_s6 + $0x54] sm:$0xf] %v1960_v11  ;;  %v1887_v57 = vld [vmem:[%s2024_s28 + $0x20] sm:$0xff]   ;;  %v716_v59 = vrot.slane %v614_v51, 1  ;;  %v617_v2 = vunpack.c.l.bf16 %v1604_v52  ;;  %v425_v13 = vsub.f32 %v1803_v1, %v2041_v8 }
  0x1d   : > { %869 = vst [vmem:[%s2030_s6 + $0x58] sm:$0xf] %v1960_v11  ;;  %870 = vst [vmem:[%s2030_s6 + $0x5c] sm:$0xf] %v1960_v11  ;;  %v1605_v62 = vld [vmem:[%s2035_s9 + $0x3c] sm:$0xff]   ;;  %v2149_v63 = vsel %vm702_vm0, %v713_v54, %v714_v55  ;;  %v718_v6 = vrot.slane %v1858_v60, 1  ;;  %v1806_v10 = vunpack.c.l.bf16 %v1887_v57  ;;  %v1807_v20 = vunpack.c.h.bf16 %v1887_v57 }
  0x1e   : > { %871 = vst [vmem:[%s2030_s6 + $0x60] sm:$0xf] %v1960_v11  ;;  %872 = vst [vmem:[%s2030_s6 + $0x64] sm:$0xf] %v1960_v11  ;;  %v1607_v4 = vld [vmem:[%s2035_s9 + $0x44] sm:$0x1]  ;;  %v2154_v5 = vsel %vm702_vm0, %v714_v55, %v716_v59  ;;  %v618_v15 = vunpack.c.l.bf16 %v1605_v62  ;;  %v619_v16 = vunpack.c.h.bf16 %v1605_v62 }
  0x1f   : > { %873 = vst [vmem:[%s2030_s6 + $0x68] sm:$0xf] %v1960_v11  ;;  %874 = vst [vmem:[%s2030_s6 + $0x6c] sm:$0xf] %v1960_v11  ;;  %v719_v7 = vrot.slane %v1859_v61, 1  ;;  %v721_v14 = vrot.slane %v617_v2, 1  ;;  %v2166_v19 = vsub.f32 %v1806_v10, %v2041_v8  ;;  %v620_v21 = vunpack.c.l.bf16 %v1607_v4 }
  0x20   : > { %875 = vst [vmem:[%s2030_s6 + $0x70] sm:$0xf] %v1960_v11  ;;  %876 = vst [vmem:[%s2030_s6 + $0x74] sm:$0xf] %v1960_v11  ;;  %v1591_v12 = vld [vmem:[%s2592_s2] ss:$0 sm:$0xff]  ;;  %v2173_v32 = vsub.f32 %v1807_v20, %v2041_v8 }
  0x21   : > { %877 = vst [vmem:[%s2030_s6 + $0x78] sm:$0xf] %v1960_v11  ;;  %878 = vst [vmem:[%s2030_s6 + $0x7c] sm:$0xf] %v1960_v11  ;;  %v1901_v17 = vld [vmem:[%s2035_s9 + $0x48] sm:$0xff]   ;;  %v2163_v18 = vsel %vm702_vm0, %v718_v6, %v719_v7  ;;  %v722_v23 = vsel %vm702_vm0, %v719_v7, %v721_v14  ;;  %v723_v24 = vrot.slane %v618_v15, 1  ;;  %v413_v31 = vmul.f32 %v1934_v22, %v1591_v12 }
  0x22   : > { %879 = vst [vmem:[%s2030_s6 + $0x80] sm:$0xf] %v1960_v11  ;;  %880 = vst [vmem:[%s2030_s6 + $0x84] sm:$0xf] %v1960_v11  ;;  %v724_v28 = vrot.slane %v619_v16, 1  ;;  %v726_v33 = vrot.slane %v620_v21, 1  ;;  %v1862_v34 = vunpack.c.l.bf16 %v1901_v17  ;;  %v1863_v41 = vunpack.c.h.bf16 %v1901_v17 }
  0x23   : > { %881 = vst [vmem:[%s2030_s6 + $0x88] sm:$0xf] %v1960_v11  ;;  %882 = vst [vmem:[%s2030_s6 + $0x8c] sm:$0xf] %v1960_v11  ;;  %v2170_v30 = vld [vmem:[%s2035_s9 + $0x50] sm:$0x1]  ;;  %v2189_v44 = vrot.slane %v413_v31, %v452_v9 }
  0x24   : > { %883 = vst [vmem:[%s2030_s6 + $0x90] sm:$0xf] %v1960_v11  ;;  %884 = vst [vmem:[%s2030_s6 + $0x94] sm:$0xf] %v1960_v11  ;;  %v2176_v35 = vld [vmem:[%s2024_s28 + $0x30] sm:$0xff]   ;;  %v2182_v37 = vsel %vm702_vm0, %v723_v24, %v724_v28  ;;  %v2192_v45 = vsel %vm702_vm0, %v724_v28, %v726_v33  ;;  %v2194_v46 = vrot.slane %v1862_v34, 1  ;;  %v623_v47 = vunpack.c.l.bf16 %v2170_v30 }
  0x25   : > { %885 = vst [vmem:[%s2030_s6 + $0x98] sm:$0xf] %v1960_v11  ;;  %886 = vst [vmem:[%s2030_s6 + $0x9c] sm:$0xf] %v1960_v11  ;;  %v2179_v36 = vld [vmem:[%s2035_s9 + $0x54] sm:$0xff]   ;;  %v2202_v51 = vrot.slane %v1863_v41, 1  ;;  %v1814_v3 = vunpack.c.l.bf16 %v2176_v35  ;;  %v454_v54 = vmul.f32 %v2189_v44, %v2112_v25  ;;  %v455_v55 = vmul.f32 %v2189_v44, %v2115_v26 }
  0x26   : > { %887 = vst [vmem:[%s2030_s6 + $0xa0] sm:$0xf] %v1960_v11  ;;  %888 = vst [vmem:[%s2030_s6 + $0xa4] sm:$0xf] %v1960_v11  ;;  %v2200_v50 = vld [vmem:[%s2593_s3] ss:$0 sm:$0xff]  ;;  %v624_v9 = vunpack.c.l.bf16 %v2179_v36  ;;  %v456_v56 = vmul.f32 %v2189_v44, %v2118_v27  ;;  %v457_v57 = vmul.f32 %v2189_v44, %v2132_v43  ;;  %v458_v59 = vmul.f32 %v2189_v44, %v2139_v49 }
  0x27   : > { %889 = vst [vmem:[%s2030_s6 + $0xa8] sm:$0xf] %v1960_v11  ;;  %890 = vst [vmem:[%s2030_s6 + $0xac] sm:$0xf] %v1960_v11  ;;  %v459_v60 = vmul.f32 %v2189_v44, %v423_v58  ;;  %v460_v25 = vmul.f32 %v2189_v44, %v424_v0  ;;  %v461_v61 = vmul.f32 %v2189_v44, %v425_v13  ;;  %v625_v30 = vunpack.c.h.bf16 %v2179_v36 }
  0x28   : > { %891 = vst [vmem:[%s2030_s6 + $0xb0] sm:$0xf] %v1960_v11  ;;  %892 = vst [vmem:[%s2030_s6 + $0xb4] sm:$0xf] %v1960_v11  ;;  %v493_v62 = vadd.f32 %v2200_v50, %v454_v54  ;;  %v494_v26 = vadd.f32 %v2200_v50, %v455_v55  ;;  %v495_v27 = vadd.f32 %v2200_v50, %v456_v56 }
  0x29   : > { %893 = vst [vmem:[%s2030_s6 + $0xb8] sm:$0xf] %v1960_v11  ;;  %894 = vst [vmem:[%s2030_s6 + $0xbc] sm:$0xf] %v1960_v11  ;;  %v496_v43 = vadd.f32 %v2200_v50, %v457_v57  ;;  %v497_v1 = vadd.f32 %v2200_v50, %v458_v59  ;;  %v498_v2 = vadd.f32 %v2200_v50, %v459_v60  ;;  %v1673_v57 = vld [vmem:[%s2030_s6 + $0xc] sm:$0xf] }
  0x2a   : > { %895 = vst [vmem:[%s2030_s6 + $0xc0] sm:$0xf] %v1960_v11  ;;  %896 = vst [vmem:[%s2030_s6 + $0xc4] sm:$0xf] %v1960_v11  ;;  %v499_v49 = vadd.f32 %v2200_v50, %v460_v25  ;;  %v500_v58 = vadd.f32 %v2200_v50, %v461_v61  ;;  %v525_v0 = vmax.f32 %v493_v62, 0.0  ;;  %v526_v4 = vmax.f32 %v494_v26, 0.0 }
  0x2b   : > { %897 = vst [vmem:[%s2030_s6 + $0xc8] sm:$0xf] %v1960_v11  ;;  %898 = vst [vmem:[%s2030_s6 + $0xcc] sm:$0xf] %v1960_v11  ;;  %v527_v6 = vmax.f32 %v495_v27, 0.0  ;;  %v528_v7 = vmax.f32 %v496_v43, 0.0 }
  0x2c   : > { %899 = vst [vmem:[%s2030_s6 + $0xd0] sm:$0xf] %v1960_v11  ;;  %900 = vst [vmem:[%s2030_s6 + $0xd4] sm:$0xf] %v1960_v11  ;;  %v1888_v11 = vld [vmem:[%s2024_s28 + $0x28] sm:$0xff]   ;;  %v529_v10 = vmax.f32 %v497_v1, 0.0  ;;  %v815_v14 = vadd.f32 %v2125_v38, %v525_v0  ;;  %v816_v15 = vadd.f32 %v2128_v39, %v526_v4 }
  0x2d   : > { %v1810_v29 = vunpack.c.l.bf16 %v1888_v11  ;;  %v1811_v42 = vunpack.c.h.bf16 %v1888_v11  ;;  %v530_v11 = vmax.f32 %v498_v2, 0.0  ;;  %v531_v12 = vmax.f32 %v499_v49, 0.0  ;;  %v1676_v26 = vld [vmem:[%s2030_s6 + $0x14] sm:$0x1] }
  0x2e   : > { %v532_v13 = vmax.f32 %v500_v58, 0.0  ;;  %v817_v16 = vadd.f32 %v2136_v48, %v527_v6  ;;  %v818_v17 = vadd.f32 %v2143_v53, %v528_v7  ;;  %v819_v20 = vadd.f32 %v2149_v63, %v529_v10  ;;  %v1678_v6 = vld [vmem:[%s2030_s6 + $0x18] sm:$0xf]  ;;  %v1681_v7 = vld [vmem:[%s2030_s6 + $0x20] sm:$0x1] }
  0x2f   : > { %v2185_v40 = vsub.f32 %v1810_v29, %v2041_v8  ;;  %v2205_v52 = vsub.f32 %v1811_v42, %v2041_v8  ;;  %v820_v21 = vadd.f32 %v2154_v5, %v530_v11  ;;  %v821_v22 = vadd.f32 %v2163_v18, %v531_v12 }
  0x30   : > { %v822_v24 = vadd.f32 %v722_v23, %v532_v13  ;;  %v1756_v28 = vpack.c.bf16 %v815_v14, %v815_v14  ;;  %v1757_v29 = vpack.c.bf16 %v816_v15, %v816_v15  ;;  %v1758_v31 = vpack.c.bf16 %v817_v16, %v817_v16 }
  0x31   : > { %v1759_v33 = vpack.c.bf16 %v818_v17, %v818_v17  ;;  %v1760_v34 = vpack.c.bf16 %v819_v20, %v819_v20  ;;  %v1761_v38 = vpack.c.bf16 %v820_v21, %v820_v21  ;;  %v2237_v41 = vpack.c.bf16 %v821_v22, %v821_v22 }
  0x32   : > { %v2239_v39 = vpack.c.bf16 %v822_v24, %v822_v24  ;;  %v1001_v48 = vshrl.u32 %v1756_v28, 16  ;;  %v1004_v53 = vshll.u32 %v1756_v28, 16  ;;  %v1009_v63 = vshrl.u32 %v1757_v29, 16  ;;  %v1683_v24 = vld [vmem:[%s2030_s6 + $0x24] sm:$0xf] }
  0x33   : > { %v1012_v42 = vshll.u32 %v1757_v29, 16  ;;  %v1018_v18 = vshrl.u32 %v1758_v31, 16  ;;  %v1021_v23 = vshll.u32 %v1758_v31, 16  ;;  %v1026_v54 = vshrl.u32 %v1759_v33, 16 }
  0x34   : > { %v1029_v55 = vshll.u32 %v1759_v33, 16  ;;  %v1003_v56 = vrot.slane %v1001_v48, 7  ;;  %v1011_v60 = vrot.slane %v1009_v63, 7  ;;  %v1035_v25 = vshrl.u32 %v1760_v34, 16  ;;  %v1686_v33 = vld [vmem:[%s2030_s6 + $0x2c] sm:$0x1] }
  0x35   : > { %v1038_v61 = vshll.u32 %v1760_v34, 16  ;;  %v1020_v27 = vrot.slane %v1018_v18, 7  ;;  %v1028_v43 = vrot.slane %v1026_v54, 7  ;;  %v1043_v1 = vshrl.u32 %v1761_v38, 16 }
  0x36   : > { %v1046_v2 = vshll.u32 %v1761_v38, 16  ;;  %v1006_v49 = vor.u32 %v1004_v53, %v1003_v56  ;;  %v1007_v58 = vrot.slane %v1003_v56, 4  ;;  %v1014_v0 = vor.u32 %v1012_v42, %v1011_v60 }
  0x37   : > { %v1016_v4 = vrot.slane %v1011_v60, 4  ;;  %v1023_v10 = vor.u32 %v1021_v23, %v1020_v27  ;;  %v1024_v11 = vrot.slane %v1020_v27, 4  ;;  %v1031_v12 = vor.u32 %v1029_v55, %v1028_v43 }
  0x38   : > { %v1033_v13 = vrot.slane %v1028_v43, 4  ;;  %v1325_v14 = vsel %vm2243_vm6, %v1006_v49, %v1673_v57  ;;  %v1015_v15 = vsel %vm2250_vm7, %v1007_v58, %v1014_v0  ;;  %v1037_v17 = vrot.slane %v1035_v25, 7  ;;  %v1688_v57 = vld [vmem:[%s2030_s6 + $0x30] sm:$0xf] }
  0x39   : > { %v1331_v16 = vsel %vm2256_vm8, %v1016_v4, %v1676_v26  ;;  %1674 = vst [vmem:[%s2030_s6 + $0xc] sm:$0xf] %v1325_v14  ;;  %1675 = vst [vmem:[%s2030_s6 + $0x10] sm:$0xf] %v1015_v15  ;;  %v1334_v20 = vsel %vm2243_vm6, %v1023_v10, %v1678_v6  ;;  %v1032_v21 = vsel %vm2250_vm7, %v1024_v11, %v1031_v12  ;;  %v1045_v28 = vrot.slane %v1043_v1, 7 }
  0x3a   : > { %1677 = vst [vmem:[%s2030_s6 + $0x14] sm:$0x1] %v1331_v16  ;;  %v1338_v22 = vsel %vm2256_vm8, %v1033_v13, %v1681_v7  ;;  %1679 = vst [vmem:[%s2030_s6 + $0x18] sm:$0xf] %v1334_v20  ;;  %v1040_v29 = vor.u32 %v1038_v61, %v1037_v17  ;;  %v1041_v31 = vrot.slane %v1037_v17, 4  ;;  %v1052_v34 = vshrl.u32 %v2237_v41, 16 }
  0x3b   : > { %1680 = vst [vmem:[%s2030_s6 + $0x1c] sm:$0xf] %v1032_v21  ;;  %1682 = vst [vmem:[%s2030_s6 + $0x20] sm:$0x1] %v1338_v22  ;;  %v1055_v38 = vshll.u32 %v2237_v41, 16  ;;  %v1048_v48 = vor.u32 %v1046_v2, %v1045_v28  ;;  %v1050_v53 = vrot.slane %v1045_v28, 4  ;;  %v462_v54 = vmul.f32 %v2189_v44, %v2166_v19 }
  0x3c   : > { %v1060_v63 = vshrl.u32 %v2239_v39, 16  ;;  %v1063_v42 = vshll.u32 %v2239_v39, 16  ;;  %v1341_v18 = vsel %vm2243_vm6, %v1040_v29, %v1683_v24  ;;  %v1054_v23 = vrot.slane %v1052_v34, 7  ;;  %v1691_v61 = vld [vmem:[%s2030_s6 + $0x38] sm:$0x1] }
  0x3d   : > { %v463_v55 = vmul.f32 %v2189_v44, %v2173_v32  ;;  %1684 = vst [vmem:[%s2030_s6 + $0x24] sm:$0xf] %v1341_v18  ;;  %v1049_v41 = vsel %vm2250_vm7, %v1041_v31, %v1048_v48  ;;  %v1345_v56 = vsel %vm2256_vm8, %v1050_v53, %v1686_v33  ;;  %v464_v39 = vmul.f32 %v2189_v44, %v2185_v40  ;;  %v1613_v13 = vld [vmem:[%s2035_s9 + $0x5c] sm:$0x1] }
  0x3e   : > { %v1062_v60 = vrot.slane %v1060_v63, 7  ;;  %1685 = vst [vmem:[%s2030_s6 + $0x28] sm:$0xf] %v1049_v41  ;;  %1687 = vst [vmem:[%s2030_s6 + $0x2c] sm:$0x1] %v1345_v56  ;;  %v1057_v25 = vor.u32 %v1055_v38, %v1054_v23  ;;  %v1058_v19 = vrot.slane %v1054_v23, 4  ;;  %v501_v32 = vadd.f32 %v2200_v50, %v462_v54 }
  0x3f   : > { %v502_v26 = vadd.f32 %v2200_v50, %v463_v55  ;;  %v503_v1 = vadd.f32 %v2200_v50, %v464_v39  ;;  %v730_v40 = vsel %vm702_vm0, %v2194_v46, %v2202_v51  ;;  %v465_v0 = vmul.f32 %v2189_v44, %v2205_v52  ;;  %v1693_v38 = vld [vmem:[%s2030_s6 + $0x3c] sm:$0xf] }
  0x40   : > { %v1065_v27 = vor.u32 %v1063_v42, %v1062_v60  ;;  %v1067_v43 = vrot.slane %v1062_v60, 4  ;;  %v1348_v2 = vsel %vm2243_vm6, %v1057_v25, %v1688_v57  ;;  %v533_v49 = vmax.f32 %v501_v32, 0.0  ;;  %v1698_v60 = vld [vmem:[%s2030_s6 + $0x48] sm:$0xf]  ;;  %v1890_v32 = vld [vmem:[%s2024_s28 + $0x38] sm:$0xff]  }
  0x41   : > { %v534_v58 = vmax.f32 %v502_v26, 0.0  ;;  %1689 = vst [vmem:[%s2030_s6 + $0x30] sm:$0xf] %v1348_v2  ;;  %v535_v7 = vmax.f32 %v503_v1, 0.0  ;;  %v731_v46 = vrot.slane %v623_v47, 1  ;;  %v504_v12 = vadd.f32 %v2200_v50, %v465_v0  ;;  %v1902_v26 = vld [vmem:[%s2035_s9 + $0x60] sm:$0xff]  }
  0x42   : > { %v1066_v4 = vsel %vm2250_vm7, %v1058_v19, %v1065_v27  ;;  %v1352_v6 = vsel %vm2256_vm8, %v1067_v43, %v1691_v61  ;;  %v823_v10 = vadd.f32 %v2182_v37, %v533_v49  ;;  %v430_v52 = vsub.f32 %v1814_v3, %v2041_v8 }
  0x43   : > { %1690 = vst [vmem:[%s2030_s6 + $0x34] sm:$0xf] %v1066_v4  ;;  %1692 = vst [vmem:[%s2030_s6 + $0x38] sm:$0x1] %v1352_v6  ;;  %v824_v11 = vadd.f32 %v2192_v45, %v534_v58  ;;  %v825_v14 = vadd.f32 %v730_v40, %v535_v7  ;;  %v732_v15 = vsel %vm702_vm0, %v2202_v51, %v731_v46  ;;  %v733_v47 = vrot.slane %v624_v9, 1 }
  0x44   : > { %v1764_v16 = vpack.c.bf16 %v823_v10, %v823_v10  ;;  %v536_v45 = vmax.f32 %v504_v12, 0.0  ;;  %v466_v17 = vmul.f32 %v2189_v44, %v430_v52  ;;  %v734_v21 = vrot.slane %v625_v30, 1  ;;  %v1701_v4 = vld [vmem:[%s2030_s6 + $0x50] sm:$0x1] }
  0x45   : > { %v1765_v37 = vpack.c.bf16 %v824_v11, %v824_v11  ;;  %v1766_v20 = vpack.c.bf16 %v825_v14, %v825_v14  ;;  %v1815_v3 = vunpack.c.h.bf16 %v2176_v35  ;;  %v626_v22 = vunpack.c.l.bf16 %v1613_v13  ;;  %v1696_v35 = vld [vmem:[%s2030_s6 + $0x44] sm:$0x1]  ;;  %v1616_v14 = vld [vmem:[%s2035_s9 + $0x68] sm:$0x1] }
  0x46   : > { %v1069_v24 = vshrl.u32 %v1764_v16, 16  ;;  %v1072_v28 = vshll.u32 %v1764_v16, 16  ;;  %v826_v36 = vadd.f32 %v732_v15, %v536_v45  ;;  %v505_v9 = vadd.f32 %v2200_v50, %v466_v17  ;;  %v1617_v45 = vld [vmem:[%s2035_s9 + $0x6c] sm:$0xff]  }
  0x47   : > { %v1077_v51 = vshrl.u32 %v1765_v37, 16  ;;  %v1080_v29 = vshll.u32 %v1765_v37, 16  ;;  %v1086_v31 = vshrl.u32 %v1766_v20, 16  ;;  %v1089_v33 = vshll.u32 %v1766_v20, 16  ;;  %v1891_v37 = vld [vmem:[%s2024_s28 + $0x40] sm:$0xff]  }
  0x48   : > { %v1071_v34 = vrot.slane %v1069_v24, 7  ;;  %v735_v53 = vsel %vm702_vm0, %v733_v47, %v734_v21  ;;  %v431_v63 = vsub.f32 %v1815_v3, %v2041_v8  ;;  %v1767_v18 = vpack.c.bf16 %v826_v36, %v826_v36 }
  0x49   : > { %v1079_v48 = vrot.slane %v1077_v51, 7  ;;  %v1088_v42 = vrot.slane %v1086_v31, 7  ;;  %v537_v23 = vmax.f32 %v505_v9, 0.0  ;;  %v736_v54 = vrot.slane %v626_v22, 1 }
  0x4a   : > { %v1074_v55 = vor.u32 %v1072_v28, %v1071_v34  ;;  %v1075_v41 = vrot.slane %v1071_v34, 4  ;;  %v1094_v19 = vshrl.u32 %v1767_v18, 16  ;;  %v1097_v61 = vshll.u32 %v1767_v18, 16 }
  0x4b   : > { %v1082_v56 = vor.u32 %v1080_v29, %v1079_v48  ;;  %v1084_v57 = vrot.slane %v1079_v48, 4  ;;  %v1091_v39 = vor.u32 %v1089_v33, %v1088_v42  ;;  %v1092_v25 = vrot.slane %v1088_v42, 4  ;;  %v1703_v29 = vld [vmem:[%s2030_s6 + $0x54] sm:$0xf] }
  0x4c   : > { %v1355_v27 = vsel %vm2243_vm6, %v1074_v55, %v1693_v38  ;;  %v827_v40 = vadd.f32 %v735_v53, %v537_v23  ;;  %v1096_v49 = vrot.slane %v1094_v19, 7  ;;  %v467_v58 = vmul.f32 %v2189_v44, %v431_v63 }
  0x4d   : > { %v1083_v43 = vsel %vm2250_vm7, %v1075_v41, %v1082_v56  ;;  %v1359_v1 = vsel %vm2256_vm8, %v1084_v57, %v1696_v35  ;;  %1694 = vst [vmem:[%s2030_s6 + $0x3c] sm:$0xf] %v1355_v27  ;;  %v1362_v2 = vsel %vm2243_vm6, %v1091_v39, %v1698_v60  ;;  %v737_v0 = vsel %vm702_vm0, %v734_v21, %v736_v54  ;;  %v1619_v56 = vld [vmem:[%s2035_s9 + $0x74] sm:$0x1]  ;;  %v2383_v57 = vld [vmem:[%s2024_s28 + $0x48] sm:$0xff]  }
  0x4e   : > { %1695 = vst [vmem:[%s2030_s6 + $0x40] sm:$0xf] %v1083_v43  ;;  %1697 = vst [vmem:[%s2030_s6 + $0x44] sm:$0x1] %v1359_v1  ;;  %v1768_v6 = vpack.c.bf16 %v827_v40, %v827_v40  ;;  %v1818_v7 = vunpack.c.l.bf16 %v1890_v32  ;;  %v1866_v46 = vunpack.c.l.bf16 %v1902_v26  ;;  %v1867_v10 = vunpack.c.h.bf16 %v1902_v26 }
  0x4f   : > { %1699 = vst [vmem:[%s2030_s6 + $0x48] sm:$0xf] %v1362_v2  ;;  %v1099_v11 = vor.u32 %v1097_v61, %v1096_v49  ;;  %v1101_v12 = vrot.slane %v1096_v49, 4  ;;  %v506_v52 = vadd.f32 %v2200_v50, %v467_v58  ;;  %v1819_v13 = vunpack.c.h.bf16 %v1890_v32  ;;  %v1706_v49 = vld [vmem:[%s2030_s6 + $0x5c] sm:$0x1] }
  0x50   : > { %v1103_v15 = vshrl.u32 %v1768_v6, 16  ;;  %v1106_v30 = vshll.u32 %v1768_v6, 16  ;;  %v432_v47 = vsub.f32 %v1818_v7, %v2041_v8  ;;  %v738_v16 = vrot.slane %v1866_v46, 1 }
  0x51   : > { %v1100_v17 = vsel %vm2250_vm7, %v1092_v25, %v1099_v11  ;;  %v1366_v20 = vsel %vm2256_vm8, %v1101_v12, %v1701_v4  ;;  %v538_v21 = vmax.f32 %v506_v52, 0.0  ;;  %v739_v3 = vrot.slane %v1867_v10, 1 }
  0x52   : > { %1700 = vst [vmem:[%s2030_s6 + $0x4c] sm:$0xf] %v1100_v17  ;;  %1702 = vst [vmem:[%s2030_s6 + $0x50] sm:$0x1] %v1366_v20  ;;  %v1105_v22 = vrot.slane %v1103_v15, 7  ;;  %v468_v24 = vmul.f32 %v2189_v44, %v432_v47  ;;  %v433_v28 = vsub.f32 %v1819_v13, %v2041_v8  ;;  %v629_v51 = vunpack.c.l.bf16 %v1616_v14  ;;  %v1903_v15 = vld [vmem:[%s2035_s9 + $0x78] sm:$0xff]  }
  0x53   : > { %v828_v31 = vadd.f32 %v737_v0, %v538_v21  ;;  %v740_v33 = vsel %vm702_vm0, %v738_v16, %v739_v3  ;;  %v1822_v36 = vunpack.c.l.bf16 %v1891_v37  ;;  %v630_v9 = vunpack.c.l.bf16 %v1617_v45 }
  0x54   : > { %v1108_v34 = vor.u32 %v1106_v30, %v1105_v22  ;;  %v1109_v38 = vrot.slane %v1105_v22, 4  ;;  %v507_v48 = vadd.f32 %v2200_v50, %v468_v24  ;;  %v469_v53 = vmul.f32 %v2189_v44, %v433_v28 }
  0x55   : > { %v1769_v63 = vpack.c.bf16 %v828_v31, %v828_v31  ;;  %v741_v35 = vrot.slane %v629_v51, 1  ;;  %v434_v42 = vsub.f32 %v1822_v36, %v2041_v8  ;;  %v631_v18 = vunpack.c.h.bf16 %v1617_v45  ;;  %v1711_v36 = vld [vmem:[%s2030_s6 + $0x68] sm:$0x1] }
  0x56   : > { %v1369_v23 = vsel %vm2243_vm6, %v1108_v34, %v1703_v29  ;;  %v539_v54 = vmax.f32 %v507_v48, 0.0  ;;  %v508_v55 = vadd.f32 %v2200_v50, %v469_v53  ;;  %v743_v41 = vrot.slane %v630_v9, 1 }
  0x57   : > { %1704 = vst [vmem:[%s2030_s6 + $0x54] sm:$0xf] %v1369_v23  ;;  %v1111_v60 = vshrl.u32 %v1769_v63, 16  ;;  %v1114_v39 = vshll.u32 %v1769_v63, 16  ;;  %v742_v25 = vsel %vm702_vm0, %v739_v3, %v741_v35  ;;  %v470_v19 = vmul.f32 %v2189_v44, %v434_v42  ;;  %v1708_v3 = vld [vmem:[%s2030_s6 + $0x60] sm:$0xf] }
  0x58   : > { %v829_v61 = vadd.f32 %v740_v33, %v539_v54  ;;  %v540_v32 = vmax.f32 %v508_v55, 0.0  ;;  %v744_v26 = vrot.slane %v631_v18, 1  ;;  %v1823_v27 = vunpack.c.h.bf16 %v1891_v37  ;;  %v1622_v63 = vld [vmem:[%s2035_s9 + $0x80] sm:$0x1] }
  0x59   : > { %v1113_v43 = vrot.slane %v1111_v60, 7  ;;  %v509_v1 = vadd.f32 %v2200_v50, %v470_v19  ;;  %v632_v40 = vunpack.c.l.bf16 %v1619_v56  ;;  %v1826_v2 = vunpack.c.l.bf16 %v2383_v57 }
  0x5a   : > { %v1770_v58 = vpack.c.bf16 %v829_v61, %v829_v61  ;;  %v830_v0 = vadd.f32 %v742_v25, %v540_v32  ;;  %v745_v4 = vsel %vm702_vm0, %v743_v41, %v744_v26  ;;  %v435_v6 = vsub.f32 %v1823_v27, %v2041_v8  ;;  %v1713_v25 = vld [vmem:[%s2030_s6 + $0x6c] sm:$0xf]  ;;  %v1893_v32 = vld [vmem:[%s2024_s28 + $0x50] sm:$0xff]  }
  0x5b   : > { %v1116_v7 = vor.u32 %v1114_v39, %v1113_v43  ;;  %v1118_v46 = vrot.slane %v1113_v43, 4  ;;  %v541_v10 = vmax.f32 %v509_v1, 0.0  ;;  %v746_v11 = vrot.slane %v632_v40, 1 }
  0x5c   : > { %v1120_v12 = vshrl.u32 %v1770_v58, 16  ;;  %v1123_v52 = vshll.u32 %v1770_v58, 16  ;;  %v1771_v13 = vpack.c.bf16 %v830_v0, %v830_v0  ;;  %v471_v14 = vmul.f32 %v2189_v44, %v435_v6 }
  0x5d   : > { %v1117_v30 = vsel %vm2250_vm7, %v1109_v38, %v1116_v7  ;;  %v1373_v47 = vsel %vm2256_vm8, %v1118_v46, %v1706_v49  ;;  %v831_v16 = vadd.f32 %v745_v4, %v541_v10  ;;  %v747_v37 = vsel %vm702_vm0, %v744_v26, %v746_v11  ;;  %v1623_v26 = vld [vmem:[%s2035_s9 + $0x84] sm:$0xff]  }
  0x5e   : > { %1705 = vst [vmem:[%s2030_s6 + $0x58] sm:$0xf] %v1117_v30  ;;  %1707 = vst [vmem:[%s2030_s6 + $0x5c] sm:$0x1] %v1373_v47  ;;  %v1122_v45 = vrot.slane %v1120_v12, 7  ;;  %v1128_v17 = vshrl.u32 %v1771_v13, 16  ;;  %v510_v21 = vadd.f32 %v2200_v50, %v471_v14  ;;  %v436_v24 = vsub.f32 %v1826_v2, %v2041_v8 }
  0x5f   : > { %v1131_v20 = vshll.u32 %v1771_v13, 16  ;;  %v1772_v22 = vpack.c.bf16 %v831_v16, %v831_v16  ;;  %v1870_v28 = vunpack.c.l.bf16 %v1903_v15  ;;  %v1871_v51 = vunpack.c.h.bf16 %v1903_v15 }
  0x60   : > { %v1125_v29 = vor.u32 %v1123_v52, %v1122_v45  ;;  %v1126_v31 = vrot.slane %v1122_v45, 4  ;;  %v1130_v33 = vrot.slane %v1128_v17, 7  ;;  %v542_v9 = vmax.f32 %v510_v21, 0.0  ;;  %v1716_v52 = vld [vmem:[%s2030_s6 + $0x74] sm:$0x1] }
  0x61   : > { %v1137_v34 = vshrl.u32 %v1772_v22, 16  ;;  %v1140_v38 = vshll.u32 %v1772_v22, 16  ;;  %v472_v48 = vmul.f32 %v2189_v44, %v436_v24  ;;  %v748_v53 = vrot.slane %v1870_v28, 1  ;;  %v1625_v17 = vld [vmem:[%s2035_s9 + $0x8c] sm:$0x1]  ;;  %v1894_v24 = vld [vmem:[%s2024_s28 + $0x58] sm:$0xff]  }
  0x62   : > { %v1376_v35 = vsel %vm2243_vm6, %v1125_v29, %v1708_v3  ;;  %v1133_v42 = vor.u32 %v1131_v20, %v1130_v33  ;;  %v1135_v18 = vrot.slane %v1130_v33, 4  ;;  %v832_v23 = vadd.f32 %v747_v37, %v542_v9  ;;  %v1904_v28 = vld [vmem:[%s2035_s9 + $0x90] sm:$0xff]  }
  0x63   : > { %1709 = vst [vmem:[%s2030_s6 + $0x60] sm:$0xf] %v1376_v35  ;;  %v1139_v54 = vrot.slane %v1137_v34, 7  ;;  %v511_v55 = vadd.f32 %v2200_v50, %v472_v48  ;;  %v749_v41 = vrot.slane %v1871_v51, 1  ;;  %v1827_v56 = vunpack.c.h.bf16 %v2383_v57  ;;  %v1718_v48 = vld [vmem:[%s2030_s6 + $0x78] sm:$0xf] }
  0x64   : > { %v1134_v60 = vsel %vm2250_vm7, %v1126_v31, %v1133_v42  ;;  %v1380_v39 = vsel %vm2256_vm8, %v1135_v18, %v1711_v36  ;;  %v1773_v19 = vpack.c.bf16 %v832_v23, %v832_v23  ;;  %v635_v61 = vunpack.c.l.bf16 %v1622_v63 }
  0x65   : > { %1710 = vst [vmem:[%s2030_s6 + $0x64] sm:$0xf] %v1134_v60  ;;  %1712 = vst [vmem:[%s2030_s6 + $0x68] sm:$0x1] %v1380_v39  ;;  %v1142_v27 = vor.u32 %v1140_v38, %v1139_v54  ;;  %v1143_v43 = vrot.slane %v1139_v54, 4  ;;  %v543_v1 = vmax.f32 %v511_v55, 0.0  ;;  %v750_v57 = vsel %vm702_vm0, %v748_v53, %v749_v41 }
  0x66   : > { %v1145_v40 = vshrl.u32 %v1773_v19, 16  ;;  %v1148_v2 = vshll.u32 %v1773_v19, 16  ;;  %v437_v49 = vsub.f32 %v1827_v56, %v2041_v8  ;;  %v751_v58 = vrot.slane %v635_v61, 1 }
  0x67   : > { %v1383_v0 = vsel %vm2243_vm6, %v1142_v27, %v1713_v25  ;;  %v833_v4 = vadd.f32 %v750_v57, %v543_v1  ;;  %v1830_v6 = vunpack.c.l.bf16 %v1893_v32  ;;  %v636_v7 = vunpack.c.l.bf16 %v1623_v26  ;;  %v2453_v27 = vld [vmem:[%s2024_s28 + $0x60] sm:$0xff]  }
  0x68   : > { %1714 = vst [vmem:[%s2030_s6 + $0x6c] sm:$0xf] %v1383_v0  ;;  %v1147_v46 = vrot.slane %v1145_v40, 7  ;;  %v473_v10 = vmul.f32 %v2189_v44, %v437_v49  ;;  %v752_v11 = vsel %vm702_vm0, %v749_v41, %v751_v58  ;;  %v637_v12 = vunpack.c.h.bf16 %v1623_v26  ;;  %v1628_v26 = vld [vmem:[%s2035_s9 + $0x98] sm:$0x1] }
  0x69   : > { %v1774_v13 = vpack.c.bf16 %v833_v4, %v833_v4  ;;  %v438_v14 = vsub.f32 %v1830_v6, %v2041_v8  ;;  %v753_v15 = vrot.slane %v636_v7, 1  ;;  %v1831_v30 = vunpack.c.h.bf16 %v1893_v32 }
  0x6a   : > { %v1150_v47 = vor.u32 %v1148_v2, %v1147_v46  ;;  %v1152_v16 = vrot.slane %v1147_v46, 4  ;;  %v512_v37 = vadd.f32 %v2200_v50, %v473_v10  ;;  %v754_v45 = vrot.slane %v637_v12, 1  ;;  %v1721_v10 = vld [vmem:[%s2030_s6 + $0x80] sm:$0x1] }
  0x6b   : > { %v1154_v20 = vshrl.u32 %v1774_v13, 16  ;;  %v1157_v21 = vshll.u32 %v1774_v13, 16  ;;  %v474_v3 = vmul.f32 %v2189_v44, %v438_v14  ;;  %v439_v22 = vsub.f32 %v1831_v30, %v2041_v8 }
  0x6c   : > { %v1151_v51 = vsel %vm2250_vm7, %v1143_v43, %v1150_v47  ;;  %v1387_v29 = vsel %vm2256_vm8, %v1152_v16, %v1716_v52  ;;  %v544_v31 = vmax.f32 %v512_v37, 0.0  ;;  %v755_v33 = vsel %vm702_vm0, %v753_v15, %v754_v45 }
  0x6d   : > { %1715 = vst [vmem:[%s2030_s6 + $0x70] sm:$0xf] %v1151_v51  ;;  %1717 = vst [vmem:[%s2030_s6 + $0x74] sm:$0x1] %v1387_v29  ;;  %v1156_v36 = vrot.slane %v1154_v20, 7  ;;  %v513_v9 = vadd.f32 %v2200_v50, %v474_v3  ;;  %v475_v34 = vmul.f32 %v2189_v44, %v439_v22  ;;  %v638_v38 = vunpack.c.l.bf16 %v1625_v17  ;;  %v1629_v20 = vld [vmem:[%s2035_s9 + $0x9c] sm:$0xff]  }
  0x6e   : > { %v834_v53 = vadd.f32 %v752_v11, %v544_v31  ;;  %v1834_v63 = vunpack.c.l.bf16 %v1894_v24  ;;  %v1874_v35 = vunpack.c.l.bf16 %v1904_v28  ;;  %v1875_v42 = vunpack.c.h.bf16 %v1904_v28  ;;  %v1723_v22 = vld [vmem:[%s2030_s6 + $0x84] sm:$0xf] }
  0x6f   : > { %v1159_v18 = vor.u32 %v1157_v21, %v1156_v36  ;;  %v1160_v23 = vrot.slane %v1156_v36, 4  ;;  %v545_v54 = vmax.f32 %v513_v9, 0.0  ;;  %v514_v55 = vadd.f32 %v2200_v50, %v475_v34  ;;  %v1726_v36 = vld [vmem:[%s2030_s6 + $0x8c] sm:$0x1] }
  0x70   : > { %v1775_v41 = vpack.c.bf16 %v834_v53, %v834_v53  ;;  %v756_v56 = vrot.slane %v638_v38, 1  ;;  %v440_v60 = vsub.f32 %v1834_v63, %v2041_v8  ;;  %v758_v39 = vrot.slane %v1874_v35, 1 }
  0x71   : > { %v1390_v25 = vsel %vm2243_vm6, %v1159_v18, %v1718_v48  ;;  %v835_v19 = vadd.f32 %v755_v33, %v545_v54  ;;  %v546_v61 = vmax.f32 %v514_v55, 0.0  ;;  %v759_v32 = vrot.slane %v1875_v42, 1  ;;  %v1631_v18 = vld [vmem:[%s2035_s9 + $0xa4] sm:$0x1] }
  0x72   : > { %1719 = vst [vmem:[%s2030_s6 + $0x78] sm:$0xf] %v1390_v25  ;;  %v1162_v43 = vshrl.u32 %v1775_v41, 16  ;;  %v1165_v1 = vshll.u32 %v1775_v41, 16  ;;  %v757_v57 = vsel %vm702_vm0, %v754_v45, %v756_v56  ;;  %v476_v40 = vmul.f32 %v2189_v44, %v440_v60  ;;  %v1896_v56 = vld [vmem:[%s2024_s28 + $0x68] sm:$0xff]  }
  0x73   : > { %v1776_v2 = vpack.c.bf16 %v835_v19, %v835_v19  ;;  %v836_v49 = vadd.f32 %v757_v57, %v546_v61  ;;  %v760_v58 = vsel %vm702_vm0, %v758_v39, %v759_v32  ;;  %v1835_v0 = vunpack.c.h.bf16 %v1894_v24  ;;  %v1905_v60 = vld [vmem:[%s2035_s9 + $0xa8] sm:$0xff]   ;;  %v1728_v57 = vld [vmem:[%s2030_s6 + $0x90] sm:$0xf] }
  0x74   : > { %v1164_v4 = vrot.slane %v1162_v43, 7  ;;  %v515_v6 = vadd.f32 %v2200_v50, %v476_v40  ;;  %v641_v7 = vunpack.c.l.bf16 %v1628_v26  ;;  %v1838_v46 = vunpack.c.l.bf16 %v2453_v27 }
  0x75   : > { %v1171_v11 = vshrl.u32 %v1776_v2, 16  ;;  %v1174_v12 = vshll.u32 %v1776_v2, 16  ;;  %v1777_v52 = vpack.c.bf16 %v836_v49, %v836_v49  ;;  %v441_v13 = vsub.f32 %v1835_v0, %v2041_v8 }
  0x76   : > { %v1167_v14 = vor.u32 %v1165_v1, %v1164_v4  ;;  %v1169_v15 = vrot.slane %v1164_v4, 4  ;;  %v547_v30 = vmax.f32 %v515_v6, 0.0  ;;  %v761_v47 = vrot.slane %v641_v7, 1 }
  0x77   : > { %v1173_v16 = vrot.slane %v1171_v11, 7  ;;  %v1179_v37 = vshrl.u32 %v1777_v52, 16  ;;  %v1182_v45 = vshll.u32 %v1777_v52, 16  ;;  %v477_v17 = vmul.f32 %v2189_v44, %v441_v13 }
  0x78   : > { %v1168_v21 = vsel %vm2250_vm7, %v1160_v23, %v1167_v14  ;;  %v1394_v3 = vsel %vm2256_vm8, %v1169_v15, %v1721_v10  ;;  %v837_v24 = vadd.f32 %v760_v58, %v547_v30  ;;  %v762_v28 = vsel %vm702_vm0, %v759_v32, %v761_v47  ;;  %v1634_v15 = vld [vmem:[%s2035_s9 + $0xb0] sm:$0x1] }
  0x79   : > { %1720 = vst [vmem:[%s2030_s6 + $0x7c] sm:$0xf] %v1168_v21  ;;  %1722 = vst [vmem:[%s2030_s6 + $0x80] sm:$0x1] %v1394_v3  ;;  %v1176_v51 = vor.u32 %v1174_v12, %v1173_v16  ;;  %v1177_v29 = vrot.slane %v1173_v16, 4  ;;  %v1181_v31 = vrot.slane %v1179_v37, 7  ;;  %v516_v33 = vadd.f32 %v2200_v50, %v477_v17 }
  0x7a   : > { %v1778_v9 = vpack.c.bf16 %v837_v24, %v837_v24  ;;  %v442_v34 = vsub.f32 %v1838_v46, %v2041_v8  ;;  %v642_v38 = vunpack.c.l.bf16 %v1629_v20  ;;  %v643_v48 = vunpack.c.h.bf16 %v1629_v20 }
  0x7b   : > { %v1397_v53 = vsel %vm2243_vm6, %v1176_v51, %v1723_v22  ;;  %v1184_v63 = vor.u32 %v1182_v45, %v1181_v31  ;;  %v1186_v35 = vrot.slane %v1181_v31, 4  ;;  %v548_v42 = vmax.f32 %v516_v33, 0.0  ;;  %v1731_v45 = vld [vmem:[%s2030_s6 + $0x98] sm:$0x1] }
  0x7c   : > { %1724 = vst [vmem:[%s2030_s6 + $0x84] sm:$0xf] %v1397_v53  ;;  %v1188_v23 = vshrl.u32 %v1778_v9, 16  ;;  %v1191_v54 = vshll.u32 %v1778_v9, 16  ;;  %v478_v55 = vmul.f32 %v2189_v44, %v442_v34  ;;  %v763_v41 = vrot.slane %v642_v38, 1  ;;  %v1635_v34 = vld [vmem:[%s2035_s9 + $0xb4] sm:$0xff]  }
  0x7d   : > { %v1185_v39 = vsel %vm2250_vm7, %v1177_v29, %v1184_v63  ;;  %v1401_v25 = vsel %vm2256_vm8, %v1186_v35, %v1726_v36  ;;  %v838_v19 = vadd.f32 %v762_v28, %v548_v42  ;;  %v764_v61 = vrot.slane %v643_v48, 1  ;;  %v1897_v29 = vld [vmem:[%s2024_s28 + $0x70] sm:$0xff]  }
  0x7e   : > { %1725 = vst [vmem:[%s2030_s6 + $0x88] sm:$0xf] %v1185_v39  ;;  %1727 = vst [vmem:[%s2030_s6 + $0x8c] sm:$0x1] %v1401_v25  ;;  %v1190_v32 = vrot.slane %v1188_v23, 7  ;;  %v517_v26 = vadd.f32 %v2200_v50, %v478_v55  ;;  %v1839_v43 = vunpack.c.h.bf16 %v2453_v27  ;;  %v644_v1 = vunpack.c.l.bf16 %v1631_v18 }
  0x7f   : > { %v1779_v40 = vpack.c.bf16 %v838_v19, %v838_v19  ;;  %v765_v2 = vsel %vm702_vm0, %v763_v41, %v764_v61  ;;  %v1842_v49 = vunpack.c.l.bf16 %v1896_v56  ;;  %v1878_v58 = vunpack.c.l.bf16 %v1905_v60 }
  0x80   : > { %v1193_v0 = vor.u32 %v1191_v54, %v1190_v32  ;;  %v1194_v4 = vrot.slane %v1190_v32, 4  ;;  %v549_v6 = vmax.f32 %v517_v26, 0.0  ;;  %v443_v7 = vsub.f32 %v1839_v43, %v2041_v8  ;;  %v1733_v54 = vld [vmem:[%s2030_s6 + $0x9c] sm:$0xf] }
  0x81   : > { %v1196_v46 = vshrl.u32 %v1779_v40, 16  ;;  %v1199_v10 = vshll.u32 %v1779_v40, 16  ;;  %v766_v11 = vrot.slane %v644_v1, 1  ;;  %v444_v27 = vsub.f32 %v1842_v49, %v2041_v8 }
  0x82   : > { %v1404_v12 = vsel %vm2243_vm6, %v1193_v0, %v1728_v57  ;;  %v839_v52 = vadd.f32 %v765_v2, %v549_v6  ;;  %v479_v13 = vmul.f32 %v2189_v44, %v443_v7  ;;  %v1879_v14 = vunpack.c.h.bf16 %v1905_v60  ;;  %v1637_v57 = vld [vmem:[%s2035_s9 + $0xbc] sm:$0x1] }
  0x83   : > { %1729 = vst [vmem:[%s2030_s6 + $0x90] sm:$0xf] %v1404_v12  ;;  %v1198_v30 = vrot.slane %v1196_v46, 7  ;;  %v767_v47 = vsel %vm702_vm0, %v764_v61, %v766_v11  ;;  %v480_v16 = vmul.f32 %v2189_v44, %v444_v27  ;;  %v768_v37 = vrot.slane %v1878_v58, 1  ;;  %v1898_v0 = vld [vmem:[%s2024_s28 + $0x78] sm:$0xff]  }
  0x84   : > { %v1780_v17 = vpack.c.bf16 %v839_v52, %v839_v52  ;;  %v518_v20 = vadd.f32 %v2200_v50, %v479_v13  ;;  %v769_v21 = vrot.slane %v1879_v14, 1  ;;  %v1843_v3 = vunpack.c.h.bf16 %v1896_v56  ;;  %v1736_v12 = vld [vmem:[%s2030_s6 + $0xa4] sm:$0x1]  ;;  %v1935_v14 = vld [vmem:[%s2593_s3] ss:$0 sm:$0xff] }
  0x85   : > { %v1201_v22 = vor.u32 %v1199_v10, %v1198_v30  ;;  %v1203_v24 = vrot.slane %v1198_v30, 4  ;;  %v519_v28 = vadd.f32 %v2200_v50, %v480_v16  ;;  %v647_v51 = vunpack.c.l.bf16 %v1634_v15 }
  0x86   : > { %v1205_v31 = vshrl.u32 %v1780_v17, 16  ;;  %v1208_v33 = vshll.u32 %v1780_v17, 16  ;;  %v550_v36 = vmax.f32 %v518_v20, 0.0  ;;  %v770_v9 = vsel %vm702_vm0, %v768_v37, %v769_v21  ;;  %v1738_v37 = vld [vmem:[%s2030_s6 + $0xa8] sm:$0xf] }
  0x87   : > { %v1202_v38 = vsel %vm2250_vm7, %v1194_v4, %v1201_v22  ;;  %v1408_v48 = vsel %vm2256_vm8, %v1203_v24, %v1731_v45  ;;  %v551_v53 = vmax.f32 %v519_v28, 0.0  ;;  %v445_v63 = vsub.f32 %v1843_v3, %v2041_v8  ;;  %v1906_v24 = vld [vmem:[%s2035_s9 + $0xc0] sm:$0xff]  }
  0x88   : > { %1730 = vst [vmem:[%s2030_s6 + $0x94] sm:$0xf] %v1202_v38  ;;  %1732 = vst [vmem:[%s2030_s6 + $0x98] sm:$0x1] %v1408_v48  ;;  %v1207_v35 = vrot.slane %v1205_v31, 7  ;;  %v840_v42 = vadd.f32 %v767_v47, %v550_v36  ;;  %v771_v18 = vrot.slane %v647_v51, 1  ;;  %v1846_v23 = vunpack.c.l.bf16 %v1897_v29 }
  0x89   : > { %v841_v55 = vadd.f32 %v770_v9, %v551_v53  ;;  %v481_v41 = vmul.f32 %v2189_v44, %v445_v63  ;;  %v648_v56 = vunpack.c.l.bf16 %v1635_v34  ;;  %v649_v60 = vunpack.c.h.bf16 %v1635_v34 }
  0x8a   : > { %v1210_v39 = vor.u32 %v1208_v33, %v1207_v35  ;;  %v1781_v25 = vpack.c.bf16 %v840_v42, %v840_v42  ;;  %v1211_v19 = vrot.slane %v1207_v35, 4  ;;  %v772_v61 = vsel %vm702_vm0, %v769_v21, %v771_v18  ;;  %v1640_v33 = vld [vmem:[%s2035_s9 + $0xc8] sm:$0x1] }
  0x8b   : > { %v1782_v32 = vpack.c.bf16 %v841_v55, %v841_v55  ;;  %v520_v26 = vadd.f32 %v2200_v50, %v481_v41  ;;  %v446_v43 = vsub.f32 %v1846_v23, %v2041_v8  ;;  %v773_v1 = vrot.slane %v648_v56, 1  ;;  %v1741_v55 = vld [vmem:[%s2030_s6 + $0xb0] sm:$0x1] }
  0x8c   : > { %v1411_v40 = vsel %vm2243_vm6, %v1210_v39, %v1733_v54  ;;  %v1213_v2 = vshrl.u32 %v1781_v25, 16  ;;  %v1216_v49 = vshll.u32 %v1781_v25, 16  ;;  %v774_v58 = vrot.slane %v649_v60, 1 }
  0x8d   : > { %1734 = vst [vmem:[%s2030_s6 + $0x9c] sm:$0xf] %v1411_v40  ;;  %v1222_v4 = vshrl.u32 %v1782_v32, 16  ;;  %v1225_v6 = vshll.u32 %v1782_v32, 16  ;;  %v552_v7 = vmax.f32 %v520_v26, 0.0  ;;  %v482_v46 = vmul.f32 %v2189_v44, %v446_v43 }
  0x8e   : > { %v1215_v50 = vrot.slane %v1213_v2, 7  ;;  %v775_v10 = vsel %vm702_vm0, %v773_v1, %v774_v58  ;;  %v1847_v11 = vunpack.c.h.bf16 %v1897_v29  ;;  %v650_v27 = vunpack.c.l.bf16 %v1637_v57 }
  0x8f   : > { %v1224_v52 = vrot.slane %v1222_v4, 7  ;;  %v842_v13 = vadd.f32 %v772_v61, %v552_v7  ;;  %v521_v15 = vadd.f32 %v1935_v14, %v482_v46  ;;  %v1850_v30 = vunpack.c.l.bf16 %v1898_v0 }
  0x90   : > { %v1218_v47 = vor.u32 %v1216_v49, %v1215_v50  ;;  %v1220_v16 = vrot.slane %v1215_v50, 4  ;;  %v447_v45 = vsub.f32 %v1847_v11, %v2041_v8  ;;  %v776_v17 = vrot.slane %v650_v27, 1 }
  0x91   : > { %v1227_v20 = vor.u32 %v1225_v6, %v1224_v52  ;;  %v1783_v21 = vpack.c.bf16 %v842_v13, %v842_v13  ;;  %v1228_v3 = vrot.slane %v1224_v52, 4  ;;  %v553_v22 = vmax.f32 %v521_v15, 0.0 }
  0x92   : > { %v1219_v28 = vsel %vm2250_vm7, %v1211_v19, %v1218_v47  ;;  %v1415_v51 = vsel %vm2256_vm8, %v1220_v16, %v1736_v12  ;;  %v483_v29 = vmul.f32 %v2189_v44, %v447_v45  ;;  %v777_v31 = vsel %vm702_vm0, %v774_v58, %v776_v17  ;;  %v1743_v58 = vld [vmem:[%s2030_s6 + $0xb4] sm:$0xf] }
  0x93   : > { %1735 = vst [vmem:[%s2030_s6 + $0xa0] sm:$0xf] %v1219_v28  ;;  %1737 = vst [vmem:[%s2030_s6 + $0xa4] sm:$0x1] %v1415_v51  ;;  %v1418_v36 = vsel %vm2243_vm6, %v1227_v20, %v1738_v37  ;;  %v1230_v9 = vshrl.u32 %v1783_v21, 16  ;;  %v1233_v34 = vshll.u32 %v1783_v21, 16  ;;  %v843_v38 = vadd.f32 %v775_v10, %v553_v22 }
  0x94   : > { %1739 = vst [vmem:[%s2030_s6 + $0xa8] sm:$0xf] %v1418_v36  ;;  %v522_v48 = vadd.f32 %v1935_v14, %v483_v29  ;;  %v448_v53 = vsub.f32 %v1850_v30, %v2041_v8  ;;  %v1882_v63 = vunpack.c.l.bf16 %v1906_v24  ;;  %v1883_v35 = vunpack.c.h.bf16 %v1906_v24  ;;  %v1751_v36 = vld [vmem:[%s2030_s6 + $0xc8] sm:$0x1] }
  0x95   : > { %v1232_v42 = vrot.slane %v1230_v9, 7  ;;  %v1784_v18 = vpack.c.bf16 %v843_v38, %v843_v38  ;;  %v1851_v23 = vunpack.c.h.bf16 %v1898_v0  ;;  %v653_v54 = vunpack.c.l.bf16 %v1640_v33 }
  0x96   : > { %v554_v41 = vmax.f32 %v522_v48, 0.0  ;;  %v484_v56 = vmul.f32 %v2189_v44, %v448_v53  ;;  %v778_v60 = vrot.slane %v1882_v63, 1  ;;  %v779_v39 = vrot.slane %v1883_v35, 1 }
  0x97   : > { %v1235_v25 = vor.u32 %v1233_v34, %v1232_v42  ;;  %v1237_v19 = vrot.slane %v1232_v42, 4  ;;  %v1239_v61 = vshrl.u32 %v1784_v18, 16  ;;  %v1242_v32 = vshll.u32 %v1784_v18, 16 }
  0x98   : > { %v844_v26 = vadd.f32 %v777_v31, %v554_v41  ;;  %v523_v43 = vadd.f32 %v1935_v14, %v484_v56  ;;  %v449_v1 = vsub.f32 %v1851_v23, %v2041_v8  ;;  %v780_v49 = vsel %vm702_vm0, %v778_v60, %v779_v39 }
  0x99   : > { %v1236_v57 = vsel %vm2250_vm7, %v1228_v3, %v1235_v25  ;;  %v1422_v40 = vsel %vm2256_vm8, %v1237_v19, %v1741_v55  ;;  %v1241_v2 = vrot.slane %v1239_v61, 7  ;;  %v781_v7 = vrot.slane %v653_v54, 1  ;;  %v1748_v3 = vld [vmem:[%s2030_s6 + $0xc0] sm:$0xf] }
  0x9a   : > { %1740 = vst [vmem:[%s2030_s6 + $0xac] sm:$0xf] %v1236_v57  ;;  %1742 = vst [vmem:[%s2030_s6 + $0xb0] sm:$0x1] %v1422_v40  ;;  %v1785_v0 = vpack.c.bf16 %v844_v26, %v844_v26  ;;  %v555_v4 = vmax.f32 %v523_v43, 0.0  ;;  %v485_v6 = vmul.f32 %v2189_v44, %v449_v1 }
  0x9b   : > { %v1244_v8 = vor.u32 %v1242_v32, %v1241_v2  ;;  %v1245_v12 = vrot.slane %v1241_v2, 4  ;;  %v782_v30 = vsel %vm702_vm0, %v779_v39, %v781_v7  ;;  %v1746_v44 = vld [vmem:[%s2030_s6 + $0xbc] sm:$0x1] }
  0x9c   : > { %v1247_v46 = vshrl.u32 %v1785_v0, 16  ;;  %v1250_v50 = vshll.u32 %v1785_v0, 16  ;;  %v845_v10 = vadd.f32 %v780_v49, %v555_v4  ;;  %v524_v11 = vadd.f32 %v1935_v14, %v485_v6 }
  0x9d   : > { %v1425_v27 = vsel %vm2243_vm6, %v1244_v8, %v1743_v58 }
  0x9e   : > { %1744 = vst [vmem:[%s2030_s6 + $0xb4] sm:$0xf] %v1425_v27  ;;  %v1249_v52 = vrot.slane %v1247_v46, 7  ;;  %v1786_v13 = vpack.c.bf16 %v845_v10, %v845_v10  ;;  %v556_v15 = vmax.f32 %v524_v11, 0.0 }
  0xa0   : > { %v1252_v47 = vor.u32 %v1250_v50, %v1249_v52  ;;  %v1254_v16 = vrot.slane %v1249_v52, 4  ;;  %v1256_v37 = vshrl.u32 %v1786_v13, 16  ;;  %v1259_v45 = vshll.u32 %v1786_v13, 16 }
  0xa1   : > { %v846_v14 = vadd.f32 %v782_v30, %v556_v15 }
  0xa2   : > { %v1253_v17 = vsel %vm2250_vm7, %v1245_v12, %v1252_v47  ;;  %v1429_v20 = vsel %vm2256_vm8, %v1254_v16, %v1746_v44  ;;  %v1258_v21 = vrot.slane %v1256_v37, 7 }
  0xa3   : > { %1745 = vst [vmem:[%s2030_s6 + $0xb8] sm:$0xf] %v1253_v17  ;;  %1747 = vst [vmem:[%s2030_s6 + $0xbc] sm:$0x1] %v1429_v20  ;;  %v1787_v22 = vpack.c.bf16 %v846_v14, %v846_v14 }
  0xa4   : > { %v1261_v24 = vor.u32 %v1259_v45, %v1258_v21  ;;  %v1262_v31 = vrot.slane %v1258_v21, 4 }
  0xa5   : > { %v1264_v28 = vshrl.u32 %v1787_v22, 16  ;;  %v1267_v51 = vshll.u32 %v1787_v22, 16 }
  0xa6   : > { %v1432_v29 = vsel %vm2243_vm6, %v1261_v24, %v1748_v3 }
  0xa7   : > { %1749 = vst [vmem:[%s2030_s6 + $0xc0] sm:$0xf] %v1432_v29  ;;  %v1266_v33 = vrot.slane %v1264_v28, 7 }
  0xa9   : > { %v1269_v9 = vor.u32 %v1267_v51, %v1266_v33  ;;  %v1271_v34 = vrot.slane %v1266_v33, 4 }
  0xab   : > { %v1270_v38 = vsel %vm2250_vm7, %v1262_v31, %v1269_v9  ;;  %v1436_v48 = vsel %vm2256_vm8, %v1271_v34, %v1751_v36 }
  0xac   : > { %1750 = vst [vmem:[%s2030_s6 + $0xc4] sm:$0xf] %v1270_v38  ;;  %1752 = vst [vmem:[%s2030_s6 + $0xc8] sm:$0x1] %v1436_v48 }
  0xad PF: > { %s15_s20 = sadd.s32 1, %s1958_s20   ;;  %s2602_s18 = smov %s1954_s19 }
  0xae   : > { %p12_p5 = scmp.ge.s32.totalorder %s15_s20, 4   ;;  %s2603_s19 = smov %s2605_s21 }
  0xb0   :  { %14 = sbr.rel (!%p12_p5) target bundleno = 2 (0x2), region = 84 }

// kernel: residual_conv_forward.13
= control target key start
LH: loop header
LB: loop body
LE: loop exit
PB: predicated region body
PF: predicated region fallthrough
CT: control target
= control target key end

     0   :  { %s2469_s12 = smov 0   ;;  %s2471_s13 = smov 0   ;;  %s2996_s0 = inlined_call_operand.vmem [shape: bf16[2,9,2,12,256], index: 0, kind: input, shape index: {}]   ;;  %s2997_s1 = inlined_call_operand.vmem [shape: bf16[1152,128], index: 1, kind: input, shape index: {}]   ;;  %s2998_s2 = inlined_call_operand.vmem [shape: f32[1,128], index: 2, kind: input, shape index: {}]   ;;  %s2999_s3 = inlined_call_operand.vmem [shape: f32[2,8,8,128], index: 3, kind: output, shape index: {}]  }
   0x1   :  { %s2473_s14 = smov 0  }
   0x2 LB: > { %s22_s15 = sadd.s32 1, %s2443_s13  ;;  %p1912_p0 = scmp.ge.s32.totalorder %s2447_s14, 1  ;;  %s2447_s14 = sphi %s2473_s14, %s13_s14   ;;  %s2443_s13 = sphi %s2471_s13, %s3003_s13   ;;  %s2439_s12 = sphi %s2469_s12, %s3002_s12  }
   0x3   : > { %p23_p1 = scmp.ge.s32.totalorder %s22_s15, 2  ;;  %p168_p2 = scmp.lt.s32.totalorder %s2447_s14, 3 }
   0x5   : > { %s3005_s15 = smov (%p23_p1, %s22_s15), 0  ;;  %p169_p3 = pnand %p1912_p0, %p168_p2 }
   0x6   : > { %v2353_v0 = vld [vmem:[%s2997_s1 + $0x80] sm:$0xff] (!%p169_p3)   ;;  %v2356_v3 = vld [vmem:[%s2997_s1 + $0x88] sm:$0xff] (!%p169_p3)   ;;  %v2359_v6 = vld [vmem:[%s2997_s1 + $0x90] sm:$0xff] (!%p169_p3)   ;;  %p202_p4 = scmp.lt.s32.totalorder (!%p169_p3), %s2439_s12, 1  ;;  %vm271_vm0 = vsmask.f32 (!%p169_p3), 3328 }
   0x7   : > { %172 = sbr.rel (%p169_p3) target bundleno = 335 (0x14f), region = 32  ;;  %v2354_v1 = vld [vmem:[%s2997_s1 + $0x40] sm:$0xff] (!%p169_p3)   ;;  %2216 = vmatprep.subr.bf16.mxu0 (!%p169_p3), %v2353_v0  ;;  %v2357_v4 = vld [vmem:[%s2997_s1 + $0x48] sm:$0xff] (!%p169_p3)   ;;  %v2360_v7 = vld [vmem:[%s2997_s1 + $0x50] sm:$0xff] (!%p169_p3)   ;;  %vm272_vm1 = vsmask.f32 (!%p169_p3), 7440 }
   0x8   : > { %v2355_v2 = vld [vmem:[%s2997_s1] sm:$0xff] (!%p169_p3)   ;;  %2217 = vmatpush3.bf16.msra.mxu0 (!%p169_p3), %v2353_v0  ;;  %2072 = vmatprep.subr.bf16.mxu1 (!%p169_p3), %v2354_v1  ;;  %v2358_v5 = vld [vmem:[%s2997_s1 + $0x8] sm:$0xff] (!%p169_p3)   ;;  %v2361_v8 = vld [vmem:[%s2997_s1 + $0x10] sm:$0xff] (!%p169_p3)  }
   0x9   : > { %2073 = vmatpush3.bf16.msra.mxu1 (!%p169_p3), %v2355_v2  ;;  %2218 = vmatprep.subr.bf16.mxu0 (!%p169_p3), %v2356_v3  ;;  %v2362_v9 = vld [vmem:[%s2997_s1 + $0x98] sm:$0xff] (!%p169_p3)   ;;  %v2365_v12 = vld [vmem:[%s2997_s1 + $0xa0] sm:$0xff] (!%p169_p3)   ;;  %v2368_v15 = vld [vmem:[%s2997_s1 + $0xa8] sm:$0xff] (!%p169_p3)  }
   0xa   : > { %2074 = vmatprep.subr.bf16.mxu1 (!%p169_p3), %v2357_v4  ;;  %v2363_v10 = vld [vmem:[%s2997_s1 + $0x58] sm:$0xff] (!%p169_p3)   ;;  %v2366_v13 = vld [vmem:[%s2997_s1 + $0x60] sm:$0xff] (!%p169_p3)   ;;  %v2369_v16 = vld [vmem:[%s2997_s1 + $0x68] sm:$0xff] (!%p169_p3)  }
   0xb   : > { %v2364_v11 = vld [vmem:[%s2997_s1 + $0x18] sm:$0xff] (!%p169_p3)   ;;  %v2367_v14 = vld [vmem:[%s2997_s1 + $0x20] sm:$0xff] (!%p169_p3)   ;;  %v2370_v17 = vld [vmem:[%s2997_s1 + $0x28] sm:$0xff] (!%p169_p3)  }
   0xc   : > { %2219 = vmatpush3.bf16.msra.mxu0 (!%p169_p3), %v2356_v3  ;;  %v2371_v18 = vld [vmem:[%s2997_s1 + $0xb0] sm:$0xff] (!%p169_p3)   ;;  %v2374_v21 = vld [vmem:[%s2997_s1 + $0xb8] sm:$0xff] (!%p169_p3)   ;;  %v2377_v37 = vld [vmem:[%s2997_s1 + $0x100] sm:$0xff] (!%p169_p3)  }
   0xd   : > { %2075 = vmatpush3.bf16.msra.mxu1 (!%p169_p3), %v2358_v5  ;;  %2220 = vmatprep.subr.bf16.mxu0 (!%p169_p3), %v2359_v6  ;;  %v2372_v19 = vld [vmem:[%s2997_s1 + $0x70] sm:$0xff] (!%p169_p3)   ;;  %v2375_v22 = vld [vmem:[%s2997_s1 + $0x78] sm:$0xff] (!%p169_p3)   ;;  %vm2595_vm2 = vmor (!%p169_p3), %vm271_vm0, %vm272_vm1 }
   0xe   : > { %2076 = vmatprep.subr.bf16.mxu1 %v2360_v7  ;;  %s3007_s12 = smov (!%p202_p4, %s2439_s12), 1  ;;  %v2373_v20 = vld [vmem:[%s2997_s1 + $0x30] sm:$0xff]   ;;  %v2376_v30 = vld [vmem:[%s2997_s1 + $0x38] sm:$0xff]   ;;  %v2379_v1 = vld [vmem:[%s2997_s1 + $0x1c0] sm:$0xff]  }
   0xf   : > { %s2328_s27 = smul.u32 288, %s3007_s12 }
  0x10   : > { %2221 = vmatpush3.bf16.msra.mxu0 %v2359_v6  ;;  %v2380_v6 = vld [vmem:[%s2997_s1 + $0x180] sm:$0xff]  }
  0x11   : > { %2077 = vmatpush3.bf16.msra.mxu1 %v2361_v8  ;;  %2222 = vmatprep.subr.bf16.mxu0 %v2362_v9  ;;  %s2557_s9 = scalar_lea.vmem %s2996_s0, %s2328_s27 }
  0x12   : > { %2078 = vmatprep.subr.bf16.mxu1 %v2363_v10  ;;  %v223_v23 = vld [vmem:[%s2557_s9] sm:$0xff]  ;;  %v224_v24 = vld [vmem:[%s2557_s9 + $0x8] sm:$0x33] }
  0x13   : > { %v2571_v25 = vld [vmem:[%s2557_s9 + $0x20] sm:$0xff]  ;;  %v226_v26 = vld [vmem:[%s2557_s9 + $0x28] sm:$0x33]  ;;  %v275_v27 = vshrl.u32 %v223_v23, 16  ;;  %v278_v28 = vshll.u32 %v223_v23, 16  ;;  %v284_v31 = vshll.u32 %v224_v24, 16 }
  0x14   : > { %2223 = vmatpush3.bf16.msra.mxu0 %v2362_v9  ;;  %v1929_v29 = vcombine.high %v223_v23, %v2571_v25  ;;  %v289_v32 = vshrl.u32 %v2571_v25, 16  ;;  %v292_v33 = vshll.u32 %v2571_v25, 16  ;;  %v298_v34 = vshll.u32 %v226_v26, 16  ;;  %v2584_v38 = vld [vmem:[%s2557_s9 + $0x40] sm:$0xff]  ;;  %v228_v43 = vld [vmem:[%s2557_s9 + $0x48] sm:$0x33] }
  0x15   : > { %2079 = vmatpush3.bf16.msra.mxu1 %v2364_v11  ;;  %2224 = vmatprep.subr.bf16.mxu0 %v2365_v12  ;;  %v277_v35 = vrot.slane %v275_v27, 4  ;;  %v280_v36 = vrot.slane %v278_v28, 5  ;;  %v286_v39 = vrot.slane %v284_v31, 5  ;;  %v2588_v45 = vld [vmem:[%s2557_s9 + $0x60] sm:$0xff]  ;;  %v230_v46 = vld [vmem:[%s2557_s9 + $0x68] sm:$0x33]  ;;  %v1928_v58 = vcombine.low %v223_v23, %v2571_v25 }
  0x16   : > { %2080 = vmatprep.subr.bf16.mxu1 %v2366_v13  ;;  %699 = vmatprep.mubr.bf16.mxu1 %v1929_v29  ;;  %v291_v40 = vrot.slane %v289_v32, 4  ;;  %v294_v41 = vrot.slane %v292_v33, 5  ;;  %v300_v42 = vrot.slane %v298_v34, 5  ;;  %v303_v47 = vshrl.u32 %v2584_v38, 16  ;;  %v2378_v10 = vld [vmem:[%s2997_s1 + $0xc0] sm:$0xff]   ;;  %v2391_v23 = vld [vmem:[%s2997_s1 + $0x1d8] sm:$0xff]  }
  0x17   : > { %v281_v44 = vor.u32 %v280_v36, %v277_v35  ;;  %v306_v48 = vshll.u32 %v2584_v38, 16  ;;  %v312_v49 = vshll.u32 %v228_v43, 16  ;;  %v317_v52 = vshrl.u32 %v2588_v45, 16  ;;  %v2392_v24 = vld [vmem:[%s2997_s1 + $0x198] sm:$0xff]   ;;  %v2666_v27 = vld [vmem:[%s2557_s9 + $0x80] sm:$0xff] }
  0x18   : > { %2225 = vmatpush3.bf16.msra.mxu0 %v2365_v12  ;;  %v295_v51 = vor.u32 %v294_v41, %v291_v40  ;;  %v320_v53 = vshll.u32 %v2588_v45, 16  ;;  %v326_v54 = vshll.u32 %v230_v46, 16  ;;  %v305_v56 = vrot.slane %v303_v47, 4  ;;  %v2383_v12 = vld [vmem:[%s2997_s1 + $0x1c8] sm:$0xff]   ;;  %v2389_v26 = vld [vmem:[%s2997_s1 + $0x118] sm:$0xff]   ;;  %v2672_v29 = vld [vmem:[%s2557_s9 + $0xa0] sm:$0xff] }
  0x19   : > { %2081 = vmatpush3.bf16.msra.mxu1 %v2367_v14  ;;  %2226 = vmatprep.subr.bf16.mxu0 %v2368_v15  ;;  %v282_v55 = vrot.slane %v281_v44, 4  ;;  %v308_v57 = vrot.slane %v306_v48, 5  ;;  %v319_v60 = vrot.slane %v317_v52, 4  ;;  %v314_v0 = vrot.slane %v312_v49, 5  ;;  %v2384_v14 = vld [vmem:[%s2997_s1 + $0x188] sm:$0xff]   ;;  %v2390_v28 = vld [vmem:[%s2997_s1 + $0xd8] sm:$0xff]  }
  0x1a   : > { %2082 = vmatprep.subr.bf16.mxu1 %v2369_v16  ;;  %v2602_v59 = vrot.slane %v295_v51, 4  ;;  %v322_v61 = vrot.slane %v320_v53, 5  ;;  %v1931_v2 = vcombine.high %v2584_v38, %v2588_v45  ;;  %v328_v5 = vrot.slane %v326_v54, 5  ;;  %v2381_v16 = vld [vmem:[%s2997_s1 + $0x108] sm:$0xff]   ;;  %v2393_v32 = vld [vmem:[%s2997_s1 + $0x120] sm:$0xff]  }
  0x1b   : > { %v287_v62 = vsel %vm2595_vm2, %v282_v55, %v286_v39  ;;  %v309_v63 = vor.u32 %v308_v57, %v305_v56  ;;  %v334_v31 = vshll.u32 %v2666_v27, 16  ;;  %v345_v33 = vshrl.u32 %v2672_v29, 16  ;;  %v2396_v40 = vld [vmem:[%s2997_s1 + $0x1a0] sm:$0xff]   ;;  %v2397_v44 = vld [vmem:[%s2997_s1 + $0x128] sm:$0xff]  }
  0x1c   : > { %2227 = vmatpush3.bf16.msra.mxu0 %v2368_v15  ;;  %v301_v3 = vsel %vm2595_vm2, %v2602_v59, %v300_v42  ;;  %v323_v4 = vor.u32 %v322_v61, %v319_v60  ;;  %v348_v34 = vshll.u32 %v2672_v29, 16  ;;  %v1933_v35 = vcombine.high %v2666_v27, %v2672_v29  ;;  %v2394_v42 = vld [vmem:[%s2997_s1 + $0xe0] sm:$0xff]   ;;  %v2399_v48 = vld [vmem:[%s2997_s1 + $0x1e8] sm:$0xff]  }
  0x1d   : > { %2083 = vmatpush3.bf16.msra.mxu1 %v2370_v17  ;;  %2228 = vmatprep.subr.bf16.mxu0 %v2371_v18  ;;  %v1916_v7 = vcombine.low %v287_v62, %v301_v3  ;;  %v2617_v8 = vrot.slane %v309_v63, 4  ;;  %v1930_v17 = vcombine.low %v2584_v38, %v2588_v45  ;;  %v1932_v36 = vcombine.low %v2666_v27, %v2672_v29  ;;  %v232_v49 = vld [vmem:[%s2557_s9 + $0x88] sm:$0x33]  ;;  %v2717_v63 = vld [vmem:[%s2557_s9 + $0xe0] sm:$0xff] }
  0x1e   : > { %2084 = vmatprep.subr.bf16.mxu1 %v2372_v19  ;;  %v2619_v9 = vrot.slane %v323_v4, 4  ;;  %v2387_v19 = vld [vmem:[%s2997_s1 + $0x1d0] sm:$0xff]   ;;  %v336_v41 = vrot.slane %v334_v31, 5  ;;  %v347_v43 = vrot.slane %v345_v33, 4  ;;  %v350_v47 = vrot.slane %v348_v34, 5  ;;  %v2398_v55 = vld [vmem:[%s2997_s1 + $0xe8] sm:$0xff]  }
  0x1f   : > { %2232 = vmatprep.mubr.bf16.mxu0 %v1916_v7  ;;  %v315_v11 = vsel %vm2595_vm2, %v2617_v8, %v314_v0  ;;  %v234_v51 = vld [vmem:[%s2557_s9 + $0xa8] sm:$0x33]  ;;  %v340_v53 = vshll.u32 %v232_v49, 16  ;;  %v2406_v34 = vld [vmem:[%s2997_s1 + $0xf8] sm:$0xff]  }
  0x20   : > { %2229 = vmatpush3.bf16.msra.mxu0 %v2371_v18  ;;  %v329_v13 = vsel %vm2595_vm2, %v2619_v9, %v328_v5  ;;  %v2382_v18 = vld [vmem:[%s2997_s1 + $0xc8] sm:$0xff]   ;;  %v351_v54 = vor.u32 %v350_v47, %v347_v43  ;;  %v354_v56 = vshll.u32 %v234_v51, 16  ;;  %v373_v5 = vshrl.u32 %v2717_v63, 16  ;;  %v2408_v43 = vld [vmem:[%s2997_s1 + $0x1b8] sm:$0xff]   ;;  %v2410_v51 = vld [vmem:[%s2997_s1 + $0x200] sm:$0xff]  }
  0x21   : > { %2085 = vmatpush3.bf16.msra.mxu1 %v2373_v20  ;;  %2230 = vmatprep.subr.bf16.mxu0 %v2374_v21  ;;  %v1917_v15 = vcombine.low %v315_v11, %v329_v13  ;;  %v2388_v20 = vld [vmem:[%s2997_s1 + $0x190] sm:$0xff]   ;;  %v2400_v57 = vld [vmem:[%s2997_s1 + $0x1a8] sm:$0xff]   ;;  %v342_v60 = vrot.slane %v340_v53, 5  ;;  %v2023_v53 = vcombine.high %v2588_v45, %v2666_v27 }
  0x22   : > { %2086 = vmatprep.subr.bf16.mxu1 %v2375_v22  ;;  %v2386_v22 = vld [vmem:[%s2997_s1 + $0xd0] sm:$0xff]   ;;  %v2713_v61 = vrot.slane %v351_v54, 4  ;;  %v236_v62 = vld [vmem:[%s2557_s9 + $0xc8] sm:$0x33] }
  0x23   : > { %v368_v4 = vshll.u32 %v236_v62, 16  ;;  %v2411_v62 = vld [vmem:[%s2997_s1 + $0x148] sm:$0xff]  }
  0x24   : > { %2231 = vmatpush3.bf16.msra.mxu0 %v2374_v21  ;;  %v2385_v21 = vld [vmem:[%s2997_s1 + $0x110] sm:$0xff]  }
  0x25   : > { %2087 = vmatpush3.bf16.msra.mxu1 %v2376_v30  ;;  %2112 = vmatprep.subr.bf16.mxu0 %v2377_v37  ;;  %v331_v30 = vshrl.u32 %v2666_v27, 16  ;;  %v2395_v37 = vld [vmem:[%s2997_s1 + $0x1e0] sm:$0xff]  }
  0x26   : > { %2164 = vmatprep.subr.bf16.mxu1 %v2379_v1  ;;  %v356_v1 = vrot.slane %v354_v56, 5  ;;  %v1958_v56 = vld [vmem:[%s2557_s9 + $0x70] sm:$0xff] }
  0x27   : > { %2233 = vmatmul.mubr.bf16.vlgmr.msra.gmra.mrb[0].mxu0 %v1917_v15  ;;  %v333_v39 = vrot.slane %v331_v30, 4  ;;  %v375_v15 = vrot.slane %v373_v5, 4  ;;  %v2021_v30 = vcombine.high %v2571_v25, %v2584_v38  ;;  %v1036_v5 = vshll.u32 %v1958_v56, 16 }
  0x28   : > { %700 = vmatmul.mubr.bf16.vlgmr.msra.gmra.mrb[0].mxu1 %v1928_v58  ;;  %2113 = vmatpush3.bf16.msra.mxu0 %v2378_v10  ;;  %v2711_v58 = vld [vmem:[%s2557_s9 + $0xc0] sm:$0xff]  ;;  %v376_v10 = vshll.u32 %v2717_v63, 16  ;;  %v357_v13 = vsel %vm2595_vm2, %v2713_v61, %v356_v1 }
  0x29   : > { %2165 = vmatpush3.bf16.msra.mxu1 %v2380_v6  ;;  %707 = vmatprep.mubr.bf16.mxu1 %v1931_v2  ;;  %v337_v46 = vor.u32 %v336_v41, %v333_v39  ;;  %v359_v0 = vshrl.u32 %v2711_v58, 16  ;;  %v238_v2 = vld [vmem:[%s2557_s9 + $0xe8] sm:$0x33]  ;;  %v362_v3 = vshll.u32 %v2711_v58, 16  ;;  %v1952_v39 = vld [vmem:[%s2557_s9 + $0x10] sm:$0xff] }
  0x2a   : > { %2166 = vmatprep.subr.bf16.mxu1 %v2383_v12  ;;  %2114 = vmatprep.subr.bf16.mxu0 %v2381_v16  ;;  %v382_v11 = vshll.u32 %v238_v2, 16  ;;  %v2401_v12 = vld [vmem:[%s2997_s1 + $0x130] sm:$0xff]   ;;  %v994_v47 = vshll.u32 %v1952_v39, 16  ;;  %v1033_v2 = vshrl.u32 %v1958_v56, 16 }
  0x2b   : > { %v2702_v52 = vrot.slane %v337_v46, 4  ;;  %v361_v7 = vrot.slane %v359_v0, 4  ;;  %v991_v46 = vshrl.u32 %v1952_v39, 16 }
  0x2c   : > { %2115 = vmatpush3.bf16.msra.mxu0 %v2382_v18  ;;  %v1935_v18 = vcombine.high %v2711_v58, %v2717_v63 }
  0x2d   : > { %2167 = vmatpush3.bf16.msra.mxu1 %v2384_v14  ;;  %2116 = vmatprep.subr.bf16.mxu0 %v2385_v21  ;;  %v343_v6 = vsel %vm2595_vm2, %v2702_v52, %v342_v60  ;;  %v364_v14 = vrot.slane %v362_v3, 5  ;;  %v370_v21 = vrot.slane %v368_v4, 5  ;;  %v996_v60 = vrot.slane %v994_v47, 5 }
  0x2e   : > { %2168 = vmatprep.subr.bf16.mxu1 %v2387_v19  ;;  %v1918_v16 = vcombine.low %v343_v6, %v357_v13  ;;  %v2402_v19 = vld [vmem:[%s2997_s1 + $0xf0] sm:$0xff]   ;;  %v1038_v13 = vrot.slane %v1036_v5, 5 }
  0x30   : > { %708 = vmatmul.mubr.bf16.gmra.mrb[4].mxu1 %v1930_v17  ;;  %2117 = vmatpush3.bf16.msra.mxu0 %v2386_v22  ;;  %v378_v17 = vrot.slane %v376_v10, 5  ;;  %v1934_v22 = vcombine.low %v2711_v58, %v2717_v63 }
  0x31   : > { %2169 = vmatpush3.bf16.msra.mxu1 %v2388_v20  ;;  %2118 = vmatprep.subr.bf16.mxu0 %v2389_v26  ;;  %v365_v20 = vor.u32 %v364_v14, %v361_v7  ;;  %v384_v26 = vrot.slane %v382_v11, 5  ;;  %v1035_v11 = vrot.slane %v1033_v2, 4  ;;  %v2022_v14 = vcombine.low %v2588_v45, %v2666_v27  ;;  %v2413_v45 = vld [vmem:[%s2997_s1 + $0x150] sm:$0xff]  }
  0x32   : > { %2170 = vmatprep.subr.bf16.mxu1 %v2391_v23  ;;  %715 = vmatprep.mubr.bf16.mxu1 %v1933_v35  ;;  %v2403_v23 = vld [vmem:[%s2997_s1 + $0x1f0] sm:$0xff]  }
  0x33   : > { %2236 = vmatprep.mubr.bf16.mxu0 %v1918_v16  ;;  %v2748_v31 = vrot.slane %v365_v20, 4  ;;  %v2025_v16 = vcombine.high %v2672_v29, %v2711_v58  ;;  %v2807_v27 = vld [vmem:[%s2557_s9 + $0xb0] sm:$0xff] }
  0x34   : > { %2119 = vmatpush3.bf16.msra.mxu0 %v2390_v28  ;;  %v2404_v28 = vld [vmem:[%s2997_s1 + $0x1b0] sm:$0xff]  }
  0x35   : > { %2171 = vmatpush3.bf16.msra.mxu1 %v2392_v24  ;;  %2120 = vmatprep.subr.bf16.mxu0 %v2393_v32  ;;  %v379_v24 = vor.u32 %v378_v17, %v375_v15  ;;  %v2405_v32 = vld [vmem:[%s2997_s1 + $0x138] sm:$0xff]   ;;  %v371_v35 = vsel %vm2595_vm2, %v2748_v31, %v370_v21  ;;  %v1039_v21 = vor.u32 %v1038_v13, %v1035_v11 }
  0x36   : > { %2172 = vmatprep.subr.bf16.mxu1 %v2395_v37  ;;  %v2416_v15 = vld [vmem:[%s2997_s1 + $0x218] sm:$0xff]  }
  0x37   : > { %v2753_v33 = vrot.slane %v379_v24, 4  ;;  %v1061_v24 = vshrl.u32 %v2807_v27, 16 }
  0x38   : > { %716 = vmatmul.mubr.bf16.gmra.mrb[8].mxu1 %v1932_v36  ;;  %2121 = vmatpush3.bf16.msra.mxu0 %v2394_v42  ;;  %v2407_v36 = vld [vmem:[%s2997_s1 + $0x1f8] sm:$0xff]  }
  0x39   : > { %2173 = vmatpush3.bf16.msra.mxu1 %v2396_v40  ;;  %2122 = vmatprep.subr.bf16.mxu0 %v2397_v44  ;;  %v385_v37 = vsel %vm2595_vm2, %v2753_v33, %v384_v26  ;;  %v1954_v40 = vld [vmem:[%s2557_s9 + $0x30] sm:$0xff]  ;;  %v2409_v44 = vld [vmem:[%s2997_s1 + $0x140] sm:$0xff]   ;;  %v2840_v47 = vrot.slane %v1061_v24, 4 }
  0x3a   : > { %2174 = vmatprep.subr.bf16.mxu1 %v2399_v48  ;;  %723 = vmatprep.mubr.bf16.mxu1 %v1935_v18  ;;  %v1919_v41 = vcombine.low %v371_v35, %v385_v37  ;;  %v1969_v42 = vcombine.high %v1952_v39, %v1954_v40  ;;  %v2020_v48 = vcombine.low %v2571_v25, %v2584_v38  ;;  %v1005_v49 = vshrl.u32 %v1954_v40, 16  ;;  %v1956_v38 = vld [vmem:[%s2557_s9 + $0x50] sm:$0xff] }
  0x3b   : > { %v1008_v54 = vshll.u32 %v1954_v40, 16  ;;  %v1968_v25 = vcombine.low %v1952_v39, %v1954_v40  ;;  %v1019_v0 = vshrl.u32 %v1956_v38, 16  ;;  %v1022_v1 = vshll.u32 %v1956_v38, 16  ;;  %v2801_v18 = vld [vmem:[%s2557_s9 + $0x90] sm:$0xff]  ;;  %v2418_v39 = vld [vmem:[%s2997_s1 + $0x220] sm:$0xff]  }
  0x3c   : > { %2123 = vmatpush3.bf16.msra.mxu0 %v2398_v55  ;;  %v2412_v55 = vld [vmem:[%s2997_s1 + $0x208] sm:$0xff]   ;;  %v1007_v3 = vrot.slane %v1005_v49, 4  ;;  %v1971_v4 = vcombine.high %v1956_v38, %v1958_v56  ;;  %v1970_v26 = vcombine.low %v1956_v38, %v1958_v56  ;;  %v1064_v37 = vshll.u32 %v2807_v27, 16  ;;  %v1953_v38 = vld [vmem:[%s2557_s9 + $0x18] sm:$0x33] }
  0x3d   : > { %2175 = vmatpush3.bf16.msra.mxu1 %v2400_v57  ;;  %2124 = vmatprep.subr.bf16.mxu0 %v2401_v12  ;;  %v993_v57 = vrot.slane %v991_v46, 4  ;;  %v1010_v6 = vrot.slane %v1008_v54, 5  ;;  %v1021_v7 = vrot.slane %v1019_v0, 4  ;;  %v1024_v10 = vrot.slane %v1022_v1, 5  ;;  %v2414_v12 = vld [vmem:[%s2997_s1 + $0x210] sm:$0xff]  }
  0x3e   : > { %2176 = vmatprep.subr.bf16.mxu1 %v2403_v23  ;;  %2237 = vmatmul.mubr.bf16.gmra.mrb[4].mxu0 %v1919_v41  ;;  %v1050_v23 = vshll.u32 %v2801_v18, 16  ;;  %v2024_v41 = vcombine.low %v2672_v29, %v2711_v58  ;;  %v2846_v29 = vld [vmem:[%s2557_s9 + $0xf0] sm:$0xff]  ;;  %v1955_v56 = vld [vmem:[%s2557_s9 + $0x38] sm:$0x33] }
  0x3f   : > { %949 = vmatprep.mubr.bf16.mxu0 %v1969_v42  ;;  %v1025_v17 = vor.u32 %v1024_v10, %v1021_v7  ;;  %v1011_v20 = vor.u32 %v1010_v6, %v1007_v3  ;;  %v2420_v42 = vld [vmem:[%s2997_s1 + $0x228] sm:$0xff]   ;;  %v1092_v54 = vshll.u32 %v2846_v29, 16  ;;  %v1014_v0 = vshll.u32 %v1955_v56, 16  ;;  %v1959_v1 = vld [vmem:[%s2557_s9 + $0x78] sm:$0x33] }
  0x40   : > { %724 = vmatmul.mubr.bf16.gmra.mrb[12].mxu1 %v1934_v22  ;;  %2125 = vmatpush3.bf16.msra.mxu0 %v2402_v19  ;;  %v997_v19 = vor.u32 %v996_v60, %v993_v57  ;;  %v1047_v22 = vshrl.u32 %v2801_v18, 16  ;;  %v1052_v46 = vrot.slane %v1050_v23, 5  ;;  %v1957_v57 = vld [vmem:[%s2557_s9 + $0x58] sm:$0x33]  ;;  %v2419_v60 = vld [vmem:[%s2997_s1 + $0x168] sm:$0xff]   ;;  %v2864_v3 = vrot.slane %v1064_v37, 5 }
  0x41   : > { %2177 = vmatpush3.bf16.msra.mxu1 %v2404_v28  ;;  %2126 = vmatprep.subr.bf16.mxu0 %v2405_v32  ;;  %v2812_v28 = vrot.slane %v1025_v17, 4  ;;  %v1973_v32 = vcombine.high %v2801_v18, %v2807_v27  ;;  %v2821_v35 = vrot.slane %v1011_v20, 4  ;;  %v1028_v6 = vshll.u32 %v1957_v57, 16  ;;  %v2005_v7 = vld [vmem:[%s2557_s9 + $0x28] sm:$0x33] }
  0x42   : > { %1472 = vmatprep.mubr.bf16.mxu1 %v2021_v30  ;;  %2178 = vmatprep.subr.bf16.mxu1 %v2407_v36  ;;  %v2415_v30 = vld [vmem:[%s2997_s1 + $0x158] sm:$0xff]   ;;  %v2823_v36 = vrot.slane %v1039_v21, 4  ;;  %v1049_v40 = vrot.slane %v1047_v22, 4  ;;  %v2007_v10 = vld [vmem:[%s2557_s9 + $0x48] sm:$0x33]  ;;  %v1042_v17 = vshll.u32 %v1959_v1, 16  ;;  %v1067_v24 = vor.u32 %v2864_v3, %v2840_v47 }
  0x43   : > { %v1963_v22 = vld [vmem:[%s2557_s9 + $0xb8] sm:$0x33]  ;;  %v2013_v57 = vld [vmem:[%s2557_s9 + $0xa8] sm:$0x33] }
  0x44   : > { %2127 = vmatpush3.bf16.msra.mxu0 %v2406_v34  ;;  %v2819_v34 = vrot.slane %v997_v19, 4  ;;  %v1053_v2 = vor.u32 %v1052_v46, %v1049_v40  ;;  %v2011_v19 = vld [vmem:[%s2557_s9 + $0x88] sm:$0x33]  ;;  %v2421_v40 = vld [vmem:[%s2997_s1 + $0x170] sm:$0xff]   ;;  %v1044_v47 = vrot.slane %v1042_v17, 5 }
  0x45   : > { %2179 = vmatpush3.bf16.msra.mxu1 %v2408_v43  ;;  %2240 = vmatprep.subr.bf16.mxu0 %v2409_v44  ;;  %v2835_v43 = vld [vmem:[%s2557_s9 + $0xd0] sm:$0xff]  ;;  %v1965_v56 = vld [vmem:[%s2557_s9 + $0xd8] sm:$0x33]  ;;  %v2017_v3 = vld [vmem:[%s2557_s9 + $0xe8] sm:$0x33] }
  0x46   : > { %2264 = vmatprep.subr.bf16.mxu1 %v2410_v51  ;;  %v1075_v58 = vshrl.u32 %v2835_v43, 16  ;;  %v2884_v23 = vrot.slane %v1053_v2, 4  ;;  %v1068_v2 = vrot.slane %v1067_v24, 4 }
  0x47   : > { %950 = vmatmul.mubr.bf16.vlgmr.msra.gmra.mrb[8].mxu0 %v1968_v25  ;;  %v1972_v25 = vcombine.low %v2801_v18, %v2807_v27  ;;  %v1537_v18 = vshll.u32 %v2007_v10, 16  ;;  %v1961_v27 = vld [vmem:[%s2557_s9 + $0x98] sm:$0x33]  ;;  %v1084_v10 = vshll.u32 %v1965_v56, 16 }
  0x48   : > { %1473 = vmatmul.mubr.bf16.vlgmr.msra.gmra.mrb[16].mxu1 %v2020_v48  ;;  %2241 = vmatpush3.bf16.msra.mxu0 %v2409_v44  ;;  %v2838_v44 = vld [vmem:[%s2557_s9 + $0x100] sm:$0xff]  ;;  %v2878_v21 = vrot.slane %v1075_v58, 4  ;;  %v1056_v46 = vshll.u32 %v1961_v27, 16  ;;  %v1070_v58 = vshll.u32 %v1963_v22, 16 }
  0x49   : > { %2265 = vmatpush3.bf16.msra.mxu1 %v2410_v51  ;;  %1480 = vmatprep.mubr.bf16.mxu1 %v2023_v53  ;;  %v2417_v48 = vld [vmem:[%s2997_s1 + $0x160] sm:$0xff]   ;;  %v2027_v49 = vcombine.high %v2717_v63, %v2838_v44  ;;  %v1078_v51 = vshll.u32 %v2835_v43, 16  ;;  %v1089_v53 = vshrl.u32 %v2846_v29, 16  ;;  %v1615_v5 = vshll.u32 %v2838_v44, 16 }
  0x4a   : > { %2266 = vmatprep.subr.bf16.mxu1 %v2412_v55  ;;  %957 = vmatprep.mubr.bf16.mxu0 %v1971_v4  ;;  %v1975_v4 = vcombine.high %v2835_v43, %v2846_v29  ;;  %v2026_v11 = vcombine.low %v2717_v63, %v2838_v44  ;;  %v1974_v63 = vcombine.low %v2835_v43, %v2846_v29  ;;  %v1539_v37 = vrot.slane %v1537_v18, 5 }
  0x4b   : > { %2242 = vmatprep.subr.bf16.mxu0 %v2411_v62  ;;  %v1091_v43 = vrot.slane %v1089_v53, 4  ;;  %v1072_v53 = vrot.slane %v1070_v58, 5  ;;  %v1045_v29 = vsel %vm2595_vm2, %v2823_v36, %v1044_v47  ;;  %v1617_v17 = vrot.slane %v1615_v5, 5 }
  0x4c   : > { %2243 = vmatpush3.bf16.msra.mxu0 %v2411_v62  ;;  %v1000_v62 = vshll.u32 %v1953_v38, 16  ;;  %v1058_v38 = vrot.slane %v1056_v46, 5 }
  0x4d   : > { %2267 = vmatpush3.bf16.msra.mxu1 %v2412_v55  ;;  %2244 = vmatprep.subr.bf16.mxu0 %v2413_v45  ;;  %v1612_v55 = vshrl.u32 %v2838_v44, 16 }
  0x4e   : > { %2268 = vmatprep.subr.bf16.mxu1 %v2414_v12  ;;  %v1002_v13 = vrot.slane %v1000_v62, 5 }
  0x4f   : > { %958 = vmatmul.mubr.bf16.gmra.mrb[12].mxu0 %v1970_v26  ;;  %v2424_v26 = vld [vmem:[%s2997_s1 + $0x238] sm:$0xff]   ;;  %v1614_v36 = vrot.slane %v1612_v55, 4 }
  0x50   : > { %1481 = vmatmul.mubr.bf16.gmra.mrb[20].mxu1 %v2022_v14  ;;  %2245 = vmatpush3.bf16.msra.mxu0 %v2413_v45  ;;  %v1016_v14 = vrot.slane %v1014_v0, 5  ;;  %v2015_v0 = vld [vmem:[%s2557_s9 + $0xc8] sm:$0x33] }
  0x51   : > { %2269 = vmatpush3.bf16.msra.mxu1 %v2414_v12  ;;  %1488 = vmatprep.mubr.bf16.mxu1 %v2025_v16  ;;  %v2422_v12 = vld [vmem:[%s2997_s1 + $0x230] sm:$0xff]   ;;  %v2009_v16 = vld [vmem:[%s2557_s9 + $0x68] sm:$0x33]  ;;  %v1618_v27 = vor.u32 %v1617_v17, %v1614_v36 }
  0x52   : > { %2270 = vmatprep.subr.bf16.mxu1 %v2416_v15  ;;  %965 = vmatprep.mubr.bf16.mxu0 %v1973_v32  ;;  %v1551_v20 = vshll.u32 %v2009_v16, 16  ;;  %v1030_v32 = vrot.slane %v1028_v6, 5  ;;  %v1579_v6 = vshll.u32 %v2013_v57, 16 }
  0x53   : > { %2246 = vmatprep.subr.bf16.mxu0 %v2415_v30 }
  0x54   : > { %2247 = vmatpush3.bf16.msra.mxu0 %v2415_v30  ;;  %v1003_v30 = vsel %vm2595_vm2, %v2819_v34, %v1002_v13  ;;  %v1565_v34 = vshll.u32 %v2011_v19, 16  ;;  %v1581_v13 = vrot.slane %v1579_v6, 5 }
  0x55   : > { %2271 = vmatpush3.bf16.msra.mxu1 %v2416_v15  ;;  %2248 = vmatprep.subr.bf16.mxu0 %v2417_v48  ;;  %v1523_v15 = vshll.u32 %v2005_v7, 16  ;;  %v2019_v7 = vld [vmem:[%s2557_s9 + $0x108] sm:$0x33] }
  0x56   : > { %2272 = vmatprep.subr.bf16.mxu1 %v2418_v39  ;;  %v1621_v18 = vshll.u32 %v2019_v7, 16 }
  0x57   : > { %966 = vmatmul.mubr.bf16.gmra.mrb[16].mxu0 %v1972_v25  ;;  %v1525_v45 = vrot.slane %v1523_v15, 5  ;;  %v1567_v25 = vrot.slane %v1565_v34, 5  ;;  %v1073_v15 = vsel %vm2595_vm2, %v1068_v2, %v1072_v53 }
  0x58   : > { %1489 = vmatmul.mubr.bf16.gmra.mrb[24].mxu1 %v2024_v41  ;;  %2249 = vmatpush3.bf16.msra.mxu0 %v2417_v48  ;;  %v1017_v41 = vsel %vm2595_vm2, %v2821_v35, %v1016_v14  ;;  %v1540_v48 = vsel %vm2595_vm2, %v2617_v8, %v1539_v37  ;;  %v1967_v8 = vld [vmem:[%s2557_s9 + $0xf8] sm:$0x33]  ;;  %v1607_v14 = vshll.u32 %v2017_v3, 16  ;;  %v1623_v22 = vrot.slane %v1621_v18, 5  ;;  %s2059_s9 = sshll.u32 %s3007_s12, 6 }
  0x59   : > { %2273 = vmatpush3.bf16.msra.mxu1 %v2418_v39  ;;  %1496 = vmatprep.mubr.bf16.mxu1 %v2027_v49  ;;  %v1553_v39 = vrot.slane %v1551_v20, 5  ;;  %v1080_v49 = vrot.slane %v1078_v51, 5  ;;  %v1992_v62 = vcombine.low %v1003_v30, %v1017_v41  ;;  %v1094_v51 = vrot.slane %v1092_v54, 5  ;;  %s2974_s7 = scalar_lea.vmem %s2999_s3, %s2059_s9 }
  0x5a   : > { %2274 = vmatprep.subr.bf16.mxu1 %v2420_v42  ;;  %973 = vmatprep.mubr.bf16.mxu0 %v1975_v4  ;;  %v1568_v1 = vsel %vm2595_vm2, %v2702_v52, %v1567_v25  ;;  %v1098_v52 = vshll.u32 %v1967_v8, 16  ;;  %v1619_v30 = vrot.slane %v1618_v27, 4 }
  0x5b   : > { %2250 = vmatprep.subr.bf16.mxu0 %v2419_v60  ;;  %v1081_v4 = vor.u32 %v1080_v49, %v2878_v21  ;;  %v1582_v21 = vsel %vm2595_vm2, %v2713_v61, %v1581_v13 }
  0x5c   : > { %2251 = vmatpush3.bf16.msra.mxu0 %v2419_v60  ;;  %v1031_v60 = vsel %vm2595_vm2, %v2812_v28, %v1030_v32  ;;  %v1059_v28 = vsel %vm2595_vm2, %v2884_v23, %v1058_v38  ;;  %v1100_v5 = vrot.slane %v1098_v52, 5  ;;  %v1624_v61 = vsel %vm2595_vm2, %v1619_v30, %v1623_v22 }
  0x5d   : > { %2275 = vmatpush3.bf16.msra.mxu1 %v2420_v42  ;;  %v1526_v42 = vsel %vm2595_vm2, %v2602_v59, %v1525_v45  ;;  %v1554_v59 = vsel %vm2595_vm2, %v2619_v9, %v1553_v39  ;;  %2252 = vmatprep.subr.bf16.mxu0 %v2421_v40  ;;  %v2423_v9 = vld [vmem:[%s2997_s1 + $0x178] sm:$0xff]   ;;  %v1993_v19 = vcombine.low %v1031_v60, %v1045_v29  ;;  %v1082_v20 = vrot.slane %v1081_v4, 4 }
  0x5e   : > { %2276 = vmatprep.subr.bf16.mxu1 %v2422_v12  ;;  %v2044_v35 = vcombine.low %v1526_v42, %v1540_v48  ;;  %v2045_v54 = vcombine.low %v1554_v59, %v1568_v1  ;;  %v1086_v45 = vrot.slane %v1084_v10, 5  ;;  %v1994_v23 = vcombine.low %v1059_v28, %v1073_v15 }
  0x5f   : > { %974 = vmatmul.mubr.bf16.gmra.mrb[20].mxu0 %v1974_v63  ;;  %v1609_v63 = vrot.slane %v1607_v14, 5 }
  0x60   : > { %1497 = vmatmul.mubr.bf16.gmra.mrb[28].mxu1 %v2026_v11  ;;  %v1593_v11 = vshll.u32 %v2015_v0, 16  ;;  %2253 = vmatpush3.bf16.msra.mxu0 %v2421_v40 }
  0x61   : > { %2277 = vmatpush3.bf16.msra.mxu1 %v2422_v12  ;;  %2280 = vmatprep.mubr.bf16.mxu1 %v2044_v35  ;;  %v1095_v12 = vor.u32 %v1094_v51, %v1091_v43 }
  0x62   : > { %2278 = vmatprep.subr.bf16.mxu1 %v2424_v26  ;;  %2256 = vmatprep.mubr.bf16.mxu0 %v1992_v62  ;;  %v1595_v16 = vrot.slane %v1593_v11, 5 }
  0x63   : > { %2254 = vmatprep.subr.bf16.mxu0 %v2423_v9  ;;  %v1096_v44 = vrot.slane %v1095_v12, 4 }
  0x64   : > { %v1596_v55 = vsel %vm2595_vm2, %v2748_v31, %v1595_v16  ;;  %2255 = vmatpush3.bf16.msra.mxu0 %v2423_v9  ;;  %v1087_v31 = vsel %vm2595_vm2, %v1082_v20, %v1086_v45 }
  0x65   : > { %2279 = vmatpush3.bf16.msra.mxu1 %v2424_v26  ;;  %v2046_v24 = vcombine.low %v1582_v21, %v1596_v55  ;;  %v1610_v26 = vsel %vm2595_vm2, %v2753_v33, %v1609_v63  ;;  %v1101_v32 = vsel %vm2595_vm2, %v1096_v44, %v1100_v5 }
  0x66   : > { %v2047_v37 = vcombine.low %v1610_v26, %v1624_v61  ;;  %v1995_v39 = vcombine.low %v1087_v31, %v1101_v32 }
  0x67   : > { %2257 = vmatmul.mubr.bf16.vlgmr.msra.gmra.mrb[0].mxu0 %v1993_v19 }
  0x68   : > { %2281 = vmatmul.mubr.bf16.vlgmr.msra.gmra.mrb[32].mxu1 %v2045_v54  ;;  %2260 = vmatprep.mubr.bf16.mxu0 %v1994_v23 }
  0x69   : > { %2284 = vmatprep.mubr.bf16.mxu1 %v2046_v24 }
  0x6f   : > { %2261 = vmatmul.mubr.bf16.gmra.mrb[4].mxu0 %v1995_v39 }
  0x70   : > { %2285 = vmatmul.mubr.bf16.gmra.mrb[36].mxu1 %v2047_v37 }
  0xfb   : > { %v2088_v40 = vpop.f32.mrb[0].mxu1 }
  0xfc   : > { %v2089_v41 = vpop.f32.mrb[1].mxu1 }
  0xfd   : > { %v2090_v33 = vadd.f32 %v2089_v41, %v2088_v40  ;;  %v2091_v42 = vpop.f32.mrb[2].mxu1 }
  0xfe   : > { %v2092_v34 = vpop.f32.mrb[3].mxu1 }
  0xff   : > { %v2093_v46 = vadd.f32 %v2092_v34, %v2091_v42 }
 0x103   : > { %v2094_v47 = vpop.f32.mrb[4].mxu1 }
 0x104   : > { %v2095_v48 = vpop.f32.mrb[5].mxu1 }
 0x105   : > { %v2096_v58 = vadd.f32 %v2095_v48, %v2094_v47  ;;  %v2097_v49 = vpop.f32.mrb[6].mxu1 }
 0x106   : > { %v2098_v35 = vpop.f32.mrb[7].mxu1 }
 0x107   : > { %v2099_v59 = vadd.f32 %v2098_v35, %v2097_v49 }
 0x10b   : > { %v2100_v25 = vpop.f32.mrb[8].mxu1 }
 0x10c   : > { %v2101_v38 = vpop.f32.mrb[9].mxu1 }
 0x10d   : > { %v2102_v50 = vadd.f32 %v2101_v38, %v2100_v25  ;;  %v2103_v56 = vpop.f32.mrb[10].mxu1 }
 0x10e   : > { %v2104_v57 = vpop.f32.mrb[11].mxu1 }
 0x10f   : > { %v2105_v62 = vadd.f32 %v2104_v57, %v2103_v56 }
 0x113   : > { %v2106_v8 = vpop.f32.mrb[12].mxu1 }
 0x114   : > { %v2107_v43 = vpop.f32.mrb[13].mxu1 }
 0x115   : > { %v2108_v51 = vadd.f32 %v2107_v43, %v2106_v8  ;;  %v2109_v0 = vpop.f32.mrb[14].mxu1 }
 0x116   : > { %v2110_v9 = vpop.f32.mrb[15].mxu1 }
 0x117   : > { %v2111_v60 = vadd.f32 %v2110_v9, %v2109_v0 }
 0x11a   : > { %v2128_v4 = vpop.f32.mrb[8].mxu0 }
 0x11b   : > { %v2180_v1 = vpop.f32.mrb[16].mxu1  ;;  %v2129_v6 = vpop.f32.mrb[9].mxu0 }
 0x11c   : > { %v2181_v2 = vpop.f32.mrb[17].mxu1  ;;  %v2130_v7 = vadd.f32 %v2129_v6, %v2128_v4  ;;  %v2131_v28 = vpop.f32.mrb[10].mxu0 }
 0x11d   : > { %v2958_v53 = vadd.f32 %v2181_v2, %v2180_v1  ;;  %v2183_v3 = vpop.f32.mrb[18].mxu1  ;;  %v2132_v10 = vpop.f32.mrb[11].mxu0 }
 0x11e   : > { %v2184_v29 = vpop.f32.mrb[19].mxu1  ;;  %v2133_v11 = vadd.f32 %v2132_v10, %v2131_v28  ;;  %v2292_v13 = vadd.f32 %v2130_v7, %v2090_v33  ;;  %v2056_v28 = vld [vmem:[%s2998_s2] ss:$0 sm:$0xff] }
 0x11f   : > { %v2960_v54 = vadd.f32 %v2184_v29, %v2183_v3 }
 0x120   : > { %v2300_v16 = vadd.f32 %v2133_v11, %v2093_v46 }
 0x122   : > { %v2134_v18 = vpop.f32.mrb[12].mxu0 }
 0x123   : > { %v2186_v52 = vpop.f32.mrb[20].mxu1  ;;  %v2135_v19 = vpop.f32.mrb[13].mxu0 }
 0x124   : > { %v2187_v12 = vpop.f32.mrb[21].mxu1  ;;  %v2136_v20 = vadd.f32 %v2135_v19, %v2134_v18  ;;  %v2137_v21 = vpop.f32.mrb[14].mxu0 }
 0x125   : > { %v2188_v14 = vadd.f32 %v2187_v12, %v2186_v52  ;;  %v2189_v36 = vpop.f32.mrb[22].mxu1  ;;  %v2138_v63 = vpop.f32.mrb[15].mxu0 }
 0x126   : > { %v2190_v15 = vpop.f32.mrb[23].mxu1  ;;  %v2139_v55 = vadd.f32 %v2138_v63, %v2137_v21  ;;  %v2288_v22 = vadd.f32 %v2136_v20, %v2096_v58 }
 0x127   : > { %v2191_v17 = vadd.f32 %v2190_v15, %v2189_v36 }
 0x128   : > { %v2296_v24 = vadd.f32 %v2139_v55, %v2099_v59 }
 0x12a   : > { %v2140_v30 = vpop.f32.mrb[16].mxu0 }
 0x12b   : > { %v2192_v45 = vpop.f32.mrb[24].mxu1  ;;  %v2141_v61 = vpop.f32.mrb[17].mxu0 }
 0x12c   : > { %v2193_v27 = vpop.f32.mrb[25].mxu1  ;;  %v2142_v31 = vadd.f32 %v2141_v61, %v2140_v30  ;;  %v2143_v32 = vpop.f32.mrb[18].mxu0 }
 0x12d   : > { %v2962_v23 = vadd.f32 %v2193_v27, %v2192_v45  ;;  %v2195_v44 = vpop.f32.mrb[26].mxu1  ;;  %v2144_v37 = vpop.f32.mrb[19].mxu0 }
 0x12e   : > { %v2196_v5 = vpop.f32.mrb[27].mxu1  ;;  %v2145_v40 = vadd.f32 %v2144_v37, %v2143_v32  ;;  %v2308_v33 = vadd.f32 %v2142_v31, %v2102_v50 }
 0x12f   : > { %v2964_v26 = vadd.f32 %v2196_v5, %v2195_v44 }
 0x130   : > { %v2316_v47 = vadd.f32 %v2145_v40, %v2105_v62 }
 0x132   : > { %v2146_v58 = vpop.f32.mrb[20].mxu0 }
 0x133   : > { %v2198_v39 = vpop.f32.mrb[28].mxu1  ;;  %v2147_v49 = vpop.f32.mrb[21].mxu0 }
 0x134   : > { %v2199_v41 = vpop.f32.mrb[29].mxu1  ;;  %v2148_v35 = vadd.f32 %v2147_v49, %v2146_v58  ;;  %v2149_v59 = vpop.f32.mrb[22].mxu0 }
 0x135   : > { %v2200_v42 = vadd.f32 %v2199_v41, %v2198_v39  ;;  %v2201_v34 = vpop.f32.mrb[30].mxu1  ;;  %v2150_v25 = vpop.f32.mrb[23].mxu0 }
 0x136   : > { %v2202_v46 = vpop.f32.mrb[31].mxu1  ;;  %v2151_v56 = vadd.f32 %v2150_v25, %v2149_v59  ;;  %v2304_v8 = vadd.f32 %v2148_v35, %v2108_v51 }
 0x137   : > { %v2203_v48 = vadd.f32 %v2202_v46, %v2201_v34 }
 0x138   : > { %v2312_v9 = vadd.f32 %v2151_v56, %v2111_v60 }
 0x13a   : > { %v2258_v1 = vpop.f32.mrb[0].mxu0 }
 0x13b   : > { %v2282_v38 = vpop.f32.mrb[32].mxu1  ;;  %v2289_v50 = vadd.f32 %v2288_v22, %v2258_v1  ;;  %v1216_v2 = vpop.f32.mrb[1].mxu0 }
 0x13c   : > { %v1739_v57 = vpop.f32.mrb[33].mxu1  ;;  %v2293_v3 = vadd.f32 %v2292_v13, %v1216_v2  ;;  %v2259_v29 = vpop.f32.mrb[2].mxu0 }
 0x13d   : > { %v2283_v43 = vpop.f32.mrb[34].mxu1  ;;  %v2297_v62 = vadd.f32 %v2296_v24, %v2259_v29  ;;  %v2290_v4 = vadd.f32 %v2289_v50, %v2188_v14  ;;  %v1219_v6 = vpop.f32.mrb[3].mxu0 }
 0x13e   : > { %v1742_v0 = vpop.f32.mrb[35].mxu1  ;;  %v2301_v10 = vadd.f32 %v2300_v16, %v1219_v6  ;;  %v2294_v51 = vadd.f32 %v2293_v3, %v2958_v53 }
 0x13f   : > { %v2291_v11 = vadd.f32 %v2290_v4, %v2282_v38  ;;  %v2298_v60 = vadd.f32 %v2297_v62, %v2191_v17 }
 0x140   : > { %v2295_v13 = vadd.f32 %v2294_v51, %v1739_v57  ;;  %v2302_v14 = vadd.f32 %v2301_v10, %v2960_v54 }
 0x141   : > { %v1787_v15 = vadd.f32 %v2291_v11, %v2056_v28  ;;  %v2299_v16 = vadd.f32 %v2298_v60, %v2283_v43 }
 0x142   : > { %v1785_v53 = vadd.f32 %v2295_v13, %v2056_v28  ;;  %v2303_v18 = vadd.f32 %v2302_v14, %v1742_v0  ;;  %v2262_v19 = vpop.f32.mrb[4].mxu0 }
 0x143   : > { %v2286_v7 = vpop.f32.mrb[36].mxu1  ;;  %1795 = vst [vmem:[%s2974_s7 + $0x10] sm:$0xff] %v1787_v15  ;;  %v1788_v17 = vadd.f32 %v2299_v16, %v2056_v28  ;;  %v2305_v20 = vadd.f32 %v2304_v8, %v2262_v19  ;;  %v1232_v21 = vpop.f32.mrb[5].mxu0 }
 0x144   : > { %v1755_v52 = vpop.f32.mrb[37].mxu1  ;;  %1793 = vst [vmem:[%s2974_s7] sm:$0xff] %v1785_v53  ;;  %v1786_v63 = vadd.f32 %v2303_v18, %v2056_v28  ;;  %v2309_v45 = vadd.f32 %v2308_v33, %v1232_v21  ;;  %v2263_v55 = vpop.f32.mrb[6].mxu0 }
 0x145   : > { %v2287_v12 = vpop.f32.mrb[38].mxu1  ;;  %1796 = vst [vmem:[%s2974_s7 + $0x18] sm:$0xff] %v1788_v17  ;;  %v2313_v27 = vadd.f32 %v2312_v9, %v2263_v55  ;;  %v2306_v54 = vadd.f32 %v2305_v20, %v2200_v42  ;;  %v1235_v22 = vpop.f32.mrb[7].mxu0 }
 0x146   : > { %v1758_v36 = vpop.f32.mrb[39].mxu1  ;;  %1794 = vst [vmem:[%s2974_s7 + $0x8] sm:$0xff] %v1786_v63  ;;  %v2317_v44 = vadd.f32 %v2316_v47, %v1235_v22  ;;  %v2310_v5 = vadd.f32 %v2309_v45, %v2962_v23 }
 0x147   : > { %v2307_v24 = vadd.f32 %v2306_v54, %v2286_v7  ;;  %v2314_v30 = vadd.f32 %v2313_v27, %v2203_v48 }
 0x148   : > { %v2311_v61 = vadd.f32 %v2310_v5, %v1755_v52  ;;  %v2318_v31 = vadd.f32 %v2317_v44, %v2964_v26 }
 0x149   : > { %v1791_v32 = vadd.f32 %v2307_v24, %v2056_v28  ;;  %v2315_v37 = vadd.f32 %v2314_v30, %v2287_v12 }
 0x14a   : > { %v1789_v39 = vadd.f32 %v2311_v61, %v2056_v28  ;;  %v2319_v40 = vadd.f32 %v2318_v31, %v1758_v36 }
 0x14b   : > { %1799 = vst [vmem:[%s2974_s7 + $0x30] sm:$0xff] %v1791_v32  ;;  %v1792_v41 = vadd.f32 %v2315_v37, %v2056_v28 }
 0x14c   : > { %1797 = vst [vmem:[%s2974_s7 + $0x20] sm:$0xff] %v1789_v39  ;;  %v1790_v33 = vadd.f32 %v2319_v40, %v2056_v28 }
 0x14d   : > { %1800 = vst [vmem:[%s2974_s7 + $0x38] sm:$0xff] %v1792_v41 }
 0x14e   : > { %1798 = vst [vmem:[%s2974_s7 + $0x28] sm:$0xff] %v1790_v33 }
 0x14f PF: > { %s13_s14 = sadd.s32 1, %s2447_s14   ;;  %s3002_s12 = smov %s2443_s13 }
 0x150   : > { %p10_p5 = scmp.ge.s32.totalorder %s13_s14, 4   ;;  %s3003_s13 = smov %s3005_s15 }
 0x152   :  { %12 = sbr.rel (!%p10_p5) target bundleno = 2 (0x2), region = 70 }

// kernel: residual_conv_forward.7
= control target key start
LH: loop header
LB: loop body
LE: loop exit
PB: predicated region body
PF: predicated region fallthrough
CT: control target
= control target key end

     0   :  { %s7370_s15 = smov 0   ;;  %s7372_s16 = smov 0   ;;  %s9242_s0 = inlined_call_operand.vmem [shape: bf16[2,18,24,128], index: 0, kind: input, shape index: {}]   ;;  %s9243_s1 = inlined_call_operand.vmem [shape: bf16[1152,128], index: 1, kind: input, shape index: {}]   ;;  %s9244_s2 = inlined_call_operand.vmem [shape: f32[1,128], index: 2, kind: input, shape index: {}]   ;;  %s9245_s3 = inlined_call_operand.vmem [shape: bf16[2,16,16,128], index: 3, kind: output, shape index: {0}]   ;;  %s9246_s4 = inlined_call_operand.vmem [shape: f32[2,2,128], index: 4, kind: output, shape index: {1}]  }
   0x1   :  { %s7374_s17 = smov 0  }
   0x2 LB: > { %s24_s18 = sadd.s32 1, %s7339_s16  ;;  %p5562_p0 = scmp.ge.s32.totalorder %s7343_s17, 1  ;;  %s7343_s17 = sphi %s7374_s17, %s15_s17   ;;  %s7339_s16 = sphi %s7372_s16, %s9314_s16   ;;  %s7335_s15 = sphi %s7370_s15, %s9313_s15  }
   0x3   : > { %p25_p1 = scmp.ge.s32.totalorder %s24_s18, 2  ;;  %p198_p2 = scmp.lt.s32.totalorder %s7343_s17, 3 }
   0x5   : > { %s9316_s18 = smov (%p25_p1, %s24_s18), 0  ;;  %p199_p3 = pnand %p5562_p0, %p198_p2 }
   0x7   : > { %202 = sbr.rel (%p199_p3) target bundleno = 613 (0x265), region = 32 }
   0xe   : > { %v7131_v0 = vld [vmem:[%s9243_s1 + $0x40] sm:$0xff]   ;;  %p241_p4 = scmp.lt.s32.totalorder %s7335_s15, 1  ;;  %v7133_v2 = vld [vmem:[%s9243_s1 + $0x48] sm:$0xff]   ;;  %v7135_v4 = vld [vmem:[%s9243_s1 + $0x50] sm:$0xff]   ;;  %vm333_vm0 = vsmask.f32 3328 }
   0xf   : > { %v7132_v1 = vld [vmem:[%s9243_s1 + $0x100] sm:$0xff]   ;;  %6402 = vmatprep.subr.bf16.mxu1 %v7131_v0  ;;  %v7134_v3 = vld [vmem:[%s9243_s1 + $0x108] sm:$0xff]   ;;  %v7136_v5 = vld [vmem:[%s9243_s1 + $0x110] sm:$0xff]   ;;  %vm334_vm1 = vsmask.f32 7440  ;;  %vm1362_vm3 = vcmask 1042432  }
  0x10   : > { %6594 = vmatprep.subr.bf16.mxu0 %v7132_v1  ;;  %6403 = vmatpush3.bf16.msra.mxu1 %v7131_v0  ;;  %s9318_s15 = smov (!%p241_p4, %s7335_s15), 1  ;;  %v7137_v6 = vld [vmem:[%s9243_s1 + $0x58] sm:$0xff]   ;;  %v7139_v8 = vld [vmem:[%s9243_s1 + $0x60] sm:$0xff]   ;;  %v7141_v10 = vld [vmem:[%s9243_s1 + $0x68] sm:$0xff]   ;;  %vm1363_vm4 = vcmask 1046532   ;;  %vm5407_vm6 = vcmask 1040384  }
  0x11   : > { %6595 = vmatpush3.bf16.msra.mxu0 %v7132_v1  ;;  %6404 = vmatprep.subr.bf16.mxu1 %v7133_v2  ;;  %v7138_v7 = vld [vmem:[%s9243_s1 + $0x118] sm:$0xff]   ;;  %s7106_s9 = smul.u32 216, %s9318_s15  ;;  %v7140_v9 = vld [vmem:[%s9243_s1 + $0x120] sm:$0xff]   ;;  %v7142_v11 = vld [vmem:[%s9243_s1 + $0x128] sm:$0xff]   ;;  %s6058_s10 = sshll.u32 %s9318_s15, 7 }
  0x12   : > { %6596 = vmatprep.subr.bf16.mxu0 %v7134_v3  ;;  %v7143_v25 = vld [vmem:[%s9243_s1 + $0x70] sm:$0xff]   ;;  %v7145_v36 = vld [vmem:[%s9243_s1 + $0x78] sm:$0xff]   ;;  %vm7456_vm2 = vmor %vm333_vm0, %vm334_vm1  ;;  %s9176_s13 = scalar_lea.vmem %s9245_s3, %s6058_s10  ;;  %s5566_s14 = sshll.u32 %s9318_s15, 1 }
  0x13   : > { %s7424_s20 = scalar_lea.vmem %s9242_s0, %s7106_s9  ;;  %v7144_v30 = vld [vmem:[%s9243_s1 + $0x130] sm:$0xff]   ;;  %v7146_v51 = vld [vmem:[%s9243_s1 + $0x138] sm:$0xff]   ;;  %vm7702_vm5 = vmor %vm1362_vm3, %vm1363_vm4  ;;  %s267_s22 = scalar_lea.vmem %s9246_s4, %s5566_s14 }
  0x14   : > { %6405 = vmatpush3.bf16.msra.mxu1 %v7133_v2  ;;  %v269_v12 = vld [vmem:[%s7424_s20] sm:$0xf]  ;;  %v270_v13 = vld [vmem:[%s7424_s20 + $0x4] sm:$0xf]  ;;  %v317_v14 = vld [vmem:[%s7424_s20 + $0x8] sm:$0x1] }
  0x15   : > { %6597 = vmatpush3.bf16.msra.mxu0 %v7134_v3  ;;  %6406 = vmatprep.subr.bf16.mxu1 %v7135_v4  ;;  %v337_v15 = vshrl.u32 %v269_v12, 16  ;;  %v340_v16 = vshll.u32 %v269_v12, 16  ;;  %v346_v17 = vshll.u32 %v270_v13, 16  ;;  %v350_v18 = vshrl.u32 %v270_v13, 16  ;;  %v5711_v20 = vld [vmem:[%s7424_s20 + $0xc] sm:$0xf] }
  0x16   : > { %6598 = vmatprep.subr.bf16.mxu0 %v7136_v5  ;;  %v356_v19 = vshll.u32 %v317_v14, 16  ;;  %v7437_v23 = vld [vmem:[%s7424_s20 + $0x10] sm:$0xf]  ;;  %v7440_v24 = vld [vmem:[%s7424_s20 + $0x14] sm:$0x1]  ;;  %v2233_v29 = vshrl.u32 %v5711_v20, 16 }
  0x17   : > { %v339_v21 = vrot.slane %v337_v15, 4  ;;  %v342_v22 = vrot.slane %v340_v16, 5  ;;  %v348_v26 = vrot.slane %v346_v17, 5  ;;  %v352_v27 = vrot.slane %v350_v18, 4  ;;  %v271_v35 = vld [vmem:[%s7424_s20 + $0xc] sm:$0xf] }
  0x18   : > { %6407 = vmatpush3.bf16.msra.mxu1 %v7135_v4  ;;  %v358_v28 = vrot.slane %v356_v19, 5  ;;  %v2236_v32 = vshll.u32 %v5711_v20, 16  ;;  %v2242_v33 = vshll.u32 %v7437_v23, 16  ;;  %v2246_v34 = vshrl.u32 %v7437_v23, 16  ;;  %v272_v42 = vld [vmem:[%s7424_s20 + $0x10] sm:$0xf] }
  0x19   : > { %6599 = vmatpush3.bf16.msra.mxu0 %v7136_v5  ;;  %6408 = vmatprep.subr.bf16.mxu1 %v7137_v6  ;;  %v343_v31 = vor.u32 %v342_v22, %v339_v21  ;;  %v353_v38 = vor.u32 %v352_v27, %v348_v26  ;;  %v2235_v39 = vrot.slane %v2233_v29, 4  ;;  %v2252_v40 = vshll.u32 %v7440_v24, 16  ;;  %v318_v55 = vld [vmem:[%s7424_s20 + $0x14] sm:$0x1]  ;;  %v5714_v57 = vld [vmem:[%s7424_s20 + $0x18] sm:$0xf] }
  0x1a   : > { %6600 = vmatprep.subr.bf16.mxu0 %v7138_v7  ;;  %v3006_v41 = vrot.slane %v7440_v24, 5  ;;  %v2238_v44 = vrot.slane %v2236_v32, 5  ;;  %v2244_v45 = vrot.slane %v2242_v33, 5  ;;  %v2248_v46 = vrot.slane %v2246_v34, 4  ;;  %v7473_v62 = vld [vmem:[%s7424_s20 + $0x1c] sm:$0xf] }
  0x1b   : > { %v344_v43 = vrot.slane %v343_v31, 4  ;;  %v354_v47 = vrot.slane %v353_v38, 4  ;;  %v2254_v48 = vrot.slane %v2252_v40, 5  ;;  %v361_v49 = vshrl.u32 %v271_v35, 16  ;;  %v7147_v3 = vld [vmem:[%s9243_s1] sm:$0xff]  }
  0x1c   : > { %6409 = vmatpush3.bf16.msra.mxu1 %v7137_v6  ;;  %v364_v50 = vshll.u32 %v271_v35, 16  ;;  %v2239_v53 = vor.u32 %v2238_v44, %v2235_v39  ;;  %v2249_v54 = vor.u32 %v2248_v46, %v2244_v45  ;;  %v370_v56 = vshll.u32 %v272_v42, 16  ;;  %v7481_v4 = vld [vmem:[%s9243_s1 + $0x140] sm:$0xff]   ;;  %v273_v21 = vld [vmem:[%s7424_s20 + $0x18] sm:$0xf]  ;;  %v7150_v46 = vld [vmem:[%s9243_s1 + $0x8] sm:$0xff]  }
  0x1d   : > { %6601 = vmatpush3.bf16.msra.mxu0 %v7138_v7  ;;  %6410 = vmatprep.subr.bf16.mxu1 %v7139_v8  ;;  %v349_v52 = vsel %vm7456_vm2, %v344_v43, %v348_v26  ;;  %v359_v58 = vsel %vm7456_vm2, %v354_v47, %v358_v28  ;;  %v363_v59 = vrot.slane %v361_v49, 4  ;;  %v374_v61 = vshrl.u32 %v272_v42, 16  ;;  %v274_v28 = vld [vmem:[%s7424_s20 + $0x1c] sm:$0xf]  ;;  %v319_v33 = vld [vmem:[%s7424_s20 + $0x20] sm:$0x1] }
  0x1e   : > { %6602 = vmatprep.subr.bf16.mxu0 %v7140_v9  ;;  %v366_v60 = vrot.slane %v364_v50, 5  ;;  %v5567_v63 = vcombine.low %v349_v52, %v359_v58  ;;  %v2240_v0 = vrot.slane %v2239_v53, 4  ;;  %v2250_v1 = vrot.slane %v2249_v54, 4  ;;  %v5717_v39 = vld [vmem:[%s7424_s20 + $0x24] sm:$0xf] }
  0x1f   : > { %v372_v2 = vrot.slane %v370_v56, 5  ;;  %v376_v6 = vrot.slane %v374_v61, 4  ;;  %v380_v7 = vshll.u32 %v318_v55, 16  ;;  %v2260_v12 = vshll.u32 %v5714_v57, 16  ;;  %v275_v52 = vld [vmem:[%s7424_s20 + $0x24] sm:$0xf] }
  0x20   : > { %6411 = vmatpush3.bf16.msra.mxu1 %v7139_v8  ;;  %v367_v5 = vor.u32 %v366_v60, %v363_v59  ;;  %v7484_v8 = vld [vmem:[%s7424_s20 + $0x20] sm:$0x1]  ;;  %6418 = vmatprep.mubr.bf16.mxu1 %v5567_v63  ;;  %v2266_v19 = vshll.u32 %v7473_v62, 16  ;;  %v2270_v20 = vshrl.u32 %v7473_v62, 16  ;;  %v3010_v27 = vrot.slane %v7473_v62, 5  ;;  %v7149_v63 = vld [vmem:[%s9243_s1 + $0x148] sm:$0xff]  }
  0x21   : > { %6603 = vmatpush3.bf16.msra.mxu0 %v7140_v9  ;;  %6412 = vmatprep.subr.bf16.mxu1 %v7141_v10  ;;  %v2245_v9 = vsel %vm7456_vm2, %v2240_v0, %v2244_v45  ;;  %v377_v15 = vor.u32 %v376_v6, %v372_v2  ;;  %v382_v16 = vrot.slane %v380_v7, 5  ;;  %v2262_v18 = vrot.slane %v2260_v12, 5  ;;  %v7509_v45 = vld [vmem:[%s7424_s20 + $0x28] sm:$0xf] }
  0x22   : > { %6604 = vmatprep.subr.bf16.mxu0 %v7142_v11  ;;  %v368_v14 = vrot.slane %v367_v5, 4  ;;  %v2276_v26 = vshll.u32 %v7484_v8, 16  ;;  %v2272_v31 = vrot.slane %v2270_v20, 4  ;;  %v3013_v32 = vrot.slane %v7484_v8, 5  ;;  %v276_v5 = vld [vmem:[%s7424_s20 + $0x28] sm:$0xf] }
  0x23   : > { %v385_v38 = vshrl.u32 %v273_v21, 16  ;;  %v388_v44 = vshll.u32 %v273_v21, 16  ;;  %v398_v49 = vshrl.u32 %v274_v28, 16  ;;  %v404_v50 = vshll.u32 %v319_v33, 16  ;;  %v7540_v33 = vld [vmem:[%s7424_s20 + $0x34] sm:$0xf] }
  0x24   : > { %6413 = vmatpush3.bf16.msra.mxu1 %v7141_v10  ;;  %v2255_v10 = vsel %vm7456_vm2, %v2250_v1, %v2254_v48  ;;  %v373_v22 = vsel %vm7456_vm2, %v368_v14, %v372_v2  ;;  %v2278_v35 = vrot.slane %v2276_v26, 5  ;;  %v394_v48 = vshll.u32 %v274_v28, 16 }
  0x25   : > { %6605 = vmatpush3.bf16.msra.mxu0 %v7142_v11  ;;  %6414 = vmatprep.subr.bf16.mxu1 %v7143_v25  ;;  %v2257_v11 = vshrl.u32 %v5714_v57, 16  ;;  %v5759_v13 = vcombine.low %v2245_v9, %v2255_v10  ;;  %v387_v47 = vrot.slane %v385_v38, 4  ;;  %v390_v55 = vrot.slane %v388_v44, 5 }
  0x26   : > { %6606 = vmatprep.subr.bf16.mxu0 %v7144_v30  ;;  %v2281_v56 = vshrl.u32 %v5717_v39, 16  ;;  %v396_v57 = vrot.slane %v394_v48, 5  ;;  %v400_v58 = vrot.slane %v398_v49, 4  ;;  %v406_v59 = vrot.slane %v404_v50, 5  ;;  %v7152_v48 = vld [vmem:[%s9243_s1 + $0x158] sm:$0xff]  }
  0x27   : > { %v2259_v17 = vrot.slane %v2257_v11, 4  ;;  %6610 = vmatprep.mubr.bf16.mxu0 %v5759_v13  ;;  %v2284_v60 = vshll.u32 %v5717_v39, 16  ;;  %v391_v0 = vor.u32 %v390_v55, %v387_v47  ;;  %v2290_v2 = vshll.u32 %v7509_v45, 16  ;;  %v320_v11 = vld [vmem:[%s7424_s20 + $0x2c] sm:$0x1] }
  0x28   : > { %6415 = vmatpush3.bf16.msra.mxu1 %v7143_v25  ;;  %v378_v25 = vrot.slane %v377_v15, 4  ;;  %v2283_v1 = vrot.slane %v2281_v56, 4  ;;  %v401_v7 = vor.u32 %v400_v58, %v396_v57  ;;  %v2294_v10 = vshrl.u32 %v7509_v45, 16 }
  0x29   : > { %6607 = vmatpush3.bf16.msra.mxu0 %v7144_v30  ;;  %6416 = vmatprep.subr.bf16.mxu1 %v7145_v36  ;;  %v2263_v29 = vor.u32 %v2262_v18, %v2259_v17  ;;  %v2268_v30 = vrot.slane %v2266_v19, 5  ;;  %v2286_v9 = vrot.slane %v2284_v60, 5  ;;  %v392_v12 = vrot.slane %v391_v0, 4  ;;  %v7159_v60 = vld [vmem:[%s9243_s1 + $0x20] sm:$0xff]  }
  0x2a   : > { %6608 = vmatprep.subr.bf16.mxu0 %v7146_v51  ;;  %v383_v34 = vsel %vm7456_vm2, %v378_v25, %v382_v16  ;;  %v2292_v13 = vrot.slane %v2290_v2, 5  ;;  %v409_v15 = vshrl.u32 %v275_v52, 16  ;;  %v5720_v16 = vld [vmem:[%s7424_s20 + $0x30] sm:$0xf]  ;;  %v402_v17 = vrot.slane %v401_v7, 4 }
  0x2b   : > { %v5568_v40 = vcombine.low %v373_v22, %v383_v34  ;;  %v2264_v42 = vrot.slane %v2263_v29, 4  ;;  %v2273_v43 = vor.u32 %v2272_v31, %v2268_v30  ;;  %v2287_v18 = vor.u32 %v2286_v9, %v2283_v1  ;;  %v7156_v34 = vld [vmem:[%s9243_s1 + $0x18] sm:$0xff]  }
  0x2c   : > { %6417 = vmatpush3.bf16.msra.mxu1 %v7145_v36  ;;  %v7505_v36 = vrot.slane %v3010_v27, 4  ;;  %v2296_v19 = vrot.slane %v2294_v10, 4  ;;  %v412_v20 = vshll.u32 %v275_v52, 16  ;;  %v397_v21 = vsel %vm7456_vm2, %v392_v12, %v396_v57  ;;  %v321_v2 = vld [vmem:[%s7424_s20 + $0x38] sm:$0x1] }
  0x2d   : > { %6609 = vmatpush3.bf16.msra.mxu0 %v7146_v51  ;;  %6450 = vmatprep.subr.bf16.mxu1 %v7147_v3  ;;  %v7515_v51 = vld [vmem:[%s7424_s20 + $0x2c] sm:$0x1]  ;;  %v2269_v53 = vsel %vm7456_vm2, %v2264_v42, %v2268_v30  ;;  %v2274_v54 = vrot.slane %v2273_v43, 4  ;;  %v411_v25 = vrot.slane %v409_v15, 4  ;;  %v418_v26 = vshll.u32 %v276_v5, 16 }
  0x2e   : > { %6642 = vmatprep.subr.bf16.mxu0 %v7481_v4  ;;  %v2300_v14 = vshll.u32 %v7515_v51, 16  ;;  %v407_v28 = vsel %vm7456_vm2, %v402_v17, %v406_v59  ;;  %v2288_v29 = vrot.slane %v2287_v18, 4  ;;  %v2297_v30 = vor.u32 %v2296_v19, %v2292_v13  ;;  %v278_v59 = vld [vmem:[%s7424_s20 + $0x34] sm:$0xf]  ;;  %v5723_v9 = vld [vmem:[%s7424_s20 + $0x3c] sm:$0xf] }
  0x2f   : > { %6419 = vmatmul.mubr.bf16.vlgmr.msra.gmra.mrb[0].mxu1 %v5568_v40  ;;  %v2279_v61 = vsel %vm7456_vm2, %v2274_v54, %v2278_v35  ;;  %v414_v31 = vrot.slane %v412_v20, 5  ;;  %v5569_v35 = vcombine.low %v397_v21, %v407_v28  ;;  %v420_v38 = vrot.slane %v418_v26, 5  ;;  %v277_v54 = vld [vmem:[%s7424_s20 + $0x30] sm:$0xf]  ;;  %v7574_v19 = vld [vmem:[%s7424_s20 + $0x40] sm:$0xf] }
  0x30   : > { %6451 = vmatpush3.bf16.msra.mxu1 %v7147_v3  ;;  %v7153_v3 = vld [vmem:[%s9243_s1 + $0x10] sm:$0xff]   ;;  %v5760_v6 = vcombine.low %v2269_v53, %v2279_v61  ;;  %v2302_v22 = vrot.slane %v2300_v14, 5  ;;  %v422_v39 = vshrl.u32 %v276_v5, 16  ;;  %v428_v40 = vshll.u32 %v320_v11, 16  ;;  %v7161_v14 = vld [vmem:[%s9243_s1 + $0x28] sm:$0xff]   ;;  %v7154_v20 = vld [vmem:[%s9243_s1 + $0x160] sm:$0xff]  }
  0x31   : > { %6452 = vmatprep.subr.bf16.mxu1 %v7150_v46  ;;  %v2293_v42 = vsel %vm7456_vm2, %v2288_v29, %v2292_v13  ;;  %v2298_v43 = vrot.slane %v2297_v30, 4  ;;  %v415_v44 = vor.u32 %v414_v31, %v411_v25  ;;  %v2305_v47 = vshrl.u32 %v5720_v16, 16  ;;  %6422 = vmatprep.mubr.bf16.mxu1 %v5569_v35  ;;  %v7582_v28 = vld [vmem:[%s7424_s20 + $0x44] sm:$0x1]  ;;  %v7163_v35 = vld [vmem:[%s9243_s1 + $0x30] sm:$0xff]  }
  0x32   : > { %6611 = vmatmul.mubr.bf16.vlgmr.msra.gmra.mrb[0].mxu0 %v5760_v6  ;;  %v424_v49 = vrot.slane %v422_v39, 4  ;;  %v430_v50 = vrot.slane %v428_v40, 5  ;;  %v2308_v52 = vshll.u32 %v5720_v16, 16  ;;  %v2314_v53 = vshll.u32 %v7540_v33, 16 }
  0x33   : > { %6643 = vmatpush3.bf16.msra.mxu0 %v7481_v4  ;;  %v7151_v4 = vld [vmem:[%s9243_s1 + $0x150] sm:$0xff]   ;;  %v2303_v55 = vsel %vm7456_vm2, %v2298_v43, %v2302_v22  ;;  %v416_v56 = vrot.slane %v415_v44, 4  ;;  %v2307_v57 = vrot.slane %v2305_v47, 4  ;;  %v2318_v58 = vshrl.u32 %v7540_v33, 16 }
  0x34   : > { %6453 = vmatpush3.bf16.msra.mxu1 %v7150_v46  ;;  %6644 = vmatprep.subr.bf16.mxu0 %v7149_v63  ;;  %v7551_v46 = vld [vmem:[%s7424_s20 + $0x38] sm:$0x1]  ;;  %v5761_v61 = vcombine.low %v2293_v42, %v2303_v55  ;;  %v2310_v0 = vrot.slane %v2308_v52, 5  ;;  %v2316_v1 = vrot.slane %v2314_v53, 5  ;;  %v433_v7 = vshrl.u32 %v277_v54, 16 }
  0x35   : > { %6454 = vmatprep.subr.bf16.mxu1 %v7153_v3  ;;  %v421_v5 = vsel %vm7456_vm2, %v416_v56, %v420_v38  ;;  %v2324_v6 = vshll.u32 %v7551_v46, 16  ;;  %v436_v12 = vshll.u32 %v277_v54, 16  ;;  %v442_v13 = vshll.u32 %v278_v59, 16  ;;  %v280_v55 = vld [vmem:[%s7424_s20 + $0x40] sm:$0xf] }
  0x36   : > { %6614 = vmatprep.mubr.bf16.mxu0 %v5761_v61  ;;  %v2311_v11 = vor.u32 %v2310_v0, %v2307_v57  ;;  %v435_v17 = vrot.slane %v433_v7, 4  ;;  %v446_v18 = vshrl.u32 %v278_v59, 16  ;;  %v2329_v40 = vshrl.u32 %v5723_v9, 16 }
  0x37   : > { %6645 = vmatpush3.bf16.msra.mxu0 %v7149_v63  ;;  %v425_v63 = vor.u32 %v424_v49, %v420_v38  ;;  %v2326_v16 = vrot.slane %v2324_v6, 5  ;;  %v438_v25 = vrot.slane %v436_v12, 5  ;;  %v444_v26 = vrot.slane %v442_v13, 5 }
  0x38   : > { %6455 = vmatpush3.bf16.msra.mxu1 %v7153_v3  ;;  %6646 = vmatprep.subr.bf16.mxu0 %v7151_v4  ;;  %v2320_v3 = vrot.slane %v2318_v58, 4  ;;  %v2312_v22 = vrot.slane %v2311_v11, 4  ;;  %v448_v31 = vrot.slane %v446_v18, 4  ;;  %v2332_v42 = vshll.u32 %v5723_v9, 16  ;;  %v5726_v9 = vld [vmem:[%s7424_s20 + $0x48] sm:$0xf] }
  0x39   : > { %6456 = vmatprep.subr.bf16.mxu1 %v7156_v34  ;;  %v426_v10 = vrot.slane %v425_v63, 4  ;;  %v439_v39 = vor.u32 %v438_v25, %v435_v17  ;;  %v2338_v49 = vshll.u32 %v7574_v19, 16  ;;  %v2331_v53 = vrot.slane %v2329_v40, 4  ;;  %v322_v63 = vld [vmem:[%s7424_s20 + $0x44] sm:$0x1] }
  0x3a   : > { %v2321_v15 = vor.u32 %v2320_v3, %v2316_v1  ;;  %v2317_v38 = vsel %vm7456_vm2, %v2312_v22, %v2316_v1  ;;  %v449_v44 = vor.u32 %v448_v31, %v444_v26  ;;  %v2334_v54 = vrot.slane %v2332_v42, 5  ;;  %v7615_v22 = vld [vmem:[%s7424_s20 + $0x50] sm:$0x1]  ;;  %v7158_v31 = vld [vmem:[%s9243_s1 + $0x178] sm:$0xff]  }
  0x3b   : > { %6647 = vmatpush3.bf16.msra.mxu0 %v7151_v4  ;;  %v431_v21 = vsel %vm7456_vm2, %v426_v10, %v430_v50  ;;  %v452_v4 = vshll.u32 %v321_v2, 16  ;;  %v440_v52 = vrot.slane %v439_v39, 4  ;;  %v2340_v57 = vrot.slane %v2338_v49, 5  ;;  %v7165_v2 = vld [vmem:[%s9243_s1 + $0x38] sm:$0xff]  }
  0x3c   : > { %6457 = vmatpush3.bf16.msra.mxu1 %v7156_v34  ;;  %6648 = vmatprep.subr.bf16.mxu0 %v7152_v48  ;;  %v5570_v29 = vcombine.low %v421_v5, %v431_v21  ;;  %v2322_v30 = vrot.slane %v2321_v15, 4  ;;  %v279_v34 = vld [vmem:[%s7424_s20 + $0x3c] sm:$0xf]  ;;  %v450_v56 = vrot.slane %v449_v44, 4  ;;  %v2342_v58 = vshrl.u32 %v7574_v19, 16  ;;  %v7157_v15 = vld [vmem:[%s9243_s1 + $0x170] sm:$0xff]  }
  0x3d   : > { %6458 = vmatprep.subr.bf16.mxu1 %v7159_v60  ;;  %v454_v47 = vrot.slane %v452_v4, 5  ;;  %v2348_v59 = vshll.u32 %v7582_v28, 16  ;;  %v2335_v61 = vor.u32 %v2334_v54, %v2331_v53  ;;  %v457_v0 = vshrl.u32 %v279_v34, 16  ;;  %v7626_v4 = vld [vmem:[%s9243_s1 + $0x80] sm:$0xff]   ;;  %v282_v53 = vld [vmem:[%s7424_s20 + $0x4c] sm:$0xf] }
  0x3e   : > { %6423 = vmatmul.mubr.bf16.gmra.mrb[4].mxu1 %v5570_v29  ;;  %v2327_v43 = vsel %vm7456_vm2, %v2322_v30, %v2326_v16  ;;  %v460_v1 = vshll.u32 %v279_v34, 16  ;;  %v2344_v3 = vrot.slane %v2342_v58, 4  ;;  %v466_v7 = vshll.u32 %v280_v55, 16  ;;  %v281_v30 = vld [vmem:[%s7424_s20 + $0x48] sm:$0xf] }
  0x3f   : > { %6649 = vmatpush3.bf16.msra.mxu0 %v7152_v48  ;;  %v5762_v50 = vcombine.low %v2317_v38, %v2327_v43  ;;  %v7155_v48 = vld [vmem:[%s9243_s1 + $0x168] sm:$0xff]   ;;  %v455_v5 = vsel %vm7456_vm2, %v450_v56, %v454_v47  ;;  %v2350_v6 = vrot.slane %v2348_v59, 5  ;;  %v2336_v11 = vrot.slane %v2335_v61, 4  ;;  %v323_v54 = vld [vmem:[%s7424_s20 + $0x50] sm:$0x1] }
  0x40   : > { %6459 = vmatpush3.bf16.msra.mxu1 %v7159_v60  ;;  %6650 = vmatprep.subr.bf16.mxu0 %v7154_v20  ;;  %v445_v60 = vsel %vm7456_vm2, %v440_v52, %v444_v26  ;;  %v459_v12 = vrot.slane %v457_v0, 4  ;;  %v462_v13 = vrot.slane %v460_v1, 5  ;;  %v2345_v16 = vor.u32 %v2344_v3, %v2340_v57  ;;  %v5729_v58 = vld [vmem:[%s7424_s20 + $0x54] sm:$0xf]  ;;  %v7640_v0 = vld [vmem:[%s7424_s20 + $0x58] sm:$0xf] }
  0x41   : > { %6460 = vmatprep.subr.bf16.mxu1 %v7161_v14  ;;  %6615 = vmatmul.mubr.bf16.gmra.mrb[4].mxu0 %v5762_v50  ;;  %v5571_v10 = vcombine.low %v445_v60, %v455_v5  ;;  %v468_v17 = vrot.slane %v466_v7, 5  ;;  %v470_v18 = vshrl.u32 %v280_v55, 16  ;;  %v476_v21 = vshll.u32 %v322_v63, 16 }
  0x42   : > { %v463_v25 = vor.u32 %v462_v13, %v459_v12  ;;  %v2353_v26 = vshrl.u32 %v5726_v9, 16  ;;  %v2356_v29 = vshll.u32 %v5726_v9, 16  ;;  %v2346_v34 = vrot.slane %v2345_v16, 4 }
  0x43   : > { %6651 = vmatpush3.bf16.msra.mxu0 %v7154_v20  ;;  %6426 = vmatprep.mubr.bf16.mxu1 %v5571_v10  ;;  %v2341_v20 = vsel %vm7456_vm2, %v2336_v11, %v2340_v57  ;;  %v478_v38 = vrot.slane %v476_v21, 5  ;;  %v2372_v52 = vshll.u32 %v7615_v22, 16  ;;  %v481_v61 = vshrl.u32 %v281_v30, 16 }
  0x44   : > { %6461 = vmatpush3.bf16.msra.mxu1 %v7161_v14  ;;  %v7609_v14 = vld [vmem:[%s7424_s20 + $0x4c] sm:$0xf]  ;;  %6652 = vmatprep.subr.bf16.mxu0 %v7155_v48  ;;  %v464_v40 = vrot.slane %v463_v25, 4  ;;  %v2355_v42 = vrot.slane %v2353_v26, 4  ;;  %v2358_v43 = vrot.slane %v2356_v29, 5  ;;  %v2351_v47 = vsel %vm7456_vm2, %v2346_v34, %v2350_v6  ;;  %v7645_v6 = vld [vmem:[%s9243_s1 + $0x180] sm:$0xff]  }
  0x45   : > { %6462 = vmatprep.subr.bf16.mxu1 %v7163_v35  ;;  %v2362_v39 = vshll.u32 %v7609_v14, 16  ;;  %v2366_v44 = vshrl.u32 %v7609_v14, 16  ;;  %v5763_v55 = vcombine.low %v2341_v20, %v2351_v47  ;;  %v2374_v60 = vrot.slane %v2372_v52, 5  ;;  %v7652_v20 = vld [vmem:[%s7424_s20 + $0x5c] sm:$0x1] }
  0x46   : > { %v2359_v56 = vor.u32 %v2358_v43, %v2355_v42  ;;  %v484_v63 = vshll.u32 %v281_v30, 16  ;;  %v494_v3 = vshrl.u32 %v282_v53, 16  ;;  %v483_v9 = vrot.slane %v481_v61, 4  ;;  %v284_v43 = vld [vmem:[%s7424_s20 + $0x58] sm:$0xf] }
  0x47   : > { %6653 = vmatpush3.bf16.msra.mxu0 %v7155_v48  ;;  %v2364_v50 = vrot.slane %v2362_v39, 5  ;;  %v469_v48 = vsel %vm7456_vm2, %v464_v40, %v468_v17  ;;  %v2368_v57 = vrot.slane %v2366_v44, 4  ;;  %6618 = vmatprep.mubr.bf16.mxu0 %v5763_v55  ;;  %v500_v11 = vshll.u32 %v323_v54, 16  ;;  %v5732_v52 = vld [vmem:[%s7424_s20 + $0x60] sm:$0xf] }
  0x48   : > { %6463 = vmatpush3.bf16.msra.mxu1 %v7163_v35  ;;  %v472_v35 = vrot.slane %v470_v18, 4  ;;  %6654 = vmatprep.subr.bf16.mxu0 %v7157_v15  ;;  %v2360_v1 = vrot.slane %v2359_v56, 4  ;;  %v486_v10 = vrot.slane %v484_v63, 5  ;;  %v496_v18 = vrot.slane %v494_v3, 4 }
  0x49   : > { %6464 = vmatprep.subr.bf16.mxu1 %v7165_v2  ;;  %v2369_v5 = vor.u32 %v2368_v57, %v2364_v50  ;;  %v502_v21 = vrot.slane %v500_v11, 5  ;;  %v2377_v25 = vshrl.u32 %v5729_v58, 16  ;;  %v2380_v29 = vshll.u32 %v5729_v58, 16 }
  0x4a   : > { %v473_v49 = vor.u32 %v472_v35, %v468_v17  ;;  %v2365_v13 = vsel %vm7456_vm2, %v2360_v1, %v2364_v50  ;;  %v487_v17 = vor.u32 %v486_v10, %v483_v9  ;;  %v2386_v30 = vshll.u32 %v7640_v0, 16  ;;  %v283_v35 = vld [vmem:[%s7424_s20 + $0x54] sm:$0xf]  ;;  %v324_v50 = vld [vmem:[%s7424_s20 + $0x5c] sm:$0x1] }
  0x4b   : > { %6655 = vmatpush3.bf16.msra.mxu0 %v7157_v15  ;;  %v2370_v15 = vrot.slane %v2369_v5, 4  ;;  %v2390_v34 = vshrl.u32 %v7640_v0, 16  ;;  %v2379_v42 = vrot.slane %v2377_v25, 4  ;;  %v505_v55 = vshrl.u32 %v283_v35, 16  ;;  %v7680_v25 = vld [vmem:[%s7424_s20 + $0x60] sm:$0xf] }
  0x4c   : > { %6465 = vmatpush3.bf16.msra.mxu1 %v7165_v2  ;;  %v474_v59 = vrot.slane %v473_v49, 4  ;;  %v490_v2 = vshll.u32 %v282_v53, 16  ;;  %6656 = vmatprep.subr.bf16.mxu0 %v7158_v31  ;;  %v488_v39 = vrot.slane %v487_v17, 4  ;;  %v2388_v44 = vrot.slane %v2386_v30, 5  ;;  %v7676_v17 = vld [vmem:[%s7424_s20 + $0x68] sm:$0x1] }
  0x4d   : > { %6498 = vmatprep.subr.bf16.mxu1 %v7626_v4  ;;  %v2375_v26 = vsel %vm7456_vm2, %v2370_v15, %v2374_v60  ;;  %v2392_v47 = vrot.slane %v2390_v34, 4  ;;  %v2396_v49 = vshll.u32 %v7652_v20, 16  ;;  %v7667_v60 = vld [vmem:[%s7424_s20 + $0x64] sm:$0xf]  ;;  %v507_v63 = vrot.slane %v505_v55, 4 }
  0x4e   : > { %v479_v7 = vsel %vm7456_vm2, %v474_v59, %v478_v38  ;;  %v492_v16 = vrot.slane %v490_v2, 5  ;;  %v5764_v38 = vcombine.low %v2365_v13, %v2375_v26  ;;  %v514_v59 = vshll.u32 %v284_v43, 16 }
  0x4f   : > { %v5572_v12 = vcombine.low %v469_v48, %v479_v7  ;;  %6657 = vmatpush3.bf16.msra.mxu0 %v7158_v31  ;;  %v2382_v31 = vrot.slane %v2380_v29, 5  ;;  %v508_v48 = vshll.u32 %v283_v35, 16  ;;  %v2393_v57 = vor.u32 %v2392_v47, %v2388_v44  ;;  %v7683_v35 = vld [vmem:[%s7424_s20 + $0x64] sm:$0xf] }
  0x50   : > { %6690 = vmatprep.subr.bf16.mxu0 %v7645_v6  ;;  %v497_v40 = vor.u32 %v496_v18, %v492_v16  ;;  %6619 = vmatmul.mubr.bf16.gmra.mrb[8].mxu0 %v5764_v38  ;;  %v493_v53 = vsel %vm7456_vm2, %v488_v39, %v492_v16  ;;  %v2398_v58 = vrot.slane %v2396_v49, 5  ;;  %v518_v5 = vshrl.u32 %v284_v43, 16  ;;  %v325_v43 = vld [vmem:[%s7424_s20 + $0x68] sm:$0x1] }
  0x51   : > { %6427 = vmatmul.mubr.bf16.gmra.mrb[8].mxu1 %v5572_v12  ;;  %v2383_v56 = vor.u32 %v2382_v31, %v2379_v42  ;;  %v510_v1 = vrot.slane %v508_v48, 5  ;;  %v2394_v7 = vrot.slane %v2393_v57, 4  ;;  %v516_v9 = vrot.slane %v514_v59, 5 }
  0x52   : > { %v498_v54 = vrot.slane %v497_v40, 4  ;;  %v520_v11 = vrot.slane %v518_v5, 4  ;;  %v524_v12 = vshll.u32 %v324_v50, 16  ;;  %v2401_v13 = vshrl.u32 %v5732_v52, 16  ;;  %v5783_v50 = vld [vmem:[%s7424_s20 + $0xc] sm:$0xe] }
  0x53   : > { %v2384_v3 = vrot.slane %v2383_v56, 4  ;;  %v511_v10 = vor.u32 %v510_v1, %v507_v63  ;;  %v2399_v16 = vsel %vm7456_vm2, %v2394_v7, %v2398_v58  ;;  %v2404_v18 = vshll.u32 %v5732_v52, 16  ;;  %v7698_v5 = vld [vmem:[%s7424_s20 + $0x6c] sm:$0xf] }
  0x54   : > { %v503_v61 = vsel %vm7456_vm2, %v498_v54, %v502_v21  ;;  %v2410_v21 = vshll.u32 %v7667_v60, 16  ;;  %v521_v30 = vor.u32 %v520_v11, %v516_v9  ;;  %v526_v34 = vrot.slane %v524_v12, 5 }
  0x55   : > { %v5573_v2 = vcombine.low %v493_v53, %v503_v61  ;;  %v2389_v15 = vsel %vm7456_vm2, %v2384_v3, %v2388_v44  ;;  %v512_v29 = vrot.slane %v511_v10, 4  ;;  %v2403_v38 = vrot.slane %v2401_v13, 4 }
  0x56   : > { %v5765_v26 = vcombine.low %v2389_v15, %v2399_v16  ;;  %v2406_v39 = vrot.slane %v2404_v18, 5  ;;  %v2412_v40 = vrot.slane %v2410_v21, 5  ;;  %v2414_v42 = vshrl.u32 %v7667_v60, 16  ;;  %v7710_v21 = vld [vmem:[%s7424_s20 + $0x70] sm:$0xf] }
  0x57   : > { %6430 = vmatprep.mubr.bf16.mxu1 %v5573_v2  ;;  %v517_v31 = vsel %vm7456_vm2, %v512_v29, %v516_v9  ;;  %v522_v44 = vrot.slane %v521_v30, 4  ;;  %v2420_v47 = vshll.u32 %v7676_v17, 16  ;;  %v529_v49 = vshrl.u32 %v7680_v25, 16  ;;  %v7249_v9 = vld [vmem:[%s7424_s20 + $0xb4] sm:$0xff]  }
  0x58   : > { %6622 = vmatprep.mubr.bf16.mxu0 %v5765_v26  ;;  %v2407_v52 = vor.u32 %v2406_v39, %v2403_v38  ;;  %v2416_v53 = vrot.slane %v2414_v42, 4  ;;  %v532_v54 = vshll.u32 %v7680_v25, 16  ;;  %v538_v55 = vshll.u32 %v7683_v35, 16 }
  0x59   : > { %v527_v48 = vsel %vm7456_vm2, %v522_v44, %v526_v34  ;;  %v2422_v56 = vrot.slane %v2420_v47, 5  ;;  %v531_v57 = vrot.slane %v529_v49, 4  ;;  %v542_v58 = vshrl.u32 %v7683_v35, 16  ;;  %v7721_v47 = vld [vmem:[%s7424_s20 + $0x78] sm:$0xf] }
  0x5a   : > { %v5574_v59 = vcombine.low %v517_v31, %v527_v48  ;;  %v2408_v61 = vrot.slane %v2407_v52, 4  ;;  %v2417_v63 = vor.u32 %v2416_v53, %v2412_v40  ;;  %v534_v1 = vrot.slane %v532_v54, 5  ;;  %v7732_v54 = vld [vmem:[%s7424_s20 + $0x7c] sm:$0xf] }
  0x5b   : > { %v540_v2 = vrot.slane %v538_v55, 5  ;;  %v544_v3 = vrot.slane %v542_v58, 4  ;;  %v548_v7 = vshll.u32 %v325_v43, 16  ;;  %v5799_v10 = vrot.slane %v5783_v50, 9  ;;  %v327_v58 = vld [vmem:[%s7424_s20 + $0x80] sm:$0x1] }
  0x5c   : > { %6431 = vmatmul.mubr.bf16.gmra.mrb[12].mxu1 %v5574_v59  ;;  %v2413_v11 = vsel %vm7456_vm2, %v2408_v61, %v2412_v40  ;;  %v2418_v12 = vrot.slane %v2417_v63, 4  ;;  %v535_v13 = vor.u32 %v534_v1, %v531_v57  ;;  %v3003_v15 = vrot.slane %v7437_v23, 5  ;;  %v326_v40 = vld [vmem:[%s7424_s20 + $0x74] sm:$0x1]  ;;  %v5784_v23 = vld [vmem:[%s7424_s20 + $0x18] sm:$0xe] }
  0x5d   : > { %v545_v16 = vor.u32 %v544_v3, %v540_v2  ;;  %v550_v18 = vrot.slane %v548_v7, 5  ;;  %v553_v26 = vshrl.u32 %v7698_v5, 16  ;;  %v556_v29 = vshll.u32 %v7698_v5, 16 }
  0x5e   : > { %v2423_v30 = vsel %vm7456_vm2, %v2418_v12, %v2422_v56  ;;  %v536_v34 = vrot.slane %v535_v13, 4  ;;  %v3004_v38 = vsel %vm7702_vm5, %v5799_v10, %v3003_v15  ;;  %v3005_v39 = vrot.slane %v3003_v15, 4  ;;  %v5785_v13 = vld [vmem:[%s7424_s20 + $0x24] sm:$0xe] }
  0x5f   : > { %v5766_v42 = vcombine.low %v2413_v11, %v2423_v30  ;;  %v546_v43 = vrot.slane %v545_v16, 4  ;;  %v555_v31 = vrot.slane %v553_v26, 4  ;;  %v558_v44 = vrot.slane %v556_v29, 5  ;;  %v7754_v16 = vld [vmem:[%s7424_s20 + $0x84] sm:$0xf]  ;;  %v7162_v29 = vld [vmem:[%s9243_s1 + $0x188] sm:$0xff]  }
  0x60   : > { %v541_v49 = vsel %vm7456_vm2, %v536_v34, %v540_v2  ;;  %v3007_v50 = vsel %vm7702_vm5, %v3005_v39, %v3006_v41  ;;  %v562_v52 = vshll.u32 %v7710_v21, 16  ;;  %v566_v53 = vshrl.u32 %v7710_v21, 16 }
  0x61   : > { %6623 = vmatmul.mubr.bf16.gmra.mrb[12].mxu0 %v5766_v42  ;;  %v551_v55 = vsel %vm7456_vm2, %v546_v43, %v550_v18  ;;  %v5815_v48 = vcombine.low %v3004_v38, %v3007_v50  ;;  %v559_v56 = vor.u32 %v558_v44, %v555_v31  ;;  %v572_v57 = vshll.u32 %v326_v40, 16  ;;  %v7762_v40 = vld [vmem:[%s7424_s20 + $0x88] sm:$0xf]  ;;  %v328_v31 = vld [vmem:[%s7424_s20 + $0x8c] sm:$0x1] }
  0x62   : > { %v5575_v59 = vcombine.low %v541_v49, %v551_v55  ;;  %v564_v24 = vrot.slane %v562_v52, 5  ;;  %v568_v61 = vrot.slane %v566_v53, 4  ;;  %v5800_v63 = vrot.slane %v5784_v23, 9 }
  0x63   : > { %6658 = vmatprep.mubr.bf16.mxu0 %v5815_v48  ;;  %v560_v41 = vrot.slane %v559_v56, 4  ;;  %v574_v1 = vrot.slane %v572_v57, 5  ;;  %v3014_v2 = vsel %vm7702_vm5, %v7505_v36, %v3013_v32  ;;  %v577_v3 = vshrl.u32 %v7721_v47, 16 }
  0x64   : > { %6434 = vmatprep.mubr.bf16.mxu1 %v5575_v59  ;;  %v569_v7 = vor.u32 %v568_v61, %v564_v24  ;;  %v3011_v10 = vsel %vm7702_vm5, %v5800_v63, %v3010_v27  ;;  %v580_v11 = vshll.u32 %v7721_v47, 16  ;;  %v586_v12 = vshll.u32 %v7732_v54, 16 }
  0x65   : > { %v565_v8 = vsel %vm7456_vm2, %v560_v41, %v564_v24  ;;  %v5816_v15 = vcombine.low %v3011_v10, %v3014_v2  ;;  %v579_v32 = vrot.slane %v577_v3, 4  ;;  %v590_v36 = vshrl.u32 %v7732_v54, 16  ;;  %v7783_v2 = vld [vmem:[%s7424_s20 + $0x90] sm:$0xf]  ;;  %v7786_v3 = vld [vmem:[%s7424_s20 + $0x94] sm:$0xf] }
  0x66   : > { %v570_v62 = vrot.slane %v569_v7, 4  ;;  %v582_v18 = vrot.slane %v580_v11, 5  ;;  %v588_v26 = vrot.slane %v586_v12, 5  ;;  %v596_v27 = vshll.u32 %v327_v58, 16 }
  0x67   : > { %v592_v30 = vrot.slane %v590_v36, 4  ;;  %v5801_v34 = vrot.slane %v5785_v13, 9  ;;  %v3017_v38 = vrot.slane %v7509_v45, 5  ;;  %v3020_v39 = vrot.slane %v7515_v51, 5  ;;  %v5786_v45 = vld [vmem:[%s7424_s20 + $0x30] sm:$0xe] }
  0x68   : > { %v575_v23 = vsel %vm7456_vm2, %v570_v62, %v574_v1  ;;  %v583_v42 = vor.u32 %v582_v18, %v579_v32  ;;  %v598_v43 = vrot.slane %v596_v27, 5  ;;  %v601_v44 = vshrl.u32 %v7754_v16, 16  ;;  %v329_v62 = vld [vmem:[%s7424_s20 + $0x98] sm:$0x1] }
  0x69   : > { %v5576_v49 = vcombine.low %v565_v8, %v575_v23  ;;  %6659 = vmatmul.mubr.bf16.vlgmr.msra.gmra.mrb[0].mxu0 %v5816_v15  ;;  %v593_v50 = vor.u32 %v592_v30, %v588_v26  ;;  %v3018_v52 = vsel %vm7702_vm5, %v5801_v34, %v3017_v38  ;;  %v3019_v53 = vrot.slane %v3017_v38, 4  ;;  %v7166_v30 = vld [vmem:[%s9243_s1 + $0x198] sm:$0xff]  }
  0x6a   : > { %6691 = vmatpush3.bf16.msra.mxu0 %v7645_v6  ;;  %v584_v51 = vrot.slane %v583_v42, 4  ;;  %v603_v55 = vrot.slane %v601_v44, 4  ;;  %v604_v48 = vshll.u32 %v7754_v16, 16  ;;  %v610_v56 = vshll.u32 %v7762_v40, 16  ;;  %v7164_v6 = vld [vmem:[%s9243_s1 + $0x190] sm:$0xff]  }
  0x6b   : > { %6435 = vmatmul.mubr.bf16.gmra.mrb[16].mxu1 %v5576_v49  ;;  %v594_v57 = vrot.slane %v593_v50, 4  ;;  %v3021_v58 = vsel %vm7702_vm5, %v3019_v53, %v3020_v39  ;;  %v614_v59 = vshrl.u32 %v7762_v40, 16  ;;  %v620_v24 = vshll.u32 %v328_v31, 16  ;;  %6692 = vmatprep.subr.bf16.mxu0 %v7162_v29  ;;  %v5787_v38 = vld [vmem:[%s7424_s20 + $0x3c] sm:$0xe] }
  0x6c   : > { %v589_v61 = vsel %vm7456_vm2, %v584_v51, %v588_v26  ;;  %v5817_v63 = vcombine.low %v3018_v52, %v3021_v58  ;;  %v606_v41 = vrot.slane %v604_v48, 5  ;;  %v612_v1 = vrot.slane %v610_v56, 5  ;;  %v7804_v31 = vld [vmem:[%s7424_s20 + $0x9c] sm:$0xf]  ;;  %v7813_v48 = vld [vmem:[%s7424_s20 + $0xa0] sm:$0xf] }
  0x6d   : > { %v599_v7 = vsel %vm7456_vm2, %v594_v57, %v598_v43  ;;  %v616_v10 = vrot.slane %v614_v59, 4  ;;  %v622_v11 = vrot.slane %v620_v24, 5  ;;  %v5802_v12 = vrot.slane %v5786_v45, 9  ;;  %v7170_v56 = vld [vmem:[%s9243_s1 + $0x1a0] sm:$0xff]  }
  0x6e   : > { %v5577_v13 = vcombine.low %v589_v61, %v599_v7  ;;  %6662 = vmatprep.mubr.bf16.mxu0 %v5817_v63  ;;  %v607_v8 = vor.u32 %v606_v41, %v603_v55  ;;  %v3024_v15 = vrot.slane %v7540_v33, 5  ;;  %v3027_v32 = vrot.slane %v7551_v46, 5  ;;  %6693 = vmatpush3.bf16.msra.mxu0 %v7162_v29  ;;  %v330_v61 = vld [vmem:[%s7424_s20 + $0xa4] sm:$0x1] }
  0x6f   : > { %v617_v36 = vor.u32 %v616_v10, %v612_v1  ;;  %v625_v18 = vshrl.u32 %v7783_v2, 16  ;;  %v628_v26 = vshll.u32 %v7783_v2, 16  ;;  %v634_v27 = vshll.u32 %v7786_v3, 16  ;;  %6694 = vmatprep.subr.bf16.mxu0 %v7164_v6 }
  0x70   : > { %6438 = vmatprep.mubr.bf16.mxu1 %v5577_v13  ;;  %v608_v34 = vrot.slane %v607_v8, 4  ;;  %v3025_v33 = vsel %vm7702_vm5, %v5802_v12, %v3024_v15  ;;  %v3026_v46 = vrot.slane %v3024_v15, 4  ;;  %v638_v29 = vshrl.u32 %v7786_v3, 16  ;;  %v5788_v15 = vld [vmem:[%s7424_s20 + $0x48] sm:$0xe] }
  0x71   : > { %v618_v39 = vrot.slane %v617_v36, 4  ;;  %v627_v23 = vrot.slane %v625_v18, 4  ;;  %v630_v42 = vrot.slane %v628_v26, 5  ;;  %v636_v43 = vrot.slane %v634_v27, 5  ;;  %v7838_v27 = vld [vmem:[%s7424_s20 + $0xa8] sm:$0xf] }
  0x72   : > { %v613_v44 = vsel %vm7456_vm2, %v608_v34, %v612_v1  ;;  %v3028_v49 = vsel %vm7702_vm5, %v3026_v46, %v3027_v32  ;;  %v640_v50 = vrot.slane %v638_v29, 4  ;;  %v644_v52 = vshll.u32 %v329_v62, 16  ;;  %6695 = vmatpush3.bf16.msra.mxu0 %v7164_v6  ;;  %v7174_v32 = vld [vmem:[%s9243_s1 + $0x1a8] sm:$0xff]  }
  0x73   : > { %v623_v53 = vsel %vm7456_vm2, %v618_v39, %v622_v11  ;;  %v5818_v45 = vcombine.low %v3025_v33, %v3028_v49  ;;  %v631_v51 = vor.u32 %v630_v42, %v627_v23  ;;  %v5803_v55 = vrot.slane %v5787_v38, 9  ;;  %6696 = vmatprep.subr.bf16.mxu0 %v7166_v30  ;;  %v7841_v29 = vld [vmem:[%s7424_s20 + $0xac] sm:$0xf] }
  0x74   : > { %v5578_v57 = vcombine.low %v613_v44, %v623_v53  ;;  %v641_v58 = vor.u32 %v640_v50, %v636_v43  ;;  %v646_v59 = vrot.slane %v644_v52, 5  ;;  %v3031_v24 = vrot.slane %v7574_v19, 5  ;;  %v5789_v53 = vld [vmem:[%s7424_s20 + $0x54] sm:$0xe] }
  0x75   : > { %6663 = vmatmul.mubr.bf16.gmra.mrb[4].mxu0 %v5818_v45  ;;  %v632_v6 = vrot.slane %v631_v51, 4  ;;  %v3034_v63 = vrot.slane %v7582_v28, 5  ;;  %v649_v41 = vshrl.u32 %v7804_v31, 16  ;;  %v652_v1 = vshll.u32 %v7804_v31, 16  ;;  %v7178_v45 = vld [vmem:[%s9243_s1 + $0x1b0] sm:$0xff]  }
  0x76   : > { %6439 = vmatmul.mubr.bf16.gmra.mrb[20].mxu1 %v5578_v57  ;;  %v642_v7 = vrot.slane %v641_v58, 4  ;;  %v3032_v10 = vsel %vm7702_vm5, %v5803_v55, %v3031_v24  ;;  %v3033_v11 = vrot.slane %v3031_v24, 4  ;;  %v658_v12 = vshll.u32 %v7813_v48, 16  ;;  %6697 = vmatpush3.bf16.msra.mxu0 %v7166_v30 }
  0x77   : > { %v637_v19 = vsel %vm7456_vm2, %v632_v6, %v636_v43  ;;  %v651_v13 = vrot.slane %v649_v41, 4  ;;  %v654_v28 = vrot.slane %v652_v1, 5  ;;  %v662_v8 = vshrl.u32 %v7813_v48, 16  ;;  %6698 = vmatprep.subr.bf16.mxu0 %v7170_v56  ;;  %v331_v43 = vld [vmem:[%s7424_s20 + $0xb0] sm:$0x1] }
  0x78   : > { %v647_v36 = vsel %vm7456_vm2, %v642_v7, %v646_v59  ;;  %v3035_v62 = vsel %vm7702_vm5, %v3033_v11, %v3034_v63  ;;  %v660_v18 = vrot.slane %v658_v12, 5  ;;  %v668_v26 = vshll.u32 %v330_v61, 16  ;;  %v7861_v41 = vld [vmem:[%s7424_s20 + $0xb4] sm:$0xf]  ;;  %v7866_v12 = vld [vmem:[%s7424_s20 + $0xb8] sm:$0xf] }
  0x79   : > { %v5579_v30 = vcombine.low %v637_v19, %v647_v36  ;;  %v5819_v34 = vcombine.low %v3032_v10, %v3035_v62  ;;  %v655_v33 = vor.u32 %v654_v28, %v651_v13  ;;  %v664_v46 = vrot.slane %v662_v8, 4  ;;  %v332_v19 = vld [vmem:[%s7424_s20 + $0xbc] sm:$0x1] }
  0x7a   : > { %v670_v38 = vrot.slane %v668_v26, 5  ;;  %v5804_v39 = vrot.slane %v5788_v15, 9  ;;  %v3038_v23 = vrot.slane %v7609_v14, 5  ;;  %v3041_v42 = vrot.slane %v7615_v22, 5  ;;  %6699 = vmatpush3.bf16.msra.mxu0 %v7170_v56  ;;  %v7182_v13 = vld [vmem:[%s9243_s1 + $0x1b8] sm:$0xff]  }
  0x7b   : > { %6442 = vmatprep.mubr.bf16.mxu1 %v5579_v30  ;;  %6666 = vmatprep.mubr.bf16.mxu0 %v5819_v34  ;;  %v656_v44 = vrot.slane %v655_v33, 4  ;;  %v665_v49 = vor.u32 %v664_v46, %v660_v18  ;;  %v673_v50 = vshrl.u32 %v7838_v27, 16  ;;  %v676_v52 = vshll.u32 %v7838_v27, 16  ;;  %v5790_v30 = vld [vmem:[%s7424_s20 + $0x60] sm:$0xe] }
  0x7c   : > { %v3039_v14 = vsel %vm7702_vm5, %v5804_v39, %v3038_v23  ;;  %v3040_v22 = vrot.slane %v3038_v23, 4  ;;  %v682_v51 = vshll.u32 %v7841_v29, 16  ;;  %v686_v55 = vshrl.u32 %v7841_v29, 16  ;;  %6700 = vmatprep.subr.bf16.mxu0 %v7174_v32  ;;  %v5736_v39 = vld [vmem:[%s7424_s20 + $0x70] sm:$0xf] }
  0x7d   : > { %v661_v56 = vsel %vm7456_vm2, %v656_v44, %v660_v18  ;;  %v666_v57 = vrot.slane %v665_v49, 4  ;;  %v675_v58 = vrot.slane %v673_v50, 4  ;;  %v678_v59 = vrot.slane %v676_v52, 5  ;;  %v7888_v44 = vld [vmem:[%s9243_s1 + $0x1c0] sm:$0xff]  }
  0x7e   : > { %v3042_v24 = vsel %vm7702_vm5, %v3040_v22, %v3041_v42  ;;  %v684_v61 = vrot.slane %v682_v51, 5  ;;  %v688_v6 = vrot.slane %v686_v55, 4  ;;  %v692_v63 = vshll.u32 %v331_v43, 16  ;;  %6701 = vmatpush3.bf16.msra.mxu0 %v7174_v32  ;;  %v5791_v43 = vld [vmem:[%s7424_s20 + $0x6c] sm:$0xe] }
  0x7f   : > { %v671_v1 = vsel %vm7456_vm2, %v666_v57, %v670_v38  ;;  %v5820_v7 = vcombine.low %v3039_v14, %v3042_v24  ;;  %v679_v10 = vor.u32 %v678_v59, %v675_v58  ;;  %v5805_v11 = vrot.slane %v5789_v53, 9  ;;  %6702 = vmatprep.subr.bf16.mxu0 %v7178_v45  ;;  %v5737_v55 = vld [vmem:[%s7424_s20 + $0x74] sm:$0x1]  ;;  %v5792_v24 = vld [vmem:[%s7424_s20 + $0x78] sm:$0xe] }
  0x80   : > { %v5580_v28 = vcombine.low %v661_v56, %v671_v1  ;;  %v689_v8 = vor.u32 %v688_v6, %v684_v61  ;;  %v694_v15 = vrot.slane %v692_v63, 5  ;;  %v3045_v32 = vrot.slane %v7640_v0, 5 }
  0x81   : > { %6667 = vmatmul.mubr.bf16.gmra.mrb[8].mxu0 %v5820_v7  ;;  %v680_v36 = vrot.slane %v679_v10, 4  ;;  %v3048_v62 = vrot.slane %v7652_v20, 5  ;;  %v697_v18 = vshrl.u32 %v7861_v41, 16  ;;  %v700_v26 = vshll.u32 %v7861_v41, 16 }
  0x82   : > { %6443 = vmatmul.mubr.bf16.gmra.mrb[24].mxu1 %v5580_v28  ;;  %v690_v34 = vrot.slane %v689_v8, 4  ;;  %v3046_v33 = vsel %vm7702_vm5, %v5805_v11, %v3045_v32  ;;  %v3047_v46 = vrot.slane %v3045_v32, 4  ;;  %v706_v38 = vshll.u32 %v7866_v12, 16  ;;  %6703 = vmatpush3.bf16.msra.mxu0 %v7178_v45  ;;  %v7901_v11 = vld [vmem:[%s7424_s20 + $0x7c] sm:$0xf] }
  0x83   : > { %v685_v0 = vsel %vm7456_vm2, %v680_v36, %v684_v61  ;;  %v699_v20 = vrot.slane %v697_v18, 4  ;;  %v702_v23 = vrot.slane %v700_v26, 5  ;;  %v710_v42 = vshrl.u32 %v7866_v12, 16  ;;  %6704 = vmatprep.subr.bf16.mxu0 %v7182_v13  ;;  %v7251_v36 = vld [vmem:[%s7424_s20] sm:$0xf] }
  0x84   : > { %v695_v49 = vsel %vm7456_vm2, %v690_v34, %v694_v15  ;;  %v3049_v50 = vsel %vm7702_vm5, %v3047_v46, %v3048_v62  ;;  %v708_v52 = vrot.slane %v706_v38, 5  ;;  %v716_v53 = vshll.u32 %v332_v19, 16  ;;  %v5742_v15 = vld [vmem:[%s7424_s20 + $0x88] sm:$0xf]  ;;  %v7916_v62 = vld [vmem:[%s7424_s20 + $0x4] sm:$0xf] }
  0x85   : > { %v5581_v45 = vcombine.low %v685_v0, %v695_v49  ;;  %v5821_v14 = vcombine.low %v3046_v33, %v3049_v50  ;;  %v703_v22 = vor.u32 %v702_v23, %v699_v20  ;;  %v712_v51 = vrot.slane %v710_v42, 4  ;;  %v5743_v26 = vld [vmem:[%s7424_s20 + $0x8c] sm:$0x1]  ;;  %v5746_v23 = vld [vmem:[%s7424_s20 + $0x98] sm:$0x1] }
  0x86   : > { %v718_v56 = vrot.slane %v716_v53, 5  ;;  %v5806_v57 = vrot.slane %v5790_v30, 9  ;;  %v3052_v58 = vrot.slane %v7667_v60, 5  ;;  %v3055_v59 = vrot.slane %v7676_v17, 5  ;;  %6705 = vmatpush3.bf16.msra.mxu0 %v7182_v13  ;;  %v7904_v17 = vld [vmem:[%s7424_s20 + $0x80] sm:$0x1] }
  0x87   : > { %6446 = vmatprep.mubr.bf16.mxu1 %v5581_v45  ;;  %6670 = vmatprep.mubr.bf16.mxu0 %v5821_v14  ;;  %v704_v61 = vrot.slane %v703_v22, 4  ;;  %v713_v6 = vor.u32 %v712_v51, %v708_v52  ;;  %v5807_v63 = vrot.slane %v5791_v43, 9  ;;  %v3059_v1 = vrot.slane %v5736_v39, 5  ;;  %v5793_v30 = vld [vmem:[%s7424_s20 + $0x84] sm:$0xe] }
  0x88   : > { %v3053_v7 = vsel %vm7702_vm5, %v5806_v57, %v3052_v58  ;;  %v3054_v10 = vrot.slane %v3052_v58, 4  ;;  %v3062_v60 = vrot.slane %v5737_v55, 5  ;;  %6738 = vmatprep.subr.bf16.mxu0 %v7888_v44  ;;  %v5591_v18 = vcombine.low %v7251_v36, %v7916_v62  ;;  %v5745_v39 = vld [vmem:[%s7424_s20 + $0x94] sm:$0xf]  ;;  %v5794_v42 = vld [vmem:[%s7424_s20 + $0x90] sm:$0xe] }
  0x89   : > { %v709_v19 = vsel %vm7456_vm2, %v704_v61, %v708_v52  ;;  %v714_v13 = vrot.slane %v713_v6, 4  ;;  %v3060_v28 = vsel %vm7702_vm5, %v5807_v63, %v3059_v1  ;;  %v3061_v8 = vrot.slane %v3059_v1, 4  ;;  %v5795_v50 = vld [vmem:[%s7424_s20 + $0x9c] sm:$0xe]  ;;  %v5748_v14 = vld [vmem:[%s7424_s20 + $0xa0] sm:$0xf] }
  0x8a   : > { %v3056_v32 = vsel %vm7702_vm5, %v3054_v10, %v3055_v59  ;;  %v5808_v38 = vrot.slane %v5792_v24, 9  ;;  %v3066_v43 = vrot.slane %v7901_v11, 5  ;;  %v3069_v49 = vrot.slane %v7904_v17, 5  ;;  %v5749_v22 = vld [vmem:[%s7424_s20 + $0xa4] sm:$0x1] }
  0x8b   : > { %v719_v34 = vsel %vm7456_vm2, %v714_v13, %v718_v56  ;;  %v5822_v33 = vcombine.low %v3053_v7, %v3056_v32  ;;  %v3063_v46 = vsel %vm7702_vm5, %v3061_v8, %v3062_v60  ;;  %v5809_v52 = vrot.slane %v5793_v30, 9  ;;  %v5751_v59 = vld [vmem:[%s7424_s20 + $0xac] sm:$0xf]  ;;  %v7940_v61 = vld [vmem:[%s7424_s20 + $0x10] sm:$0xf] }
  0x8c   : > { %v5582_v0 = vcombine.low %v709_v19, %v719_v34  ;;  %v5823_v20 = vcombine.low %v3060_v28, %v3063_v46  ;;  %v3073_v53 = vrot.slane %v5742_v15, 5  ;;  %v3076_v45 = vrot.slane %v5743_v26, 5  ;;  %v7253_v24 = vld [vmem:[%s7424_s20 + $0xc] sm:$0xf]  ;;  %v7255_v8 = vld [vmem:[%s7424_s20 + $0x18] sm:$0xf] }
  0x8d   : > { %6671 = vmatmul.mubr.bf16.gmra.mrb[12].mxu0 %v5822_v33  ;;  %v3067_v51 = vsel %vm7702_vm5, %v5808_v38, %v3066_v43  ;;  %v3068_v55 = vrot.slane %v3066_v43, 4  ;;  %v3080_v58 = vrot.slane %v5745_v39, 5  ;;  %v5592_v6 = vcombine.low %v7253_v24, %v7940_v61  ;;  %v7173_v19 = vld [vmem:[%s9243_s1 + $0x88] sm:$0xff]   ;;  %v7952_v15 = vld [vmem:[%s7424_s20 + $0x1c] sm:$0xf] }
  0x8e   : > { %6447 = vmatmul.mubr.bf16.gmra.mrb[28].mxu1 %v5582_v0  ;;  %6674 = vmatprep.mubr.bf16.mxu0 %v5823_v20  ;;  %v3074_v56 = vsel %vm7702_vm5, %v5809_v52, %v3073_v53  ;;  %v3075_v57 = vrot.slane %v3073_v53, 4  ;;  %v5810_v1 = vrot.slane %v5794_v42, 9  ;;  %v3083_v7 = vrot.slane %v5746_v23, 5  ;;  %v5752_v30 = vld [vmem:[%s7424_s20 + $0xb0] sm:$0x1] }
  0x8f   : > { %6466 = vmatprep.mubr.bf16.mxu1 %v5591_v18  ;;  %v3070_v63 = vsel %vm7702_vm5, %v3068_v55, %v3069_v49  ;;  %v3082_v13 = vrot.slane %v3080_v58, 4  ;;  %v5811_v28 = vrot.slane %v5795_v50, 9  ;;  %v5593_v32 = vcombine.low %v7255_v8, %v7952_v15  ;;  %v5796_v34 = vld [vmem:[%s7424_s20 + $0xa8] sm:$0xe]  ;;  %v5754_v33 = vld [vmem:[%s7424_s20 + $0xb8] sm:$0xf] }
  0x90   : > { %v5824_v10 = vcombine.low %v3067_v51, %v3070_v63  ;;  %v3077_v60 = vsel %vm7702_vm5, %v3075_v57, %v3076_v45  ;;  %v3087_v18 = vrot.slane %v5748_v14, 5  ;;  %v3090_v26 = vrot.slane %v5749_v22, 5  ;;  %v5755_v20 = vld [vmem:[%s7424_s20 + $0xbc] sm:$0x1]  ;;  %v5797_v23 = vld [vmem:[%s7424_s20 + $0xb4] sm:$0xe] }
  0x91   : > { %v5825_v36 = vcombine.low %v3074_v56, %v3077_v60  ;;  %v3094_v38 = vrot.slane %v5751_v59, 5  ;;  %v3081_v39 = vsel %vm7702_vm5, %v5810_v1, %v3080_v58  ;;  %v3084_v0 = vsel %vm7702_vm5, %v3082_v13, %v3083_v7  ;;  %v7177_v50 = vld [vmem:[%s9243_s1 + $0x90] sm:$0xff]   ;;  %v5757_v53 = vld [vmem:[%s7424_s20 + $0xc4] sm:$0xf]  ;;  %v7975_v51 = vld [vmem:[%s7424_s20 + $0x28] sm:$0xf] }
  0x92   : > { %v3089_v46 = vrot.slane %v3087_v18, 4  ;;  %v3088_v42 = vsel %vm7702_vm5, %v5811_v28, %v3087_v18  ;;  %v3101_v49 = vrot.slane %v5754_v33, 5  ;;  %v5812_v52 = vrot.slane %v5796_v34, 9  ;;  %v7257_v22 = vld [vmem:[%s7424_s20 + $0x24] sm:$0xf]  ;;  %v7181_v1 = vld [vmem:[%s9243_s1 + $0x98] sm:$0xff]  }
  0x93   : > { %v5826_v45 = vcombine.low %v3081_v39, %v3084_v0  ;;  %v3096_v14 = vrot.slane %v3094_v38, 4  ;;  %v5594_v55 = vcombine.low %v7257_v22, %v7975_v51  ;;  %v7259_v57 = vld [vmem:[%s7424_s20 + $0x30] sm:$0xf]  ;;  %v7980_v58 = vld [vmem:[%s7424_s20 + $0x34] sm:$0xf]  ;;  %v5813_v24 = vrot.slane %v5797_v23, 9 }
  0x94   : > { %v3091_v43 = vsel %vm7702_vm5, %v3089_v46, %v3090_v26  ;;  %v5595_v59 = vcombine.low %v7259_v57, %v7980_v58  ;;  %v3104_v63 = vrot.slane %v5755_v20, 5  ;;  %v5798_v7 = vld [vmem:[%s7424_s20 + $0xc0] sm:$0xe]  ;;  %v3095_v60 = vsel %vm7702_vm5, %v5812_v52, %v3094_v38  ;;  %v5758_v8 = vld [vmem:[%s7424_s20 + $0xc8] sm:$0x1]  ;;  %v7184_v22 = vld [vmem:[%s7424_s20 + $0x18] sm:$0xff]  }
  0x95   : > { %6675 = vmatmul.mubr.bf16.gmra.mrb[16].mxu0 %v5824_v10  ;;  %v5827_v56 = vcombine.low %v3088_v42, %v3091_v43  ;;  %v3108_v10 = vrot.slane %v5757_v53, 5  ;;  %v3102_v13 = vsel %vm7702_vm5, %v5813_v24, %v3101_v49  ;;  %v5814_v18 = vrot.slane %v5798_v7, 9  ;;  %v7261_v26 = vld [vmem:[%s7424_s20 + $0x3c] sm:$0xf]  ;;  %v7263_v39 = vld [vmem:[%s7424_s20 + $0x48] sm:$0xf] }
  0x96   : > { %6467 = vmatmul.mubr.bf16.vlgmr.msra.gmra.mrb[0].mxu1 %v5592_v6  ;;  %6678 = vmatprep.mubr.bf16.mxu0 %v5825_v36  ;;  %v3103_v6 = vrot.slane %v3101_v49, 4  ;;  %v3111_v38 = vrot.slane %v5758_v8, 5  ;;  %v8006_v0 = vld [vmem:[%s7424_s20 + $0x4c] sm:$0xf]  ;;  %v7198_v49 = vld [vmem:[%s9243_s1 + $0xb0] sm:$0xff]   ;;  %v2462_v52 = vshrl.u32 %v7901_v11, 16 }
  0x97   : > { %6499 = vmatpush3.bf16.msra.mxu1 %v7626_v4  ;;  %6470 = vmatprep.mubr.bf16.mxu1 %v5593_v32  ;;  %v3097_v4 = vrot.slane %v5752_v30, 5  ;;  %v7186_v32 = vld [vmem:[%s9243_s1 + $0xa0] sm:$0xff]   ;;  %v3110_v46 = vrot.slane %v3108_v10, 4  ;;  %v5597_v20 = vcombine.low %v7263_v39, %v8006_v0  ;;  %v7192_v23 = vld [vmem:[%s9243_s1 + $0xa8] sm:$0xff]   ;;  %v3109_v42 = vsel %vm7702_vm5, %v5814_v18, %v3108_v10  ;;  %v7190_v18 = vld [vmem:[%s7424_s20 + $0x30] sm:$0xff]  }
  0x98   : > { %6500 = vmatprep.subr.bf16.mxu1 %v7173_v19  ;;  %v3105_v28 = vsel %vm7702_vm5, %v3103_v6, %v3104_v63  ;;  %v8001_v30 = vld [vmem:[%s7424_s20 + $0x40] sm:$0xf]  ;;  %v8034_v57 = vrot.slane %v2462_v52, 4  ;;  %v7187_v6 = vld [vmem:[%s7424_s20 + $0x24] sm:$0xff]   ;;  %v1374_v7 = vrot.slane %v7940_v61, 5  ;;  %v2468_v8 = vshll.u32 %v7904_v17, 16 }
  0x99   : > { %v5596_v34 = vcombine.low %v7261_v26, %v8001_v30  ;;  %v5829_v33 = vcombine.low %v3102_v13, %v3105_v28  ;;  %v3112_v43 = vsel %vm7702_vm5, %v3110_v46, %v3111_v38  ;;  %v1314_v63 = vld [vmem:[%s7424_s20] sm:$0xe]  ;;  %v1315_v10 = vld [vmem:[%s7424_s20 + $0xc] sm:$0xe]  ;;  %v1381_v13 = vrot.slane %v7952_v15, 5 }
  0x9a   : > { %v5830_v53 = vcombine.low %v3109_v42, %v3112_v43  ;;  %v1317_v61 = vld [vmem:[%s7424_s20 + $0x24] sm:$0xe]  ;;  %v5602_v15 = vcombine.low %v7754_v16, %v7762_v40  ;;  %v5603_v26 = vcombine.low %v7783_v2, %v7786_v3  ;;  %v5615_v17 = vrot.slane %v1314_v63, 9  ;;  %v7269_v38 = vld [vmem:[%s7424_s20 + $0x20] sm:$0x1]  ;;  %v7199_v2 = vld [vmem:[%s7424_s20 + $0x54] sm:$0xff]  }
  0x9b   : > { %6501 = vmatpush3.bf16.msra.mxu1 %v7173_v19  ;;  %v3098_v19 = vsel %vm7702_vm5, %v3096_v14, %v3097_v4  ;;  %v8023_v14 = vld [vmem:[%s7424_s20 + $0x58] sm:$0xf]  ;;  %v1383_v46 = vrot.slane %v1381_v13, 4  ;;  %v1384_v39 = vrot.slane %v7269_v38, 5  ;;  %v7270_v43 = vld [vmem:[%s7424_s20 + $0x2c] sm:$0x1] }
  0x9c   : > { %6502 = vmatprep.subr.bf16.mxu1 %v7177_v50  ;;  %v5828_v36 = vcombine.low %v3095_v60, %v3098_v19  ;;  %v8049_v60 = vld [vmem:[%s9243_s1 + $0xc0] sm:$0xff]   ;;  %v1316_v19 = vld [vmem:[%s7424_s20 + $0x18] sm:$0xe]  ;;  %v7273_v38 = vld [vmem:[%s7424_s20 + $0x50] sm:$0x1]  ;;  %v1416_v16 = vrot.slane %v8023_v14, 5 }
  0x9d   : > { %6679 = vmatmul.mubr.bf16.gmra.mrb[20].mxu0 %v5826_v45  ;;  %v7265_v45 = vld [vmem:[%s7424_s20 + $0x54] sm:$0xf]  ;;  %v8172_v40 = vld [vmem:[%s7424_s20 + $0x64] sm:$0xf] }
  0x9e   : > { %6471 = vmatmul.mubr.bf16.gmra.mrb[4].mxu1 %v5594_v55  ;;  %6682 = vmatprep.mubr.bf16.mxu0 %v5827_v56  ;;  %v5598_v4 = vcombine.low %v7265_v45, %v8023_v14  ;;  %v5599_v55 = vcombine.low %v7680_v25, %v7683_v35  ;;  %v7204_v56 = vld [vmem:[%s9243_s1 + $0xb8] sm:$0xff]   ;;  %v7268_v25 = vld [vmem:[%s7424_s20 + $0x14] sm:$0x1]  ;;  %v7202_v3 = vld [vmem:[%s7424_s20 + $0x60] sm:$0xff]  }
  0x9f   : > { %6474 = vmatprep.mubr.bf16.mxu1 %v5595_v59  ;;  %6503 = vmatpush3.bf16.msra.mxu1 %v7177_v50  ;;  %v2458_v50 = vshll.u32 %v7901_v11, 16  ;;  %v8037_v59 = vld [vmem:[%s7424_s20 + $0x8] sm:$0x1]  ;;  %v1377_v35 = vrot.slane %v7268_v25, 5 }
  0xa0   : > { %6504 = vmatprep.subr.bf16.mxu1 %v7181_v1  ;;  %v1370_v24 = vrot.slane %v8037_v59, 5 }
  0xa1   : > { %v8032_v11 = vrot.slane %v2458_v50, 5 }
  0xa3   : > { %6505 = vmatpush3.bf16.msra.mxu1 %v7181_v1  ;;  %v1367_v1 = vrot.slane %v7916_v62, 5  ;;  %v5600_v62 = vcombine.low %v7698_v5, %v7710_v21  ;;  %v5616_v21 = vrot.slane %v1315_v10, 9  ;;  %v5895_v10 = vld [vmem:[%s7424_s20 + $0x18] sm:$0xf] }
  0xa4   : > { %6506 = vmatprep.subr.bf16.mxu1 %v7186_v32 }
  0xa5   : > { %6683 = vmatmul.mubr.bf16.gmra.mrb[24].mxu0 %v5828_v36  ;;  %v5601_v36 = vcombine.low %v7721_v47, %v7732_v54  ;;  %v1369_v5 = vrot.slane %v1367_v1, 4  ;;  %v7194_v47 = vld [vmem:[%s9243_s1 + $0x1c8] sm:$0xff]   ;;  %v5617_v54 = vrot.slane %v1316_v19, 9  ;;  %v8092_v59 = vsel %vm7702_vm5, %v5615_v17, %v1367_v1  ;;  %v5896_v19 = vld [vmem:[%s7424_s20 + $0x1c] sm:$0xf] }
  0xa6   : > { %6475 = vmatmul.mubr.bf16.gmra.mrb[8].mxu1 %v5596_v34  ;;  %6686 = vmatprep.mubr.bf16.mxu0 %v5829_v33  ;;  %v1395_v34 = vrot.slane %v7980_v58, 5  ;;  %v1376_v33 = vrot.slane %v1374_v7, 4  ;;  %v5618_v58 = vrot.slane %v1317_v61, 9  ;;  %v1409_v1 = vrot.slane %v8006_v0, 5  ;;  %v7196_v0 = vld [vmem:[%s7424_s20 + $0x48] sm:$0xff]  }
  0xa7   : > { %6478 = vmatprep.mubr.bf16.mxu1 %v5597_v20  ;;  %6507 = vmatpush3.bf16.msra.mxu1 %v7186_v32  ;;  %v1388_v32 = vrot.slane %v7975_v51, 5  ;;  %v1318_v51 = vld [vmem:[%s7424_s20 + $0x30] sm:$0xe]  ;;  %v5604_v20 = vcombine.low %v7804_v31, %v7813_v48  ;;  %v8100_v25 = vsel %vm7702_vm5, %v1369_v5, %v1370_v24  ;;  %v8108_v63 = vsel %vm7702_vm5, %v5617_v54, %v1381_v13  ;;  %v1320_v13 = vld [vmem:[%s7424_s20 + $0x48] sm:$0xe] }
  0xa8   : > { %6508 = vmatprep.subr.bf16.mxu1 %v7192_v23  ;;  %v5619_v50 = vrot.slane %v1318_v51, 9  ;;  %v1397_v52 = vrot.slane %v1395_v34, 4  ;;  %v3869_v5 = vshrl.u32 %v5895_v10, 16  ;;  %v3882_v51 = vshrl.u32 %v5896_v19, 16  ;;  %v7205_v48 = vld [vmem:[%s7424_s20 + $0x6c] sm:$0xff]  }
  0xa9   : > { %v1390_v42 = vrot.slane %v1388_v32, 4  ;;  %v8120_v24 = vsel %vm7702_vm5, %v5618_v58, %v1388_v32  ;;  %v7272_v32 = vld [vmem:[%s7424_s20 + $0x44] sm:$0x1]  ;;  %v5621_v54 = vrot.slane %v1320_v13, 9  ;;  %v5899_v13 = vld [vmem:[%s7424_s20 + $0x28] sm:$0xf] }
  0xaa   : > { %v8130_v61 = vsel %vm7702_vm5, %v5619_v50, %v1395_v34  ;;  %v1405_v17 = vrot.slane %v7272_v32, 5  ;;  %v5897_v50 = vld [vmem:[%s7424_s20 + $0x20] sm:$0x1]  ;;  %v1322_v32 = vld [vmem:[%s7424_s20 + $0x60] sm:$0xe] }
  0xab   : > { %6509 = vmatpush3.bf16.msra.mxu1 %v7192_v23  ;;  %v5605_v23 = vcombine.low %v7838_v27, %v7841_v29 }
  0xac   : > { %6510 = vmatprep.subr.bf16.mxu1 %v7198_v49 }
  0xad   : > { %6687 = vmatmul.mubr.bf16.gmra.mrb[28].mxu0 %v5830_v53  ;;  %v7271_v53 = vld [vmem:[%s7424_s20 + $0x38] sm:$0x1] }
  0xae   : > { %6479 = vmatmul.mubr.bf16.gmra.mrb[12].mxu1 %v5598_v4  ;;  %6706 = vmatprep.mubr.bf16.mxu0 %v7184_v22  ;;  %v1398_v45 = vrot.slane %v7271_v53, 5  ;;  %v1319_v4 = vld [vmem:[%s7424_s20 + $0x3c] sm:$0xe]  ;;  %v1402_v22 = vrot.slane %v8001_v30, 5  ;;  %v8096_v30 = vsel %vm7702_vm5, %v5616_v21, %v1374_v7  ;;  %v3872_v21 = vshll.u32 %v5895_v10, 16  ;;  %v7210_v53 = vld [vmem:[%s9243_s1 + $0x1e0] sm:$0xff]  }
  0xaf   : > { %6482 = vmatprep.mubr.bf16.mxu1 %v5599_v55  ;;  %6511 = vmatpush3.bf16.msra.mxu1 %v7198_v49  ;;  %v1391_v49 = vrot.slane %v7270_v43, 5  ;;  %v8083_v55 = vrot.slane %v2468_v8, 5  ;;  %v7193_v7 = vld [vmem:[%s7424_s20 + $0x3c] sm:$0xff]   ;;  %v8116_v8 = vsel %vm7702_vm5, %v1383_v46, %v1384_v39  ;;  %v1411_v46 = vrot.slane %v1409_v1, 4  ;;  %v5901_v43 = vld [vmem:[%s7424_s20 + $0x30] sm:$0xf] }
  0xb0   : > { %6512 = vmatprep.subr.bf16.mxu1 %v7204_v56  ;;  %v1412_v39 = vrot.slane %v7273_v38, 5  ;;  %v3871_v10 = vrot.slane %v3869_v5, 4 }
  0xb1   : > { %9265 = vst [vmem:[#allocation2_spill] sm:$0xff] %v8083_v55 }
  0xb3   : > { %6513 = vmatpush3.bf16.msra.mxu1 %v7204_v56  ;;  %v7200_v56 = vld [vmem:[%s9243_s1 + $0x1d0] sm:$0xff]  }
  0xb4   : > { %6546 = vmatprep.subr.bf16.mxu1 %v8049_v60 }
  0xb5   : > { %6707 = vmatmul.mubr.bf16.vlgmr.msra.gmra.mrb[0].mxu0 %v7187_v6  ;;  %v8104_v6 = vsel %vm7702_vm5, %v1376_v33, %v1377_v35  ;;  %v8124_v35 = vsel %vm7702_vm5, %v1390_v42, %v1391_v49  ;;  %v3878_v33 = vshll.u32 %v5896_v19, 16  ;;  %v3874_v19 = vrot.slane %v3872_v21, 5  ;;  %v1323_v21 = vld [vmem:[%s7424_s20 + $0x6c] sm:$0xe] }
  0xb6   : > { %6483 = vmatmul.mubr.bf16.gmra.mrb[16].mxu1 %v5600_v62  ;;  %6739 = vmatpush3.bf16.msra.mxu0 %v7888_v44  ;;  %v5620_v62 = vrot.slane %v1319_v4, 9  ;;  %v5624_v58 = vrot.slane %v1323_v21, 9 }
  0xb7   : > { %6486 = vmatprep.mubr.bf16.mxu1 %v5601_v36  ;;  %6710 = vmatprep.mubr.bf16.mxu0 %v7190_v18  ;;  %v8134_v36 = vsel %vm7702_vm5, %v1397_v52, %v1398_v45  ;;  %v1404_v18 = vrot.slane %v1402_v22, 4  ;;  %v5898_v52 = vld [vmem:[%s7424_s20 + $0x24] sm:$0xf]  ;;  %v3906_v45 = vshrl.u32 %v5899_v13, 16 }
  0xb8   : > { %6740 = vmatprep.subr.bf16.mxu0 %v7194_v47  ;;  %v8151_v49 = vsel %vm7702_vm5, %v5620_v62, %v1402_v22  ;;  %v8168_v22 = vld [vmem:[%s7424_s20 + $0x54] sm:$0xe]  ;;  %v3884_v62 = vrot.slane %v3882_v51, 4  ;;  %v3893_v38 = vshrl.u32 %v5898_v52, 16  ;;  %v3896_v28 = vshll.u32 %v5898_v52, 16 }
  0xb9   : > { %v8165_v4 = vsel %vm7702_vm5, %v1404_v18, %v1405_v17  ;;  %v3888_v17 = vshll.u32 %v5897_v50, 16  ;;  %v5622_v5 = vrot.slane %v8168_v22, 9  ;;  %v7214_v50 = vld [vmem:[%s9243_s1 + $0x1e8] sm:$0xff]   ;;  %v1418_v52 = vrot.slane %v1416_v16, 4 }
  0xba   : > { %6741 = vmatpush3.bf16.msra.mxu0 %v7194_v47  ;;  %v7206_v47 = vld [vmem:[%s9243_s1 + $0x1d8] sm:$0xff]   ;;  %v3875_v22 = vor.u32 %v3874_v19, %v3871_v10  ;;  %v3895_v34 = vrot.slane %v3893_v38, 4  ;;  %v3898_v44 = vrot.slane %v3896_v28, 5  ;;  %v7278_v10 = vld [vmem:[%s7424_s20 + $0x74] sm:$0x1]  ;;  %v3908_v28 = vrot.slane %v3906_v45, 4 }
  0xbb   : > { %6742 = vmatprep.subr.bf16.mxu0 %v7200_v56  ;;  %v8206_v42 = vrot.slane %v3888_v17, 5  ;;  %v1433_v19 = vrot.slane %v7278_v10, 5  ;;  %v3917_v38 = vshrl.u32 %v5901_v43, 16  ;;  %v8231_v27 = vsel %vm7702_vm5, %v5622_v5, %v1416_v16 }
  0xbc   : > { %v3876_v21 = vrot.slane %v3875_v22, 4 }
  0xbd   : > { %6711 = vmatmul.mubr.bf16.gmra.mrb[4].mxu0 %v7193_v7  ;;  %v8178_v7 = vrot.slane %v3878_v33, 5  ;;  %v7276_v33 = vld [vmem:[%s7424_s20 + $0x70] sm:$0xf] }
  0xbe   : > { %6487 = vmatmul.mubr.bf16.gmra.mrb[20].mxu1 %v5602_v15  ;;  %6714 = vmatprep.mubr.bf16.mxu0 %v7196_v0  ;;  %v1423_v15 = vrot.slane %v8172_v40, 5  ;;  %v7275_v0 = vld [vmem:[%s7424_s20 + $0x5c] sm:$0x1]  ;;  %v1430_v51 = vrot.slane %v7276_v33, 5 }
  0xbf   : > { %6490 = vmatprep.mubr.bf16.mxu1 %v5603_v26  ;;  %6743 = vmatpush3.bf16.msra.mxu0 %v7200_v56  ;;  %v1419_v18 = vrot.slane %v7275_v0, 5  ;;  %v8187_v26 = vsel %vm7702_vm5, %v5621_v54, %v1409_v1  ;;  %v8191_v56 = vsel %vm7702_vm5, %v1411_v46, %v1412_v39  ;;  %v7277_v1 = vld [vmem:[%s7424_s20 + $0x68] sm:$0x1]  ;;  %v3902_v0 = vshll.u32 %v5899_v13, 16  ;;  %v7222_v40 = vld [vmem:[%s9243_s1 + $0x1f8] sm:$0xff]  }
  0xc0   : > { %6744 = vmatprep.subr.bf16.mxu0 %v7206_v47  ;;  %v1426_v54 = vrot.slane %v7277_v1, 5  ;;  %v5623_v46 = vrot.slane %v1322_v32, 9  ;;  %v1425_v39 = vrot.slane %v1423_v15, 4  ;;  %v3885_v33 = vor.u32 %v3884_v62, %v8178_v7  ;;  %v5902_v1 = vld [vmem:[%s7424_s20 + $0x34] sm:$0xf] }
  0xc1   : > { %v1432_v32 = vrot.slane %v1430_v51, 4  ;;  %v5900_v62 = vld [vmem:[%s7424_s20 + $0x2c] sm:$0x1]  ;;  %v8218_v17 = vrot.slane %v3902_v0, 5  ;;  %v3926_v13 = vshll.u32 %v5902_v1, 16  ;;  %v3930_v31 = vshrl.u32 %v5902_v1, 16 }
  0xc2   : > { %v3886_v10 = vrot.slane %v3885_v33, 4  ;;  %v8235_v29 = vsel %vm7702_vm5, %v1418_v52, %v1419_v18  ;;  %v8242_v45 = vsel %vm7702_vm5, %v5623_v46, %v1423_v15  ;;  %v8246_v14 = vsel %vm7702_vm5, %v1425_v39, %v1426_v54  ;;  %v1324_v18 = vld [vmem:[%s7424_s20 + $0x78] sm:$0xe] }
  0xc3   : > { %6745 = vmatpush3.bf16.msra.mxu0 %v7206_v47  ;;  %v8250_v16 = vsel %vm7702_vm5, %v5624_v58, %v1430_v51  ;;  %v8260_v15 = vsel %vm7702_vm5, %v1432_v32, %v1433_v19  ;;  %v3909_v5 = vor.u32 %v3908_v28, %v8218_v17  ;;  %v3919_v52 = vrot.slane %v3917_v38, 4  ;;  %v5904_v58 = vld [vmem:[%s7424_s20 + $0x3c] sm:$0xf]  ;;  %v5905_v51 = vld [vmem:[%s7424_s20 + $0x40] sm:$0xf] }
  0xc4   : > { %6746 = vmatprep.subr.bf16.mxu0 %v7210_v53  ;;  %v3881_v0 = vsel %vm7456_vm2, %v3876_v21, %v8178_v7  ;;  %v3891_v46 = vsel %vm7456_vm2, %v3886_v10, %v8206_v42  ;;  %v8271_v39 = vrot.slane %v3926_v13, 5  ;;  %v3932_v22 = vrot.slane %v3930_v31, 4  ;;  %v7280_v19 = vld [vmem:[%s7424_s20 + $0x80] sm:$0x1]  ;;  %v8430_v47 = vld [vmem:[%s7424_s20 + $0x68] sm:$0x1] }
  0xc5   : > { %6715 = vmatmul.mubr.bf16.gmra.mrb[8].mxu0 %v7199_v2  ;;  %v3920_v2 = vshll.u32 %v5901_v43, 16  ;;  %v3912_v43 = vshll.u32 %v5900_v62, 16  ;;  %v5625_v32 = vrot.slane %v1324_v18, 9  ;;  %v1325_v62 = vld [vmem:[%s7424_s20 + $0x84] sm:$0xe]  ;;  %v3941_v28 = vshrl.u32 %v5904_v58, 16 }
  0xc6   : > { %6491 = vmatmul.mubr.bf16.gmra.mrb[24].mxu1 %v5604_v20  ;;  %6718 = vmatprep.mubr.bf16.mxu0 %v7202_v3  ;;  %v7218_v20 = vld [vmem:[%s9243_s1 + $0x1f0] sm:$0xff]   ;;  %v7279_v3 = vld [vmem:[%s7424_s20 + $0x7c] sm:$0xf]  ;;  %v3944_v7 = vshll.u32 %v5904_v58, 16  ;;  %v3950_v38 = vshll.u32 %v5905_v51, 16  ;;  %v9266_v42 = vcombine.low %v7861_v41, %v7866_v12  ;;  %v8282_v13 = vrot.slane %v3909_v5, 4 }
  0xc7   : > { %6494 = vmatprep.mubr.bf16.mxu1 %v5605_v23  ;;  %6747 = vmatpush3.bf16.msra.mxu0 %v7210_v53  ;;  %v3899_v23 = vor.u32 %v3898_v44, %v3895_v34  ;;  %v7207_v53 = vld [vmem:[%s7424_s20 + $0x78] sm:$0xff]   ;;  %v1437_v44 = vrot.slane %v7279_v3, 5  ;;  %v3922_v54 = vrot.slane %v3920_v2, 5  ;;  %v8275_v1 = vrot.slane %v3912_v43, 5  ;;  %v8287_v21 = vld [vmem:[%s9243_s1 + $0x200] sm:$0xff]   ;;  %9274 = vst [vmem:[#allocation5_spill] sm:$0xff] %v8430_v47 }
  0xc8   : > { %6748 = vmatprep.subr.bf16.mxu0 %v7214_v50  ;;  %v5903_v34 = vld [vmem:[%s7424_s20 + $0x38] sm:$0x1]  ;;  %v3954_v2 = vshrl.u32 %v5905_v51, 16  ;;  %v7209_v43 = vld [vmem:[%s7424_s20 + $0x84] sm:$0xff]   ;;  %v3933_v12 = vor.u32 %v3932_v22, %v8271_v39  ;;  %v3946_v58 = vrot.slane %v3944_v7, 5  ;;  %v8309_v51 = vrot.slane %v3950_v38, 5 }
  0xc9   : > { %v8273_v33 = vrot.slane %v3899_v23, 4  ;;  %v1439_v10 = vrot.slane %v1437_v44, 4  ;;  %v3923_v31 = vor.u32 %v3922_v54, %v3919_v52  ;;  %v9267_v23 = vcombine.low %v8092_v59, %v8100_v25  ;;  %v7281_v18 = vld [vmem:[%s7424_s20 + $0x88] sm:$0xf]  ;;  %v5906_v5 = vld [vmem:[%s7424_s20 + $0x44] sm:$0x1] }
  0xca   : > { %v1444_v3 = vrot.slane %v7281_v18, 5  ;;  %v8300_v59 = vcombine.low %v3881_v0, %v3891_v46  ;;  %v5907_v52 = vld [vmem:[%s7424_s20 + $0x48] sm:$0xf]  ;;  %v3943_v54 = vrot.slane %v3941_v28, 4  ;;  %v3956_v22 = vrot.slane %v3954_v2, 4 }
  0xcb   : > { %6749 = vmatpush3.bf16.msra.mxu0 %v7214_v50  ;;  %v1440_v50 = vrot.slane %v7280_v19, 5  ;;  %v7211_v19 = vld [vmem:[%s7424_s20 + $0x90] sm:$0xff]   ;;  %v3905_v0 = vsel %vm7456_vm2, %v8273_v33, %v8218_v17  ;;  %v3924_v46 = vrot.slane %v3923_v31, 4  ;;  %v3915_v28 = vsel %vm7456_vm2, %v8282_v13, %v8275_v1  ;;  %v8331_v33 = vld [vmem:[%s7424_s20 + $0x58] sm:$0xf]  ;;  %v7212_v31 = vld [vmem:[%s9243_s1 + $0xc8] sm:$0xff]  }
  0xcc   : > { %6750 = vmatprep.subr.bf16.mxu0 %v7218_v20  ;;  %v3934_v38 = vrot.slane %v3933_v12, 4  ;;  %v1446_v2 = vrot.slane %v1444_v3, 4  ;;  %v5910_v17 = vld [vmem:[%s7424_s20 + $0x54] sm:$0xf]  ;;  %v3960_v1 = vshll.u32 %v5906_v5, 16  ;;  %v3965_v13 = vshrl.u32 %v5907_v52, 16 }
  0xcd   : > { %6719 = vmatmul.mubr.bf16.gmra.mrb[12].mxu0 %v7205_v48  ;;  %v3936_v48 = vshll.u32 %v5903_v34, 16  ;;  %v8327_v7 = vsel %vm7702_vm5, %v1439_v10, %v1440_v50  ;;  %v3968_v50 = vshll.u32 %v5907_v52, 16  ;;  %v3947_v10 = vor.u32 %v3946_v58, %v3943_v54  ;;  %v7213_v54 = vld [vmem:[%s7424_s20 + $0x9c] sm:$0xff]   ;;  %v7287_v41 = vld [vmem:[%s7424_s20 + $0xac] sm:$0xf] }
  0xce   : > { %6495 = vmatmul.mubr.bf16.gmra.mrb[28].mxu1 %v9266_v42  ;;  %6722 = vmatprep.mubr.bf16.mxu0 %v7207_v53  ;;  %v5626_v53 = vrot.slane %v1325_v62, 9  ;;  %v7282_v42 = vld [vmem:[%s7424_s20 + $0x8c] sm:$0x1]  ;;  %v3998_v5 = vshll.u32 %v8331_v33, 16  ;;  %v9269_v52 = vcombine.low %v8108_v63, %v8116_v8  ;;  %v8367_v63 = vld [vmem:[%s7424_s20 + $0x50] sm:$0x1] }
  0xcf   : > { %6514 = vmatprep.mubr.bf16.mxu1 %v9267_v23  ;;  %6751 = vmatpush3.bf16.msra.mxu0 %v7218_v20  ;;  %v8306_v20 = vsel %vm7702_vm5, %v5625_v32, %v1437_v44  ;;  %v3938_v62 = vrot.slane %v3936_v48, 5  ;;  %v1447_v23 = vrot.slane %v7282_v42, 5  ;;  %v1326_v44 = vld [vmem:[%s7424_s20 + $0x90] sm:$0xe]  ;;  %v8319_v32 = vld [vmem:[%s7424_s20 + $0x4c] sm:$0xf]  ;;  %v3957_v48 = vor.u32 %v3956_v22, %v8309_v51 }
  0xd0   : > { %6752 = vmatprep.subr.bf16.mxu0 %v7222_v40  ;;  %v3974_v12 = vshll.u32 %v8319_v32, 16  ;;  %v3978_v18 = vshrl.u32 %v8319_v32, 16  ;;  %v9268_v42 = vcombine.low %v8096_v30, %v8104_v6  ;;  %v7216_v30 = vld [vmem:[%s9243_s1 + $0xd0] sm:$0xff]   ;;  %v3929_v6 = vsel %vm7456_vm2, %v3924_v46, %v8271_v39  ;;  %v7215_v8 = vld [vmem:[%s7424_s20 + $0xa8] sm:$0xff]   ;;  %v8374_v39 = vld [vmem:[%s7424_s20 + $0x5c] sm:$0x1] }
  0xd1   : > { %v3939_v58 = vsel %vm7456_vm2, %v3934_v38, %v3938_v62  ;;  %v5627_v22 = vrot.slane %v1326_v44, 9  ;;  %v3970_v25 = vrot.slane %v3968_v50, 5  ;;  %9270 = vst [vmem:[#allocation3_spill] sm:$0xff] %v8374_v39  ;;  %v3948_v46 = vrot.slane %v3947_v10, 4 }
  0xd2   : > { %v3958_v62 = vrot.slane %v3957_v48, 4  ;;  %v8376_v38 = vrot.slane %v3974_v12, 5  ;;  %v8378_v34 = vrot.slane %v3998_v5, 5  ;;  %v8383_v50 = vcombine.low %v3905_v0, %v3915_v28  ;;  %v5913_v28 = vld [vmem:[%s7424_s20 + $0x60] sm:$0xf] }
  0xd3   : > { %6753 = vmatpush3.bf16.msra.mxu0 %v7222_v40  ;;  %v8339_v40 = vsel %vm7702_vm5, %v5626_v53, %v1444_v3  ;;  %v3989_v53 = vshrl.u32 %v5910_v17, 16  ;;  %v3992_v3 = vshll.u32 %v5910_v17, 16  ;;  %v7283_v17 = vld [vmem:[%s7424_s20 + $0x94] sm:$0xf]  ;;  %v8387_v48 = vcombine.low %v3929_v6, %v3939_v58 }
  0xd4   : > { %6786 = vmatprep.subr.bf16.mxu0 %v8287_v21  ;;  %v3984_v0 = vshll.u32 %v8367_v63, 16  ;;  %v3953_v6 = vsel %vm7456_vm2, %v3948_v46, %v8309_v51  ;;  %v9273_v46 = vcombine.low %v8130_v61, %v8134_v36 }
  0xd5   : > { %6723 = vmatmul.mubr.bf16.gmra.mrb[16].mxu0 %v7209_v43  ;;  %v4002_v43 = vshrl.u32 %v8331_v33, 16  ;;  %v3991_v44 = vrot.slane %v3989_v53, 4  ;;  %v7284_v53 = vld [vmem:[%s7424_s20 + $0x98] sm:$0x1] }
  0xd6   : > { %6515 = vmatmul.mubr.bf16.vlgmr.msra.gmra.mrb[0].mxu1 %v9268_v42  ;;  %6726 = vmatprep.mubr.bf16.mxu0 %v7211_v19  ;;  %v8370_v19 = vrot.slane %v3960_v1, 5  ;;  %v1451_v42 = vrot.slane %v7283_v17, 5  ;;  %v7285_v17 = vld [vmem:[%s7424_s20 + $0xa0] sm:$0xf]  ;;  %v3986_v36 = vrot.slane %v3984_v0, 5 }
  0xd7   : > { %6547 = vmatpush3.bf16.msra.mxu1 %v8049_v60  ;;  %6518 = vmatprep.mubr.bf16.mxu1 %v9269_v52  ;;  %v8364_v60 = vsel %vm7702_vm5, %v1446_v2, %v1447_v23  ;;  %v3967_v52 = vrot.slane %v3965_v13, 4  ;;  %v3980_v23 = vrot.slane %v3978_v18, 4  ;;  %v3994_v2 = vrot.slane %v3992_v3, 5  ;;  %v7220_v13 = vld [vmem:[%s9243_s1 + $0xd8] sm:$0xff]  }
  0xd8   : > { %6548 = vmatprep.subr.bf16.mxu1 %v7212_v31  ;;  %v4004_v1 = vrot.slane %v4002_v43, 4  ;;  %v1327_v18 = vld [vmem:[%s7424_s20 + $0x9c] sm:$0xe]  ;;  %v1454_v3 = vrot.slane %v7284_v53, 5  ;;  %v8400_v43 = vld [vmem:[%s7424_s20 + $0x64] sm:$0xf] }
  0xd9   : > { %v3971_v5 = vor.u32 %v3970_v25, %v3967_v52  ;;  %9271 = vst [vmem:[#allocation4_spill] sm:$0xff] %v8400_v43  ;;  %v3981_v58 = vor.u32 %v3980_v23, %v8376_v38  ;;  %v1458_v12 = vrot.slane %v7285_v17, 5  ;;  %v9272_v25 = vcombine.low %v8120_v24, %v8124_v35  ;;  %v7217_v23 = vld [vmem:[%s7424_s20 + $0xb4] sm:$0xff]   ;;  %v7223_v24 = vld [vmem:[%s9243_s1 + $0xe0] sm:$0xff]   ;;  %v5916_v17 = vld [vmem:[%s7424_s20 + $0x6c] sm:$0xf] }
  0xda   : > { %v1453_v52 = vrot.slane %v1451_v42, 4  ;;  %v3995_v53 = vor.u32 %v3994_v2, %v3991_v44  ;;  %v4005_v51 = vor.u32 %v4004_v1, %v8378_v34  ;;  %v4013_v35 = vshrl.u32 %v5913_v28, 16  ;;  %v7286_v2 = vld [vmem:[%s7424_s20 + $0xa4] sm:$0x1] }
  0xdb   : > { %6549 = vmatpush3.bf16.msra.mxu1 %v7212_v31  ;;  %v8394_v31 = vsel %vm7702_vm5, %v5627_v22, %v1451_v42  ;;  %v4008_v22 = vshll.u32 %v8374_v39, 16  ;;  %v4026_v42 = vshrl.u32 %v8400_v43, 16  ;;  %v3972_v61 = vrot.slane %v3971_v5, 4  ;;  %v8569_v39 = vld [vmem:[%s7424_s20 + $0x98] sm:$0x1] }
  0xdc   : > { %6550 = vmatprep.subr.bf16.mxu1 %v7216_v30  ;;  %v5628_v44 = vrot.slane %v1327_v18, 9  ;;  %v1461_v1 = vrot.slane %v7286_v2, 5  ;;  %v3996_v5 = vrot.slane %v3995_v53, 4  ;;  %v4006_v18 = vrot.slane %v4005_v51, 4  ;;  %9287 = vst [vmem:[#allocation14_spill] sm:$0xff] %v8569_v39 }
  0xdd   : > { %6727 = vmatmul.mubr.bf16.gmra.mrb[20].mxu0 %v7213_v54  ;;  %v3963_v54 = vsel %vm7456_vm2, %v3958_v62, %v8370_v19  ;;  %v4022_v19 = vshll.u32 %v8400_v43, 16  ;;  %v7219_v62 = vld [vmem:[%s7424_s20 + $0xc0] sm:$0xff]   ;;  %v4010_v10 = vrot.slane %v4008_v22, 5  ;;  %v8436_v43 = vsel %vm7702_vm5, %v1453_v52, %v1454_v3 }
  0xde   : > { %6519 = vmatmul.mubr.bf16.gmra.mrb[4].mxu1 %v9272_v25  ;;  %6730 = vmatprep.mubr.bf16.mxu0 %v7215_v8  ;;  %v4016_v8 = vshll.u32 %v5913_v28, 16  ;;  %v3982_v25 = vrot.slane %v3981_v58, 4  ;;  %v1465_v28 = vrot.slane %v7287_v41, 5  ;;  %v8432_v55 = vcombine.low %v3953_v6, %v3963_v54  ;;  %v7225_v41 = vld [vmem:[%s9243_s1 + $0xe8] sm:$0xff]  }
  0xdf   : > { %6522 = vmatprep.mubr.bf16.mxu1 %v9273_v46  ;;  %6551 = vmatpush3.bf16.msra.mxu1 %v7216_v30  ;;  %v1328_v30 = vld [vmem:[%s7424_s20 + $0xa8] sm:$0xe]  ;;  %v1460_v46 = vrot.slane %v1458_v12, 4  ;;  %v4015_v0 = vrot.slane %v4013_v35, 4  ;;  %v8438_v58 = vrot.slane %v4022_v19, 5  ;;  %v4028_v22 = vrot.slane %v4026_v42, 4 }
  0xe0   : > { %6552 = vmatprep.subr.bf16.mxu1 %v7220_v13  ;;  %v4018_v2 = vrot.slane %v4016_v8, 5  ;;  %v3977_v3 = vsel %vm7456_vm2, %v3972_v61, %v8376_v38  ;;  %v8448_v6 = vsel %vm7702_vm5, %v5628_v44, %v1458_v12  ;;  %v4037_v54 = vshrl.u32 %v5916_v17, 16  ;;  %v7288_v38 = vld [vmem:[%s7424_s20 + $0xb0] sm:$0x1]  ;;  %v1329_v19 = vld [vmem:[%s7424_s20 + $0xb4] sm:$0xe] }
  0xe1   : > { %v4040_v52 = vshll.u32 %v5916_v17, 16  ;;  %v3987_v53 = vsel %vm7456_vm2, %v3982_v25, %v3986_v36  ;;  %v8457_v51 = vsel %vm7702_vm5, %v1460_v46, %v1461_v1  ;;  %v5629_v35 = vrot.slane %v1328_v30, 9  ;;  %v8479_v30 = vld [vmem:[%s7424_s20 + $0x74] sm:$0x1]  ;;  %v7289_v25 = vld [vmem:[%s7424_s20 + $0xb8] sm:$0xf] }
  0xe2   : > { %v1468_v8 = vrot.slane %v7288_v38, 5  ;;  %v9276_v12 = vcombine.low %v8151_v49, %v8165_v4  ;;  %v4001_v42 = vsel %vm7456_vm2, %v3996_v5, %v8378_v34  ;;  %v4011_v61 = vsel %vm7456_vm2, %v4006_v18, %v4010_v10  ;;  %v7221_v4 = vld [vmem:[%s7424_s20 + $0xcc] sm:$0xff]   ;;  %9278 = vst [vmem:[#allocation7_spill] sm:$0xff] %v8479_v30  ;;  %v5922_v38 = vld [vmem:[%s7424_s20 + $0x84] sm:$0xf] }
  0xe3   : > { %6553 = vmatpush3.bf16.msra.mxu1 %v7220_v13  ;;  %v8451_v13 = vld [vmem:[%s7424_s20 + $0x70] sm:$0xf]  ;;  %v1467_v36 = vrot.slane %v1465_v28, 4  ;;  %v4032_v44 = vshll.u32 %v8430_v47, 16  ;;  %v9277_v49 = vcombine.low %v8187_v26, %v8191_v56  ;;  %v4029_v1 = vor.u32 %v4028_v22, %v8438_v58  ;;  %v8496_v22 = vld [vmem:[%s7424_s20 + $0x7c] sm:$0xf] }
  0xe4   : > { %6554 = vmatprep.subr.bf16.mxu1 %v7223_v24  ;;  %9275 = vst [vmem:[#allocation6_spill] sm:$0xff] %v8451_v13  ;;  %v4046_v34 = vshll.u32 %v8451_v13, 16  ;;  %v4050_v10 = vshrl.u32 %v8451_v13, 16  ;;  %v5630_v17 = vrot.slane %v1329_v19, 9  ;;  %v1472_v46 = vrot.slane %v7289_v25, 5  ;;  %9279 = vst [vmem:[#allocation8_spill] sm:$0xff] %v8496_v22 }
  0xe5   : > { %6731 = vmatmul.mubr.bf16.gmra.mrb[24].mxu0 %v7217_v23  ;;  %v7227_v23 = vld [vmem:[%s9243_s1 + $0xf0] sm:$0xff]   ;;  %v4039_v26 = vrot.slane %v4037_v54, 4  ;;  %v4042_v56 = vrot.slane %v4040_v52, 5  ;;  %v8487_v18 = vcombine.low %v3977_v3, %v3987_v53  ;;  %v8499_v19 = vcombine.low %v4001_v42, %v4011_v61  ;;  %v7290_v3 = vld [vmem:[%s7424_s20 + $0xbc] sm:$0x1] }
  0xe6   : > { %6523 = vmatmul.mubr.bf16.gmra.mrb[8].mxu1 %v9276_v12  ;;  %6734 = vmatprep.mubr.bf16.mxu0 %v7219_v62  ;;  %v4019_v62 = vor.u32 %v4018_v2, %v4015_v0  ;;  %v8493_v2 = vsel %vm7702_vm5, %v5629_v35, %v1465_v28  ;;  %v8503_v54 = vsel %vm7702_vm5, %v1467_v36, %v1468_v8  ;;  %v8505_v52 = vrot.slane %v4032_v44, 5  ;;  %v7229_v12 = vld [vmem:[%s9243_s1 + $0xf8] sm:$0xff]   ;;  %v8512_v28 = vld [vmem:[%s7424_s20 + $0x88] sm:$0xf] }
  0xe7   : > { %6526 = vmatprep.mubr.bf16.mxu1 %v9277_v49  ;;  %6555 = vmatpush3.bf16.msra.mxu1 %v7223_v24  ;;  %v5919_v24 = vld [vmem:[%s7424_s20 + $0x78] sm:$0xf]  ;;  %v1475_v53 = vrot.slane %v7290_v3, 5  ;;  %9280 = vst [vmem:[#allocation9_spill] sm:$0xff] %v8512_v28  ;;  %v8516_v42 = vrot.slane %v4029_v1, 4  ;;  %v8518_v61 = vrot.slane %v4046_v34, 5  ;;  %v8522_v36 = vsel %vm7702_vm5, %v5630_v17, %v1472_v46 }
  0xe8   : > { %6556 = vmatprep.subr.bf16.mxu1 %v7225_v41  ;;  %v8514_v35 = vrot.slane %v4019_v62, 4  ;;  %v4052_v8 = vrot.slane %v4050_v10, 4  ;;  %v1474_v44 = vrot.slane %v1472_v46, 4  ;;  %v4043_v49 = vor.u32 %v4042_v56, %v4039_v26  ;;  %v5925_v3 = vld [vmem:[%s7424_s20 + $0x90] sm:$0xf] }
  0xe9   : > { %v4056_v25 = vshll.u32 %v8479_v30, 16  ;;  %v4064_v0 = vshll.u32 %v5919_v24, 16  ;;  %v4070_v62 = vshll.u32 %v8496_v22, 16  ;;  %v4074_v1 = vshrl.u32 %v8496_v22, 16  ;;  %v8529_v34 = vld [vmem:[%s7424_s20 + $0x94] sm:$0xf] }
  0xea   : > { %9281 = vst [vmem:[#allocation10_spill] sm:$0xff] %v8529_v34  ;;  %v9282_v10 = vcombine.low %v8231_v27, %v8235_v29  ;;  %v4085_v17 = vshrl.u32 %v5922_v38, 16  ;;  %v4088_v46 = vshll.u32 %v5922_v38, 16  ;;  %v4098_v26 = vshrl.u32 %v8512_v28, 16  ;;  %v5928_v38 = vld [vmem:[%s7424_s20 + $0x9c] sm:$0xf] }
  0xeb   : > { %6557 = vmatpush3.bf16.msra.mxu1 %v7225_v41  ;;  %v4061_v41 = vshrl.u32 %v5919_v24, 16  ;;  %v9283_v56 = vcombine.low %v8242_v45, %v8246_v14  ;;  %v4053_v29 = vor.u32 %v4052_v8, %v8518_v61  ;;  %v4112_v24 = vshll.u32 %v5925_v3, 16  ;;  %v8551_v45 = vld [vmem:[%s7424_s20 + $0x80] sm:$0x1] }
  0xec   : > { %6558 = vmatprep.subr.bf16.mxu1 %v7227_v23  ;;  %v8548_v5 = vrot.slane %v4056_v25, 5  ;;  %9284 = vst [vmem:[#allocation11_spill] sm:$0xff] %v8551_v45  ;;  %v4118_v14 = vshll.u32 %v8529_v34, 16  ;;  %v4066_v27 = vrot.slane %v4064_v0, 5  ;;  %v4076_v8 = vrot.slane %v4074_v1, 4 }
  0xed   : > { %6735 = vmatmul.mubr.bf16.gmra.mrb[28].mxu0 %v7221_v4  ;;  %v4094_v4 = vshll.u32 %v8512_v28, 16  ;;  %v8555_v28 = vrot.slane %v4070_v62, 5  ;;  %v8561_v22 = vld [vmem:[%s7424_s20 + $0xa0] sm:$0xf]  ;;  %v4087_v25 = vrot.slane %v4085_v17, 4  ;;  %v4090_v30 = vrot.slane %v4088_v46, 5 }
  0xee   : > { %6527 = vmatmul.mubr.bf16.gmra.mrb[12].mxu1 %v9282_v10  ;;  %6754 = vmatprep.mubr.bf16.mxu0 %v8300_v59  ;;  %v4109_v59 = vshrl.u32 %v5925_v3, 16  ;;  %v8546_v10 = vrot.slane %v4043_v49, 4  ;;  %v8558_v3 = vld [vmem:[%s7424_s20 + $0x8c] sm:$0x1]  ;;  %9286 = vst [vmem:[#allocation13_spill] sm:$0xff] %v8561_v22  ;;  %v4100_v47 = vrot.slane %v4098_v26, 4  ;;  %v8578_v62 = vsel %vm7702_vm5, %v1474_v44, %v1475_v53 }
  0xef   : > { %6530 = vmatprep.mubr.bf16.mxu1 %v9283_v56  ;;  %6559 = vmatpush3.bf16.msra.mxu1 %v7227_v23  ;;  %v4122_v23 = vshrl.u32 %v8529_v34, 16  ;;  %v4063_v56 = vrot.slane %v4061_v41, 4  ;;  %9285 = vst [vmem:[#allocation12_spill] sm:$0xff] %v8558_v3  ;;  %v7226_v49 = vld [vmem:[%s9243_s1 + $0x208] sm:$0xff]   ;;  %v8566_v13 = vrot.slane %v4094_v4, 5  ;;  %v4114_v34 = vrot.slane %v4112_v24, 5 }
  0xf0   : > { %6560 = vmatprep.subr.bf16.mxu1 %v7229_v12  ;;  %v5931_v41 = vld [vmem:[%s7424_s20 + $0xa8] sm:$0xf]  ;;  %v4111_v1 = vrot.slane %v4109_v59, 4  ;;  %v8583_v17 = vld [vmem:[%s9243_s1 + $0x100] sm:$0xff]   ;;  %v8586_v46 = vrot.slane %v4118_v14, 5  ;;  %v4133_v26 = vshrl.u32 %v5928_v38, 16  ;;  %v9289_v24 = vcombine.low %v8250_v16, %v8260_v15 }
  0xf1   : > { %9288 = vst [vmem:[#allocation15_spill] sm:$0xff] %v8583_v17  ;;  %v4124_v4 = vrot.slane %v4122_v23, 4  ;;  %v4136_v0 = vshll.u32 %v5928_v38, 16  ;;  %v8589_v53 = vrot.slane %v4053_v29, 4  ;;  %v4142_v44 = vshll.u32 %v8561_v22, 16  ;;  %v7228_v16 = vld [vmem:[%s9243_s1 + $0x210] sm:$0xff]  }
  0xf2   : > { %v4146_v59 = vshrl.u32 %v8561_v22, 16  ;;  %v4067_v14 = vor.u32 %v4066_v27, %v4063_v56  ;;  %v4077_v38 = vor.u32 %v4076_v8, %v8555_v28  ;;  %v4091_v23 = vor.u32 %v4090_v30, %v4087_v25  ;;  %v8601_v29 = vld [vmem:[%s7424_s20 + $0xac] sm:$0xf]  ;;  %v8614_v25 = vld [vmem:[%s7424_s20 + $0xa4] sm:$0x1] }
  0xf3   : > { %6561 = vmatpush3.bf16.msra.mxu1 %v7229_v12  ;;  %v4080_v12 = vshll.u32 %v8551_v45, 16  ;;  %9290 = vst [vmem:[#allocation16_spill] sm:$0xff] %v8601_v29  ;;  %v4101_v15 = vor.u32 %v4100_v47, %v8566_v13  ;;  %v4157_v27 = vshrl.u32 %v5931_v41, 16  ;;  %v4160_v30 = vshll.u32 %v5931_v41, 16 }
  0xf4   : > { %6834 = vmatprep.subr.bf16.mxu1 %v8583_v17  ;;  %v9291_v17 = vcombine.low %v8306_v20, %v8327_v7  ;;  %v4115_v56 = vor.u32 %v4114_v34, %v4111_v1  ;;  %v4125_v8 = vor.u32 %v4124_v4, %v8586_v46  ;;  %v4135_v20 = vrot.slane %v4133_v26, 4 }
  0xf5   : > { %6755 = vmatmul.mubr.bf16.vlgmr.msra.gmra.mrb[0].mxu0 %v8383_v50  ;;  %v4104_v50 = vshll.u32 %v8558_v3, 16  ;;  %v4138_v7 = vrot.slane %v4136_v0, 5  ;;  %v4170_v22 = vshrl.u32 %v8601_v29, 16  ;;  %v4068_v47 = vrot.slane %v4067_v14, 4  ;;  %v7230_v0 = vld [vmem:[%s9243_s1 + $0x218] sm:$0xff]  }
  0xf6   : > { %6531 = vmatmul.mubr.bf16.gmra.mrb[16].mxu1 %v9289_v24  ;;  %6787 = vmatpush3.bf16.msra.mxu0 %v8287_v21  ;;  %v4128_v21 = vshll.u32 %v8569_v39, 16  ;;  %v4166_v24 = vshll.u32 %v8601_v29, 16  ;;  %v4078_v39 = vrot.slane %v4077_v38, 4  ;;  %v4082_v3 = vrot.slane %v4080_v12, 5 }
  0xf7   : > { %6534 = vmatprep.mubr.bf16.mxu1 %v9291_v17  ;;  %6758 = vmatprep.mubr.bf16.mxu0 %v8387_v48  ;;  %v8616_v17 = vrot.slane %v4142_v44, 5  ;;  %v4148_v48 = vrot.slane %v4146_v59, 4  ;;  %v4106_v41 = vrot.slane %v4104_v50, 5  ;;  %v4092_v34 = vrot.slane %v4091_v23, 4 }
  0xf8   : > { %6788 = vmatprep.subr.bf16.mxu0 %v7226_v49  ;;  %v4102_v1 = vrot.slane %v4101_v15, 4  ;;  %v4159_v4 = vrot.slane %v4157_v27, 4  ;;  %v4162_v45 = vrot.slane %v4160_v30, 5  ;;  %v4116_v26 = vrot.slane %v4115_v56, 4  ;;  %v8682_v27 = vld [vmem:[%s7424_s20 + $0xbc] sm:$0x1] }
  0xf9   : > { %v4130_v44 = vrot.slane %v4128_v21, 5  ;;  %v4139_v59 = vor.u32 %v4138_v7, %v4135_v20  ;;  %v4152_v29 = vshll.u32 %v8614_v25, 16  ;;  %v4149_v12 = vor.u32 %v4148_v48, %v8616_v17  ;;  %v8649_v21 = vld [vmem:[%s7424_s20 + $0xb0] sm:$0x1] }
  0xfa   : > { %6789 = vmatpush3.bf16.msra.mxu0 %v7226_v49  ;;  %v4126_v49 = vrot.slane %v4125_v8, 4  ;;  %v8626_v14 = vrot.slane %v4166_v24, 5  ;;  %v4172_v38 = vrot.slane %v4170_v22, 4  ;;  %v9292_v23 = vor.u32 %v8034_v57, %v8032_v11 }
  0xfb   : > { %6790 = vmatprep.subr.bf16.mxu0 %v7228_v16  ;;  %v9293_v15 = vcombine.low %v8339_v40, %v8364_v60  ;;  %v4059_v22 = vsel %vm7456_vm2, %v8589_v53, %v8548_v5  ;;  %v4073_v57 = vsel %vm7456_vm2, %v4068_v47, %v8555_v28  ;;  %v9294_v40 = vcombine.low %v8394_v31, %v8436_v43  ;;  %v7233_v31 = vld [vmem:[%s9243_s1 + $0x220] sm:$0xff]  }
  0xfc   : > { %v8631_v50 = vrot.slane %v9292_v23, 4  ;;  %v4083_v60 = vsel %vm7456_vm2, %v4078_v39, %v4082_v3  ;;  %v4163_v5 = vor.u32 %v4162_v45, %v4159_v4  ;;  %v4107_v28 = vsel %vm7456_vm2, %v4102_v1, %v4106_v41  ;;  %v5971_v41 = vld [vmem:[%s7424_s20 + $0x48] sm:$0xe] }
  0xfd   : > { %6759 = vmatmul.mubr.bf16.gmra.mrb[4].mxu0 %v8432_v55  ;;  %v4049_v55 = vsel %vm7456_vm2, %v8546_v10, %v8518_v61  ;;  %v5934_v61 = vld [vmem:[%s7424_s20 + $0xb4] sm:$0xf]  ;;  %v8661_v10 = vld [vmem:[%s7424_s20 + $0xb8] sm:$0xf]  ;;  %v4121_v39 = vsel %vm7456_vm2, %v4116_v26, %v8586_v46  ;;  %v8671_v43 = vrot.slane %v4139_v59, 4  ;;  %v8673_v3 = vrot.slane %v4152_v29, 5 }
  0xfe   : > { %6535 = vmatmul.mubr.bf16.gmra.mrb[20].mxu1 %v9293_v15  ;;  %6762 = vmatprep.mubr.bf16.mxu0 %v8487_v18  ;;  %v4097_v18 = vsel %vm7456_vm2, %v4092_v34, %v8566_v13  ;;  %v4131_v13 = vsel %vm7456_vm2, %v4126_v49, %v4130_v44  ;;  %v8677_v45 = vrot.slane %v4149_v12, 4  ;;  %v4173_v53 = vor.u32 %v4172_v38, %v8626_v14  ;;  %v5972_v26 = vld [vmem:[%s7424_s20 + $0x54] sm:$0xe] }
  0xff   : > { %6538 = vmatprep.mubr.bf16.mxu1 %v9294_v40  ;;  %6791 = vmatpush3.bf16.msra.mxu0 %v7228_v16  ;;  %v4176_v16 = vshll.u32 %v8649_v21, 16  ;;  %v9295_v46 = vsel %vm7456_vm2, %v8516_v42, %v8505_v52  ;;  %v9296_v29 = vsel %vm7456_vm2, %v8514_v35, %v8438_v58  ;;  %v4181_v56 = vshrl.u32 %v5934_v61, 16 }
 0x100   : > { %6792 = vmatprep.subr.bf16.mxu0 %v7230_v0  ;;  %v5949_v30 = vcombine.low %v9296_v29, %v9295_v46  ;;  %v4184_v8 = vshll.u32 %v5934_v61, 16  ;;  %v4190_v20 = vshll.u32 %v8661_v10, 16  ;;  %v5645_v7 = vcombine.low %v8493_v2, %v8503_v54  ;;  %v7236_v2 = vld [vmem:[%s9243_s1 + $0x228] sm:$0xff]   ;;  %v5937_v54 = vld [vmem:[%s7424_s20 + $0xc0] sm:$0xf]  ;;  %v9300_v29 = vld [vmem:[#allocation5_spill] sm:$0xff] }
 0x101   : > { %v5646_v48 = vcombine.low %v8522_v36, %v8578_v62  ;;  %v5950_v24 = vcombine.low %v4049_v55, %v4059_v22  ;;  %v8699_v52 = vrot.slane %v4163_v5, 4  ;;  %v5951_v42 = vcombine.low %v4073_v57, %v4083_v60 }
 0x102   : > { %v8701_v58 = vcombine.low %v4097_v18, %v4107_v28  ;;  %v8703_v35 = vcombine.low %v4121_v39, %v4131_v13  ;;  %v4145_v47 = vsel %vm7456_vm2, %v8671_v43, %v8616_v17  ;;  %v4155_v34 = vsel %vm7456_vm2, %v8677_v45, %v8673_v3  ;;  %v5974_v28 = vld [vmem:[%s7424_s20 + $0x6c] sm:$0xe] }
 0x103   : > { %6793 = vmatpush3.bf16.msra.mxu0 %v7230_v0  ;;  %v8719_v1 = vrot.slane %v4173_v53, 4  ;;  %v8721_v4 = vrot.slane %v4176_v16, 5  ;;  %v4194_v0 = vshrl.u32 %v8661_v10, 16  ;;  %v9297_v44 = vcombine.low %v8448_v6, %v8457_v51  ;;  %v7239_v6 = vld [vmem:[%s9243_s1 + $0x230] sm:$0xff]   ;;  %v8743_v51 = vld [vmem:[%s7424_s20 + $0xc4] sm:$0xf] }
 0x104   : > { %6794 = vmatprep.subr.bf16.mxu0 %v7233_v31  ;;  %v8728_v59 = vrot.slane %v4181_v56, 4  ;;  %v8732_v49 = vrot.slane %v4190_v20, 5  ;;  %v4200_v12 = vshll.u32 %v8682_v27, 16  ;;  %v4169_v38 = vsel %vm7456_vm2, %v8699_v52, %v8626_v14  ;;  %v5973_v14 = vld [vmem:[%s7424_s20 + $0x60] sm:$0xe]  ;;  %v9298_v39 = vld [vmem:[#allocation3_spill] sm:$0xff] }
 0x105   : > { %6763 = vmatmul.mubr.bf16.gmra.mrb[8].mxu0 %v8499_v19  ;;  %v8730_v19 = vrot.slane %v4184_v8, 5  ;;  %v4205_v23 = vshrl.u32 %v5937_v54, 16  ;;  %v5987_v15 = vrot.slane %v5971_v41, 9  ;;  %v4667_v55 = vrot.slane %v8319_v32, 5  ;;  %v7231_v13 = vld [vmem:[%s7424_s20 + $0xc] sm:$0xff]   ;;  %v7242_v56 = vld [vmem:[%s9243_s1 + $0x238] sm:$0xff]  }
 0x106   : > { %6539 = vmatmul.mubr.bf16.gmra.mrb[24].mxu1 %v9297_v44  ;;  %6766 = vmatprep.mubr.bf16.mxu0 %v5949_v30  ;;  %v4208_v22 = vshll.u32 %v5937_v54, 16  ;;  %v4670_v57 = vrot.slane %v8367_v63, 5  ;;  %v5988_v40 = vrot.slane %v5972_v26, 9  ;;  %v4674_v60 = vrot.slane %v8331_v33, 5  ;;  %v9299_v16 = vld [vmem:[#allocation4_spill] sm:$0xff]  ;;  %v9301_v52 = vld [vmem:[#allocation6_spill] sm:$0xff] }
 0x107   : > { %6542 = vmatprep.mubr.bf16.mxu1 %v5645_v7  ;;  %6795 = vmatpush3.bf16.msra.mxu0 %v7233_v31  ;;  %v4179_v18 = vsel %vm7456_vm2, %v8719_v1, %v8721_v4  ;;  %v8753_v5 = vrot.slane %v4194_v0, 4  ;;  %v8757_v61 = vsel %vm7702_vm5, %v5987_v15, %v4667_v55  ;;  %v4669_v32 = vrot.slane %v4667_v55, 4  ;;  %v9302_v4 = vld [vmem:[#allocation7_spill] sm:$0xff] }
 0x108   : > { %6796 = vmatprep.subr.bf16.mxu0 %v7236_v2  ;;  %v4214_v31 = vshll.u32 %v8743_v51, 16  ;;  %v8763_v63 = vsel %vm7702_vm5, %v5988_v40, %v4674_v60  ;;  %v4676_v33 = vrot.slane %v4674_v60, 4  ;;  %v4677_v3 = vrot.slane %v9298_v39, 5  ;;  %v8794_v26 = vld [vmem:[%s7424_s20 + $0xc8] sm:$0x1]  ;;  %v7232_v40 = vld [vmem:[%s7424_s20 + $0x18] sm:$0xff]  }
 0x109   : > { %v8769_v45 = vsel %vm7702_vm5, %v4669_v32, %v4670_v57  ;;  %v5989_v53 = vrot.slane %v5973_v14, 9  ;;  %v4681_v46 = vrot.slane %v9299_v16, 5  ;;  %v4684_v30 = vrot.slane %v9300_v29, 5  ;;  %v7234_v39 = vld [vmem:[%s7424_s20 + $0x24] sm:$0xff]  }
 0x10a   : > { %v6003_v8 = vcombine.low %v8757_v61, %v8769_v45  ;;  %v8780_v20 = vsel %vm7702_vm5, %v4676_v33, %v4677_v3  ;;  %v5990_v7 = vrot.slane %v5974_v28, 9  ;;  %v4691_v0 = vrot.slane %v9302_v4, 5  ;;  %v9304_v28 = vld [vmem:[#allocation11_spill] sm:$0xff]  ;;  %v5744_v61 = vld [vmem:[%s7424_s20 + $0x90] sm:$0xf] }
 0x10b   : > { %6797 = vmatpush3.bf16.msra.mxu0 %v7236_v2  ;;  %v4688_v2 = vrot.slane %v9301_v52, 5  ;;  %v6004_v54 = vcombine.low %v8763_v63, %v8780_v20  ;;  %v8787_v41 = vsel %vm7702_vm5, %v5989_v53, %v4681_v46  ;;  %v4683_v1 = vrot.slane %v4681_v46, 4  ;;  %v9305_v53 = vld [vmem:[#allocation2_spill] sm:$0xff]  ;;  %v7248_v45 = vld [vmem:[%s7424_s20 + $0xa8] sm:$0xff]  }
 0x10c   : > { %6798 = vmatprep.subr.bf16.mxu0 %v7239_v6  ;;  %v8796_v44 = vrot.slane %v4205_v23, 4  ;;  %v8809_v36 = vcombine.low %v4145_v47, %v4155_v34  ;;  %v4187_v62 = vor.u32 %v8730_v19, %v8728_v59  ;;  %v5975_v23 = vld [vmem:[%s7424_s20 + $0x78] sm:$0xe]  ;;  %v8821_v57 = vrot.slane %v4200_v12, 5  ;;  %v5940_v12 = vld [vmem:[%s7424_s20 + $0xcc] sm:$0xf] }
 0x10d   : > { %6767 = vmatmul.mubr.bf16.gmra.mrb[12].mxu0 %v5950_v24  ;;  %v8798_v24 = vrot.slane %v4208_v22, 5  ;;  %v8802_v15 = vsel %vm7702_vm5, %v5990_v7, %v4688_v2  ;;  %v4690_v55 = vrot.slane %v4688_v2, 4  ;;  %v8819_v22 = vcombine.low %v4169_v38, %v4179_v18  ;;  %v5738_v47 = vld [vmem:[%s7424_s20 + $0x78] sm:$0xf]  ;;  %v9303_v18 = vld [vmem:[#allocation8_spill] sm:$0xff] }
 0x10e   : > { %6543 = vmatmul.mubr.bf16.gmra.mrb[28].mxu1 %v5646_v48  ;;  %6770 = vmatprep.mubr.bf16.mxu0 %v5951_v42  ;;  %v4218_v48 = vshrl.u32 %v8743_v51, 16  ;;  %v8816_v42 = vsel %vm7702_vm5, %v4683_v1, %v4684_v30  ;;  %v4197_v34 = vor.u32 %v8753_v5, %v8732_v49  ;;  %v8832_v59 = vrot.slane %v4214_v31, 5  ;;  %v8846_v31 = vld [vmem:[%s7424_s20 + $0xd0] sm:$0xf]  ;;  %v9306_v1 = vld [vmem:[#allocation9_spill] sm:$0xff] }
 0x10f   : > { %6562 = vmatprep.mubr.bf16.mxu1 %v7231_v13  ;;  %6799 = vmatpush3.bf16.msra.mxu0 %v7239_v6  ;;  %v6005_v17 = vcombine.low %v8787_v41, %v8816_v42  ;;  %v8827_v43 = vsel %vm7702_vm5, %v4690_v55, %v4691_v0  ;;  %v4224_v19 = vshll.u32 %v8794_v26, 16  ;;  %v5976_v6 = vld [vmem:[%s7424_s20 + $0x84] sm:$0xe]  ;;  %v4211_v60 = vor.u32 %v8798_v24, %v8796_v44  ;;  %v9307_v24 = vld [vmem:[#allocation12_spill] sm:$0xff]  ;;  %v7312_v63 = vld [vmem:[%s7424_s20 + $0x8c] sm:$0x1] }
 0x110   : > { %6800 = vmatprep.subr.bf16.mxu0 %v7242_v56  ;;  %v6006_v38 = vcombine.low %v8802_v15, %v8827_v43  ;;  %v5991_v14 = vrot.slane %v5975_v23, 9  ;;  %v4695_v32 = vrot.slane %v9303_v18, 5  ;;  %v4698_v33 = vrot.slane %v9304_v28, 5 }
 0x111   : > { %v4220_v5 = vrot.slane %v4218_v48, 4  ;;  %v2449_v3 = vshrl.u32 %v5738_v47, 16  ;;  %v2452_v13 = vshll.u32 %v5738_v47, 16  ;;  %v2471_v16 = vsel %vm7456_vm2, %v8631_v50, %v9305_v53 }
 0x112   : > { %v4229_v46 = vshrl.u32 %v5940_v12, 16  ;;  %v8854_v29 = vsel %vm7702_vm5, %v5991_v14, %v4695_v32  ;;  %v4697_v30 = vrot.slane %v4695_v32, 4  ;;  %v5992_v7 = vrot.slane %v5976_v6, 9  ;;  %v7292_v6 = vld [vmem:[%s9243_s1 + $0x108] sm:$0xff]  }
 0x113   : > { %6801 = vmatpush3.bf16.msra.mxu0 %v7242_v56  ;;  %v4232_v52 = vshll.u32 %v5940_v12, 16  ;;  %v2451_v2 = vrot.slane %v2449_v3, 4  ;;  %v2454_v56 = vrot.slane %v2452_v13, 5  ;;  %v4702_v4 = vrot.slane %v9306_v1, 5  ;;  %v5977_v12 = vld [vmem:[%s7424_s20 + $0x90] sm:$0xe] }
 0x114   : > { %v4238_v50 = vshll.u32 %v8846_v31, 16  ;;  %v4242_v0 = vshrl.u32 %v8846_v31, 16  ;;  %v8863_v44 = vsel %vm7702_vm5, %v4697_v30, %v4698_v33  ;;  %v4705_v55 = vrot.slane %v9307_v24, 5  ;;  %v7235_v3 = vld [vmem:[%s7424_s20 + $0x30] sm:$0xff]  }
 0x115   : > { %6771 = vmatmul.mubr.bf16.gmra.mrb[16].mxu0 %v8701_v58  ;;  %v9308_v58 = vld [vmem:[#allocation15_spill] sm:$0xff]  ;;  %v4221_v48 = vor.u32 %v4220_v5, %v8832_v59  ;;  %v2455_v23 = vor.u32 %v2454_v56, %v2451_v2  ;;  %v4704_v47 = vrot.slane %v4702_v4, 4  ;;  %v4198_v14 = vrot.slane %v4197_v34, 4  ;;  %v8884_v13 = vld [vmem:[%s7424_s20 + $0xd4] sm:$0x1]  ;;  %v9309_v2 = vld [vmem:[#allocation10_spill] sm:$0xff] }
 0x116   : > { %6563 = vmatmul.mubr.bf16.vlgmr.msra.gmra.mrb[0].mxu1 %v7232_v40  ;;  %6774 = vmatprep.mubr.bf16.mxu0 %v8703_v35  ;;  %v6007_v35 = vcombine.low %v8854_v29, %v8863_v44  ;;  %v4188_v40 = vrot.slane %v4187_v62, 4  ;;  %v4226_v18 = vrot.slane %v4224_v19, 5  ;;  %v8876_v32 = vsel %vm7702_vm5, %v5992_v7, %v4702_v4  ;;  %v7237_v19 = vld [vmem:[%s7424_s20 + $0x3c] sm:$0xff]   ;;  %v7293_v1 = vld [vmem:[%s9243_s1 + $0x110] sm:$0xff]  }
 0x117   : > { %6842 = vmatpush3.bf16.msra.mxu1 %v9308_v58  ;;  %6566 = vmatprep.mubr.bf16.mxu1 %v7234_v39  ;;  %v4231_v28 = vrot.slane %v4229_v46, 4  ;;  %v4234_v33 = vrot.slane %v4232_v52, 5  ;;  %v2456_v39 = vrot.slane %v2455_v23, 4  ;;  %v8880_v5 = vsel %vm7702_vm5, %v4704_v47, %v4705_v55  ;;  %v7294_v47 = vld [vmem:[%s7424_s20 + $0x1c] sm:$0xf] }
 0x118   : > { %6835 = vmatprep.subr.bf16.mxu1 %v7292_v6  ;;  %v8886_v53 = vrot.slane %v4238_v50, 5  ;;  %v4244_v30 = vrot.slane %v4242_v0, 4  ;;  %v6008_v62 = vcombine.low %v8876_v32, %v8880_v5  ;;  %v5993_v34 = vrot.slane %v5977_v12, 9 }
 0x119   : > { %v4212_v7 = vrot.slane %v4211_v60, 4  ;;  %v4222_v46 = vrot.slane %v4221_v48, 4  ;;  %v2461_v52 = vsel %vm7456_vm2, %v2456_v39, %v8032_v11  ;;  %v4709_v56 = vrot.slane %v9309_v2, 5  ;;  %v9310_v11 = vld [vmem:[#allocation14_spill] sm:$0xff]  ;;  %v7238_v39 = vld [vmem:[%s7424_s20 + $0x48] sm:$0xff]  }
 0x11a   : > { %v4193_v4 = vsel %vm7456_vm2, %v4188_v40, %v8732_v49  ;;  %v4203_v60 = vsel %vm7456_vm2, %v4198_v14, %v8821_v57  ;;  %v8904_v50 = vcombine.low %v2461_v52, %v2471_v16  ;;  %v4712_v0 = vrot.slane %v9310_v11, 5  ;;  %v5967_v57 = vld [vmem:[%s7424_s20 + $0x18] sm:$0xe]  ;;  %v5978_v16 = vld [vmem:[%s7424_s20 + $0x9c] sm:$0xe] }
 0x11b   : > { %6843 = vmatpush3.bf16.msra.mxu1 %v7292_v6  ;;  %v4235_v24 = vor.u32 %v4234_v33, %v4231_v28  ;;  %v4248_v55 = vshll.u32 %v8884_v13, 16  ;;  %v8911_v58 = vsel %vm7702_vm5, %v5993_v34, %v4709_v56  ;;  %v4711_v48 = vrot.slane %v4709_v56, 4  ;;  %v7295_v40 = vld [vmem:[%s9243_s1 + $0x118] sm:$0xff]   ;;  %v7296_v2 = vld [vmem:[%s7424_s20 + $0x20] sm:$0x1] }
 0x11c   : > { %6836 = vmatprep.subr.bf16.mxu1 %v7293_v1  ;;  %v4245_v49 = vor.u32 %v4244_v30, %v8886_v53  ;;  %v4227_v23 = vsel %vm7456_vm2, %v4222_v46, %v4226_v18  ;;  %v4639_v12 = vrot.slane %v7294_v47, 5  ;;  %v5956_v6 = vcombine.low %v4193_v4, %v4203_v60  ;;  %v9311_v34 = vld [vmem:[#allocation13_spill] sm:$0xff]  ;;  %v5979_v11 = vld [vmem:[%s7424_s20 + $0xa8] sm:$0xe] }
 0x11d   : > { %6775 = vmatmul.mubr.bf16.gmra.mrb[20].mxu0 %v8809_v36  ;;  %v4217_v36 = vsel %vm7456_vm2, %v4212_v7, %v8832_v59  ;;  %v4236_v14 = vrot.slane %v4235_v24, 4  ;;  %v4250_v28 = vrot.slane %v4248_v55, 5  ;;  %v5983_v18 = vrot.slane %v5967_v57, 9  ;;  %v7240_v46 = vld [vmem:[%s7424_s20 + $0x54] sm:$0xff]   ;;  %v5968_v55 = vld [vmem:[%s7424_s20 + $0x24] sm:$0xe] }
 0x11e   : > { %6567 = vmatmul.mubr.bf16.gmra.mrb[4].mxu1 %v7235_v3  ;;  %6778 = vmatprep.mubr.bf16.mxu0 %v8819_v22  ;;  %v8925_v22 = vsel %vm7702_vm5, %v4711_v48, %v4712_v0  ;;  %v5994_v33 = vrot.slane %v5978_v16, 9  ;;  %v5957_v3 = vcombine.low %v4217_v36, %v4227_v23  ;;  %v4246_v30 = vrot.slane %v4245_v49, 4  ;;  %v7298_v48 = vld [vmem:[%s7424_s20 + $0x28] sm:$0xf]  ;;  %v7299_v36 = vld [vmem:[%s7424_s20 + $0x34] sm:$0xf] }
 0x11f   : > { %6570 = vmatprep.mubr.bf16.mxu1 %v7237_v19  ;;  %6844 = vmatpush3.bf16.msra.mxu1 %v7293_v1  ;;  %v6009_v59 = vcombine.low %v8911_v58, %v8925_v22  ;;  %v4716_v19 = vrot.slane %v9311_v34, 5  ;;  %v4719_v7 = vrot.slane %v8614_v25, 5  ;;  %v4641_v52 = vrot.slane %v4639_v12, 4  ;;  %v7297_v1 = vld [vmem:[%s9243_s1 + $0x120] sm:$0xff]  }
 0x120   : > { %6837 = vmatprep.subr.bf16.mxu1 %v7295_v40  ;;  %v4642_v56 = vrot.slane %v7296_v2, 5  ;;  %v4640_v25 = vsel %vm7702_vm5, %v5983_v18, %v4639_v12  ;;  %v4241_v0 = vsel %vm7456_vm2, %v4236_v14, %v8886_v53  ;;  %v4251_v24 = vsel %vm7456_vm2, %v4246_v30, %v4250_v28  ;;  %v5969_v12 = vld [vmem:[%s7424_s20 + $0x30] sm:$0xe]  ;;  %v7241_v30 = vld [vmem:[%s7424_s20 + $0x60] sm:$0xff]  }
 0x121   : > { %v8942_v4 = vsel %vm7702_vm5, %v5994_v33, %v4716_v19  ;;  %v4718_v60 = vrot.slane %v4716_v19, 4  ;;  %v4646_v49 = vrot.slane %v7298_v48, 5  ;;  %v4653_v23 = vrot.slane %v7299_v36, 5  ;;  %v7301_v33 = vld [vmem:[%s7424_s20 + $0x2c] sm:$0x1] }
 0x122   : > { %v4643_v16 = vsel %vm7702_vm5, %v4641_v52, %v4642_v56  ;;  %v5995_v47 = vrot.slane %v5979_v11, 9  ;;  %v5958_v28 = vcombine.low %v4241_v0, %v4251_v24  ;;  %v5984_v18 = vrot.slane %v5968_v55, 9  ;;  %v7243_v52 = vld [vmem:[%s7424_s20 + $0x6c] sm:$0xff]   ;;  %v5980_v11 = vld [vmem:[%s7424_s20 + $0xb4] sm:$0xe] }
 0x123   : > { %6845 = vmatpush3.bf16.msra.mxu1 %v7295_v40  ;;  %v8956_v57 = vsel %vm7702_vm5, %v4718_v60, %v4719_v7  ;;  %v9312_v40 = vld [vmem:[#allocation16_spill] sm:$0xff]  ;;  %v5999_v34 = vcombine.low %v4640_v25, %v4643_v16  ;;  %v4648_v19 = vrot.slane %v4646_v49, 4  ;;  %v5985_v2 = vrot.slane %v5969_v12, 9  ;;  %v5970_v0 = vld [vmem:[%s7424_s20 + $0x3c] sm:$0xe] }
 0x124   : > { %6838 = vmatprep.subr.bf16.mxu1 %v7297_v1  ;;  %v6010_v53 = vcombine.low %v8942_v4, %v8956_v57  ;;  %v4723_v14 = vrot.slane %v9312_v40, 5  ;;  %v4655_v56 = vrot.slane %v4653_v23, 4  ;;  %v7303_v24 = vld [vmem:[%s7424_s20 + $0x40] sm:$0xf]  ;;  %v4647_v48 = vsel %vm7702_vm5, %v5984_v18, %v4646_v49  ;;  %v7305_v18 = vld [vmem:[%s7424_s20 + $0x44] sm:$0x1] }
 0x125   : > { %6779 = vmatmul.mubr.bf16.gmra.mrb[24].mxu0 %v5956_v6  ;;  %v7300_v6 = vld [vmem:[%s9243_s1 + $0x128] sm:$0xff]   ;;  %v4660_v55 = vrot.slane %v7303_v24, 5  ;;  %v4730_v12 = vrot.slane %v8661_v10, 5  ;;  %v4654_v49 = vsel %vm7702_vm5, %v5985_v2, %v4653_v23  ;;  %v7306_v10 = vld [vmem:[%s9243_s1 + $0x138] sm:$0xff]   ;;  %v5981_v23 = vld [vmem:[%s7424_s20 + $0xc0] sm:$0xe] }
 0x126   : > { %6571 = vmatmul.mubr.bf16.gmra.mrb[8].mxu1 %v7238_v39  ;;  %6782 = vmatprep.mubr.bf16.mxu0 %v5957_v3  ;;  %v4649_v39 = vrot.slane %v7301_v33, 5  ;;  %v4726_v3 = vrot.slane %v8649_v21, 5  ;;  %v8973_v7 = vsel %vm7702_vm5, %v5995_v47, %v4723_v14  ;;  %v7304_v21 = vld [vmem:[%s9243_s1 + $0x130] sm:$0xff]   ;;  %v5996_v47 = vrot.slane %v5980_v11, 9 }
 0x127   : > { %6574 = vmatprep.mubr.bf16.mxu1 %v7240_v46  ;;  %6846 = vmatpush3.bf16.msra.mxu1 %v7297_v1  ;;  %v4725_v46 = vrot.slane %v4723_v14, 4  ;;  %v7302_v1 = vld [vmem:[%s7424_s20 + $0x38] sm:$0x1]  ;;  %v5986_v14 = vrot.slane %v5970_v0, 9  ;;  %v4663_v33 = vrot.slane %v7305_v18, 5  ;;  %v4737_v11 = vrot.slane %v8743_v51, 5 }
 0x128   : > { %6839 = vmatprep.subr.bf16.mxu1 %v7300_v6  ;;  %v4656_v60 = vrot.slane %v7302_v1, 5  ;;  %v4650_v36 = vsel %vm7702_vm5, %v4648_v19, %v4649_v39  ;;  %v4732_v39 = vrot.slane %v4730_v12, 4  ;;  %v5735_v19 = vld [vmem:[%s7424_s20 + $0x6c] sm:$0xf]  ;;  %v7246_v18 = vld [vmem:[%s7424_s20 + $0x90] sm:$0xff]   ;;  %v2492_v20 = vshll.u32 %v7312_v63, 16 }
 0x129   : > { %v8985_v25 = vsel %vm7702_vm5, %v4725_v46, %v4726_v3  ;;  %v6000_v3 = vcombine.low %v4647_v48, %v4650_v36  ;;  %v4661_v1 = vsel %vm7702_vm5, %v5986_v14, %v4660_v55  ;;  %v2425_v0 = vshrl.u32 %v5735_v19, 16  ;;  %v5982_v51 = vld [vmem:[%s7424_s20 + $0xcc] sm:$0xe] }
 0x12a   : > { %v6011_v16 = vcombine.low %v8973_v7, %v8985_v25  ;;  %v4657_v40 = vsel %vm7702_vm5, %v4655_v56, %v4656_v60  ;;  %v5997_v56 = vrot.slane %v5981_v23, 9  ;;  %v2428_v24 = vshll.u32 %v5735_v19, 16 }
 0x12b   : > { %6847 = vmatpush3.bf16.msra.mxu1 %v7300_v6  ;;  %v4733_v6 = vrot.slane %v8682_v27, 5  ;;  %v9005_v27 = vsel %vm7702_vm5, %v5996_v47, %v4730_v12  ;;  %v4740_v36 = vrot.slane %v8794_v26, 5  ;;  %v4739_v12 = vrot.slane %v4737_v11, 4 }
 0x12c   : > { %6840 = vmatprep.subr.bf16.mxu1 %v7304_v21  ;;  %v2430_v26 = vrot.slane %v2428_v24, 5  ;;  %v4747_v23 = vrot.slane %v8884_v13, 5 }
 0x12d   : > { %6783 = vmatmul.mubr.bf16.gmra.mrb[28].mxu0 %v5958_v28  ;;  %v4662_v28 = vrot.slane %v4660_v55, 4  ;;  %v9012_v46 = vsel %vm7702_vm5, %v4732_v39, %v4733_v6  ;;  %v9026_v55 = vsel %vm7702_vm5, %v5997_v56, %v4737_v11  ;;  %v4744_v39 = vrot.slane %v8846_v31, 5  ;;  %v7308_v56 = vld [vmem:[%s7424_s20 + $0x74] sm:$0x1] }
 0x12e   : > { %6575 = vmatmul.mubr.bf16.gmra.mrb[12].mxu1 %v7241_v30  ;;  %6802 = vmatprep.mubr.bf16.mxu0 %v5999_v34  ;;  %v7244_v30 = vld [vmem:[%s7424_s20 + $0x78] sm:$0xff]   ;;  %v6001_v34 = vcombine.low %v4654_v49, %v4657_v40  ;;  %v6012_v2 = vcombine.low %v9005_v27, %v9012_v46  ;;  %v9031_v49 = vsel %vm7702_vm5, %v4739_v12, %v4740_v36  ;;  %v2427_v40 = vrot.slane %v2425_v0, 4  ;;  %v7309_v0 = vld [vmem:[%s7424_s20 + $0x88] sm:$0xf] }
 0x12f   : > { %6578 = vmatprep.mubr.bf16.mxu1 %v7243_v52  ;;  %6848 = vmatpush3.bf16.msra.mxu1 %v7304_v21  ;;  %v7245_v52 = vld [vmem:[%s7424_s20 + $0x84] sm:$0xff]   ;;  %v4664_v60 = vsel %vm7702_vm5, %v4662_v28, %v4663_v33  ;;  %v7307_v21 = vld [vmem:[%s7424_s20 + $0x70] sm:$0xf]  ;;  %v6013_v28 = vcombine.low %v9026_v55, %v9031_v49  ;;  %v4746_v19 = vrot.slane %v4744_v39, 4  ;;  %v2482_v24 = vshll.u32 %v7309_v0, 16 }
 0x130   : > { %6841 = vmatprep.subr.bf16.mxu1 %v7306_v10  ;;  %v2434_v48 = vshll.u32 %v7307_v21, 16  ;;  %v2438_v47 = vshrl.u32 %v7307_v21, 16  ;;  %v6002_v6 = vcombine.low %v4661_v1, %v4664_v60  ;;  %v2444_v1 = vshll.u32 %v7308_v56, 16 }
 0x131   : > { %v9053_v11 = vsel %vm7702_vm5, %v4746_v19, %v4747_v23  ;;  %v2486_v21 = vshrl.u32 %v7309_v0, 16  ;;  %v7311_v19 = vld [vmem:[%s7424_s20 + $0xa0] sm:$0xf] }
 0x132   : > { %v9033_v14 = vrot.slane %v2434_v48, 5  ;;  %v2440_v33 = vrot.slane %v2438_v47, 4  ;;  %v2534_v56 = vshrl.u32 %v7311_v19, 16 }
 0x133   : > { %6849 = vmatpush3.bf16.msra.mxu1 %v7306_v10  ;;  %v5998_v10 = vrot.slane %v5982_v51, 9 }
 0x134   : > { %v2441_v31 = vor.u32 %v2440_v33, %v9033_v14  ;;  %v2500_v33 = vshll.u32 %v5744_v61, 16 }
 0x135   : > { %6803 = vmatmul.mubr.bf16.vlgmr.msra.gmra.mrb[0].mxu0 %v6000_v3  ;;  %v7247_v3 = vld [vmem:[%s7424_s20 + $0x9c] sm:$0xff]  }
 0x136   : > { %6579 = vmatmul.mubr.bf16.gmra.mrb[16].mxu1 %v7244_v30  ;;  %6806 = vmatprep.mubr.bf16.mxu0 %v6001_v34  ;;  %v5741_v30 = vld [vmem:[%s7424_s20 + $0x84] sm:$0xf]  ;;  %v9044_v34 = vsel %vm7702_vm5, %v5998_v10, %v4744_v39  ;;  %v2442_v47 = vrot.slane %v2441_v31, 4  ;;  %v7310_v10 = vld [vmem:[%s7424_s20 + $0x94] sm:$0xf]  ;;  %v2502_v0 = vrot.slane %v2500_v33, 5 }
 0x137   : > { %6582 = vmatprep.mubr.bf16.mxu1 %v7245_v52  ;;  %v2431_v52 = vor.u32 %v2430_v26, %v2427_v40  ;;  %v2473_v13 = vshrl.u32 %v5741_v30, 16  ;;  %v2476_v60 = vshll.u32 %v5741_v30, 16  ;;  %v6014_v48 = vcombine.low %v9044_v34, %v9053_v11 }
 0x138   : > { %v9062_v40 = vrot.slane %v2482_v24, 5  ;;  %v2488_v26 = vrot.slane %v2486_v21, 4  ;;  %v2506_v39 = vshll.u32 %v7310_v10, 16  ;;  %v2510_v23 = vshrl.u32 %v7310_v10, 16  ;;  %v7314_v10 = vld [vmem:[%s7424_s20 + $0xa4] sm:$0x1] }
 0x139   : > { %v2432_v36 = vrot.slane %v2431_v52, 4  ;;  %v2475_v12 = vrot.slane %v2473_v13, 4  ;;  %v2478_v51 = vrot.slane %v2476_v60, 5  ;;  %v2530_v52 = vshll.u32 %v7311_v19, 16  ;;  %v7315_v19 = vld [vmem:[%s7424_s20 + $0xac] sm:$0xf] }
 0x13a   : > { %v2489_v13 = vor.u32 %v2488_v26, %v9062_v40  ;;  %v9079_v41 = vrot.slane %v2506_v39, 5  ;;  %v2512_v42 = vrot.slane %v2510_v23, 4  ;;  %v2536_v21 = vrot.slane %v2534_v56, 4  ;;  %v5753_v23 = vld [vmem:[%s7424_s20 + $0xb4] sm:$0xf] }
 0x13b   : > { %v2540_v39 = vshll.u32 %v7314_v10, 16  ;;  %v2558_v15 = vshrl.u32 %v7315_v19, 16  ;;  %v2572_v63 = vshll.u32 %v5753_v23, 16 }
 0x13c   : > { %v2513_v26 = vor.u32 %v2512_v42, %v9079_v41 }
 0x13d   : > { %6807 = vmatmul.mubr.bf16.gmra.mrb[4].mxu0 %v6002_v6  ;;  %v5747_v6 = vld [vmem:[%s7424_s20 + $0x9c] sm:$0xf] }
 0x13e   : > { %6583 = vmatmul.mubr.bf16.gmra.mrb[20].mxu1 %v7246_v18  ;;  %6810 = vmatprep.mubr.bf16.mxu0 %v6003_v8  ;;  %v2446_v8 = vrot.slane %v2444_v1, 5  ;;  %v2497_v18 = vshrl.u32 %v5744_v61, 16  ;;  %v2524_v30 = vshll.u32 %v5747_v6, 16  ;;  %v2437_v1 = vsel %vm7456_vm2, %v2432_v36, %v9033_v14  ;;  %v7250_v61 = vld [vmem:[%s7424_s20 + $0xc0] sm:$0xff]  }
 0x13f   : > { %6586 = vmatprep.mubr.bf16.mxu1 %v7247_v3  ;;  %v2521_v3 = vshrl.u32 %v5747_v6, 16  ;;  %v9081_v14 = vrot.slane %v2530_v52, 5  ;;  %v2554_v52 = vshll.u32 %v7315_v19, 16 }
 0x140   : > { %v2447_v31 = vsel %vm7456_vm2, %v2442_v47, %v2446_v8  ;;  %v2499_v60 = vrot.slane %v2497_v18, 4  ;;  %v2526_v24 = vrot.slane %v2524_v30, 5  ;;  %v2494_v8 = vrot.slane %v2492_v20, 5  ;;  %v7316_v20 = vld [vmem:[%s7424_s20 + $0xb8] sm:$0xf] }
 0x141   : > { %v2490_v47 = vrot.slane %v2489_v13, 4  ;;  %v2537_v33 = vor.u32 %v2536_v21, %v9081_v14  ;;  %v2578_v29 = vshll.u32 %v7316_v20, 16  ;;  %v2582_v44 = vshrl.u32 %v7316_v20, 16 }
 0x143   : > { %v2538_v13 = vrot.slane %v2537_v33, 4 }
 0x145   : > { %6811 = vmatmul.mubr.bf16.gmra.mrb[8].mxu0 %v6004_v54  ;;  %v2479_v54 = vor.u32 %v2478_v51, %v2475_v12  ;;  %v2503_v12 = vor.u32 %v2502_v0, %v2499_v60  ;;  %v7313_v51 = vld [vmem:[%s7424_s20 + $0x98] sm:$0x1]  ;;  %v2542_v60 = vrot.slane %v2540_v39, 5 }
 0x146   : > { %6587 = vmatmul.mubr.bf16.gmra.mrb[24].mxu1 %v7248_v45  ;;  %6814 = vmatprep.mubr.bf16.mxu0 %v6005_v17  ;;  %v2523_v17 = vrot.slane %v2521_v3, 4  ;;  %v5767_v45 = vcombine.low %v2437_v1, %v2447_v31  ;;  %v2516_v6 = vshll.u32 %v7313_v51, 16  ;;  %v2569_v31 = vshrl.u32 %v5753_v23, 16 }
 0x147   : > { %6590 = vmatprep.mubr.bf16.mxu1 %v7249_v9  ;;  %v2480_v36 = vrot.slane %v2479_v54, 4  ;;  %v5750_v9 = vld [vmem:[%s7424_s20 + $0xa8] sm:$0xf]  ;;  %v2504_v56 = vrot.slane %v2503_v12, 4  ;;  %v2543_v32 = vsel %vm7456_vm2, %v2538_v13, %v2542_v60 }
 0x148   : > { %v2527_v18 = vor.u32 %v2526_v24, %v2523_v17  ;;  %v2545_v3 = vshrl.u32 %v5750_v9, 16  ;;  %v2548_v30 = vshll.u32 %v5750_v9, 16  ;;  %v2518_v1 = vrot.slane %v2516_v6, 5 }
 0x149   : > { %v2485_v43 = vsel %vm7456_vm2, %v2480_v36, %v9062_v40  ;;  %v2556_v17 = vrot.slane %v2554_v52, 5  ;;  %v2560_v24 = vrot.slane %v2558_v15, 4  ;;  %v2571_v21 = vrot.slane %v2569_v31, 4  ;;  %v5756_v36 = vld [vmem:[%s7424_s20 + $0xc0] sm:$0xf] }
 0x14a   : > { %v2528_v54 = vrot.slane %v2527_v18, 4  ;;  %v2547_v0 = vrot.slane %v2545_v3, 4  ;;  %v2550_v42 = vrot.slane %v2548_v30, 5  ;;  %v2593_v9 = vshrl.u32 %v5756_v36, 16  ;;  %v7318_v18 = vld [vmem:[%s7424_s20 + $0xc4] sm:$0xf] }
 0x14b   : > { %v2602_v33 = vshll.u32 %v7318_v18, 16 }
 0x14c   : > { %v2533_v51 = vsel %vm7456_vm2, %v2528_v54, %v9081_v14  ;;  %v2551_v5 = vor.u32 %v2550_v42, %v2547_v0  ;;  %v2606_v14 = vshrl.u32 %v7318_v18, 16  ;;  %v2595_v19 = vrot.slane %v2593_v9, 4 }
 0x14d   : > { %6815 = vmatmul.mubr.bf16.gmra.mrb[12].mxu0 %v6006_v38  ;;  %v2495_v38 = vsel %vm7456_vm2, %v2490_v47, %v2494_v8  ;;  %v2584_v8 = vrot.slane %v2582_v44, 4  ;;  %v2509_v47 = vsel %vm7456_vm2, %v2504_v56, %v9079_v41  ;;  %v7317_v41 = vld [vmem:[%s7424_s20 + $0xb0] sm:$0x1]  ;;  %v5771_v58 = vcombine.low %v2533_v51, %v2543_v32  ;;  %v7320_v44 = vld [vmem:[%s7424_s20 + $0xc8] sm:$0x1] }
 0x14e   : > { %6591 = vmatmul.mubr.bf16.gmra.mrb[28].mxu1 %v7250_v61  ;;  %6818 = vmatprep.mubr.bf16.mxu0 %v6007_v35  ;;  %v2514_v35 = vrot.slane %v2513_v26, 4  ;;  %v5769_v40 = vcombine.low %v2485_v43, %v2495_v38  ;;  %v2574_v61 = vrot.slane %v2572_v63, 5  ;;  %v2564_v6 = vshll.u32 %v7317_v41, 16 }
 0x14f   : > { %6626 = vmatprep.mubr.bf16.mxu1 %v5767_v45  ;;  %v2580_v45 = vrot.slane %v2578_v29, 5  ;;  %v2596_v26 = vshll.u32 %v5756_v36, 16  ;;  %v2552_v22 = vrot.slane %v2551_v5, 4  ;;  %v2604_v15 = vrot.slane %v2602_v33, 5 }
 0x150   : > { %v2519_v12 = vsel %vm7456_vm2, %v2514_v35, %v2518_v1  ;;  %v2575_v10 = vor.u32 %v2574_v61, %v2571_v21  ;;  %v2566_v30 = vrot.slane %v2564_v6, 5  ;;  %v2608_v43 = vrot.slane %v2606_v14, 4 }
 0x151   : > { %v2585_v39 = vor.u32 %v2584_v8, %v2580_v45  ;;  %v5770_v3 = vcombine.low %v2509_v47, %v2519_v12  ;;  %v2598_v52 = vrot.slane %v2596_v26, 5  ;;  %v2557_v31 = vsel %vm7456_vm2, %v2552_v22, %v2556_v17  ;;  %v9167_v47 = vld [vmem:[%s9244_s2] ss:$0 sm:$0xff] }
 0x152   : > { %v2576_v38 = vrot.slane %v2575_v10, 4  ;;  %v2609_v29 = vor.u32 %v2608_v43, %v2604_v15  ;;  %v2612_v35 = vshll.u32 %v7320_v44, 16 }
 0x153   : > { %v2586_v56 = vrot.slane %v2585_v39, 4  ;;  %v2599_v20 = vor.u32 %v2598_v52, %v2595_v19 }
 0x154   : > { %v2581_v4 = vsel %vm7456_vm2, %v2576_v38, %v2580_v45  ;;  %v2614_v54 = vrot.slane %v2612_v35, 5 }
 0x155   : > { %6819 = vmatmul.mubr.bf16.gmra.mrb[16].mxu0 %v6008_v62  ;;  %v2561_v62 = vor.u32 %v2560_v24, %v2556_v17  ;;  %v2600_v25 = vrot.slane %v2599_v20, 4 }
 0x156   : > { %6627 = vmatmul.mubr.bf16.vlgmr.msra.gmra.mrb[16].mxu1 %v8904_v50  ;;  %6822 = vmatprep.mubr.bf16.mxu0 %v6009_v59  ;;  %v7319_v50 = vld [vmem:[%s7424_s20 + $0xbc] sm:$0x1] }
 0x157   : > { %6630 = vmatprep.mubr.bf16.mxu1 %v5769_v40  ;;  %v2588_v23 = vshll.u32 %v7319_v50, 16  ;;  %v2562_v59 = vrot.slane %v2561_v62, 4  ;;  %v2605_v13 = vsel %vm7456_vm2, %v2600_v25, %v2604_v15 }
 0x159   : > { %v2590_v1 = vrot.slane %v2588_v23, 5  ;;  %v2567_v63 = vsel %vm7456_vm2, %v2562_v59, %v2566_v30 }
 0x15b   : > { %v2591_v57 = vsel %vm7456_vm2, %v2586_v56, %v2590_v1 }
 0x15c   : > { %v5773_v7 = vcombine.low %v2581_v4, %v2591_v57 }
 0x15d   : > { %6823 = vmatmul.mubr.bf16.gmra.mrb[20].mxu0 %v6010_v53  ;;  %v5772_v53 = vcombine.low %v2557_v31, %v2567_v63 }
 0x15e   : > { %6631 = vmatmul.mubr.bf16.gmra.mrb[20].mxu1 %v5770_v3  ;;  %6826 = vmatprep.mubr.bf16.mxu0 %v6011_v16  ;;  %v2610_v16 = vrot.slane %v2609_v29, 4 }
 0x15f   : > { %6634 = vmatprep.mubr.bf16.mxu1 %v5771_v58 }
 0x160   : > { %v2615_v60 = vsel %vm7456_vm2, %v2610_v16, %v2614_v54 }
 0x161   : > { %v5774_v0 = vcombine.low %v2605_v13, %v2615_v60 }
 0x165   : > { %6827 = vmatmul.mubr.bf16.gmra.mrb[24].mxu0 %v6012_v2 }
 0x166   : > { %6635 = vmatmul.mubr.bf16.gmra.mrb[24].mxu1 %v5772_v53  ;;  %6830 = vmatprep.mubr.bf16.mxu0 %v6013_v28 }
 0x167   : > { %6638 = vmatprep.mubr.bf16.mxu1 %v5773_v7 }
 0x16d   : > { %6831 = vmatmul.mubr.bf16.gmra.mrb[28].mxu0 %v6014_v48 }
 0x16e   : > { %6639 = vmatmul.mubr.bf16.gmra.mrb[28].mxu1 %v5774_v0 }
 0x1e9   : > { %v6564_v27 = vpop.f32.mrb[0].mxu1 }
 0x1ea   : > { %v2025_v46 = vpop.f32.mrb[1].mxu1 }
 0x1eb   : > { %v6565_v2 = vpop.f32.mrb[2].mxu1 }
 0x1ec   : > { %v2028_v42 = vpop.f32.mrb[3].mxu1 }
 0x1f1   : > { %v6568_v17 = vpop.f32.mrb[4].mxu1 }
 0x1f2   : > { %v2041_v55 = vpop.f32.mrb[5].mxu1 }
 0x1f3   : > { %v6569_v49 = vpop.f32.mrb[6].mxu1 }
 0x1f4   : > { %v2044_v28 = vpop.f32.mrb[7].mxu1 }
 0x1f9   : > { %v6572_v24 = vpop.f32.mrb[8].mxu1 }
 0x1fa   : > { %v2057_v40 = vpop.f32.mrb[9].mxu1 }
 0x1fb   : > { %v9152_v21 = vpop.f32.mrb[10].mxu1 }
 0x1fc   : > { %v9154_v37 = vpop.f32.mrb[11].mxu1 }
 0x201   : > { %v9156_v61 = vpop.f32.mrb[12].mxu1 }
 0x202   : > { %v9158_v34 = vpop.f32.mrb[13].mxu1 }
 0x203   : > { %v9160_v11 = vpop.f32.mrb[14].mxu1 }
 0x204   : > { %v9162_v48 = vpop.f32.mrb[15].mxu1 }
 0x208   : > { %v6804_v45 = vpop.f32.mrb[0].mxu0 }
 0x209   : > { %v6850_v8 = vadd.f32 %v6804_v45, %v6564_v27  ;;  %v4911_v36 = vpop.f32.mrb[1].mxu0 }
 0x20a   : > { %v6851_v12 = vadd.f32 %v4911_v36, %v2025_v46  ;;  %v6805_v51 = vpop.f32.mrb[2].mxu0 }
 0x20b   : > { %v6852_v32 = vadd.f32 %v6805_v51, %v6565_v2  ;;  %v4914_v5 = vpop.f32.mrb[3].mxu0  ;;  %v5079_v41 = vadd.f32 %v6850_v8, %v9167_v47 }
 0x20c   : > { %v6853_v62 = vadd.f32 %v4914_v5, %v2028_v42  ;;  %v5077_v9 = vadd.f32 %v6851_v12, %v9167_v47 }
 0x20d   : > { %v5080_v6 = vadd.f32 %v6852_v32, %v9167_v47 }
 0x20e   : > { %v5078_v26 = vadd.f32 %v6853_v62, %v9167_v47 }
 0x20f   : > { %v5110_v18 = vpack.c.bf16 %v5080_v6, %v5079_v41 }
 0x210   : > { %v5109_v33 = vpack.c.bf16 %v5078_v26, %v5077_v9  ;;  %v6808_v14 = vpop.f32.mrb[4].mxu0 }
 0x211   : > { %6171 = vst [vmem:[%s9176_s13 + $0x8] sm:$0xff] %v5110_v18   ;;  %v6854_v10 = vadd.f32 %v6808_v14, %v6568_v17  ;;  %v4927_v39 = vpop.f32.mrb[5].mxu0  ;;  %v5271_v50 = vunpack.c.l.bf16 %v5110_v18  ;;  %v5272_v19 = vunpack.c.h.bf16 %v5110_v18 }
 0x212   : > { %6095 = vst [vmem:[%s9176_s13] sm:$0xff] %v5109_v33   ;;  %v5269_v23 = vunpack.c.l.bf16 %v5109_v33  ;;  %v5270_v3 = vunpack.c.h.bf16 %v5109_v33  ;;  %v6855_v58 = vadd.f32 %v4927_v39, %v2041_v55  ;;  %v6809_v22 = vpop.f32.mrb[6].mxu0 }
 0x213   : > { %v6856_v59 = vadd.f32 %v6809_v22, %v6569_v49  ;;  %v4930_v30 = vpop.f32.mrb[7].mxu0  ;;  %v5083_v38 = vadd.f32 %v6854_v10, %v9167_v47  ;;  %v5340_v31 = vmul.f32 %v5271_v50, %v5271_v50  ;;  %v5341_v4 = vmul.f32 %v5272_v19, %v5272_v19 }
 0x214   : > { %v5301_v52 = vadd.f32 %v5270_v3, %v5269_v23  ;;  %v5338_v15 = vmul.f32 %v5269_v23, %v5269_v23  ;;  %v5339_v43 = vmul.f32 %v5270_v3, %v5270_v3  ;;  %v6857_v1 = vadd.f32 %v4930_v30, %v2044_v28 }
 0x215   : > { %v5084_v56 = vadd.f32 %v6856_v59, %v9167_v47  ;;  %v5081_v29 = vadd.f32 %v6855_v58, %v9167_v47 }
 0x216   : > { %v5302_v63 = vadd.f32 %v5301_v52, %v5271_v50  ;;  %v5370_v20 = vadd.f32 %v5339_v43, %v5338_v15  ;;  %v5082_v35 = vadd.f32 %v6857_v1, %v9167_v47 }
 0x217   : > { %v5112_v44 = vpack.c.bf16 %v5084_v56, %v5083_v38 }
 0x218   : > { %v5371_v57 = vadd.f32 %v5370_v20, %v5340_v31  ;;  %v5303_v53 = vadd.f32 %v5302_v63, %v5272_v19  ;;  %v6812_v7 = vpop.f32.mrb[8].mxu0  ;;  %v5111_v25 = vpack.c.bf16 %v5082_v35, %v5081_v29 }
 0x219   : > { %6173 = vst [vmem:[%s9176_s13 + $0x18] sm:$0xff] %v5112_v44   ;;  %v6858_v16 = vadd.f32 %v6812_v7, %v6572_v24  ;;  %v4943_v54 = vpop.f32.mrb[9].mxu0  ;;  %v5275_v55 = vunpack.c.l.bf16 %v5112_v44  ;;  %v5276_v49 = vunpack.c.h.bf16 %v5112_v44 }
 0x21a   : > { %v5372_v13 = vadd.f32 %v5371_v57, %v5341_v4  ;;  %v6859_v60 = vadd.f32 %v4943_v54, %v2057_v40  ;;  %v6813_v0 = vpop.f32.mrb[10].mxu0  ;;  %6172 = vst [vmem:[%s9176_s13 + $0x10] sm:$0xff] %v5111_v25   ;;  %v5273_v27 = vunpack.c.l.bf16 %v5111_v25  ;;  %v5274_v46 = vunpack.c.h.bf16 %v5111_v25 }
 0x21b   : > { %v4946_v2 = vpop.f32.mrb[11].mxu0  ;;  %v6860_v42 = vadd.f32 %v6813_v0, %v9152_v21  ;;  %v5087_v8 = vadd.f32 %v6858_v16, %v9167_v47  ;;  %v5344_v62 = vmul.f32 %v5275_v55, %v5275_v55  ;;  %v5345_v18 = vmul.f32 %v5276_v49, %v5276_v49 }
 0x21c   : > { %v6861_v17 = vadd.f32 %v4946_v2, %v9154_v37  ;;  %v5304_v28 = vadd.f32 %v5303_v53, %v5273_v27  ;;  %v5342_v45 = vmul.f32 %v5273_v27, %v5273_v27  ;;  %v5085_v24 = vadd.f32 %v6859_v60, %v9167_v47 }
 0x21d   : > { %v5088_v40 = vadd.f32 %v6860_v42, %v9167_v47  ;;  %v5343_v51 = vmul.f32 %v5274_v46, %v5274_v46 }
 0x21e   : > { %v5086_v36 = vadd.f32 %v6861_v17, %v9167_v47  ;;  %v5305_v12 = vadd.f32 %v5304_v28, %v5274_v46  ;;  %v5373_v32 = vadd.f32 %v5372_v13, %v5342_v45 }
 0x21f   : > { %v5114_v21 = vpack.c.bf16 %v5088_v40, %v5087_v8 }
 0x220   : > { %v5113_v5 = vpack.c.bf16 %v5086_v36, %v5085_v24  ;;  %v6816_v37 = vpop.f32.mrb[12].mxu0  ;;  %v5306_v41 = vadd.f32 %v5305_v12, %v5275_v55  ;;  %v5374_v6 = vadd.f32 %v5373_v32, %v5343_v51 }
 0x221   : > { %v6862_v9 = vadd.f32 %v6816_v37, %v9156_v61  ;;  %v4959_v26 = vpop.f32.mrb[13].mxu0  ;;  %6175 = vst [vmem:[%s9176_s13 + $0x28] sm:$0xff] %v5114_v21   ;;  %v5279_v22 = vunpack.c.l.bf16 %v5114_v21  ;;  %v5280_v52 = vunpack.c.h.bf16 %v5114_v21 }
 0x222   : > { %6174 = vst [vmem:[%s9176_s13 + $0x20] sm:$0xff] %v5113_v5   ;;  %v5277_v33 = vunpack.c.l.bf16 %v5113_v5  ;;  %v6817_v14 = vpop.f32.mrb[14].mxu0  ;;  %v5375_v10 = vadd.f32 %v5374_v6, %v5344_v62  ;;  %v5278_v39 = vunpack.c.h.bf16 %v5113_v5  ;;  %v5307_v50 = vadd.f32 %v5306_v41, %v5276_v49 }
 0x223   : > { %v6863_v23 = vadd.f32 %v4959_v26, %v9158_v34  ;;  %v4962_v3 = vpop.f32.mrb[15].mxu0  ;;  %v6864_v19 = vadd.f32 %v6817_v14, %v9160_v11  ;;  %v5091_v61 = vadd.f32 %v6862_v9, %v9167_v47  ;;  %v5348_v20 = vmul.f32 %v5279_v22, %v5279_v22 }
 0x224   : > { %v5346_v58 = vmul.f32 %v5277_v33, %v5277_v33  ;;  %v5308_v59 = vadd.f32 %v5307_v50, %v5277_v33  ;;  %v5376_v30 = vadd.f32 %v5375_v10, %v5345_v18  ;;  %v6865_v15 = vadd.f32 %v4962_v3, %v9162_v48 }
 0x225   : > { %v5347_v38 = vmul.f32 %v5278_v39, %v5278_v39  ;;  %v5092_v1 = vadd.f32 %v6864_v19, %v9167_v47  ;;  %v5089_v34 = vadd.f32 %v6863_v23, %v9167_v47  ;;  %v5349_v25 = vmul.f32 %v5280_v52, %v5280_v52 }
 0x226   : > { %v5309_v43 = vadd.f32 %v5308_v59, %v5278_v39  ;;  %v5377_v56 = vadd.f32 %v5376_v30, %v5346_v58  ;;  %v5090_v31 = vadd.f32 %v6865_v15, %v9167_v47 }
 0x227   : > { %v5116_v44 = vpack.c.bf16 %v5092_v1, %v5091_v61 }
 0x228   : > { %v6820_v63 = vpop.f32.mrb[16].mxu0  ;;  %v5310_v29 = vadd.f32 %v5309_v43, %v5279_v22  ;;  %v5378_v11 = vadd.f32 %v5377_v56, %v5347_v38  ;;  %v5115_v57 = vpack.c.bf16 %v5090_v31, %v5089_v34 }
 0x229   : > { %v6628_v35 = vpop.f32.mrb[16].mxu1  ;;  %v4975_v4 = vpop.f32.mrb[17].mxu0  ;;  %6177 = vst [vmem:[%s9176_s13 + $0x38] sm:$0xff] %v5116_v44   ;;  %v5283_v55 = vunpack.c.l.bf16 %v5116_v44  ;;  %v5284_v40 = vunpack.c.h.bf16 %v5116_v44 }
 0x22a   : > { %v6866_v48 = vadd.f32 %v6820_v63, %v6628_v35  ;;  %v2842_v53 = vpop.f32.mrb[17].mxu1  ;;  %v6821_v7 = vpop.f32.mrb[18].mxu0  ;;  %v5379_v16 = vadd.f32 %v5378_v11, %v5348_v20  ;;  %v5311_v54 = vadd.f32 %v5310_v29, %v5280_v52  ;;  %6176 = vst [vmem:[%s9176_s13 + $0x30] sm:$0xff] %v5115_v57   ;;  %v5281_v0 = vunpack.c.l.bf16 %v5115_v57 }
 0x22b   : > { %v6629_v13 = vpop.f32.mrb[18].mxu1  ;;  %v4978_v60 = vpop.f32.mrb[19].mxu0  ;;  %v5282_v27 = vunpack.c.h.bf16 %v5115_v57  ;;  %v6867_v46 = vadd.f32 %v4975_v4, %v2842_v53  ;;  %v5352_v6 = vmul.f32 %v5283_v55, %v5283_v55  ;;  %v5353_v3 = vmul.f32 %v5284_v40, %v5284_v40 }
 0x22c   : > { %v2845_v2 = vpop.f32.mrb[19].mxu1  ;;  %v5380_v42 = vadd.f32 %v5379_v16, %v5349_v25  ;;  %v6868_v17 = vadd.f32 %v6821_v7, %v6629_v13  ;;  %v5312_v49 = vadd.f32 %v5311_v54, %v5281_v0  ;;  %v5350_v28 = vmul.f32 %v5281_v0, %v5281_v0 }
 0x22d   : > { %v5095_v45 = vadd.f32 %v6866_v48, %v9167_v47  ;;  %v6869_v24 = vadd.f32 %v4978_v60, %v2845_v2  ;;  %v5351_v12 = vmul.f32 %v5282_v27, %v5282_v27  ;;  %v5093_v21 = vadd.f32 %v6867_v46, %v9167_v47 }
 0x22e   : > { %v5096_v8 = vadd.f32 %v6868_v17, %v9167_v47  ;;  %v5313_v36 = vadd.f32 %v5312_v49, %v5282_v27  ;;  %v5381_v51 = vadd.f32 %v5380_v42, %v5350_v28 }
 0x22f   : > { %v5094_v37 = vadd.f32 %v6869_v24, %v9167_v47 }
 0x230   : > { %v6824_v32 = vpop.f32.mrb[20].mxu0  ;;  %v5118_v5 = vpack.c.bf16 %v5096_v8, %v5095_v45  ;;  %v5314_v9 = vadd.f32 %v5313_v36, %v5283_v55  ;;  %v5382_v26 = vadd.f32 %v5381_v51, %v5351_v12 }
 0x231   : > { %v6632_v62 = vpop.f32.mrb[20].mxu1  ;;  %v4991_v41 = vpop.f32.mrb[21].mxu0  ;;  %v5117_v10 = vpack.c.bf16 %v5094_v37, %v5093_v21 }
 0x232   : > { %v6870_v18 = vadd.f32 %v6824_v32, %v6632_v62  ;;  %v2858_v33 = vpop.f32.mrb[21].mxu1  ;;  %v6825_v14 = vpop.f32.mrb[22].mxu0  ;;  %6179 = vst [vmem:[%s9176_s13 + $0x48] sm:$0xff] %v5118_v5   ;;  %v5383_v58 = vadd.f32 %v5382_v26, %v5352_v6  ;;  %v5315_v22 = vadd.f32 %v5314_v9, %v5284_v40  ;;  %v5287_v56 = vunpack.c.l.bf16 %v5118_v5 }
 0x233   : > { %v6871_v39 = vadd.f32 %v4991_v41, %v2858_v33  ;;  %v6633_v50 = vpop.f32.mrb[22].mxu1  ;;  %v4994_v23 = vpop.f32.mrb[23].mxu0  ;;  %6178 = vst [vmem:[%s9176_s13 + $0x40] sm:$0xff] %v5117_v10   ;;  %v5285_v19 = vunpack.c.l.bf16 %v5117_v10  ;;  %v5286_v52 = vunpack.c.h.bf16 %v5117_v10  ;;  %v5288_v11 = vunpack.c.h.bf16 %v5118_v5 }
 0x234   : > { %v6872_v59 = vadd.f32 %v6825_v14, %v6633_v50  ;;  %v2861_v30 = vpop.f32.mrb[23].mxu1  ;;  %v5384_v61 = vadd.f32 %v5383_v58, %v5353_v3  ;;  %v5099_v15 = vadd.f32 %v6870_v18, %v9167_v47  ;;  %v5356_v54 = vmul.f32 %v5287_v56, %v5287_v56 }
 0x235   : > { %v6873_v38 = vadd.f32 %v4994_v23, %v2861_v30  ;;  %v5316_v1 = vadd.f32 %v5315_v22, %v5285_v19  ;;  %v5354_v34 = vmul.f32 %v5285_v19, %v5285_v19  ;;  %v5097_v31 = vadd.f32 %v6871_v39, %v9167_v47 }
 0x236   : > { %v5100_v43 = vadd.f32 %v6872_v59, %v9167_v47  ;;  %v5355_v35 = vmul.f32 %v5286_v52, %v5286_v52  ;;  %v5357_v17 = vmul.f32 %v5288_v11, %v5288_v11 }
 0x237   : > { %v5098_v20 = vadd.f32 %v6873_v38, %v9167_v47  ;;  %v5317_v44 = vadd.f32 %v5316_v1, %v5286_v52  ;;  %v5385_v4 = vadd.f32 %v5384_v61, %v5354_v34 }
 0x238   : > { %v5120_v63 = vpack.c.bf16 %v5100_v43, %v5099_v15  ;;  %v6828_v29 = vpop.f32.mrb[24].mxu0 }
 0x239   : > { %v6636_v57 = vpop.f32.mrb[24].mxu1  ;;  %v5007_v48 = vpop.f32.mrb[25].mxu0  ;;  %v5119_v53 = vpack.c.bf16 %v5098_v20, %v5097_v31  ;;  %v5318_v13 = vadd.f32 %v5317_v44, %v5287_v56  ;;  %v5386_v60 = vadd.f32 %v5385_v4, %v5355_v35 }
 0x23a   : > { %6181 = vst [vmem:[%s9176_s13 + $0x58] sm:$0xff] %v5120_v63   ;;  %v6874_v7 = vadd.f32 %v6828_v29, %v6636_v57  ;;  %v2874_v25 = vpop.f32.mrb[25].mxu1  ;;  %v6829_v16 = vpop.f32.mrb[26].mxu0  ;;  %v5291_v40 = vunpack.c.l.bf16 %v5120_v63  ;;  %v5292_v62 = vunpack.c.h.bf16 %v5120_v63 }
 0x23b   : > { %v6875_v0 = vadd.f32 %v5007_v48, %v2874_v25  ;;  %v6637_v27 = vpop.f32.mrb[26].mxu1  ;;  %v5010_v46 = vpop.f32.mrb[27].mxu0  ;;  %6180 = vst [vmem:[%s9176_s13 + $0x50] sm:$0xff] %v5119_v53   ;;  %v5289_v2 = vunpack.c.l.bf16 %v5119_v53  ;;  %v5387_v55 = vadd.f32 %v5386_v60, %v5356_v54  ;;  %v5290_v49 = vunpack.c.h.bf16 %v5119_v53 }
 0x23c   : > { %v2877_v42 = vpop.f32.mrb[27].mxu1  ;;  %v5319_v28 = vadd.f32 %v5318_v13, %v5288_v11  ;;  %v6876_v8 = vadd.f32 %v6829_v16, %v6637_v27  ;;  %v5103_v51 = vadd.f32 %v6874_v7, %v9167_v47  ;;  %v5360_v23 = vmul.f32 %v5291_v40, %v5291_v40 }
 0x23d   : > { %v5358_v45 = vmul.f32 %v5289_v2, %v5289_v2  ;;  %v6877_v24 = vadd.f32 %v5010_v46, %v2877_v42  ;;  %v5388_v12 = vadd.f32 %v5387_v55, %v5357_v17  ;;  %v5101_v32 = vadd.f32 %v6875_v0, %v9167_v47 }
 0x23e   : > { %v5320_v36 = vadd.f32 %v5319_v28, %v5289_v2  ;;  %v5104_v21 = vadd.f32 %v6876_v8, %v9167_v47  ;;  %v5359_v6 = vmul.f32 %v5290_v49, %v5290_v49  ;;  %v5361_v15 = vmul.f32 %v5292_v62, %v5292_v62 }
 0x23f   : > { %v5102_v5 = vadd.f32 %v6877_v24, %v9167_v47  ;;  %v5389_v9 = vadd.f32 %v5388_v12, %v5358_v45 }
 0x240   : > { %v6832_v37 = vpop.f32.mrb[28].mxu0  ;;  %v5321_v41 = vadd.f32 %v5320_v36, %v5290_v49  ;;  %v5122_v33 = vpack.c.bf16 %v5104_v21, %v5103_v51 }
 0x241   : > { %v6640_v26 = vpop.f32.mrb[28].mxu1  ;;  %v5023_v18 = vpop.f32.mrb[29].mxu0  ;;  %v5121_v14 = vpack.c.bf16 %v5102_v5, %v5101_v32  ;;  %v5390_v58 = vadd.f32 %v5389_v9, %v5359_v6 }
 0x242   : > { %v6878_v10 = vadd.f32 %v6832_v37, %v6640_v26  ;;  %v2890_v39 = vpop.f32.mrb[29].mxu1  ;;  %v6833_v50 = vpop.f32.mrb[30].mxu0  ;;  %v5322_v3 = vadd.f32 %v5321_v41, %v5291_v40  ;;  %6183 = vst [vmem:[%s9176_s13 + $0x68] sm:$0xff] %v5122_v33   ;;  %v5295_v56 = vunpack.c.l.bf16 %v5122_v33  ;;  %v5296_v29 = vunpack.c.h.bf16 %v5122_v33 }
 0x243   : > { %v6879_v22 = vadd.f32 %v5023_v18, %v2890_v39  ;;  %v6641_v59 = vpop.f32.mrb[30].mxu1  ;;  %v5026_v30 = vpop.f32.mrb[31].mxu0  ;;  %6182 = vst [vmem:[%s9176_s13 + $0x60] sm:$0xff] %v5121_v14   ;;  %v5293_v19 = vunpack.c.l.bf16 %v5121_v14  ;;  %v5294_v52 = vunpack.c.h.bf16 %v5121_v14  ;;  %v5391_v43 = vadd.f32 %v5390_v58, %v5360_v23 }
 0x244   : > { %v2893_v61 = vpop.f32.mrb[31].mxu1  ;;  %v5323_v38 = vadd.f32 %v5322_v3, %v5292_v62  ;;  %v6880_v63 = vadd.f32 %v6833_v50, %v6641_v59  ;;  %v5107_v44 = vadd.f32 %v6878_v10, %v9167_v47  ;;  %v5364_v7 = vmul.f32 %v5295_v56, %v5295_v56 }
 0x245   : > { %v5362_v1 = vmul.f32 %v5293_v19, %v5293_v19  ;;  %v5392_v31 = vadd.f32 %v5391_v43, %v5361_v15  ;;  %v6881_v20 = vadd.f32 %v5026_v30, %v2893_v61  ;;  %v5363_v11 = vmul.f32 %v5294_v52, %v5294_v52 }
 0x246   : > { %v5324_v34 = vadd.f32 %v5323_v38, %v5293_v19  ;;  %v5105_v35 = vadd.f32 %v6879_v22, %v9167_v47  ;;  %v5108_v48 = vadd.f32 %v6880_v63, %v9167_v47  ;;  %v5365_v60 = vmul.f32 %v5296_v29, %v5296_v29 }
 0x247   : > { %v5393_v57 = vadd.f32 %v5392_v31, %v5362_v1  ;;  %v5106_v53 = vadd.f32 %v6881_v20, %v9167_v47 }
 0x248   : > { %v5325_v4 = vadd.f32 %v5324_v34, %v5294_v52  ;;  %v5124_v54 = vpack.c.bf16 %v5108_v48, %v5107_v44 }
 0x249   : > { %v5394_v16 = vadd.f32 %v5393_v57, %v5363_v11  ;;  %v5123_v13 = vpack.c.bf16 %v5106_v53, %v5105_v35 }
 0x24a   : > { %v5326_v25 = vadd.f32 %v5325_v4, %v5295_v56  ;;  %6185 = vst [vmem:[%s9176_s13 + $0x78] sm:$0xff] %v5124_v54   ;;  %v5299_v42 = vunpack.c.l.bf16 %v5124_v54  ;;  %v5300_v28 = vunpack.c.h.bf16 %v5124_v54 }
 0x24b   : > { %v5395_v0 = vadd.f32 %v5394_v16, %v5364_v7  ;;  %6184 = vst [vmem:[%s9176_s13 + $0x70] sm:$0xff] %v5123_v13   ;;  %v5297_v27 = vunpack.c.l.bf16 %v5123_v13  ;;  %v5298_v46 = vunpack.c.h.bf16 %v5123_v13 }
 0x24c   : > { %v5327_v2 = vadd.f32 %v5326_v25, %v5296_v29  ;;  %v5368_v24 = vmul.f32 %v5299_v42, %v5299_v42  ;;  %v5369_v12 = vmul.f32 %v5300_v28, %v5300_v28 }
 0x24d   : > { %v5366_v17 = vmul.f32 %v5297_v27, %v5297_v27  ;;  %v5396_v55 = vadd.f32 %v5395_v0, %v5365_v60  ;;  %v5367_v45 = vmul.f32 %v5298_v46, %v5298_v46 }
 0x24e   : > { %v5328_v49 = vadd.f32 %v5327_v2, %v5297_v27 }
 0x24f   : > { %v5397_v8 = vadd.f32 %v5396_v55, %v5366_v17 }
 0x250   : > { %v5329_v47 = vadd.f32 %v5328_v49, %v5298_v46 }
 0x251   : > { %v5398_v40 = vadd.f32 %v5397_v8, %v5367_v45 }
 0x252   : > { %v5330_v36 = vadd.f32 %v5329_v47, %v5299_v42 }
 0x253   : > { %v5399_v51 = vadd.f32 %v5398_v40, %v5368_v24 }
 0x254   : > { %v5331_v32 = vadd.f32 %v5330_v36, %v5300_v28 }
 0x255   : > { %v5400_v21 = vadd.f32 %v5399_v51, %v5369_v12 }
 0x256   : > { %v5332_v5 = vrot.slane %v5331_v32, 4 }
 0x257   : > { %v5401_v37 = vrot.slane %v5400_v21, 4 }
 0x258   : > { %v5333_v62 = vadd.f32 %v5332_v5, %v5331_v32 }
 0x259   : > { %v5402_v41 = vadd.f32 %v5401_v37, %v5400_v21 }
 0x25a   : > { %v5334_v6 = vrot.slane %v5333_v62, 2 }
 0x25b   : > { %v5403_v9 = vrot.slane %v5402_v41, 2 }
 0x25c   : > { %v5335_v26 = vadd.f32 %v5334_v6, %v5333_v62 }
 0x25d   : > { %v5404_v18 = vadd.f32 %v5403_v9, %v5402_v41 }
 0x25e   : > { %v5336_v33 = vrot.slane %v5335_v26, 1 }
 0x25f   : > { %v5405_v14 = vrot.slane %v5404_v18, 1 }
 0x260   : > { %v5337_v10 = vadd.f32 %v5336_v33, %v5335_v26 }
 0x261   : > { %v5406_v39 = vadd.f32 %v5405_v14, %v5404_v18 }
 0x263   : > { %v5408_v50 = vsel %vm5407_vm6, %v5337_v10, %v5406_v39 }
 0x264   : > { %5409 = vst [vmem:[%s267_s22] sm:$0x3] %v5408_v50 }
 0x265 PF: > { %s15_s17 = sadd.s32 1, %s7343_s17   ;;  %s9313_s15 = smov %s7339_s16 }
 0x266   : > { %p12_p5 = scmp.ge.s32.totalorder %s15_s17, 4   ;;  %s9314_s16 = smov %s9316_s18 }
 0x268   :  { %14 = sbr.rel (!%p12_p5) target bundleno = 2 (0x2), region = 82 }

</bundles_post_ra>
